<compile_context>
chip_gen: v7x
topology: tpu7x:2x2x1
jax: 0.10.0
libtpu: 0.0.40
codegen_flags: <defaults>
</compile_context>

<pallas_src>
import jax
import jax.numpy as jnp
from jax.experimental import pallas as pl
from jax.experimental.pallas import tpu as pltpu

# Original (PyTorch) feature widths.
LABEL_KNOTS = 64
PIC_KNOTS = 512 - LABEL_KNOTS      # 448
OUT_FEATS = 784

# Lane-aligned (x128) widths used inside the kernel.
IN_PAD = 128                       # [noise(100) | one-hot(10) | zeros(18)]
PIC_PAD = 512                      # branch-1 slot in the fused layer-1 output
LAB_PAD = 128                      # branch-2 slot
H1 = PIC_PAD + LAB_PAD             # 640 : fused fc1 output width
H2 = 512                           # fc2 output width
H3 = 896                           # fc3 output width (784 -> 7*128)
GB_W = H1 + H2 + H3                # 2048 : packed gamma/beta lane width

BN_BATCH = 128                     # rows per independent BatchNorm batch
SCALE = 0.2                        # leaky_relu negative_slope
BN_EPS = 1e-5


def _bn_train_fused(y, gamma, beta):
    """BatchNorm1d, training mode (biased batch variance), single-pass stats
    (var = E[y^2] - mean^2) folded into one per-feature scale/shift FMA."""
    inv_n = 1.0 / y.shape[0]
    mean = jnp.sum(y, axis=0, keepdims=True) * inv_n
    ex2 = jnp.sum(y * y, axis=0, keepdims=True) * inv_n
    var = jnp.maximum(ex2 - mean * mean, 0.0)
    scale = gamma * jax.lax.rsqrt(var + BN_EPS)
    shift = beta - mean * scale
    return y * scale + shift


def _lrelu(z):
    return jnp.where(z >= 0.0, z, SCALE * z)


def gen_kernel(x_ref, w1_ref, w2_ref, w3_ref, gb_ref, out_ref):
    gb = gb_ref[...]                                   # (2, 2048) f32 gamma/beta
    x = x_ref[...]                                     # (128, 128) bf16 fused input

    # Fused fc1_1 / fc1_2 (block-diagonal weight) -> [y1 | y2] in one MXU pass.
    y1 = jnp.dot(x, w1_ref[...], preferred_element_type=jnp.float32)        # (B, 640)
    x1 = _lrelu(_bn_train_fused(y1, gb[0:1, :H1], gb[1:2, :H1]))
    x1 = x1.astype(jnp.bfloat16)

    # TODO(synk): dropout1 / dropout2 use stochastic masks in PyTorch train
    # mode; implemented here as identity (eval-mode dropout).

    # fc2 over the 640-wide concat (pad rows of the weight are zero).
    y2 = jnp.dot(x1, w2_ref[...], preferred_element_type=jnp.float32)       # (B, 512)
    x2 = _lrelu(_bn_train_fused(y2, gb[0:1, H1:H1 + H2], gb[1:2, H1:H1 + H2]))
    x2 = x2.astype(jnp.bfloat16)

    # fc3 -> BN -> tanh, lane-dense 896-wide bf16 output (pad lanes exact 0).
    y3 = jnp.dot(x2, w3_ref[...], preferred_element_type=jnp.float32)       # (B, 896)
    o = jnp.tanh(_bn_train_fused(y3, gb[0:1, H1 + H2:GB_W], gb[1:2, H1 + H2:GB_W]))
    out_ref[...] = o.astype(jnp.bfloat16)


def gen_forward(noise, label, params):
    """noise: (NB, 128, 100), label: (NB, 128, 10).  Each of the NB slices is
    an independent BatchNorm batch (one Gen.forward call).  Returns an
    (NB, 128, 896) bf16 array; real features are [..., :784] and the pad
    lanes are exact zeros (slice on the consumer side)."""
    NB, PB = noise.shape[0], noise.shape[1]
    x = jnp.concatenate([noise, label], axis=-1).astype(jnp.bfloat16)
    x = jnp.pad(x, ((0, 0), (0, 0), (0, IN_PAD - x.shape[-1])))

    return pl.pallas_call(
        gen_kernel,
        out_shape=jax.ShapeDtypeStruct((NB, PB, H3), jnp.bfloat16),
        grid=(NB,),
        in_specs=[
            # Per-batch activation block, pipelined across the grid.
            pl.BlockSpec((None, PB, IN_PAD), lambda n: (n, 0, 0)),
            # Weights / BN params: constant index_map -> DMA'd once, VMEM-resident.
            pl.BlockSpec((IN_PAD, H1), lambda n: (0, 0)),
            pl.BlockSpec((H1, H2), lambda n: (0, 0)),
            pl.BlockSpec((H2, H3), lambda n: (0, 0)),
            pl.BlockSpec((2, GB_W), lambda n: (0, 0)),
        ],
        out_specs=pl.BlockSpec((None, PB, H3), lambda n: (n, 0, 0)),
        compiler_params=pltpu.CompilerParams(
            dimension_semantics=("parallel",)),
    )(x, params["w1"], params["w2"], params["w3"], params["gb"])


def init_params(key):
    """Deterministic synthetic parameters (PyTorch-Linear-like uniform init),
    stored fused / padded / pre-transposed / bf16 for the kernel.  Linear
    biases are generated only for the reference (they cancel under
    training-mode BN and are not passed to the kernel)."""
    def linear(key, fan_in, fan_out):
        kw, kb = jax.random.split(key)
        bound = 1.0 / float(fan_in) ** 0.5
        w = jax.random.uniform(kw, (fan_in, fan_out), jnp.float32, -bound, bound)
        b = jax.random.uniform(kb, (fan_out,), jnp.float32, -bound, bound)
        return w, b

    k11, k12, k2, k3, kbn = jax.random.split(key, 5)
    w11, b11 = linear(k11, 100, PIC_KNOTS)
    w12, b12 = linear(k12, 10, LABEL_KNOTS)
    w2, b2 = linear(k2, 512, 512)
    w3, b3 = linear(k3, 512, OUT_FEATS)

    # Fused block-diagonal layer-1 weight: rows 0:100 -> pic cols, rows
    # 100:110 -> label cols; everything else zero.
    W1 = jnp.zeros((IN_PAD, H1), jnp.float32)
    W1 = W1.at[:100, :PIC_KNOTS].set(w11)
    W1 = W1.at[100:110, PIC_PAD:PIC_PAD + LABEL_KNOTS].set(w12)

    # fc2 weight re-indexed to the padded 640-wide activation layout.
    W2 = jnp.zeros((H1, H2), jnp.float32)
    W2 = W2.at[:PIC_KNOTS, :].set(w2[:PIC_KNOTS, :])
    W2 = W2.at[PIC_PAD:PIC_PAD + LABEL_KNOTS, :].set(w2[PIC_KNOTS:, :])

    # fc3 weight, output padded 784 -> 896 with zero columns.
    W3 = jnp.zeros((H2, H3), jnp.float32)
    W3 = W3.at[:, :OUT_FEATS].set(w3)

    # Packed per-feature BN affine params: row 0 = gamma, row 1 = beta.
    # gamma = 0 / beta = 0 on every pad feature => padded activations stay 0.
    kg1, kg2, kg3, kg4, kb1, kb2, kb3, kb4 = jax.random.split(kbn, 8)
    gb = jnp.zeros((2, GB_W), jnp.float32)

    def fill(gb, kgamma, kbeta, lo, n):
        g = jax.random.uniform(kgamma, (n,), jnp.float32, 0.5, 1.5)
        b = jax.random.uniform(kbeta, (n,), jnp.float32, -0.1, 0.1)
        return gb.at[0, lo:lo + n].set(g).at[1, lo:lo + n].set(b)

    gb = fill(gb, kg1, kb1, 0, PIC_KNOTS)                    # fc1_1_bn
    gb = fill(gb, kg2, kb2, PIC_PAD, LABEL_KNOTS)            # fc1_2_bn
    gb = fill(gb, kg3, kb3, H1, H2)                          # fc2_bn
    gb = fill(gb, kg4, kb4, H1 + H2, OUT_FEATS)              # fc3_bn

    bf = lambda a: a.astype(jnp.bfloat16)
    return dict(
        w1=bf(W1), w2=bf(W2), w3=bf(W3), gb=gb,
        # Biases are used only by the reference (exact BN cancellation check).
        b11=b11, b12=b12, b2=b2, b3=b3,
    )


def gen_reference(noise, label, p):
    """Pure-JAX per-BN-batch reference mirroring the ORIGINAL graph: unfused
    branches, explicit Linear biases, two-pass BatchNorm, eval-mode dropout,
    operating on the UNPADDED parameter slices."""
    f32 = jnp.float32
    W1, W2, W3, gb = p["w1"], p["w2"], p["w3"], p["gb"]
    w11 = W1[:100, :PIC_KNOTS]
    w12 = W1[100:110, PIC_PAD:PIC_PAD + LABEL_KNOTS]
    w2a = W2[:PIC_KNOTS, :]
    w2b = W2[PIC_PAD:PIC_PAD + LABEL_KNOTS, :]
    w3 = W3[:, :OUT_FEATS]

    def aff(lo, n):
        return gb[0, lo:lo + n][None, :], gb[1, lo:lo + n][None, :]

    g1p, be1p = aff(0, PIC_KNOTS)
    g1l, be1l = aff(PIC_PAD, LABEL_KNOTS)
    g2, be2 = aff(H1, H2)
    g3, be3 = aff(H1 + H2, OUT_FEATS)

    def bn(y, g, b):
        mean = jnp.mean(y, axis=0, keepdims=True)
        var = jnp.mean((y - mean) ** 2, axis=0, keepdims=True)
        return g * (y - mean) * jax.lax.rsqrt(var + BN_EPS) + b

    def one(nz, lb):
        xn = nz.astype(jnp.bfloat16)
        xl = lb.astype(jnp.bfloat16)
        y1 = jnp.dot(xn, w11, preferred_element_type=f32) + p["b11"]
        x1 = _lrelu(bn(y1, g1p, be1p)).astype(jnp.bfloat16)
        y2 = jnp.dot(xl, w12, preferred_element_type=f32) + p["b12"]
        x2 = _lrelu(bn(y2, g1l, be1l)).astype(jnp.bfloat16)
        h = (jnp.dot(x1, w2a, preferred_element_type=f32)
             + jnp.dot(x2, w2b, preferred_element_type=f32) + p["b2"])
        h = _lrelu(bn(h, g2, be2)).astype(jnp.bfloat16)
        o = jnp.dot(h, w3, preferred_element_type=f32) + p["b3"]
        return jnp.tanh(bn(o, g3, be3))

    return jax.vmap(one)(noise, label)


if __name__ == "__main__":
    key = jax.random.PRNGKey(0)
    kp, ki, kl = jax.random.split(key, 3)

    NB = 4                 # independent 128-row BN batches per call (grid axis)
    PB = BN_BATCH          # 128 rows per BN batch (full sublane / MXU row tile)

    params = init_params(kp)
    noise = jax.random.normal(ki, (NB, PB, 100), jnp.float32)          # "input"
    labels = jax.nn.one_hot(jax.random.randint(kl, (NB, PB), 0, 10),
                            10, dtype=jnp.float32)                     # "label"

    out_pad = jax.block_until_ready(gen_forward(noise, labels, params))
    assert out_pad.shape == (NB, PB, H3) and out_pad.dtype == jnp.bfloat16

    # Pad lanes must be exact zeros; consumer slices to the 784 real features.
    assert bool(jnp.all(out_pad[..., OUT_FEATS:] == 0)), "pad leak"
    out = out_pad[..., :OUT_FEATS].astype(jnp.float32)

    ref = gen_reference(noise, labels, params)
    assert bool(jnp.all(jnp.isfinite(out))), "non-finite output"
    assert jnp.allclose(out, ref, atol=1e-2, rtol=1e-2), (
        f"mismatch vs reference, max abs diff {jnp.max(jnp.abs(out - ref))}")

    print("KERNEL_OK")
</pallas_src>

<mosaic_0001>
module attributes {stable_mosaic.version = 11 : i64} {
  func.func @gen_kernel(%arg0: i32, %arg1: memref<1x128x128xbf16, #tpu.memory_space<vmem>>, %arg2: memref<128x640xbf16, #tpu.memory_space<vmem>>, %arg3: memref<640x512xbf16, #tpu.memory_space<vmem>>, %arg4: memref<512x896xbf16, #tpu.memory_space<vmem>>, %arg5: memref<2x2048xf32, #tpu.memory_space<vmem>>, %arg6: memref<1x128x896xbf16, #tpu.memory_space<vmem>>) attributes {dimension_semantics = [#tpu.dimension_semantics<parallel>], iteration_bounds = array<i64: 4>, scalar_prefetch = 0 : i64, scratch_operands = 0 : i64, tpu.core_type = #tpu.core_type<tc>, window_params = [{transform_indices = @transform_0, window_bounds = array<i64: 1, 128, 128>}, {pipeline_mode = #tpu.pipeline_mode<synchronous>, transform_indices = @transform_1, window_bounds = array<i64: 128, 640>}, {pipeline_mode = #tpu.pipeline_mode<synchronous>, transform_indices = @transform_2, window_bounds = array<i64: 640, 512>}, {pipeline_mode = #tpu.pipeline_mode<synchronous>, transform_indices = @transform_3, window_bounds = array<i64: 512, 896>}, {pipeline_mode = #tpu.pipeline_mode<synchronous>, transform_indices = @transform_4, window_bounds = array<i64: 2, 2048>}, {transform_indices = @transform_5, window_bounds = array<i64: 1, 128, 896>}]} {
    %c0 = arith.constant 0 : index
    %c0_0 = arith.constant 0 : index
    %0 = vector.load %arg5[%c0, %c0_0] : memref<2x2048xf32, #tpu.memory_space<vmem>>, vector<2x2048xf32>
    %c0_1 = arith.constant 0 : index
    %c0_2 = arith.constant 0 : index
    %c0_3 = arith.constant 0 : index
    %1 = vector.load %arg1[%c0_1, %c0_2, %c0_3] : memref<1x128x128xbf16, #tpu.memory_space<vmem>>, vector<1x128x128xbf16>
    %2 = vector.shape_cast %1 : vector<1x128x128xbf16> to vector<128x128xbf16>
    %c0_4 = arith.constant 0 : index
    %c0_5 = arith.constant 0 : index
    %3 = vector.load %arg2[%c0_4, %c0_5] : memref<128x640xbf16, #tpu.memory_space<vmem>>, vector<128x640xbf16>
    %cst = arith.constant dense<0.000000e+00> : vector<128x640xf32>
    %4 = tpu.matmul %2, %3, %cst {dimension_numbers = #tpu.dot_dimension_numbers<[1], [0], [0], [1], [0, 0, 1, 1], [], []>} : vector<128x128xbf16>, vector<128x640xbf16>, vector<128x640xf32> -> vector<128x640xf32>
    %5 = vector.extract_strided_slice %0 {offsets = [0, 0], sizes = [1, 640], strides = [1, 1]} : vector<2x2048xf32> to vector<1x640xf32>
    %6 = vector.extract_strided_slice %0 {offsets = [1, 0], sizes = [1, 640], strides = [1, 1]} : vector<2x2048xf32> to vector<1x640xf32>
    %cst_6 = arith.constant dense<0.000000e+00> : vector<640xf32>
    %7 = vector.multi_reduction <add>, %4, %cst_6 [0] : vector<128x640xf32> to vector<640xf32>
    %8 = vector.shape_cast %7 : vector<640xf32> to vector<1x640xf32>
    %cst_7 = arith.constant 7.812500e-03 : f32
    %9 = vector.broadcast %cst_7 : f32 to vector<1x640xf32>
    %10 = arith.mulf %8, %9 : vector<1x640xf32>
    %11 = arith.mulf %4, %4 : vector<128x640xf32>
    %cst_8 = arith.constant dense<0.000000e+00> : vector<640xf32>
    %12 = vector.multi_reduction <add>, %11, %cst_8 [0] : vector<128x640xf32> to vector<640xf32>
    %13 = vector.shape_cast %12 : vector<640xf32> to vector<1x640xf32>
    %cst_9 = arith.constant 7.812500e-03 : f32
    %14 = vector.broadcast %cst_9 : f32 to vector<1x640xf32>
    %15 = arith.mulf %13, %14 : vector<1x640xf32>
    %16 = arith.mulf %10, %10 : vector<1x640xf32>
    %17 = arith.subf %15, %16 : vector<1x640xf32>
    %cst_10 = arith.constant 0.000000e+00 : f32
    %18 = vector.broadcast %cst_10 : f32 to vector<1x640xf32>
    %19 = arith.maximumf %17, %18 : vector<1x640xf32>
    %cst_11 = arith.constant 9.99999974E-6 : f32
    %20 = vector.broadcast %cst_11 : f32 to vector<1x640xf32>
    %21 = arith.addf %19, %20 : vector<1x640xf32>
    %22 = math.rsqrt %21 : vector<1x640xf32>
    %23 = arith.mulf %5, %22 : vector<1x640xf32>
    %24 = arith.mulf %10, %23 : vector<1x640xf32>
    %25 = arith.subf %6, %24 : vector<1x640xf32>
    %26 = vector.broadcast %23 : vector<1x640xf32> to vector<128x640xf32>
    %27 = arith.mulf %4, %26 : vector<128x640xf32>
    %28 = vector.broadcast %25 : vector<1x640xf32> to vector<128x640xf32>
    %29 = arith.addf %27, %28 : vector<128x640xf32>
    %cst_12 = arith.constant 0.000000e+00 : f32
    %30 = vector.broadcast %cst_12 : f32 to vector<128x640xf32>
    %31 = arith.cmpf oge, %29, %30 : vector<128x640xf32>
    %cst_13 = arith.constant 2.000000e-01 : f32
    %32 = vector.broadcast %cst_13 : f32 to vector<128x640xf32>
    %33 = arith.mulf %32, %29 : vector<128x640xf32>
    %34 = arith.select %31, %29, %33 : vector<128x640xi1>, vector<128x640xf32>
    %35 = arith.truncf %34 : vector<128x640xf32> to vector<128x640xbf16>
    %c0_14 = arith.constant 0 : index
    %c0_15 = arith.constant 0 : index
    %36 = vector.load %arg3[%c0_14, %c0_15] : memref<640x512xbf16, #tpu.memory_space<vmem>>, vector<640x512xbf16>
    %cst_16 = arith.constant dense<0.000000e+00> : vector<128x512xf32>
    %37 = tpu.matmul %35, %36, %cst_16 {dimension_numbers = #tpu.dot_dimension_numbers<[1], [0], [0], [1], [0, 0, 1, 1], [], []>} : vector<128x640xbf16>, vector<640x512xbf16>, vector<128x512xf32> -> vector<128x512xf32>
    %38 = vector.extract_strided_slice %0 {offsets = [0, 640], sizes = [1, 512], strides = [1, 1]} : vector<2x2048xf32> to vector<1x512xf32>
    %39 = vector.extract_strided_slice %0 {offsets = [1, 640], sizes = [1, 512], strides = [1, 1]} : vector<2x2048xf32> to vector<1x512xf32>
    %cst_17 = arith.constant dense<0.000000e+00> : vector<512xf32>
    %40 = vector.multi_reduction <add>, %37, %cst_17 [0] : vector<128x512xf32> to vector<512xf32>
    %41 = vector.shape_cast %40 : vector<512xf32> to vector<1x512xf32>
    %cst_18 = arith.constant 7.812500e-03 : f32
    %42 = vector.broadcast %cst_18 : f32 to vector<1x512xf32>
    %43 = arith.mulf %41, %42 : vector<1x512xf32>
    %44 = arith.mulf %37, %37 : vector<128x512xf32>
    %cst_19 = arith.constant dense<0.000000e+00> : vector<512xf32>
    %45 = vector.multi_reduction <add>, %44, %cst_19 [0] : vector<128x512xf32> to vector<512xf32>
    %46 = vector.shape_cast %45 : vector<512xf32> to vector<1x512xf32>
    %cst_20 = arith.constant 7.812500e-03 : f32
    %47 = vector.broadcast %cst_20 : f32 to vector<1x512xf32>
    %48 = arith.mulf %46, %47 : vector<1x512xf32>
    %49 = arith.mulf %43, %43 : vector<1x512xf32>
    %50 = arith.subf %48, %49 : vector<1x512xf32>
    %cst_21 = arith.constant 0.000000e+00 : f32
    %51 = vector.broadcast %cst_21 : f32 to vector<1x512xf32>
    %52 = arith.maximumf %50, %51 : vector<1x512xf32>
    %cst_22 = arith.constant 9.99999974E-6 : f32
    %53 = vector.broadcast %cst_22 : f32 to vector<1x512xf32>
    %54 = arith.addf %52, %53 : vector<1x512xf32>
    %55 = math.rsqrt %54 : vector<1x512xf32>
    %56 = arith.mulf %38, %55 : vector<1x512xf32>
    %57 = arith.mulf %43, %56 : vector<1x512xf32>
    %58 = arith.subf %39, %57 : vector<1x512xf32>
    %59 = vector.broadcast %56 : vector<1x512xf32> to vector<128x512xf32>
    %60 = arith.mulf %37, %59 : vector<128x512xf32>
    %61 = vector.broadcast %58 : vector<1x512xf32> to vector<128x512xf32>
    %62 = arith.addf %60, %61 : vector<128x512xf32>
    %cst_23 = arith.constant 0.000000e+00 : f32
    %63 = vector.broadcast %cst_23 : f32 to vector<128x512xf32>
    %64 = arith.cmpf oge, %62, %63 : vector<128x512xf32>
    %cst_24 = arith.constant 2.000000e-01 : f32
    %65 = vector.broadcast %cst_24 : f32 to vector<128x512xf32>
    %66 = arith.mulf %65, %62 : vector<128x512xf32>
    %67 = arith.select %64, %62, %66 : vector<128x512xi1>, vector<128x512xf32>
    %68 = arith.truncf %67 : vector<128x512xf32> to vector<128x512xbf16>
    %c0_25 = arith.constant 0 : index
    %c0_26 = arith.constant 0 : index
    %69 = vector.load %arg4[%c0_25, %c0_26] : memref<512x896xbf16, #tpu.memory_space<vmem>>, vector<512x896xbf16>
    %cst_27 = arith.constant dense<0.000000e+00> : vector<128x896xf32>
    %70 = tpu.matmul %68, %69, %cst_27 {dimension_numbers = #tpu.dot_dimension_numbers<[1], [0], [0], [1], [0, 0, 1, 1], [], []>} : vector<128x512xbf16>, vector<512x896xbf16>, vector<128x896xf32> -> vector<128x896xf32>
    %71 = vector.extract_strided_slice %0 {offsets = [0, 1152], sizes = [1, 896], strides = [1, 1]} : vector<2x2048xf32> to vector<1x896xf32>
    %72 = vector.extract_strided_slice %0 {offsets = [1, 1152], sizes = [1, 896], strides = [1, 1]} : vector<2x2048xf32> to vector<1x896xf32>
    %cst_28 = arith.constant dense<0.000000e+00> : vector<896xf32>
    %73 = vector.multi_reduction <add>, %70, %cst_28 [0] : vector<128x896xf32> to vector<896xf32>
    %74 = vector.shape_cast %73 : vector<896xf32> to vector<1x896xf32>
    %cst_29 = arith.constant 7.812500e-03 : f32
    %75 = vector.broadcast %cst_29 : f32 to vector<1x896xf32>
    %76 = arith.mulf %74, %75 : vector<1x896xf32>
    %77 = arith.mulf %70, %70 : vector<128x896xf32>
    %cst_30 = arith.constant dense<0.000000e+00> : vector<896xf32>
    %78 = vector.multi_reduction <add>, %77, %cst_30 [0] : vector<128x896xf32> to vector<896xf32>
    %79 = vector.shape_cast %78 : vector<896xf32> to vector<1x896xf32>
    %cst_31 = arith.constant 7.812500e-03 : f32
    %80 = vector.broadcast %cst_31 : f32 to vector<1x896xf32>
    %81 = arith.mulf %79, %80 : vector<1x896xf32>
    %82 = arith.mulf %76, %76 : vector<1x896xf32>
    %83 = arith.subf %81, %82 : vector<1x896xf32>
    %cst_32 = arith.constant 0.000000e+00 : f32
    %84 = vector.broadcast %cst_32 : f32 to vector<1x896xf32>
    %85 = arith.maximumf %83, %84 : vector<1x896xf32>
    %cst_33 = arith.constant 9.99999974E-6 : f32
    %86 = vector.broadcast %cst_33 : f32 to vector<1x896xf32>
    %87 = arith.addf %85, %86 : vector<1x896xf32>
    %88 = math.rsqrt %87 : vector<1x896xf32>
    %89 = arith.mulf %71, %88 : vector<1x896xf32>
    %90 = arith.mulf %76, %89 : vector<1x896xf32>
    %91 = arith.subf %72, %90 : vector<1x896xf32>
    %92 = vector.broadcast %89 : vector<1x896xf32> to vector<128x896xf32>
    %93 = arith.mulf %70, %92 : vector<128x896xf32>
    %94 = vector.broadcast %91 : vector<1x896xf32> to vector<128x896xf32>
    %95 = arith.addf %93, %94 : vector<128x896xf32>
    %96 = math.tanh %95 : vector<128x896xf32>
    %97 = arith.truncf %96 : vector<128x896xf32> to vector<128x896xbf16>
    %c0_34 = arith.constant 0 : index
    %c0_35 = arith.constant 0 : index
    %c0_36 = arith.constant 0 : index
    %98 = vector.load %arg6[%c0_34, %c0_35, %c0_36] : memref<1x128x896xbf16, #tpu.memory_space<vmem>>, vector<1x128x896xbf16>
    %99 = vector.shape_cast %98 : vector<1x128x896xbf16> to vector<128x896xbf16>
    %100 = vector.shape_cast %97 : vector<128x896xbf16> to vector<1x128x896xbf16>
    tpu.vector_store %arg6[%c0_34, %c0_35, %c0_36], %100 {strides = array<i32>} : memref<1x128x896xbf16, #tpu.memory_space<vmem>>, vector<1x128x896xbf16>,
    return
  }
  func.func @transform_0(%arg0: i32) -> (i32, i32, i32) {
    %c0_i32 = arith.constant 0 : i32
    %c0_i32_0 = arith.constant 0 : i32
    %c0_i32_1 = arith.constant 0 : i32
    return %arg0, %c0_i32, %c0_i32_0 : i32, i32, i32
  }
  func.func @transform_1(%arg0: i32) -> (i32, i32) {
    %c0_i32 = arith.constant 0 : i32
    %c0_i32_0 = arith.constant 0 : i32
    %c0_i32_1 = arith.constant 0 : i32
    return %c0_i32, %c0_i32_0 : i32, i32
  }
  func.func @transform_2(%arg0: i32) -> (i32, i32) {
    %c0_i32 = arith.constant 0 : i32
    %c0_i32_0 = arith.constant 0 : i32
    %c0_i32_1 = arith.constant 0 : i32
    return %c0_i32, %c0_i32_0 : i32, i32
  }
  func.func @transform_3(%arg0: i32) -> (i32, i32) {
    %c0_i32 = arith.constant 0 : i32
    %c0_i32_0 = arith.constant 0 : i32
    %c0_i32_1 = arith.constant 0 : i32
    return %c0_i32, %c0_i32_0 : i32, i32
  }
  func.func @transform_4(%arg0: i32) -> (i32, i32) {
    %c0_i32 = arith.constant 0 : i32
    %c0_i32_0 = arith.constant 0 : i32
    %c0_i32_1 = arith.constant 0 : i32
    return %c0_i32, %c0_i32_0 : i32, i32
  }
  func.func @transform_5(%arg0: i32) -> (i32, i32, i32) {
    %c0_i32 = arith.constant 0 : i32
    %c0_i32_0 = arith.constant 0 : i32
    %c0_i32_1 = arith.constant 0 : i32
    return %arg0, %c0_i32, %c0_i32_0 : i32, i32, i32
  }
}

</mosaic_0001>

<bundles_post_ra>
// kernel: tpu_custom_call.1
= control target key start
LH: loop header
LB: loop body
LE: loop exit
PB: predicated region body
PF: predicated region fallthrough
CT: control target
= control target key end

     0   :  { %10 = vsyncpa [#allocation3], 0  ;;  %s14014_s0 = inlined_call_operand.hbm [shape: bf16[4,128,128], index: 0, kind: input, shape index: {}]   ;;  %s14015_s1 = inlined_call_operand.hbm [shape: bf16[128,640], index: 1, kind: input, shape index: {}]   ;;  %s14016_s2 = inlined_call_operand.hbm [shape: bf16[640,512], index: 2, kind: input, shape index: {}]   ;;  %s14017_s3 = inlined_call_operand.hbm [shape: bf16[512,896], index: 3, kind: input, shape index: {}]   ;;  %s14018_s4 = inlined_call_operand.hbm [shape: f32[2,2048], index: 4, kind: input, shape index: {}]   ;;  %s14019_s5 = inlined_call_operand.hbm [shape: bf16[4,128,896], index: 5, kind: output, shape index: {}]  }
   0x1   :  { %12 = vsyncpa [#allocation3 + $0x1], 0 }
   0x2   :  { %13 = vsyncpa [#allocation6], 0 }
   0x3   :  { %14 = vsyncpa [#allocation9], 0 }
   0x4   :  { %15 = vsyncpa [#allocation4], 0 }
   0x5   :  { %17 = vsyncpa [#allocation4 + $0x1], 0  ;;  %s10349_s18 = smov 0   ;;  %s10351_s19 = smov 0  }
   0x6   :  { %s10353_s20 = smov 0   ;;  %s10355_s21 = smov 0  }
   0x7 LB: > { %s10370_s22 = sadd.s32 4294967295, %s10299_s21   ;;  %s8105_s23 = sadd.s32 4294967294, %s10299_s21   ;;  %s10299_s21 = sphi %s10355_s21, %s14678_s21   ;;  %s10295_s20 = sphi %s10353_s20, %s14677_s20   ;;  %s10291_s19 = sphi %s10351_s19, %s14676_s19   ;;  %s10287_s18 = sphi %s10349_s18, %s14675_s18  }
   0x8   : > { %p43_p0 = scmp.ne.s32.totalorder %s10291_s19, %s10287_s18  ;;  %p14020_p1 = scmp.eq.s32.totalorder %s10370_s22, 0 }
   0x9   : > { %p157_p3 = scmp.eq.s32.totalorder %s8105_s23, 3  ;;  %p8106_p5 = scmp.ge.s32.totalorder %s10299_s21, 1 }
   0xa   : > { %p10379_p4 = por %p14020_p1, %p43_p0  ;;  %p164_p7 = scmp.lt.s32.totalorder %s10299_s21, 5 }
   0xb   : > { %p10384_p6 = por %p157_p3, %p43_p0  ;;  %s10301_s27 = smov [#allocation5]  }
   0xc   : > { %s14195_s24 = scalar_select %p10379_p4, 1, 0 }
   0xd   : > { %s14196_s25 = scalar_select %p10384_p6, 1, 0 }
   0xe   : > { %p10389_p8 = pnand %p8106_p5, %p164_p7  ;;  %s176_s28 = sshll.u32 %s10301_s27, 4  ;;  %s177_s28 = int_to_ptr.vmem [resolvable:$true] %s176_s28 }
   0xf   : > { %s10302_s30 = smov [#allocation8]   ;;  %s10083_s9 = scalar_lea.hbm %s14015_s1, 5120 }
  0x10   : > { %s14197_s26 = scalar_select %p10389_p8, 1, 0 }
  0x11   : > { %p9123_p9 = pneg %p10389_p8  ;;  %s202_s6 = sshll.u32 %s10302_s30, 4  ;;  %s10401_s6 = int_to_ptr.vmem [resolvable:$true] %s202_s6 }
  0x12   : > { %p10084_p11 = scmp.ne.s32.totalorder %s14015_s1, %s10083_s9  ;;  %p10090_p3 = scmp.lt.u32.totalorder %s10083_s9, %s14015_s1 }
  0x13   : > { %p10397_p10 = pnand %p9123_p9, %p14020_p1 }
  0x15   : > { %p10411_p12 = pneg %p10397_p10 }
  0x17   : > { %p10086_p13 = pnand %p10411_p12, %p10084_p11 }
  0x19   : > { %p10087_p0 = pneg %p10086_p13 }
  0x1b   : > { %p10092_p5 = pnand %p10090_p3, %p10087_p0 }
  0x1d   : > { %10095 = shalt.err (!%p10092_p5)
}
  0x1e   : > { %s10096_s15 = scalar_lea.vmem %s177_s28, 5120  ;;  %p10104_p2 = scmp.lt.s32.totalorder %s177_s28, %s177_s28 }
  0x1f   : > { %p10097_p7 = scmp.ne.s32.totalorder %s177_s28, %s10096_s15  ;;  %p10105_p6 = scmp.lt.s32.totalorder %s10096_s15, %s10096_s15 }
  0x21   : > { %p10099_p9 = pnand %p10097_p7, %p10411_p12  ;;  %p10106_p4 = por %p10105_p6, %p10104_p2 }
  0x23   : > { %p10100_p1 = pneg %p10099_p9 }
  0x25   : > { %p10107_p8 = pnand %p10106_p4, %p10100_p1 }
  0x27   : > { %10110 = shalt.err (!%p10107_p8)
}
  0x28   : > { %s10303_s16 = smov 320   ;;  %s10304_s17 = smov 20  }
  0x29   : > { %9126 = dma.hbm_to_vmem [thread:$0]  (!%p10397_p10), %s14015_s1, 5120, %s177_s28, [#allocation6], %s10303_s16, %s10303_s16, %s10304_s17  }
  0x2a   : > { %s10111_s8 = scalar_lea.hbm %s14017_s3, 28672 }
  0x2b   : > { %p10112_p11 = scmp.ne.s32.totalorder %s14017_s3, %s10111_s8  ;;  %p10118_p4 = scmp.lt.u32.totalorder %s10111_s8, %s14017_s3 }
  0x2d   : > { %p10114_p1 = pnand %p10112_p11, %p10411_p12 }
  0x2f   : > { %p10115_p2 = pneg %p10114_p1 }
  0x31   : > { %p10120_p6 = pnand %p10118_p4, %p10115_p2 }
  0x33   : > { %10123 = shalt.err (!%p10120_p6)
}
  0x34   : > { %s10124_s28 = scalar_lea.vmem %s10401_s6, 28672  ;;  %p10132_p3 = scmp.lt.s32.totalorder %s10401_s6, %s10401_s6 }
  0x35   : > { %p10125_p8 = scmp.ne.s32.totalorder %s10401_s6, %s10124_s28  ;;  %p10133_p5 = scmp.lt.s32.totalorder %s10124_s28, %s10124_s28 }
  0x37   : > { %p10127_p13 = pnand %p10125_p8, %p10411_p12  ;;  %p10134_p7 = por %p10133_p5, %p10132_p3 }
  0x39   : > { %p10128_p0 = pneg %p10127_p13 }
  0x3b   : > { %p10135_p9 = pnand %p10134_p7, %p10128_p0 }
  0x3d   : > { %10138 = shalt.err (!%p10135_p9)
}
  0x3e   : > { %s10305_s14 = smov 448   ;;  %s10306_s15 = smov 28  }
  0x3f   : > { %9132 = dma.hbm_to_vmem [thread:$0]  (!%p10397_p10), %s14017_s3, 28672, %s10401_s6, [#allocation9], %s10305_s14, %s10305_s14, %s10306_s15  }
  0x40   : > { %s10307_s23 = smov [#allocation7]   ;;  %s10139_s8 = scalar_lea.hbm %s14016_s2, 20480 }
  0x41   : > { %s189_s27 = sshll.u32 %s10307_s23, 4  ;;  %p10140_p11 = scmp.ne.s32.totalorder %s14016_s2, %s10139_s8  ;;  %s190_s27 = int_to_ptr.vmem [resolvable:$true] %s189_s27 }
  0x42   : > { %p10146_p4 = scmp.lt.u32.totalorder %s10139_s8, %s14016_s2 }
  0x43   : > { %p10142_p1 = pnand %p10140_p11, %p10411_p12 }
  0x45   : > { %p10143_p2 = pneg %p10142_p1 }
  0x47   : > { %p10148_p6 = pnand %p10146_p4, %p10143_p2 }
  0x49   : > { %10151 = shalt.err (!%p10148_p6)
}
  0x4a   : > { %s10152_s6 = scalar_lea.vmem %s190_s27, 20480  ;;  %p10160_p3 = scmp.lt.s32.totalorder %s190_s27, %s190_s27 }
  0x4b   : > { %p10153_p8 = scmp.ne.s32.totalorder %s190_s27, %s10152_s6  ;;  %p10161_p5 = scmp.lt.s32.totalorder %s10152_s6, %s10152_s6 }
  0x4d   : > { %p10155_p13 = pnand %p10153_p8, %p10411_p12  ;;  %p10162_p7 = por %p10161_p5, %p10160_p3 }
  0x4f   : > { %p10156_p0 = pneg %p10155_p13 }
  0x51   : > { %p10163_p9 = pnand %p10162_p7, %p10156_p0 }
  0x53   : > { %10166 = shalt.err (!%p10163_p9)
}
  0x54   : > { %s10308_s28 = smov 256   ;;  %s10309_s14 = smov 16  }
  0x55   : > { %9129 = dma.hbm_to_vmem [thread:$0]  (!%p10397_p10), %s14016_s2, 20480, %s190_s27, [#allocation6], %s10308_s28, %s10308_s28, %s10309_s14  }
  0x56   : > { %s10310_s17 = smov [#allocation10]   ;;  %s10167_s8 = scalar_lea.hbm %s14018_s4, 512 }
  0x57   : > { %s216_s23 = sshll.u32 %s10310_s17, 4  ;;  %p10168_p11 = scmp.ne.s32.totalorder %s14018_s4, %s10167_s8  ;;  %s217_s23 = int_to_ptr.vmem [resolvable:$true] %s216_s23 }
  0x58   : > { %p10174_p4 = scmp.lt.u32.totalorder %s10167_s8, %s14018_s4 }
  0x59   : > { %p10170_p1 = pnand %p10168_p11, %p10411_p12 }
  0x5b   : > { %p10171_p2 = pneg %p10170_p1 }
  0x5d   : > { %p10176_p6 = pnand %p10174_p4, %p10171_p2 }
  0x5f   : > { %10179 = shalt.err (!%p10176_p6)
}
  0x60   : > { %s10180_s27 = scalar_lea.vmem %s217_s23, 512  ;;  %p10188_p3 = scmp.lt.s32.totalorder %s217_s23, %s217_s23 }
  0x61   : > { %p10181_p8 = scmp.ne.s32.totalorder %s217_s23, %s10180_s27  ;;  %p10189_p5 = scmp.lt.s32.totalorder %s10180_s27, %s10180_s27 }
  0x63   : > { %p10183_p13 = pnand %p10181_p8, %p10411_p12  ;;  %p10190_p7 = por %p10189_p5, %p10188_p3 }
  0x65   : > { %p10184_p0 = pneg %p10183_p13 }
  0x67   : > { %p10191_p9 = pnand %p10190_p7, %p10184_p0 }
  0x69   : > { %10194 = shalt.err (!%p10191_p9)
}
  0x6a   : > { %9135 = dma.hbm_to_vmem [thread:$0]  (!%p10397_p10), %s14018_s4, 512, %s217_s23, [#allocation9]  }
  0x6b   : > { %s10487_s12 = sadd.s32 1, %s10299_s21   ;;  %s30_s14 = sadd.s32 1, %s10295_s20 }
  0x6c   : > { %s27_s29 = ssub.s32 %s10299_s21, %s10487_s12  ;;  %p37_p12 = scmp.ne.s32.totalorder %s10295_s20, %s10291_s19 }
  0x6d   : > { %p28_p11 = scmp.eq.s32.totalorder %s27_s29, 0  ;;  %p38_p1 = scmp.eq.s32.totalorder %s10299_s21, 0 }
  0x6e   : > { %p14200_p2 = scmp.eq.s32.totalorder %s10370_s22, 3  ;;  %p9148_p6 = scmp.lt.s32.totalorder %s10299_s21, 4 }
  0x6f   : > { %s10503_s16 = scalar_select %p28_p11, %s10295_s20, %s30_s14  }
  0x70   : > { %p10497_p4 = por %p14200_p2, %p37_p12  ;;  %p39_p8 = por %p38_p1, %p37_p12 }
  0x71   : > { %s227_s17 = sand.u32 1, %s10295_s20   ;;  %s8620_s23 = sshll.u32 %s10299_s21, 10 }
  0x72   : > { %s8112_s30 = sshll.u32 %s227_s17, 6  ;;  %s10510_s9 = scalar_lea.hbm %s14014_s0, %s8620_s23 }
  0x73   : > { %s231_s10 = scalar_lea.vmem [#allocation2], %s8112_s30  ;;  %p10514_p10 = pnand %p9148_p6, %p39_p8 }
  0x74   : > { %s238_s11 = sshll.u32 %s231_s10, 4  ;;  %s10518_s27 = scalar_lea.sflag [#allocation3], %s227_s17  ;;  %s10512_s11 = int_to_ptr.vmem [resolvable:$true] %s238_s11 }
  0x75   : > { %s10195_s6 = scalar_lea.hbm %s10510_s9, 1024  ;;  %p10197_p0 = pneg %p10514_p10 }
  0x76   : > { %p10196_p13 = scmp.ne.s32.totalorder %s10510_s9, %s10195_s6  ;;  %s10200_s29 = scalar_lea.hbm %s14014_s0, 4096 }
  0x77   : > { %p10201_p7 = scmp.lt.u32.totalorder %s10510_s9, %s14014_s0  ;;  %p10202_p9 = scmp.lt.u32.totalorder %s10200_s29, %s10195_s6 }
  0x78   : > { %p10198_p3 = pnand %p10197_p0, %p10196_p13  ;;  %p10204_p11 = scmp.lt.u32.totalorder %s10195_s6, %s10510_s9 }
  0x79   : > { %p10203_p12 = por %p10202_p9, %p10201_p7 }
  0x7a   : > { %p10199_p5 = pneg %p10198_p3 }
  0x7b   : > { %p10205_p1 = por %p10204_p11, %p10203_p12 }
  0x7d   : > { %p10206_p2 = pnand %p10205_p1, %p10199_p5 }
  0x7f   : > { %10209 = shalt.err (!%p10206_p2)
}
  0x80   : > { %s10210_s17 = scalar_lea.vmem %s10512_s11, 1024  ;;  %s10311_s7 = smov [#allocation2]  }
  0x81   : > { %p10211_p6 = scmp.ne.s32.totalorder %s10512_s11, %s10210_s17  ;;  %s10215_s8 = sshll.u32 %s10311_s7, 4  ;;  %s10216_s8 = int_to_ptr.vmem [resolvable:$false] %s10215_s8 }
  0x82   : > { %s10217_s10 = scalar_lea.vmem %s10216_s8, 2048  ;;  %p10218_p3 = scmp.lt.s32.totalorder %s10512_s11, %s10216_s8 }
  0x83   : > { %p10213_p8 = pnand %p10211_p6, %p10197_p0  ;;  %p10219_p7 = scmp.lt.s32.totalorder %s10217_s10, %s10210_s17 }
  0x85   : > { %p10214_p13 = pneg %p10213_p8  ;;  %p10220_p9 = por %p10219_p7, %p10218_p3 }
  0x87   : > { %p10221_p12 = pnand %p10220_p9, %p10214_p13 }
  0x89   : > { %10224 = shalt.err (!%p10221_p12)
}
  0x8a   : > { %s10312_s6 = smov 64   ;;  %s10313_s28 = smov 4  }
  0x8b   : > { %9139 = dma.hbm_to_vmem [thread:$0]  (!%p10514_p10), %s10510_s9, 1024, %s10512_s11, %s10518_s27, %s10312_s6, %s10312_s6, %s10313_s28  }
  0x8c   : > { %p14203_p0 = scmp.ne.s32.totalorder %s14197_s26, 0 }
  0x8e   : > { %250 = sbr.rel (%p14203_p0) target bundleno = 1688 (0x698), region = 40 }
  0x95   : > { %s10549_s14 = sand.u32 1, %s10291_s19   ;;  %p14204_p5 = scmp.ne.s32.totalorder %s14195_s24, 0 }
  0x96   : > { %s8116_s29 = sshll.u32 %s10549_s14, 6  ;;  %s253_s30 = scalar_lea.sflag [#allocation3], %s10549_s14 }
  0x97   : > { %s10553_s23 = scalar_lea.vmem [#allocation2], %s8116_s29 }
  0x98   : > { %10270 = dma.done.wait (%p14204_p5), %s253_s30, 1024  }
  0x99   : > { %10272 = vsyncadd (%p14204_p5), %s253_s30, 4294966272  ;;  %p14205_p10 = scmp.eq.s32.totalorder %s10370_s22, 0 }
  0x9b   : > { %10274 = dma.done.wait (%p14205_p10), [#allocation6], 25600   ;;  %p14206_p11 = pmov %p14205_p10 }
  0x9c   : > { %p14207_p1 = pmov %p14205_p10 }
  0x9d   : > { %10276 = vsyncadd (%p14206_p11), [#allocation6], 4294941696 }
  0x9e   : > { %10278 = dma.done.wait (%p14207_p1), [#allocation9], 29184   ;;  %p14208_p2 = pmov %p14207_p1 }
  0x9f   : > { %v14023_v0 = vmov 0   ;;  %v9202_v1 = vld [vmem:[#allocation5 + $0x4] ss:$20 sps:$4 sm:$0xff]   ;;  %v9204_v2 = vld [vmem:[#allocation5] ss:$20 sps:$4 sm:$0xff]   ;;  %v10580_v25 = vld [vmem:[%s10553_s23 + $0x8] sm:$0xff]  }
  0xa0   : > { %10280 = vsyncadd (%p14208_p2), [#allocation9], 4294938112  ;;  %656 = vmatprep.mubr.bf16.mxu0 %v14023_v0  ;;  %696 = vmatprep.mubr.bf16.mxu1 %v14023_v0  ;;  %v9205_v3 = vld [vmem:[#allocation5 + $0x2c] ss:$20 sps:$4 sm:$0xff]   ;;  %v9207_v4 = vld [vmem:[#allocation5 + $0x28] ss:$20 sps:$4 sm:$0xff]  }
  0xa1   : > { %624 = vmatprep.subr.bf16.mxu0 %v9202_v1  ;;  %8861 = vmatprep.subr.bf16.mxu1 %v9202_v1  ;;  %v9208_v5 = vld [vmem:[#allocation5 + $0x54] ss:$20 sps:$4 sm:$0xff]   ;;  %v9210_v6 = vld [vmem:[#allocation5 + $0x50] ss:$20 sps:$4 sm:$0xff]   ;;  %v9213_v8 = vld [vmem:[#allocation5 + $0x78] ss:$20 sps:$4 sm:$0xff]  }
  0xa2   : > { %625 = vmatpush1.bf16.msra.mxu0 %v9204_v2  ;;  %8869 = vmatpush1.bf16.msra.mxu1 %v9204_v2  ;;  %v9211_v7 = vld [vmem:[#allocation5 + $0x7c] ss:$20 sps:$4 sm:$0xff]   ;;  %v9214_v9 = vld [vmem:[#allocation5 + $0xa4] ss:$20 sps:$4 sm:$0xff]   ;;  %v9216_v10 = vld [vmem:[#allocation5 + $0xa0] ss:$20 sps:$4 sm:$0xff]  }
  0xa3   : > { %626 = vmatprep.subr.bf16.mxu0 %v9205_v3  ;;  %8862 = vmatprep.subr.bf16.mxu1 %v9205_v3  ;;  %v9217_v11 = vld [vmem:[#allocation5 + $0xcc] ss:$20 sps:$4 sm:$0xff]   ;;  %v9219_v12 = vld [vmem:[#allocation5 + $0xc8] ss:$20 sps:$4 sm:$0xff]   ;;  %v9222_v14 = vld [vmem:[#allocation5 + $0xf0] ss:$20 sps:$4 sm:$0xff]  }
  0xa4   : > { %v9220_v13 = vld [vmem:[#allocation5 + $0xf4] ss:$20 sps:$4 sm:$0xff]   ;;  %v9223_v15 = vld [vmem:[#allocation5 + $0x11c] ss:$20 sps:$4 sm:$0xff]   ;;  %v9225_v16 = vld [vmem:[#allocation5 + $0x118] ss:$20 sps:$4 sm:$0xff]  }
  0xa5   : > { %v10570_v17 = vld [vmem:[%s10553_s23] sm:$0xff]   ;;  %v9228_v21 = vld [vmem:[#allocation5 + $0x8] ss:$20 sps:$4 sm:$0xff]   ;;  %v9259_v23 = vld [vmem:[#allocation5 + $0x38] ss:$20 sps:$4 sm:$0xff]   ;;  %s9101_s24 = smul.u32 448, %s10549_s14 }
  0xa6   : > { %627 = vmatpush1.bf16.msra.mxu0 %v9207_v4  ;;  %8870 = vmatpush1.bf16.msra.mxu1 %v9207_v4  ;;  %v9230_v18 = vld [vmem:[#allocation5 + $0xc] ss:$20 sps:$4 sm:$0xff]   ;;  %v9258_v20 = vld [vmem:[#allocation5 + $0x10] ss:$20 sps:$4 sm:$0xff]   ;;  %v9233_v22 = vld [vmem:[#allocation5 + $0x34] ss:$20 sps:$4 sm:$0xff]  }
  0xa7   : > { %628 = vmatprep.subr.bf16.mxu0 %v9208_v5  ;;  %8863 = vmatprep.subr.bf16.mxu1 %v9208_v5  ;;  %v10573_v19 = vld [vmem:[%s10553_s23 + $0x20] sm:$0xff]   ;;  %v10583_v26 = vld [vmem:[%s10553_s23 + $0x28] sm:$0xff]   ;;  %v9238_v27 = vld [vmem:[#allocation5 + $0x5c] ss:$20 sps:$4 sm:$0xff]   ;;  %s13473_s26 = scalar_lea.vmem [#allocation11], %s9101_s24  ;;  %s9102_s9 = smul.u32 7168, %s10370_s22 }
  0xa8   : > { %v9231_v24 = vld [vmem:[#allocation5 + $0x30] ss:$20 sps:$4 sm:$0xff]   ;;  %v9236_v28 = vld [vmem:[#allocation5 + $0x58] ss:$20 sps:$4 sm:$0xff]   ;;  %v9260_v30 = vld [vmem:[#allocation5 + $0x60] ss:$20 sps:$4 sm:$0xff]  }
  0xa9   : > { %v9241_v29 = vld [vmem:[#allocation5 + $0x84] ss:$20 sps:$4 sm:$0xff]   ;;  %v9239_v31 = vld [vmem:[#allocation5 + $0x80] ss:$20 sps:$4 sm:$0xff]   ;;  %v9261_v32 = vld [vmem:[#allocation5 + $0x88] ss:$20 sps:$4 sm:$0xff]   ;;  %s13967_s17 = scalar_lea.hbm %s14019_s5, %s9102_s9 }
  0xaa   : > { %629 = vmatpush1.bf16.msra.mxu0 %v9210_v6  ;;  %8871 = vmatpush1.bf16.msra.mxu1 %v9210_v6  ;;  %v9246_v33 = vld [vmem:[#allocation5 + $0xac] ss:$20 sps:$4 sm:$0xff]   ;;  %v9242_v34 = vld [vmem:[%s10553_s23 + $0x10] sm:$0xff]   ;;  %v9244_v36 = vld [vmem:[#allocation5 + $0xa8] ss:$20 sps:$4 sm:$0xff]   ;;  %s7994_s11 = sshll.u32 %s13473_s26, 4  ;;  %s13969_s11 = int_to_ptr.vmem [resolvable:$true] %s7994_s11 }
  0xab   : > { %630 = vmatprep.subr.bf16.mxu0 %v9211_v7  ;;  %8864 = vmatprep.subr.bf16.mxu1 %v9211_v7  ;;  %v9243_v35 = vld [vmem:[%s10553_s23 + $0x30] sm:$0xff]   ;;  %v9250_v41 = vld [vmem:[%s10553_s23 + $0x18] sm:$0xff]   ;;  %s7981_s22 = scalar_lea.sflag [#allocation4], %s10549_s14  ;;  %s10225_s7 = scalar_lea.vmem %s13969_s11, 7168 }
  0xac   : > { %v9249_v37 = vld [vmem:[#allocation5 + $0xd4] ss:$20 sps:$4 sm:$0xff]   ;;  %v9262_v38 = vld [vmem:[#allocation5 + $0xb0] ss:$20 sps:$4 sm:$0xff]   ;;  %v9251_v42 = vld [vmem:[%s10553_s23 + $0x38] sm:$0xff]   ;;  %p10226_p6 = scmp.ne.s32.totalorder %s13969_s11, %s10225_s7  ;;  %s10316_s8 = smov [#allocation11]  }
  0xad   : > { %v9247_v39 = vld [vmem:[#allocation5 + $0xd0] ss:$20 sps:$4 sm:$0xff]   ;;  %v9252_v43 = vld [vmem:[#allocation5 + $0xf8] ss:$20 sps:$4 sm:$0xff]   ;;  %v9264_v46 = vld [vmem:[#allocation5 + $0x100] ss:$20 sps:$4 sm:$0xff]  }
  0xae   : > { %631 = vmatpush1.bf16.msra.mxu0 %v9213_v8  ;;  %8872 = vmatpush1.bf16.msra.mxu1 %v9213_v8  ;;  %v9254_v40 = vld [vmem:[#allocation5 + $0xfc] ss:$20 sps:$4 sm:$0xff]   ;;  %v9257_v44 = vld [vmem:[#allocation5 + $0x124] ss:$20 sps:$4 sm:$0xff]   ;;  %v9255_v47 = vld [vmem:[#allocation5 + $0x120] ss:$20 sps:$4 sm:$0xff]   ;;  %p10227_p8 = pnand %p10226_p6, %p10497_p4 }
  0xaf   : > { %632 = vmatprep.subr.bf16.mxu0 %v9214_v9  ;;  %8865 = vmatprep.subr.bf16.mxu1 %v9214_v9  ;;  %v9263_v45 = vld [vmem:[#allocation5 + $0xd8] ss:$20 sps:$4 sm:$0xff]   ;;  %v9265_v48 = vld [vmem:[#allocation5 + $0x128] ss:$20 sps:$4 sm:$0xff]   ;;  %v9268_v49 = vld [vmem:[#allocation7 + $0x4] ss:$16 sps:$4 sm:$0xff]  }
  0xb0   : > { %v9271_v50 = vld [vmem:[#allocation7 + $0xc] ss:$16 sps:$4 sm:$0xff]   ;;  %v9266_v51 = vld [vmem:[#allocation7] ss:$16 sps:$4 sm:$0xff]   ;;  %v9269_v52 = vld [vmem:[#allocation7 + $0x8] ss:$16 sps:$4 sm:$0xff]   ;;  %p10228_p13 = pneg %p10227_p8 }
  0xb1   : > { %v9274_v53 = vld [vmem:[#allocation7 + $0x24] ss:$16 sps:$4 sm:$0xff]   ;;  %v9277_v54 = vld [vmem:[#allocation7 + $0x2c] ss:$16 sps:$4 sm:$0xff]   ;;  %v9272_v55 = vld [vmem:[#allocation7 + $0x20] ss:$16 sps:$4 sm:$0xff]  }
  0xb2   : > { %633 = vmatpush1.bf16.msra.mxu0 %v9216_v10  ;;  %8873 = vmatpush1.bf16.msra.mxu1 %v9216_v10  ;;  %v9275_v56 = vld [vmem:[#allocation7 + $0x28] ss:$16 sps:$4 sm:$0xff]   ;;  %v9280_v57 = vld [vmem:[#allocation7 + $0x44] ss:$16 sps:$4 sm:$0xff]   ;;  %v9283_v58 = vld [vmem:[#allocation7 + $0x4c] ss:$16 sps:$4 sm:$0xff]  }
  0xb3   : > { %634 = vmatprep.subr.bf16.mxu0 %v9217_v11  ;;  %8866 = vmatprep.subr.bf16.mxu1 %v9217_v11  ;;  %v9278_v59 = vld [vmem:[#allocation7 + $0x40] ss:$16 sps:$4 sm:$0xff]   ;;  %v9281_v60 = vld [vmem:[#allocation7 + $0x48] ss:$16 sps:$4 sm:$0xff]   ;;  %v9286_v61 = vld [vmem:[#allocation7 + $0x64] ss:$16 sps:$4 sm:$0xff]  }
  0xb4   : > { %v9289_v62 = vld [vmem:[#allocation7 + $0x6c] ss:$16 sps:$4 sm:$0xff]   ;;  %v9284_v63 = vld [vmem:[#allocation7 + $0x60] ss:$16 sps:$4 sm:$0xff]   ;;  %v9287_v1 = vld [vmem:[#allocation7 + $0x68] ss:$16 sps:$4 sm:$0xff]  }
  0xb5   : > { %v9292_v2 = vld [vmem:[#allocation7 + $0x84] ss:$16 sps:$4 sm:$0xff]   ;;  %v9295_v3 = vld [vmem:[#allocation7 + $0x8c] ss:$16 sps:$4 sm:$0xff]   ;;  %v9290_v4 = vld [vmem:[#allocation7 + $0x80] ss:$16 sps:$4 sm:$0xff]  }
  0xb6   : > { %635 = vmatpush1.bf16.msra.mxu0 %v9219_v12  ;;  %8874 = vmatpush1.bf16.msra.mxu1 %v9219_v12  ;;  %v9293_v5 = vld [vmem:[#allocation7 + $0x88] ss:$16 sps:$4 sm:$0xff]   ;;  %v9298_v6 = vld [vmem:[#allocation7 + $0xa4] ss:$16 sps:$4 sm:$0xff]   ;;  %v9301_v7 = vld [vmem:[#allocation7 + $0xac] ss:$16 sps:$4 sm:$0xff]  }
  0xb7   : > { %636 = vmatprep.subr.bf16.mxu0 %v9220_v13  ;;  %8867 = vmatprep.subr.bf16.mxu1 %v9220_v13  ;;  %v9296_v8 = vld [vmem:[#allocation7 + $0xa0] ss:$16 sps:$4 sm:$0xff]   ;;  %v9299_v9 = vld [vmem:[#allocation7 + $0xa8] ss:$16 sps:$4 sm:$0xff]   ;;  %v9304_v10 = vld [vmem:[#allocation7 + $0xc4] ss:$16 sps:$4 sm:$0xff]  }
  0xb8   : > { %v9307_v11 = vld [vmem:[#allocation7 + $0xcc] ss:$16 sps:$4 sm:$0xff]   ;;  %v9302_v12 = vld [vmem:[#allocation7 + $0xc0] ss:$16 sps:$4 sm:$0xff]   ;;  %v9305_v13 = vld [vmem:[#allocation7 + $0xc8] ss:$16 sps:$4 sm:$0xff]  }
  0xb9   : > { %s10229_s10 = sshll.u32 %s10316_s8, 4  ;;  %s10230_s10 = int_to_ptr.vmem [resolvable:$false] %s10229_s10 }
  0xba   : > { %637 = vmatpush1.bf16.msra.mxu0 %v9222_v14  ;;  %8875 = vmatpush1.bf16.msra.mxu1 %v9222_v14  ;;  %v9310_v14 = vld [vmem:[#allocation7 + $0xe4] ss:$16 sps:$4 sm:$0xff]   ;;  %s10231_s6 = scalar_lea.vmem %s10230_s10, 14336  ;;  %p10232_p3 = scmp.lt.s32.totalorder %s13969_s11, %s10230_s10 }
  0xbb   : > { %638 = vmatprep.subr.bf16.mxu0 %v9223_v15  ;;  %8868 = vmatprep.subr.bf16.mxu1 %v9223_v15  ;;  %v9313_v15 = vld [vmem:[#allocation7 + $0xec] ss:$16 sps:$4 sm:$0xff]   ;;  %p10233_p7 = scmp.lt.s32.totalorder %s10231_s6, %s10225_s7 }
  0xbd   : > { %p10234_p9 = por %p10233_p7, %p10232_p3 }
  0xbe   : > { %639 = vmatpush1.bf16.msra.mxu0 %v9225_v16  ;;  %8876 = vmatpush1.bf16.msra.mxu1 %v9225_v16  ;;  %v9308_v16 = vld [vmem:[#allocation7 + $0xe0] ss:$16 sps:$4 sm:$0xff]  }
  0xbf   : > { %737 = vmatprep.subr.bf16.mxu1 %v9230_v18  ;;  %8829 = vmatprep.subr.bf16.mxu0 %v9258_v20  ;;  %p10235_p12 = pnand %p10234_p9, %p10228_p13 }
  0xc1   : > { %657 = vmatmul.mubr.bf16.vlgmr.msra.gmra.mrb[0].mxu0 %v10570_v17  ;;  %697 = vmatmul.mubr.bf16.vlgmr.msra.gmra.mrb[0].mxu1 %v10573_v19 }
  0xc2   : > { %738 = vmatpush1.bf16.msra.mxu1 %v9228_v21  ;;  %666 = vmatprep.mubr.bf16.mxu0 %v14023_v0  ;;  %v9319_v21 = vld [vmem:[#allocation7 + $0x10c] ss:$16 sps:$4 sm:$0xff]  }
  0xc3   : > { %739 = vmatprep.subr.bf16.mxu1 %v9233_v22  ;;  %706 = vmatprep.mubr.bf16.mxu1 %v14023_v0 }
  0xc4   : > { %8830 = vmatpush3.bf16.msra.mxu0 %v9258_v20  ;;  %v9316_v20 = vld [vmem:[#allocation7 + $0x104] ss:$16 sps:$4 sm:$0xff]  }
  0xc5   : > { %8831 = vmatprep.subr.bf16.mxu0 %v9259_v23 }
  0xc6   : > { %740 = vmatpush1.bf16.msra.mxu1 %v9231_v24 }
  0xc7   : > { %741 = vmatprep.subr.bf16.mxu1 %v9238_v27 }
  0xc8   : > { %8832 = vmatpush3.bf16.msra.mxu0 %v9259_v23 }
  0xc9   : > { %667 = vmatmul.mubr.bf16.gmra.mrb[4].mxu0 %v10580_v25  ;;  %707 = vmatmul.mubr.bf16.gmra.mrb[4].mxu1 %v10583_v26 }
  0xca   : > { %742 = vmatpush1.bf16.msra.mxu1 %v9236_v28  ;;  %676 = vmatprep.mubr.bf16.mxu0 %v14023_v0 }
  0xcb   : > { %743 = vmatprep.subr.bf16.mxu1 %v9241_v29  ;;  %716 = vmatprep.mubr.bf16.mxu1 %v14023_v0 }
  0xcc   : > { %8833 = vmatprep.subr.bf16.mxu0 %v9260_v30 }
  0xcd   : > { %8834 = vmatpush3.bf16.msra.mxu0 %v9260_v30 }
  0xce   : > { %744 = vmatpush1.bf16.msra.mxu1 %v9239_v31  ;;  %8835 = vmatprep.subr.bf16.mxu0 %v9261_v32 }
  0xcf   : > { %745 = vmatprep.subr.bf16.mxu1 %v9246_v33 }
  0xd1   : > { %677 = vmatmul.mubr.bf16.gmra.mrb[8].mxu0 %v9242_v34  ;;  %717 = vmatmul.mubr.bf16.gmra.mrb[8].mxu1 %v9243_v35 }
  0xd2   : > { %746 = vmatpush1.bf16.msra.mxu1 %v9244_v36  ;;  %686 = vmatprep.mubr.bf16.mxu0 %v14023_v0  ;;  %v9322_v36 = vld [vmem:[#allocation7 + $0x124] ss:$16 sps:$4 sm:$0xff]  }
  0xd3   : > { %747 = vmatprep.subr.bf16.mxu1 %v9249_v37  ;;  %726 = vmatprep.mubr.bf16.mxu1 %v14023_v0  ;;  %v9325_v37 = vld [vmem:[#allocation7 + $0x12c] ss:$16 sps:$4 sm:$0xff]  }
  0xd4   : > { %8836 = vmatpush3.bf16.msra.mxu0 %v9261_v32 }
  0xd5   : > { %8837 = vmatprep.subr.bf16.mxu0 %v9262_v38 }
  0xd6   : > { %748 = vmatpush1.bf16.msra.mxu1 %v9247_v39  ;;  %v9320_v39 = vld [vmem:[#allocation7 + $0x120] ss:$16 sps:$4 sm:$0xff]  }
  0xd7   : > { %749 = vmatprep.subr.bf16.mxu1 %v9254_v40  ;;  %v9323_v40 = vld [vmem:[#allocation7 + $0x128] ss:$16 sps:$4 sm:$0xff]  }
  0xd8   : > { %8838 = vmatpush3.bf16.msra.mxu0 %v9262_v38 }
  0xd9   : > { %687 = vmatmul.mubr.bf16.gmra.mrb[12].mxu0 %v9250_v41  ;;  %727 = vmatmul.mubr.bf16.gmra.mrb[12].mxu1 %v9251_v42 }
  0xda   : > { %750 = vmatpush1.bf16.msra.mxu1 %v9252_v43  ;;  %769 = vmatprep.mubr.bf16.mxu1 %v14023_v0 }
  0xdb   : > { %751 = vmatprep.subr.bf16.mxu1 %v9257_v44  ;;  %8839 = vmatprep.subr.bf16.mxu0 %v9263_v45  ;;  %v9328_v44 = vld [vmem:[#allocation7 + $0x144] ss:$16 sps:$4 sm:$0xff]  }
  0xdc   : > { %8840 = vmatpush3.bf16.msra.mxu0 %v9263_v45  ;;  %8845 = vmatprep.mubr.bf16.mxu0 %v10570_v17  ;;  %v9331_v45 = vld [vmem:[#allocation7 + $0x14c] ss:$16 sps:$4 sm:$0xff]  }
  0xdd   : > { %8841 = vmatprep.subr.bf16.mxu0 %v9264_v46 }
  0xde   : > { %752 = vmatpush1.bf16.msra.mxu1 %v9255_v47 }
  0xdf   : > { %2839 = vmatprep.subr.bf16.mxu1 %v9268_v49 }
  0xe0   : > { %8842 = vmatpush3.bf16.msra.mxu0 %v9264_v46 }
  0xe1   : > { %770 = vmatmul.mubr.bf16.vlgmr.msra.gmra.mrb[16].mxu1 %v10570_v17  ;;  %8843 = vmatprep.subr.bf16.mxu0 %v9265_v48  ;;  %v9311_v17 = vld [vmem:[#allocation7 + $0xe8] ss:$16 sps:$4 sm:$0xff]  }
  0xe2   : > { %779 = vmatprep.mubr.bf16.mxu1 %v14023_v0  ;;  %2840 = vmatpush1.bf16.msra.mxu1 %v9266_v51  ;;  %v9329_v51 = vld [vmem:[#allocation7 + $0x148] ss:$16 sps:$4 sm:$0xff]  }
  0xe3   : > { %2841 = vmatprep.subr.bf16.mxu1 %v9274_v53 }
  0xe4   : > { %8844 = vmatpush3.bf16.msra.mxu0 %v9265_v48 }
  0xe5   : > { %3178 = vmatprep.subr.bf16.mxu0 %v9271_v50  ;;  %v9326_v50 = vld [vmem:[#allocation7 + $0x140] ss:$16 sps:$4 sm:$0xff]  }
  0xe6   : > { %2842 = vmatpush1.bf16.msra.mxu1 %v9272_v55 }
  0xe7   : > { %8846 = vmatmul.mubr.bf16.vlgmr.msra.gmra.mrb[16].mxu0 %v10580_v25  ;;  %2843 = vmatprep.subr.bf16.mxu1 %v9280_v57 }
  0xe8   : > { %8849 = vmatprep.mubr.bf16.mxu0 %v9242_v34  ;;  %3179 = vmatpush1.bf16.msra.mxu0 %v9269_v52 }
  0xe9   : > { %780 = vmatmul.mubr.bf16.gmra.mrb[20].mxu1 %v10580_v25  ;;  %3180 = vmatprep.subr.bf16.mxu0 %v9277_v54  ;;  %v9314_v25 = vld [vmem:[#allocation7 + $0x100] ss:$16 sps:$4 sm:$0xff]  }
  0xea   : > { %789 = vmatprep.mubr.bf16.mxu1 %v14023_v0  ;;  %2844 = vmatpush1.bf16.msra.mxu1 %v9278_v59 }
  0xeb   : > { %2845 = vmatprep.subr.bf16.mxu1 %v9286_v61 }
  0xec   : > { %3181 = vmatpush1.bf16.msra.mxu0 %v9275_v56 }
  0xed   : > { %3182 = vmatprep.subr.bf16.mxu0 %v9283_v58 }
  0xee   : > { %2846 = vmatpush1.bf16.msra.mxu1 %v9284_v63 }
  0xef   : > { %8850 = vmatmul.mubr.bf16.gmra.mrb[20].mxu0 %v9250_v41  ;;  %2847 = vmatprep.subr.bf16.mxu1 %v9292_v2  ;;  %v9337_v2 = vld [vmem:[#allocation7 + $0x16c] ss:$16 sps:$4 sm:$0xff]  }
  0xf0   : > { %8853 = vmatprep.mubr.bf16.mxu0 %v10573_v19  ;;  %3183 = vmatpush1.bf16.msra.mxu0 %v9281_v60 }
  0xf1   : > { %790 = vmatmul.mubr.bf16.gmra.mrb[24].mxu1 %v9242_v34  ;;  %3184 = vmatprep.subr.bf16.mxu0 %v9289_v62 }
  0xf2   : > { %799 = vmatprep.mubr.bf16.mxu1 %v14023_v0  ;;  %2848 = vmatpush1.bf16.msra.mxu1 %v9290_v4  ;;  %v9332_v4 = vld [vmem:[#allocation7 + $0x160] ss:$16 sps:$4 sm:$0xff]  }
  0xf3   : > { %2849 = vmatprep.subr.bf16.mxu1 %v9298_v6 }
  0xf4   : > { %3185 = vmatpush1.bf16.msra.mxu0 %v9287_v1  ;;  %v9334_v1 = vld [vmem:[#allocation7 + $0x164] ss:$16 sps:$4 sm:$0xff]  }
  0xf5   : > { %3186 = vmatprep.subr.bf16.mxu0 %v9295_v3 }
  0xf6   : > { %2850 = vmatpush1.bf16.msra.mxu1 %v9296_v8 }
  0xf7   : > { %8854 = vmatmul.mubr.bf16.gmra.mrb[24].mxu0 %v10583_v26  ;;  %2851 = vmatprep.subr.bf16.mxu1 %v9304_v10  ;;  %v9343_v10 = vld [vmem:[#allocation7 + $0x18c] ss:$16 sps:$4 sm:$0xff]  }
  0xf8   : > { %8857 = vmatprep.mubr.bf16.mxu0 %v9243_v35  ;;  %3187 = vmatpush1.bf16.msra.mxu0 %v9293_v5  ;;  %v9335_v5 = vld [vmem:[#allocation7 + $0x168] ss:$16 sps:$4 sm:$0xff]  }
  0xf9   : > { %800 = vmatmul.mubr.bf16.gmra.mrb[28].mxu1 %v9250_v41  ;;  %3188 = vmatprep.subr.bf16.mxu0 %v9301_v7 }
  0xfa   : > { %809 = vmatprep.mubr.bf16.mxu1 %v14023_v0  ;;  %2852 = vmatpush1.bf16.msra.mxu1 %v9302_v12 }
  0xfb   : > { %2853 = vmatprep.subr.bf16.mxu1 %v9310_v14 }
  0xfc   : > { %3189 = vmatpush1.bf16.msra.mxu0 %v9299_v9  ;;  %v9340_v9 = vld [vmem:[#allocation7 + $0x184] ss:$16 sps:$4 sm:$0xff]  }
  0xfd   : > { %3190 = vmatprep.subr.bf16.mxu0 %v9307_v11 }
  0xfe   : > { %2854 = vmatpush1.bf16.msra.mxu1 %v9308_v16  ;;  %v9341_v16 = vld [vmem:[#allocation7 + $0x188] ss:$16 sps:$4 sm:$0xff]  }
  0xff   : > { %8858 = vmatmul.mubr.bf16.gmra.mrb[28].mxu0 %v9251_v42  ;;  %2855 = vmatprep.subr.bf16.mxu1 %v9316_v20 }
 0x100   : > { %3191 = vmatpush1.bf16.msra.mxu0 %v9305_v13 }
 0x101   : > { %810 = vmatmul.mubr.bf16.gmra.mrb[32].mxu1 %v10573_v19  ;;  %3192 = vmatprep.subr.bf16.mxu0 %v9313_v15  ;;  %v9338_v15 = vld [vmem:[#allocation7 + $0x180] ss:$16 sps:$4 sm:$0xff]  }
 0x102   : > { %819 = vmatprep.mubr.bf16.mxu1 %v14023_v0  ;;  %2856 = vmatpush1.bf16.msra.mxu1 %v9314_v25 }
 0x103   : > { %2857 = vmatprep.subr.bf16.mxu1 %v9322_v36 }
 0x104   : > { %3193 = vmatpush1.bf16.msra.mxu0 %v9311_v17 }
 0x105   : > { %3194 = vmatprep.subr.bf16.mxu0 %v9319_v21 }
 0x106   : > { %2858 = vmatpush1.bf16.msra.mxu1 %v9320_v39 }
 0x107   : > { %2859 = vmatprep.subr.bf16.mxu1 %v9328_v44  ;;  %v9347_v44 = vld [vmem:[#allocation7 + $0x1a8] ss:$16 sps:$4 sm:$0xff]  }
 0x109   : > { %820 = vmatmul.mubr.bf16.gmra.mrb[36].mxu1 %v10583_v26  ;;  %v9317_v26 = vld [vmem:[#allocation7 + $0x108] ss:$16 sps:$4 sm:$0xff]  }
 0x10a   : > { %829 = vmatprep.mubr.bf16.mxu1 %v14023_v0  ;;  %3195 = vmatpush1.bf16.msra.mxu0 %v9317_v26 }
 0x10b   : > { %3196 = vmatprep.subr.bf16.mxu0 %v9325_v37  ;;  %2860 = vmatpush1.bf16.msra.mxu1 %v9326_v50  ;;  %v9346_v37 = vld [vmem:[#allocation7 + $0x1a4] ss:$16 sps:$4 sm:$0xff]   ;;  %v9355_v50 = vld [vmem:[#allocation7 + $0x1cc] ss:$16 sps:$4 sm:$0xff]  }
 0x10c   : > { %2861 = vmatprep.subr.bf16.mxu1 %v9334_v1  ;;  %v9353_v1 = vld [vmem:[#allocation7 + $0x1c8] ss:$16 sps:$4 sm:$0xff]  }
 0x10e   : > { %3197 = vmatpush1.bf16.msra.mxu0 %v9323_v40  ;;  %v9344_v40 = vld [vmem:[#allocation7 + $0x1a0] ss:$16 sps:$4 sm:$0xff]  }
 0x10f   : > { %3198 = vmatprep.subr.bf16.mxu0 %v9331_v45  ;;  %2862 = vmatpush1.bf16.msra.mxu1 %v9332_v4 }
 0x110   : > { %2863 = vmatprep.subr.bf16.mxu1 %v9340_v9  ;;  %v9356_v9 = vld [vmem:[#allocation7 + $0x1e0] ss:$16 sps:$4 sm:$0xff]  }
 0x111   : > { %830 = vmatmul.mubr.bf16.gmra.mrb[40].mxu1 %v9243_v35 }
 0x112   : > { %839 = vmatprep.mubr.bf16.mxu1 %v14023_v0  ;;  %3199 = vmatpush1.bf16.msra.mxu0 %v9329_v51 }
 0x113   : > { %3200 = vmatprep.subr.bf16.mxu0 %v9337_v2  ;;  %2864 = vmatpush1.bf16.msra.mxu1 %v9338_v15 }
 0x114   : > { %2865 = vmatprep.subr.bf16.mxu1 %v9346_v37 }
 0x116   : > { %3201 = vmatpush1.bf16.msra.mxu0 %v9335_v5 }
 0x117   : > { %3202 = vmatprep.subr.bf16.mxu0 %v9343_v10  ;;  %2866 = vmatpush1.bf16.msra.mxu1 %v9344_v40  ;;  %v9358_v10 = vld [vmem:[#allocation7 + $0x1e4] ss:$16 sps:$4 sm:$0xff]  }
 0x119   : > { %840 = vmatmul.mubr.bf16.gmra.mrb[44].mxu1 %v9251_v42 }
 0x11a   : > { %3203 = vmatpush1.bf16.msra.mxu0 %v9341_v16 }
 0x194   : > { %v10611_v18 = vpop.f32.mrb[0].mxu1  ;;  %v10613_v19 = vpop.f32.mrb[0].mxu0 }
 0x195   : > { %v10615_v22 = vpop.f32.mrb[1].mxu1  ;;  %v1057_v23 = vmul.f32 %v10613_v19, %v10613_v19  ;;  %v10619_v24 = vpop.f32.mrb[1].mxu0 }
 0x196   : > { %v10621_v27 = vpop.f32.mrb[2].mxu1  ;;  %v1058_v28 = vmul.f32 %v10619_v24, %v10619_v24  ;;  %v10625_v29 = vpop.f32.mrb[2].mxu0 }
 0x197   : > { %v10627_v30 = vpop.f32.mrb[3].mxu1  ;;  %v947_v31 = vadd.f32 %v10625_v29, %v10613_v19  ;;  %v1062_v32 = vmul.f32 %v10625_v29, %v10625_v29  ;;  %v10633_v33 = vpop.f32.mrb[3].mxu0 }
 0x198   : > { %v968_v34 = vadd.f32 %v10633_v33, %v10619_v24  ;;  %v1063_v35 = vmul.f32 %v10633_v33, %v10633_v33 }
 0x199   : > { %v1137_v38 = vadd.f32 %v1062_v32, %v1057_v23 }
 0x19a   : > { %v1158_v41 = vadd.f32 %v1063_v35, %v1058_v28 }
 0x19c   : > { %v10639_v42 = vpop.f32.mrb[4].mxu1  ;;  %v10641_v43 = vpop.f32.mrb[4].mxu0 }
 0x19d   : > { %v10643_v46 = vpop.f32.mrb[5].mxu1  ;;  %v948_v47 = vadd.f32 %v947_v31, %v10641_v43  ;;  %v1067_v48 = vmul.f32 %v10641_v43, %v10641_v43  ;;  %v10648_v49 = vpop.f32.mrb[5].mxu0 }
 0x19e   : > { %v10650_v52 = vpop.f32.mrb[6].mxu1  ;;  %v969_v53 = vadd.f32 %v968_v34, %v10648_v49  ;;  %v1068_v54 = vmul.f32 %v10648_v49, %v10648_v49  ;;  %v10655_v55 = vpop.f32.mrb[6].mxu0 }
 0x19f   : > { %v10657_v56 = vpop.f32.mrb[7].mxu1  ;;  %v1138_v57 = vadd.f32 %v1137_v38, %v1067_v48  ;;  %v949_v58 = vadd.f32 %v948_v47, %v10655_v55  ;;  %v1072_v59 = vmul.f32 %v10655_v55, %v10655_v55  ;;  %v10662_v60 = vpop.f32.mrb[7].mxu0  ;;  %v9349_v38 = vld [vmem:[#allocation7 + $0x1ac] ss:$16 sps:$4 sm:$0xff]   ;;  %v9352_v48 = vld [vmem:[#allocation7 + $0x1c4] ss:$16 sps:$4 sm:$0xff]   ;;  %v1112_v40 = vmul.f32 %v10650_v52, %v10650_v52 }
 0x1a0   : > { %v1159_v61 = vadd.f32 %v1158_v41, %v1068_v54  ;;  %v970_v62 = vadd.f32 %v969_v53, %v10662_v60  ;;  %v1073_v63 = vmul.f32 %v10662_v60, %v10662_v60  ;;  %3204 = vmatprep.subr.bf16.mxu0 %v9349_v38  ;;  %2867 = vmatprep.subr.bf16.mxu1 %v9352_v48 }
 0x1a1   : > { %v1139_v3 = vadd.f32 %v1138_v57, %v1072_v59  ;;  %3205 = vmatpush1.bf16.msra.mxu0 %v9347_v44  ;;  %v1113_v48 = vmul.f32 %v10657_v56, %v10657_v56 }
 0x1a2   : > { %v1160_v6 = vadd.f32 %v1159_v61, %v1073_v63  ;;  %3206 = vmatprep.subr.bf16.mxu0 %v9355_v50 }
 0x1a4   : > { %v10667_v7 = vpop.f32.mrb[8].mxu1  ;;  %v10669_v8 = vpop.f32.mrb[8].mxu0 }
 0x1a5   : > { %14209 = vst [vmem:[#allocation16_spill] sm:$0xff] %v10667_v7  ;;  %v10671_v11 = vpop.f32.mrb[9].mxu1  ;;  %v950_v12 = vadd.f32 %v949_v58, %v10669_v8  ;;  %v1077_v13 = vmul.f32 %v10669_v8, %v10669_v8  ;;  %v10676_v14 = vpop.f32.mrb[9].mxu0  ;;  %v9350_v58 = vld [vmem:[#allocation7 + $0x1c0] ss:$16 sps:$4 sm:$0xff]   ;;  %3207 = vmatpush1.bf16.msra.mxu0 %v9353_v1  ;;  %v1117_v50 = vmul.f32 %v10667_v7, %v10667_v7 }
 0x1a6   : > { %v10678_v17 = vpop.f32.mrb[10].mxu1  ;;  %v971_v20 = vadd.f32 %v970_v62, %v10676_v14  ;;  %v1078_v21 = vmul.f32 %v10676_v14, %v10676_v14  ;;  %v10683_v23 = vpop.f32.mrb[10].mxu0  ;;  %2868 = vmatpush1.bf16.msra.mxu1 %v9350_v58 }
 0x1a7   : > { %14210 = vst [vmem:[#allocation17_spill] sm:$0xff] %v10678_v17  ;;  %v10685_v25 = vpop.f32.mrb[11].mxu1  ;;  %v1140_v26 = vadd.f32 %v1139_v3, %v1077_v13  ;;  %v951_v28 = vadd.f32 %v950_v12, %v10683_v23  ;;  %v1082_v31 = vmul.f32 %v10683_v23, %v10683_v23  ;;  %v10690_v32 = vpop.f32.mrb[11].mxu0  ;;  %v1097_v12 = vmul.f32 %v10611_v18, %v10611_v18 }
 0x1a8   : > { %v1161_v34 = vadd.f32 %v1160_v6, %v1078_v21  ;;  %v972_v35 = vadd.f32 %v971_v20, %v10690_v32  ;;  %v1083_v36 = vmul.f32 %v10690_v32, %v10690_v32  ;;  %v9359_v20 = vld [vmem:[#allocation7 + $0x1e8] ss:$16 sps:$4 sm:$0xff]   ;;  %v9361_v21 = vld [vmem:[#allocation7 + $0x1ec] ss:$16 sps:$4 sm:$0xff]   ;;  %2869 = vmatprep.subr.bf16.mxu1 %v9358_v10 }
 0x1a9   : > { %v1141_v39 = vadd.f32 %v1140_v26, %v1082_v31  ;;  %v1098_v26 = vmul.f32 %v10615_v22, %v10615_v22  ;;  %3208 = vmatprep.subr.bf16.mxu0 %v9361_v21 }
 0x1aa   : > { %v1162_v41 = vadd.f32 %v1161_v34, %v1083_v36  ;;  %v1107_v36 = vmul.f32 %v10639_v42, %v10639_v42  ;;  %2870 = vmatpush1.bf16.msra.mxu1 %v9356_v9  ;;  %3209 = vmatpush1.bf16.msra.mxu0 %v9359_v20 }
 0x1ac   : > { %v10695_v45 = vpop.f32.mrb[12].mxu0  ;;  %v10697_v47 = vpop.f32.mrb[12].mxu1 }
 0x1ad   : > { %14211 = vst [vmem:[#allocation18_spill] sm:$0xff] %v10697_v47  ;;  %v952_v51 = vadd.f32 %v951_v28, %v10695_v45  ;;  %v1087_v53 = vmul.f32 %v10695_v45, %v10695_v45  ;;  %v10702_v54 = vpop.f32.mrb[13].mxu0  ;;  %v10704_v57 = vpop.f32.mrb[13].mxu1  ;;  %v1102_v28 = vmul.f32 %v10621_v27, %v10621_v27 }
 0x1ae   : > { %14212 = vst [vmem:[#allocation19_spill] sm:$0xff] %v10704_v57  ;;  %v973_v59 = vadd.f32 %v972_v35, %v10702_v54  ;;  %v1088_v61 = vmul.f32 %v10702_v54, %v10702_v54  ;;  %v10709_v62 = vpop.f32.mrb[14].mxu0  ;;  %v10711_v63 = vpop.f32.mrb[14].mxu1  ;;  %v1103_v35 = vmul.f32 %v10627_v30, %v10627_v30 }
 0x1af   : > { %14213 = vst [vmem:[#allocation20_spill] sm:$0xff] %v10711_v63  ;;  %v1142_v2 = vadd.f32 %v1141_v39, %v1087_v53  ;;  %v953_v3 = vadd.f32 %v952_v51, %v10709_v62  ;;  %v1092_v4 = vmul.f32 %v10709_v62, %v10709_v62  ;;  %v10716_v5 = vpop.f32.mrb[15].mxu0  ;;  %v10718_v6 = vpop.f32.mrb[15].mxu1  ;;  %v1108_v39 = vmul.f32 %v10643_v46, %v10643_v46 }
 0x1b0   : > { %14214 = vst [vmem:[#allocation21_spill] sm:$0xff] %v10718_v6  ;;  %v1163_v13 = vadd.f32 %v1162_v41, %v1088_v61  ;;  %v974_v15 = vadd.f32 %v973_v59, %v10716_v5  ;;  %v1093_v16 = vmul.f32 %v10716_v5, %v10716_v5  ;;  %v1118_v59 = vmul.f32 %v10671_v11, %v10671_v11 }
 0x1b1   : > { %v954_v31 = vadd.f32 %v953_v3, %v10611_v18  ;;  %v1143_v34 = vadd.f32 %v1142_v2, %v1092_v4  ;;  %v1122_v61 = vmul.f32 %v10678_v17, %v10678_v17  ;;  %v9364_v4 = vld [vmem:[#allocation7 + $0x204] ss:$16 sps:$4 sm:$0xff]  }
 0x1b2   : > { %v975_v37 = vadd.f32 %v974_v15, %v10615_v22  ;;  %v1164_v38 = vadd.f32 %v1163_v13, %v1093_v16  ;;  %v9367_v16 = vld [vmem:[#allocation7 + $0x20c] ss:$16 sps:$4 sm:$0xff]   ;;  %2952 = vmatprep.subr.bf16.mxu1 %v9364_v4 }
 0x1b3   : > { %v955_v41 = vadd.f32 %v954_v31, %v10621_v27  ;;  %v1144_v44 = vadd.f32 %v1143_v34, %v1097_v12  ;;  %3291 = vmatprep.subr.bf16.mxu0 %v9367_v16  ;;  %v1132_v16 = vmul.f32 %v10711_v63, %v10711_v63 }
 0x1b4   : > { %v976_v51 = vadd.f32 %v975_v37, %v10627_v30  ;;  %v1165_v53 = vadd.f32 %v1164_v38, %v1098_v26  ;;  %v10745_v58 = vpop.f32.mrb[16].mxu1  ;;  %v1123_v38 = vmul.f32 %v10685_v25, %v10685_v25 }
 0x1b5   : > { %14215 = vst [vmem:[#allocation22_spill] sm:$0xff] %v10745_v58  ;;  %v956_v1 = vadd.f32 %v955_v41, %v10639_v42  ;;  %v1145_v2 = vadd.f32 %v1144_v44, %v1102_v28  ;;  %v10752_v3 = vpop.f32.mrb[17].mxu1  ;;  %v1059_v12 = vmul.f32 %v10745_v58, %v10745_v58 }
 0x1b6   : > { %14216 = vst [vmem:[#allocation23_spill] sm:$0xff] %v10752_v3  ;;  %v977_v9 = vadd.f32 %v976_v51, %v10643_v46  ;;  %v1166_v10 = vadd.f32 %v1165_v53, %v1103_v35  ;;  %v1060_v13 = vmul.f32 %v10752_v3, %v10752_v3  ;;  %v10759_v15 = vpop.f32.mrb[18].mxu1  ;;  %v1127_v53 = vmul.f32 %v10697_v47, %v10697_v47 }
 0x1b7   : > { %14217 = vst [vmem:[#allocation24_spill] sm:$0xff] %v10759_v15  ;;  %v1146_v20 = vadd.f32 %v1145_v2, %v1107_v36  ;;  %v957_v21 = vadd.f32 %v956_v1, %v10650_v52  ;;  %v989_v26 = vadd.f32 %v10759_v15, %v10745_v58  ;;  %v1064_v28 = vmul.f32 %v10759_v15, %v10759_v15  ;;  %v10766_v31 = vpop.f32.mrb[19].mxu1 }
 0x1b8   : > { %14218 = vst [vmem:[#allocation25_spill] sm:$0xff] %v10766_v31  ;;  %v1167_v34 = vadd.f32 %v1166_v10, %v1108_v39  ;;  %v978_v35 = vadd.f32 %v977_v9, %v10657_v56  ;;  %v1010_v37 = vadd.f32 %v10766_v31, %v10752_v3  ;;  %v1065_v36 = vmul.f32 %v10766_v31, %v10766_v31 }
 0x1b9   : > { %v958_v41 = vadd.f32 %v957_v21, %v10667_v7  ;;  %v1147_v44 = vadd.f32 %v1146_v20, %v1112_v40  ;;  %v1179_v51 = vadd.f32 %v1064_v28, %v1059_v12  ;;  %v1128_v9 = vmul.f32 %v10704_v57, %v10704_v57 }
 0x1ba   : > { %v979_v39 = vadd.f32 %v978_v35, %v10671_v11  ;;  %v1168_v1 = vadd.f32 %v1167_v34, %v1113_v48  ;;  %v1200_v2 = vadd.f32 %v1065_v36, %v1060_v13  ;;  %v10779_v4 = vpop.f32.mrb[16].mxu0  ;;  %v1133_v20 = vmul.f32 %v10718_v6, %v10718_v6 }
 0x1bb   : > { %14219 = vst [vmem:[#allocation26_spill] sm:$0xff] %v10779_v4  ;;  %v959_v10 = vadd.f32 %v958_v41, %v10678_v17  ;;  %v1148_v21 = vadd.f32 %v1147_v44, %v1117_v50  ;;  %v10786_v40 = vpop.f32.mrb[17].mxu0  ;;  %v10795_v28 = vmul.f32 %v10779_v4, %v10779_v4 }
 0x1bc   : > { %14220 = vst [vmem:[#allocation27_spill] sm:$0xff] %v10786_v40  ;;  %v980_v12 = vadd.f32 %v979_v39, %v10685_v25  ;;  %v1169_v48 = vadd.f32 %v1168_v1, %v1118_v59  ;;  %v10791_v13 = vpop.f32.mrb[20].mxu1  ;;  %v10797_v34 = vpop.f32.mrb[18].mxu0 }
 0x1bd   : > { %14221 = vst [vmem:[#allocation28_spill] sm:$0xff] %v10791_v13  ;;  %14222 = vst [vmem:[#allocation29_spill] sm:$0xff] %v10797_v34  ;;  %v960_v35 = vadd.f32 %v959_v10, %v10697_v47  ;;  %v1149_v36 = vadd.f32 %v1148_v21, %v1122_v61  ;;  %v990_v50 = vadd.f32 %v989_v26, %v10791_v13  ;;  %v10803_v44 = vpop.f32.mrb[21].mxu1  ;;  %v10805_v39 = vpop.f32.mrb[19].mxu0 }
 0x1be   : > { %v1069_v41 = vmul.f32 %v10791_v13, %v10791_v13  ;;  %14223 = vst [vmem:[#allocation30_spill] sm:$0xff] %v10803_v44  ;;  %14224 = vst [vmem:[#allocation31_spill] sm:$0xff] %v10805_v39  ;;  %v981_v59 = vadd.f32 %v980_v12, %v10704_v57  ;;  %v1170_v1 = vadd.f32 %v1169_v48, %v1123_v38  ;;  %v10811_v58 = vpop.f32.mrb[22].mxu1 }
 0x1bf   : > { %v1011_v0 = vadd.f32 %v1010_v37, %v10803_v44  ;;  %v1070_v15 = vmul.f32 %v10803_v44, %v10803_v44  ;;  %14225 = vst [vmem:[#allocation32_spill] sm:$0xff] %v10811_v58  ;;  %v961_v61 = vadd.f32 %v960_v35, %v10711_v63  ;;  %v1150_v26 = vadd.f32 %v1149_v36, %v1127_v53  ;;  %v10815_v13 = vpop.f32.mrb[23].mxu1 }
 0x1c0   : > { %v1180_v10 = vadd.f32 %v1179_v51, %v1069_v41  ;;  %v991_v21 = vadd.f32 %v990_v50, %v10811_v58  ;;  %14226 = vst [vmem:[#allocation33_spill] sm:$0xff] %v10815_v13  ;;  %v982_v31 = vadd.f32 %v981_v59, %v10718_v6  ;;  %v1171_v3 = vadd.f32 %v1170_v1, %v1128_v9 }
 0x1c1   : > { %v1201_v12 = vadd.f32 %v1200_v2, %v1070_v15  ;;  %v1074_v37 = vmul.f32 %v10811_v58, %v10811_v58  ;;  %v962_v38 = vrot.slane %v961_v61, 4  ;;  %v1151_v48 = vadd.f32 %v1150_v26, %v1132_v16 }
 0x1c2   : > { %v1012_v44 = vadd.f32 %v1011_v0, %v10815_v13  ;;  %v1075_v35 = vmul.f32 %v10815_v13, %v10815_v13  ;;  %v983_v53 = vrot.slane %v982_v31, 4  ;;  %v1172_v51 = vadd.f32 %v1171_v3, %v1133_v20  ;;  %v10825_v41 = vpop.f32.mrb[20].mxu0 }
 0x1c3   : > { %v1181_v36 = vadd.f32 %v1180_v10, %v1074_v37  ;;  %v1061_v50 = vmul.f32 %v10786_v40, %v10786_v40  ;;  %14227 = vst [vmem:[#allocation34_spill] sm:$0xff] %v10825_v41  ;;  %v963_v9 = vadd.f32 %v962_v38, %v961_v61  ;;  %v1152_v15 = vrot.slane %v1151_v48, 4  ;;  %v10829_v16 = vpop.f32.mrb[21].mxu0 }
 0x1c4   : > { %v1202_v2 = vadd.f32 %v1201_v12, %v1075_v35  ;;  %v1031_v59 = vadd.f32 %v10805_v39, %v10786_v40  ;;  %14228 = vst [vmem:[#allocation35_spill] sm:$0xff] %v10829_v16  ;;  %v984_v0 = vadd.f32 %v983_v53, %v982_v31  ;;  %v1173_v1 = vrot.slane %v1172_v51, 4  ;;  %v10831_v26 = vpop.f32.mrb[24].mxu1  ;;  %v10839_v10 = vpop.f32.mrb[22].mxu0 }
 0x1c5   : > { %14229 = vst [vmem:[#allocation36_spill] sm:$0xff] %v10831_v26  ;;  %v10835_v3 = vmul.f32 %v10797_v34, %v10797_v34  ;;  %v1066_v20 = vmul.f32 %v10805_v39, %v10805_v39  ;;  %14230 = vst [vmem:[#allocation37_spill] sm:$0xff] %v10839_v10  ;;  %v964_v61 = vrot.slane %v963_v9, 2  ;;  %v1153_v12 = vadd.f32 %v1152_v15, %v1151_v48  ;;  %v10844_v31 = vpop.f32.mrb[25].mxu1  ;;  %v10846_v35 = vpop.f32.mrb[23].mxu0 }
 0x1c6   : > { %v992_v37 = vadd.f32 %v991_v21, %v10831_v26  ;;  %v1079_v38 = vmul.f32 %v10831_v26, %v10831_v26  ;;  %14231 = vst [vmem:[#allocation38_spill] sm:$0xff] %v10844_v31  ;;  %14232 = vst [vmem:[#allocation39_spill] sm:$0xff] %v10846_v35  ;;  %v985_v53 = vrot.slane %v984_v0, 2  ;;  %v1174_v40 = vadd.f32 %v1173_v1, %v1172_v51  ;;  %v10851_v13 = vpop.f32.mrb[26].mxu1 }
 0x1c7   : > { %v1013_v58 = vadd.f32 %v1012_v44, %v10844_v31  ;;  %v1080_v39 = vmul.f32 %v10844_v31, %v10844_v31  ;;  %14233 = vst [vmem:[#allocation40_spill] sm:$0xff] %v10851_v13  ;;  %v965_v63 = vadd.f32 %v964_v61, %v963_v9  ;;  %v1154_v48 = vrot.slane %v1153_v12, 2  ;;  %v10854_v47 = vpop.f32.mrb[27].mxu1 }
 0x1c8   : > { %v1182_v15 = vadd.f32 %v1181_v36, %v1079_v38  ;;  %v993_v21 = vadd.f32 %v992_v37, %v10851_v13  ;;  %14234 = vst [vmem:[#allocation41_spill] sm:$0xff] %v10854_v47  ;;  %v986_v26 = vadd.f32 %v985_v53, %v984_v0  ;;  %v1175_v6 = vrot.slane %v1174_v40, 2 }
 0x1c9   : > { %v1203_v57 = vadd.f32 %v1202_v2, %v1080_v39  ;;  %v1084_v51 = vmul.f32 %v10851_v13, %v10851_v13  ;;  %v966_v1 = vrot.slane %v965_v63, 1  ;;  %v1155_v44 = vadd.f32 %v1154_v48, %v1153_v12 }
 0x1ca   : > { %v1014_v17 = vadd.f32 %v1013_v58, %v10854_v47  ;;  %v1085_v31 = vmul.f32 %v10854_v47, %v10854_v47  ;;  %v987_v9 = vrot.slane %v986_v26, 1  ;;  %v1176_v61 = vadd.f32 %v1175_v6, %v1174_v40  ;;  %v10862_v38 = vpop.f32.mrb[24].mxu0 }
 0x1cb   : > { %v1183_v36 = vadd.f32 %v1182_v15, %v1084_v51  ;;  %v1032_v37 = vadd.f32 %v10779_v4, %v1031_v59  ;;  %14235 = vst [vmem:[#allocation42_spill] sm:$0xff] %v10862_v38  ;;  %v967_v0 = vadd.f32 %v966_v1, %v965_v63  ;;  %v1156_v53 = vrot.slane %v1155_v44, 1  ;;  %v10864_v7 = vpop.f32.mrb[25].mxu0 }
 0x1cc   : > { %v1204_v39 = vadd.f32 %v1203_v57, %v1085_v31  ;;  %v1221_v2 = vadd.f32 %v1066_v20, %v1061_v50  ;;  %14236 = vst [vmem:[#allocation43_spill] sm:$0xff] %v10864_v7  ;;  %v988_v13 = vadd.f32 %v987_v9, %v986_v26  ;;  %v1177_v12 = vrot.slane %v1176_v61, 1  ;;  %v10866_v48 = vpop.f32.mrb[28].mxu1  ;;  %v10871_v40 = vpop.f32.mrb[26].mxu0 }
 0x1cd   : > { %14237 = vst [vmem:[#allocation44_spill] sm:$0xff] %v10866_v48  ;;  %v1033_v58 = vadd.f32 %v10797_v34, %v1032_v37  ;;  %v1081_v6 = vmul.f32 %v10829_v16, %v10829_v16  ;;  %14238 = vst [vmem:[#allocation45_spill] sm:$0xff] %v10871_v40  ;;  %v10873_v59 = vmul.f32 0.0078125, %v967_v0  ;;  %v1157_v15 = vadd.f32 %v1156_v53, %v1155_v44  ;;  %v10878_v50 = vpop.f32.mrb[29].mxu1  ;;  %v10880_v26 = vpop.f32.mrb[27].mxu0 }
 0x1ce   : > { %v994_v63 = vadd.f32 %v993_v21, %v10866_v48  ;;  %v1089_v57 = vmul.f32 %v10866_v48, %v10866_v48  ;;  %14239 = vst [vmem:[#allocation46_spill] sm:$0xff] %v10878_v50  ;;  %14240 = vst [vmem:[#allocation47_spill] sm:$0xff] %v10880_v26  ;;  %v10882_v20 = vmul.f32 0.0078125, %v988_v13  ;;  %v1178_v31 = vadd.f32 %v1177_v12, %v1176_v61  ;;  %v10887_v9 = vpop.f32.mrb[30].mxu1 }
 0x1cf   : > { %v1015_v51 = vadd.f32 %v1014_v17, %v10878_v50  ;;  %v1090_v1 = vmul.f32 %v10878_v50, %v10878_v50  ;;  %14241 = vst [vmem:[#allocation48_spill] sm:$0xff] %v10887_v9  ;;  %v1242_v44 = vmul.f32 0.0078125, %v1157_v15  ;;  %v1247_v21 = vmul.f32 %v10873_v59, %v10873_v59  ;;  %v10892_v53 = vpop.f32.mrb[31].mxu1 }
 0x1d0   : > { %v1184_v37 = vadd.f32 %v1183_v36, %v1089_v57  ;;  %v995_v0 = vadd.f32 %v994_v63, %v10887_v9  ;;  %v1243_v34 = vmul.f32 0.0078125, %v1178_v31  ;;  %v1248_v13 = vmul.f32 %v10882_v20, %v10882_v20 }
 0x1d1   : > { %v1205_v61 = vadd.f32 %v1204_v39, %v1090_v1  ;;  %v1094_v17 = vmul.f32 %v10887_v9, %v10887_v9  ;;  %v1252_v12 = vsub.f32 %v1242_v44, %v1247_v21  ;;  %v1016_v4 = vadd.f32 %v1015_v51, %v10892_v53 }
 0x1d2   : > { %v1095_v15 = vmul.f32 %v10892_v53, %v10892_v53  ;;  %v1222_v36 = vadd.f32 %v1221_v2, %v10795_v28  ;;  %v1253_v57 = vsub.f32 %v1243_v34, %v1248_v13  ;;  %v1034_v48 = vadd.f32 %v1033_v58, %v10829_v16  ;;  %v10903_v31 = vpop.f32.mrb[28].mxu0 }
 0x1d3   : > { %v1185_v63 = vadd.f32 %v1184_v37, %v1094_v17  ;;  %14242 = vst [vmem:[#allocation49_spill] sm:$0xff] %v10903_v31  ;;  %v1257_v50 = vmax.f32 %v1252_v12, 0.0  ;;  %v10906_v1 = vpop.f32.mrb[29].mxu0  ;;  %v1091_v51 = vmul.f32 %v10825_v41, %v10825_v41  ;;  %v1086_v34 = vmul.f32 %v10846_v35, %v10846_v35 }
 0x1d4   : > { %v1206_v47 = vadd.f32 %v1205_v61, %v1095_v15  ;;  %v1223_v39 = vadd.f32 %v1222_v36, %v10835_v3  ;;  %14243 = vst [vmem:[#allocation50_spill] sm:$0xff] %v10906_v1  ;;  %v1258_v44 = vmax.f32 %v1253_v57, 0.0  ;;  %v10908_v21 = vpop.f32.mrb[32].mxu1  ;;  %v1035_v28 = vadd.f32 %v1034_v48, %v10846_v35  ;;  %v10915_v2 = vpop.f32.mrb[30].mxu0 }
 0x1d5   : > { %14244 = vst [vmem:[#allocation51_spill] sm:$0xff] %v10908_v21  ;;  %14245 = vst [vmem:[#allocation52_spill] sm:$0xff] %v10915_v2  ;;  %v1262_v58 = vadd.f32 1e-05, %v1257_v50  ;;  %v996_v37 = vadd.f32 %v995_v0, %v10908_v21  ;;  %v1099_v3 = vmul.f32 %v10908_v21, %v10908_v21  ;;  %v10920_v13 = vpop.f32.mrb[33].mxu1  ;;  %v10922_v17 = vpop.f32.mrb[31].mxu0 }
 0x1d6   : > { %14246 = vst [vmem:[#allocation53_spill] sm:$0xff] %v10920_v13  ;;  %v1224_v61 = vadd.f32 %v1223_v39, %v1081_v6  ;;  %v1263_v12 = vadd.f32 1e-05, %v1258_v44  ;;  %v1017_v15 = vadd.f32 %v1016_v4, %v10920_v13  ;;  %v1100_v48 = vmul.f32 %v10920_v13, %v10920_v13  ;;  %v10927_v36 = vpop.f32.mrb[34].mxu1 }
 0x1d7   : > { %14247 = vst [vmem:[#allocation54_spill] sm:$0xff] %v10927_v36  ;;  %v1036_v50 = vadd.f32 %v10825_v41, %v1035_v28  ;;  %9826 = vrsqrt.f32 %v1262_v58  ;;  %v1186_v0 = vadd.f32 %v1185_v63, %v1099_v3  ;;  %v997_v57 = vadd.f32 %v996_v37, %v10927_v36  ;;  %v10933_v6 = vpop.f32.mrb[35].mxu1 }
 0x1d8   : > { %v1104_v35 = vmul.f32 %v10927_v36, %v10927_v36  ;;  %14248 = vst [vmem:[#allocation55_spill] sm:$0xff] %v10933_v6  ;;  %9828 = vrsqrt.f32 %v1263_v12  ;;  %v1207_v39 = vadd.f32 %v1206_v47, %v1100_v48  ;;  %v1018_v4 = vadd.f32 %v1017_v15, %v10933_v6 }
 0x1d9   : > { %v1105_v44 = vmul.f32 %v10933_v6, %v10933_v6  ;;  %v1096_v28 = vmul.f32 %v10839_v10, %v10839_v10  ;;  %v1225_v58 = vadd.f32 %v1224_v61, %v1086_v34  ;;  %v1037_v63 = vadd.f32 %v10839_v10, %v1036_v50 }
 0x1da   : > { %v1187_v16 = vadd.f32 %v1186_v0, %v1104_v35  ;;  %v1101_v12 = vmul.f32 %v10864_v7, %v10864_v7  ;;  %v1106_v15 = vmul.f32 %v10880_v26, %v10880_v26 }
 0x1db   : > { %v1208_v37 = vadd.f32 %v1207_v39, %v1105_v44  ;;  %v1226_v3 = vadd.f32 %v1225_v58, %v1091_v51  ;;  %v1038_v41 = vadd.f32 %v1037_v63, %v10864_v7  ;;  %v1111_v44 = vmul.f32 %v10862_v38, %v10862_v38 }
 0x1dc   : > { %v10944_v47 = vpop.f32.mrb[36].mxu1 }
 0x1dd   : > { %14249 = vst [vmem:[#allocation56_spill] sm:$0xff] %v10944_v47  ;;  %v998_v35 = vadd.f32 %v997_v57, %v10944_v47  ;;  %v1109_v48 = vmul.f32 %v10944_v47, %v10944_v47  ;;  %v10951_v34 = vpop.f32.mrb[37].mxu1  ;;  %v1227_v61 = vadd.f32 %v1226_v3, %v1096_v28  ;;  %v1039_v51 = vadd.f32 %v1038_v41, %v10880_v26 }
 0x1de   : > { %14250 = vst [vmem:[#allocation57_spill] sm:$0xff] %v10951_v34  ;;  %v1019_v50 = vadd.f32 %v1018_v4, %v10951_v34  ;;  %v1110_v0 = vmul.f32 %v10951_v34, %v10951_v34  ;;  %v10957_v39 = vpop.f32.mrb[38].mxu1 }
 0x1df   : > { %14251 = vst [vmem:[#allocation58_spill] sm:$0xff] %v10957_v39  ;;  %v1188_v58 = vadd.f32 %v1187_v16, %v1109_v48  ;;  %v999_v57 = vadd.f32 %v998_v35, %v10957_v39  ;;  %v1114_v63 = vmul.f32 %v10957_v39, %v10957_v39  ;;  %v10964_v7 = vpop.f32.mrb[39].mxu1  ;;  %v1228_v28 = vadd.f32 %v1227_v61, %v1101_v12 }
 0x1e0   : > { %14252 = vst [vmem:[#allocation59_spill] sm:$0xff] %v10964_v7  ;;  %v1209_v41 = vadd.f32 %v1208_v37, %v1110_v0  ;;  %v1020_v4 = vadd.f32 %v1019_v50, %v10964_v7  ;;  %v1115_v3 = vmul.f32 %v10964_v7, %v10964_v7  ;;  %v1040_v26 = vadd.f32 %v10862_v38, %v1039_v51 }
 0x1e1   : > { %v10970_v10 = vpop.eup %9826  ;;  %v1189_v47 = vadd.f32 %v1188_v58, %v1114_v63  ;;  %v1116_v16 = vmul.f32 %v10871_v40, %v10871_v40  ;;  %v1229_v35 = vadd.f32 %v1228_v28, %v1106_v15  ;;  %v1121_v50 = vmul.f32 %v10906_v1, %v10906_v1 }
 0x1e2   : > { %v10974_v48 = vpop.eup %9828  ;;  %v1210_v39 = vadd.f32 %v1209_v41, %v1115_v3  ;;  %v1041_v12 = vadd.f32 %v10871_v40, %v1040_v26  ;;  %v1126_v26 = vmul.f32 %v10922_v17, %v10922_v17 }
 0x1e3   : > { %v1230_v61 = vadd.f32 %v1229_v35, %v1111_v44  ;;  %v1131_v35 = vmul.f32 %v10903_v31, %v10903_v31 }
 0x1e4   : > { %v10981_v51 = vpop.f32.mrb[40].mxu1  ;;  %v1042_v0 = vadd.f32 %v1041_v12, %v10906_v1 }
 0x1e5   : > { %14253 = vst [vmem:[#allocation60_spill] sm:$0xff] %v10981_v51  ;;  %v1000_v58 = vadd.f32 %v999_v57, %v10981_v51  ;;  %v1119_v15 = vmul.f32 %v10981_v51, %v10981_v51  ;;  %v10987_v63 = vpop.f32.mrb[41].mxu1  ;;  %v1231_v28 = vadd.f32 %v1230_v61, %v1116_v16 }
 0x1e6   : > { %14254 = vst [vmem:[#allocation61_spill] sm:$0xff] %v10987_v63  ;;  %v1021_v44 = vadd.f32 %v1020_v4, %v10987_v63  ;;  %v1120_v41 = vmul.f32 %v10987_v63, %v10987_v63  ;;  %v10994_v3 = vpop.f32.mrb[42].mxu1  ;;  %v1043_v57 = vadd.f32 %v1042_v0, %v10922_v17 }
 0x1e7   : > { %14255 = vst [vmem:[#allocation62_spill] sm:$0xff] %v10994_v3  ;;  %v1190_v12 = vadd.f32 %v1189_v47, %v1119_v15  ;;  %v1001_v37 = vadd.f32 %v1000_v58, %v10994_v3  ;;  %v1124_v16 = vmul.f32 %v10994_v3, %v10994_v3  ;;  %v11002_v61 = vpop.f32.mrb[43].mxu1  ;;  %v1232_v1 = vadd.f32 %v1231_v28, %v1121_v50 }
 0x1e8   : > { %14256 = vst [vmem:[#allocation63_spill] sm:$0xff] %v11002_v61  ;;  %v1211_v4 = vadd.f32 %v1210_v39, %v1120_v41  ;;  %v1022_v40 = vadd.f32 %v1021_v44, %v11002_v61  ;;  %v1125_v38 = vmul.f32 %v11002_v61, %v11002_v61  ;;  %v1044_v51 = vadd.f32 %v10903_v31, %v1043_v57 }
 0x1e9   : > { %v1191_v63 = vadd.f32 %v1190_v12, %v1124_v16  ;;  %v1136_v47 = vmul.f32 %v10915_v2, %v10915_v2  ;;  %v1233_v0 = vadd.f32 %v1232_v1, %v1126_v26 }
 0x1ea   : > { %v1212_v58 = vadd.f32 %v1211_v4, %v1125_v38  ;;  %v1045_v15 = vadd.f32 %v10915_v2, %v1044_v51 }
 0x1eb   : > { %v1234_v3 = vadd.f32 %v1233_v0, %v1131_v35 }
 0x1ec   : > { %v11011_v7 = vpop.f32.mrb[44].mxu1  ;;  %v1046_v50 = vrot.slane %v1045_v15, 4 }
 0x1ed   : > { %14257 = vst [vmem:[#allocation64_spill] sm:$0xff] %v11011_v7  ;;  %v1002_v39 = vadd.f32 %v1001_v37, %v11011_v7  ;;  %v1129_v28 = vmul.f32 %v11011_v7, %v11011_v7  ;;  %v11016_v44 = vpop.f32.mrb[45].mxu1  ;;  %v1235_v41 = vadd.f32 %v1234_v3, %v1136_v47 }
 0x1ee   : > { %14258 = vst [vmem:[#allocation65_spill] sm:$0xff] %v11016_v44  ;;  %v1023_v57 = vadd.f32 %v1022_v40, %v11016_v44  ;;  %v1130_v1 = vmul.f32 %v11016_v44, %v11016_v44  ;;  %v11021_v38 = vpop.f32.mrb[46].mxu1  ;;  %v1047_v51 = vadd.f32 %v1046_v50, %v1045_v15 }
 0x1ef   : > { %14259 = vst [vmem:[#allocation66_spill] sm:$0xff] %v11021_v38  ;;  %v1192_v26 = vadd.f32 %v1191_v63, %v1129_v28  ;;  %v1003_v35 = vadd.f32 %v1002_v39, %v11021_v38  ;;  %v1134_v37 = vmul.f32 %v11021_v38, %v11021_v38  ;;  %v11026_v12 = vpop.f32.mrb[47].mxu1  ;;  %v1236_v16 = vrot.slane %v1235_v41, 4 }
 0x1f0   : > { %v1213_v4 = vadd.f32 %v1212_v58, %v1130_v1  ;;  %v1024_v3 = vadd.f32 %v1023_v57, %v11026_v12  ;;  %v1135_v40 = vmul.f32 %v11026_v12, %v11026_v12  ;;  %v1048_v47 = vrot.slane %v1047_v51, 2 }
 0x1f1   : > { %v1004_v0 = vrot.slane %v1003_v35, 4  ;;  %v1193_v2 = vadd.f32 %v1192_v26, %v1134_v37  ;;  %v1237_v31 = vadd.f32 %v1236_v16, %v1235_v41 }
 0x1f2   : > { %v1025_v15 = vrot.slane %v1024_v3, 4  ;;  %v1214_v63 = vadd.f32 %v1213_v4, %v1135_v40  ;;  %v1049_v50 = vadd.f32 %v1048_v47, %v1047_v51 }
 0x1f3   : > { %v1005_v39 = vadd.f32 %v1004_v0, %v1003_v35  ;;  %v1194_v28 = vrot.slane %v1193_v2, 4  ;;  %v1238_v7 = vrot.slane %v1237_v31, 2 }
 0x1f4   : > { %v1026_v38 = vadd.f32 %v1025_v15, %v1024_v3  ;;  %v1215_v44 = vrot.slane %v1214_v63, 4  ;;  %v1050_v61 = vrot.slane %v1049_v50, 1 }
 0x1f5   : > { %v1006_v34 = vrot.slane %v1005_v39, 2  ;;  %v1195_v58 = vadd.f32 %v1194_v28, %v1193_v2  ;;  %v1239_v1 = vadd.f32 %v1238_v7, %v1237_v31 }
 0x1f6   : > { %v1027_v57 = vrot.slane %v1026_v38, 2  ;;  %v1216_v36 = vadd.f32 %v1215_v44, %v1214_v63  ;;  %v1051_v21 = vadd.f32 %v1050_v61, %v1049_v50 }
 0x1f7   : > { %v1007_v6 = vadd.f32 %v1006_v34, %v1005_v39  ;;  %v1196_v13 = vrot.slane %v1195_v58, 2  ;;  %v1240_v9 = vrot.slane %v1239_v1, 1 }
 0x1f8   : > { %v1028_v26 = vadd.f32 %v1027_v57, %v1026_v38  ;;  %v1217_v41 = vrot.slane %v1216_v36, 2  ;;  %v1056_v37 = vmul.f32 0.0078125, %v1051_v21 }
 0x1f9   : > { %v1008_v16 = vrot.slane %v1007_v6, 1  ;;  %v1197_v51 = vadd.f32 %v1196_v13, %v1195_v58  ;;  %v1241_v35 = vadd.f32 %v1240_v9, %v1239_v1  ;;  %v10315_v1 = vmov 1983009808  }
 0x1fa   : > { %v1029_v4 = vrot.slane %v1028_v26, 1  ;;  %v1218_v40 = vadd.f32 %v1217_v41, %v1216_v36  ;;  %v1251_v3 = vmul.f32 %v1056_v37, %v1056_v37  ;;  %v1280_v57 = vunpack.c.l.s4 %v10315_v1 }
 0x1fb   : > { %v1009_v47 = vadd.f32 %v1008_v16, %v1007_v6  ;;  %v1198_v0 = vrot.slane %v1197_v51, 1  ;;  %v1246_v15 = vmul.f32 0.0078125, %v1241_v35 }
 0x1fc   : > { %v1030_v2 = vadd.f32 %v1029_v4, %v1028_v26  ;;  %v1219_v7 = vrot.slane %v1218_v40, 1  ;;  %v1282_v26 = vlaneseq }
 0x1fd   : > { %v1054_v31 = vmul.f32 0.0078125, %v1009_v47  ;;  %v1199_v44 = vadd.f32 %v1198_v0, %v1197_v51  ;;  %v1256_v61 = vsub.f32 %v1246_v15, %v1251_v3  ;;  %v1281_v51 = vunpack.c.0.s8 %v1280_v57  ;;  %v301_v3 = vld [vmem:[#allocation10 + $0x8] sm:$0xff] }
 0x1fe   : > { %v1055_v34 = vmul.f32 0.0078125, %v1030_v2  ;;  %v1220_v63 = vadd.f32 %v1219_v7, %v1218_v40  ;;  %v1283_v35 = vshrl.u32 %v1282_v26, 7 }
 0x1ff   : > { %v1244_v50 = vmul.f32 0.0078125, %v1199_v44  ;;  %v1249_v38 = vmul.f32 %v1054_v31, %v1054_v31  ;;  %v1261_v39 = vmax.f32 %v1256_v61, 0.0 }
 0x200   : > { %v1245_v21 = vmul.f32 0.0078125, %v1220_v63  ;;  %v1250_v28 = vmul.f32 %v1055_v34, %v1055_v34  ;;  %v11031_v4 = vsub.s32 %v1281_v51, %v1283_v35  ;;  %v11034_v0 = vsub.s32 0, %v1283_v35 }
 0x201   : > { %v1254_v13 = vsub.f32 %v1244_v50, %v1249_v38  ;;  %v1266_v9 = vadd.f32 1e-05, %v1261_v39  ;;  %v14262_v38 = vcombine.low %v10970_v10, %v10974_v48  ;;  %v11054_v26 = vsub.s32 1, %v1283_v35 }
 0x202   : > { %v1255_v58 = vsub.f32 %v1245_v21, %v1250_v28  ;;  %14260 = vst [vmem:[#allocation67_spill] sm:$0xff] %v11031_v4  ;;  %14261 = vst [vmem:[#allocation68_spill] sm:$0xff] %v11034_v0  ;;  %v300_v28 = vld [vmem:[#allocation10] sm:$0xff]  ;;  %v11060_v51 = vsub.s32 3, %v1283_v35 }
 0x203   : > { %v1259_v36 = vmax.f32 %v1254_v13, 0.0  ;;  %9830 = vrsqrt.f32 %v1266_v9  ;;  %v1285_v39 = vrot.slane %v14262_v38, %v11031_v4  ;;  %14266 = vst [vmem:[#allocation72_spill] sm:$0xff] %v11054_v26  ;;  %v11072_v38 = vsub.s32 7, %v1283_v35 }
 0x204   : > { %v1260_v6 = vmax.f32 %v1255_v58, 0.0  ;;  %14267 = vst [vmem:[#allocation73_spill] sm:$0xff] %v11060_v51 }
 0x205   : > { %v1264_v41 = vadd.f32 1e-05, %v1259_v36  ;;  %v11048_v36 = vsub.s32 2, %v1283_v35  ;;  %14269 = vst [vmem:[#allocation75_spill] sm:$0xff] %v11072_v38 }
 0x206   : > { %v1265_v16 = vadd.f32 1e-05, %v1260_v6  ;;  %v11052_v6 = vsub.s32 6, %v1283_v35 }
 0x207   : > { %9832 = vrsqrt.f32 %v1264_v41  ;;  %14263 = vst [vmem:[#allocation69_spill] sm:$0xff] %v11048_v36 }
 0x208   : > { %9834 = vrsqrt.f32 %v1265_v16  ;;  %14265 = vst [vmem:[#allocation71_spill] sm:$0xff] %v11052_v6 }
 0x20d   : > { %v9831_v40 = vpop.eup %9830 }
 0x20e   : > { %v1300_v47 = vrot.slane %v9831_v40, %v11031_v4  ;;  %v11062_v40 = vsub.s32 5, %v1283_v35 }
 0x210   : > { %v1304_v15 = vmul.f32 %v1300_v47, %v301_v3  ;;  %14268 = vst [vmem:[#allocation74_spill] sm:$0xff] %v11062_v40 }
 0x211   : > { %v9833_v2 = vpop.eup %9832 }
 0x212   : > { %v9835_v7 = vpop.eup %9834  ;;  %v1326_v44 = vrot.slane %v1304_v15, %v11034_v0 }
 0x213   : > { %v1278_v61 = vcombine.low %v9833_v2, %v9835_v7 }
 0x214   : > { %v1336_v63 = vmul.f32 %v1326_v44, %v1056_v37  ;;  %v11038_v50 = vrot.slane %v1326_v44, %v11034_v0  ;;  %v11050_v37 = vsub.s32 4, %v1283_v35 }
 0x215   : > { %v1292_v21 = vrot.slane %v1278_v61, %v11031_v4 }
 0x216   : > { %v1365_v13 = vrot.slane %v1336_v63, %v11031_v4  ;;  %v1461_v9 = vmul.f32 %v11038_v50, %v10922_v17  ;;  %14264 = vst [vmem:[#allocation70_spill] sm:$0xff] %v11050_v37 }
 0x217   : > { %v1293_v58 = vcombine.low %v1285_v39, %v1292_v21 }
 0x218   : > { %v1367_v1 = vrot.slane %v1365_v13, 7 }
 0x219   : > { %v1303_v57 = vmul.f32 %v1293_v58, %v300_v28 }
 0x21a   : > { %v1371_v10 = vsub.f32 %v301_v3, %v1367_v1 }
 0x21b   : > { %v1310_v48 = vrot.slane %v1303_v57, %v11034_v0  ;;  %v1314_v41 = vrot.slane %v1303_v57, %v11048_v36  ;;  %v1318_v16 = vrot.slane %v1303_v57, %v11050_v37  ;;  %v1322_v17 = vrot.slane %v1303_v57, %v11052_v6  ;;  %v9362_v6 = vld [vmem:[#allocation7 + $0x200] ss:$16 sps:$4 sm:$0xff]   ;;  %v9365_v37 = vld [vmem:[#allocation7 + $0x208] ss:$16 sps:$4 sm:$0xff]   ;;  %v9370_v36 = vld [vmem:[#allocation7 + $0x224] ss:$16 sps:$4 sm:$0xff]  }
 0x21c   : > { %v1493_v47 = vrot.slane %v1371_v10, %v11054_v26 }
 0x21d   : > { %v1332_v15 = vmul.f32 %v1310_v48, %v10873_v59  ;;  %v1333_v2 = vmul.f32 %v1314_v41, %v10882_v20  ;;  %v1334_v7 = vmul.f32 %v1318_v16, %v1054_v31  ;;  %v1335_v3 = vmul.f32 %v1322_v17, %v1055_v34 }
 0x21e   : > { %v1375_v44 = vrot.slane %v1310_v48, %v11034_v0  ;;  %v1379_v61 = vrot.slane %v1314_v41, %v11034_v0  ;;  %v11070_v63 = vrot.slane %v1322_v17, %v11034_v0  ;;  %v11075_v13 = vrot.slane %v1318_v16, %v11034_v0 }
 0x21f   : > { %v1342_v39 = vcombine.low %v1332_v15, %v1333_v2  ;;  %v1343_v21 = vcombine.low %v1334_v7, %v1335_v3  ;;  %v11078_v59 = vrot.slane %v1493_v47, %v11054_v26  ;;  %v14274_v7 = vld [vmem:[#allocation21_spill] sm:$0xff]  ;;  %v14275_v3 = vld [vmem:[#allocation18_spill] sm:$0xff] }
 0x220   : > { %v1470_v20 = vmul.f32 %v11070_v63, %v11026_v12  ;;  %v1393_v31 = vmul.f32 %v1379_v61, %v10619_v24  ;;  %v1398_v34 = vmul.f32 %v1379_v61, %v10633_v33  ;;  %v1392_v58 = vmul.f32 %v1375_v44, %v10613_v19 }
 0x221   : > { %v1350_v35 = vrot.slane %v1342_v39, %v11031_v4  ;;  %v1357_v1 = vrot.slane %v1343_v21, %v11031_v4  ;;  %v11088_v57 = vadd.f32 %v11078_v59, %v1461_v9  ;;  %v1397_v10 = vmul.f32 %v1375_v44, %v10625_v29  ;;  %v14276_v21 = vld [vmem:[#allocation20_spill] sm:$0xff]  ;;  %v9373_v4 = vld [vmem:[#allocation7 + $0x22c] ss:$16 sps:$4 sm:$0xff]  }
 0x222   : > { %v1403_v48 = vmul.f32 %v1379_v61, %v10648_v49  ;;  %v1408_v41 = vmul.f32 %v1379_v61, %v10662_v60  ;;  %v1402_v12 = vmul.f32 %v1375_v44, %v10641_v43  ;;  %v11095_v24 = vmul.f32 %v1375_v44, %v10655_v55 }
 0x223   : > { %14270 = vst [vmem:[#allocation76_spill] sm:$0xff] %v11088_v57  ;;  %v1358_v33 = vcombine.low %v1350_v35, %v1357_v1  ;;  %v11098_v19 = vmul.f32 %v1379_v61, %v10676_v14  ;;  %v11101_v16 = vmul.f32 %v1379_v61, %v10690_v32  ;;  %v11104_v9 = vmul.f32 %v1375_v44, %v10669_v8  ;;  %v14277_v1 = vld [vmem:[#allocation23_spill] sm:$0xff] }
 0x224   : > { %v11107_v29 = vmul.f32 %v1375_v44, %v10683_v23  ;;  %v11110_v49 = vmul.f32 %v1379_v61, %v10702_v54  ;;  %v11113_v43 = vmul.f32 %v1379_v61, %v10716_v5  ;;  %v11116_v55 = vmul.f32 %v1375_v44, %v10695_v45 }
 0x225   : > { %v1366_v60 = vrot.slane %v1358_v33, 7  ;;  %v11119_v14 = vmul.f32 %v1375_v44, %v10709_v62  ;;  %v11122_v32 = vmul.f32 %v1379_v61, %v10615_v22  ;;  %v11125_v8 = vmul.f32 %v1379_v61, %v10627_v30 }
 0x226   : > { %v11128_v23 = vmul.f32 %v1375_v44, %v10611_v18  ;;  %v11131_v54 = vmul.f32 %v1375_v44, %v10621_v27  ;;  %v11134_v5 = vmul.f32 %v1379_v61, %v10643_v46  ;;  %v11137_v45 = vmul.f32 %v1379_v61, %v10657_v56  ;;  %v14271_v27 = vld [vmem:[#allocation16_spill] sm:$0xff]  ;;  %v14272_v46 = vld [vmem:[#allocation17_spill] sm:$0xff]  ;;  %v14273_v56 = vld [vmem:[#allocation19_spill] sm:$0xff] }
 0x227   : > { %v1370_v62 = vsub.f32 %v300_v28, %v1366_v60  ;;  %v11140_v17 = vmul.f32 %v1375_v44, %v10639_v42  ;;  %v11143_v22 = vmul.f32 %v1375_v44, %v10650_v52  ;;  %v11146_v30 = vmul.f32 %v1379_v61, %v10671_v11 }
 0x228   : > { %v11149_v18 = vmul.f32 %v1379_v61, %v10685_v25  ;;  %v11152_v47 = vmul.f32 %v1375_v44, %v14271_v27  ;;  %v11155_v15 = vmul.f32 %v1375_v44, %v14272_v46  ;;  %v11158_v28 = vmul.f32 %v1379_v61, %v14273_v56  ;;  %v14278_v46 = vld [vmem:[#allocation25_spill] sm:$0xff]  ;;  %v14279_v56 = vld [vmem:[#allocation22_spill] sm:$0xff] }
 0x229   : > { %v1477_v42 = vrot.slane %v1370_v62, %v11054_v26  ;;  %v1481_v52 = vrot.slane %v1370_v62, %v11060_v51  ;;  %v1485_v2 = vrot.slane %v1370_v62, %v11062_v40  ;;  %v1489_v11 = vrot.slane %v1370_v62, %v11072_v38 }
 0x22a   : > { %v11165_v25 = vmul.f32 %v1379_v61, %v14274_v7  ;;  %v11168_v39 = vmul.f32 %v1375_v44, %v14275_v3  ;;  %v11171_v35 = vmul.f32 %v1375_v44, %v14276_v21  ;;  %v11175_v33 = vmul.f32 %v11070_v63, %v14277_v1  ;;  %v14280_v3 = vld [vmem:[#allocation24_spill] sm:$0xff] }
 0x22b   : > { %v11178_v60 = vrot.slane %v1477_v42, %v11054_v26  ;;  %v11181_v27 = vrot.slane %v1481_v52, %v11054_v26  ;;  %v11184_v62 = vrot.slane %v1485_v2, %v11054_v26  ;;  %v11187_v61 = vrot.slane %v1489_v11, %v11054_v26  ;;  %v14281_v52 = vld [vmem:[#allocation30_spill] sm:$0xff] }
 0x22c   : > { %v11191_v44 = vmul.f32 %v11070_v63, %v14278_v46  ;;  %v11195_v7 = vmul.f32 %v11075_v13, %v14279_v56  ;;  %v11199_v42 = vmul.f32 %v11075_v13, %v14280_v3  ;;  %v11203_v21 = vmul.f32 %v11070_v63, %v14281_v52 }
 0x22d   : > { %v11206_v2 = vadd.f32 %v11187_v61, %v1470_v20  ;;  %v1520_v11 = vadd.f32 %v11181_v27, %v1393_v31  ;;  %v1525_v1 = vadd.f32 %v11181_v27, %v1398_v34  ;;  %v1519_v46 = vadd.f32 %v11178_v60, %v1392_v58 }
 0x22e   : > { %v1524_v56 = vadd.f32 %v11178_v60, %v1397_v10  ;;  %v1530_v40 = vadd.f32 %v11181_v27, %v1403_v48  ;;  %v1535_v3 = vadd.f32 %v11181_v27, %v1408_v41  ;;  %v1529_v38 = vadd.f32 %v11178_v60, %v1402_v12 }
 0x22f   : > { %vm1600_vm0 = vcmp.ge.f32.partialorder %v1520_v11, 0.0  ;;  %vm1605_vm1 = vcmp.ge.f32.partialorder %v1525_v1, 0.0  ;;  %v1680_v52 = vmul.f32 0.2, %v1520_v11  ;;  %v1685_v51 = vmul.f32 0.2, %v1525_v1 }
 0x230   : > { %vm1599_vm2 = vcmp.ge.f32.partialorder %v1519_v46, 0.0  ;;  %vm1604_vm3 = vcmp.ge.f32.partialorder %v1524_v56, 0.0  ;;  %v1679_v20 = vmul.f32 0.2, %v1519_v46  ;;  %v1684_v31 = vmul.f32 0.2, %v1524_v56 }
 0x231   : > { %v1760_v26 = vsel %vm1600_vm0, %v1520_v11, %v1680_v52  ;;  %v1765_v34 = vsel %vm1605_vm1, %v1525_v1, %v1685_v51  ;;  %vm1610_vm4 = vcmp.ge.f32.partialorder %v1530_v40, 0.0  ;;  %vm1615_vm5 = vcmp.ge.f32.partialorder %v1535_v3, 0.0 }
 0x232   : > { %v1840_v58 = vpack.c.bf16 %v1765_v34, %v1760_v26  ;;  %v1759_v10 = vsel %vm1599_vm2, %v1519_v46, %v1679_v20  ;;  %v1764_v48 = vsel %vm1604_vm3, %v1524_v56, %v1684_v31  ;;  %v1690_v41 = vmul.f32 0.2, %v1530_v40  ;;  %v9368_v56 = vld [vmem:[#allocation7 + $0x220] ss:$16 sps:$4 sm:$0xff]   ;;  %v9379_v34 = vld [vmem:[#allocation7 + $0x24c] ss:$16 sps:$4 sm:$0xff]  }
 0x233   : > { %v1839_v12 = vpack.c.bf16 %v1764_v48, %v1759_v10  ;;  %v1695_v0 = vmul.f32 0.2, %v1535_v3  ;;  %v1534_v57 = vadd.f32 %v11178_v60, %v11095_v24  ;;  %vm1609_vm6 = vcmp.ge.f32.partialorder %v1529_v38, 0.0 }
 0x234   : > { %2871 = vmatprep.mubr.bf16.mxu1 %v1840_v58  ;;  %3210 = vmatprep.mubr.bf16.mxu0 %v1840_v58  ;;  %v1770_v11 = vsel %vm1610_vm4, %v1530_v40, %v1690_v41  ;;  %v1689_v51 = vmul.f32 0.2, %v1529_v38  ;;  %v1540_v1 = vadd.f32 %v11181_v27, %v11098_v19  ;;  %v1545_v26 = vadd.f32 %v11181_v27, %v11101_v16  ;;  %v9371_v40 = vld [vmem:[#allocation7 + $0x228] ss:$16 sps:$4 sm:$0xff]   ;;  %v9376_v19 = vld [vmem:[#allocation7 + $0x244] ss:$16 sps:$4 sm:$0xff]  }
 0x235   : > { %2872 = vmatmul.mubr.bf16.vlgmr.msra.gmra.mrb[48].mxu1 %v1839_v12  ;;  %3211 = vmatmul.mubr.bf16.vlgmr.msra.gmra.mrb[32].mxu0 %v1839_v12  ;;  %v1775_v46 = vsel %vm1615_vm5, %v1535_v3, %v1695_v0  ;;  %vm1614_vm7 = vcmp.ge.f32.partialorder %v1534_v57, 0.0  ;;  %v1694_v52 = vmul.f32 0.2, %v1534_v57  ;;  %v1539_v24 = vadd.f32 %v11178_v60, %v11104_v9  ;;  %v9377_v41 = vld [vmem:[#allocation7 + $0x248] ss:$16 sps:$4 sm:$0xff]  }
 0x236   : > { %v1845_v20 = vpack.c.bf16 %v1775_v46, %v1770_v11  ;;  %2953 = vmatpush1.bf16.msra.mxu1 %v9362_v6  ;;  %3292 = vmatpush1.bf16.msra.mxu0 %v9365_v37  ;;  %v1769_v31 = vsel %vm1609_vm6, %v1529_v38, %v1689_v51  ;;  %vm1620_vm8 = vcmp.ge.f32.partialorder %v1540_v1, 0.0  ;;  %vm1625_vm9 = vcmp.ge.f32.partialorder %v1545_v26, 0.0  ;;  %v9382_v12 = vld [vmem:[#allocation7 + $0x264] ss:$16 sps:$4 sm:$0xff]  }
 0x237   : > { %2954 = vmatprep.subr.bf16.mxu1 %v9370_v36  ;;  %3293 = vmatprep.subr.bf16.mxu0 %v9373_v4  ;;  %v1774_v16 = vsel %vm1614_vm7, %v1534_v57, %v1694_v52  ;;  %v1700_v0 = vmul.f32 0.2, %v1540_v1  ;;  %v1705_v3 = vmul.f32 0.2, %v1545_v26  ;;  %v1544_v58 = vadd.f32 %v11178_v60, %v11107_v29  ;;  %v9374_v4 = vld [vmem:[#allocation7 + $0x240] ss:$16 sps:$4 sm:$0xff]  }
 0x238   : > { %2881 = vmatprep.mubr.bf16.mxu1 %v1845_v20  ;;  %3220 = vmatprep.mubr.bf16.mxu0 %v1845_v20  ;;  %v1844_v9 = vpack.c.bf16 %v1774_v16, %v1769_v31  ;;  %vm1619_vm10 = vcmp.ge.f32.partialorder %v1539_v24, 0.0  ;;  %v1699_v37 = vmul.f32 0.2, %v1539_v24  ;;  %v1550_v6 = vadd.f32 %v11181_v27, %v11110_v49  ;;  %v9383_v31 = vld [vmem:[#allocation7 + $0x268] ss:$16 sps:$4 sm:$0xff]  }
 0x239   : > { %v1780_v38 = vsel %vm1620_vm8, %v1540_v1, %v1700_v0  ;;  %v1785_v10 = vsel %vm1625_vm9, %v1545_v26, %v1705_v3  ;;  %vm1624_vm11 = vcmp.ge.f32.partialorder %v1544_v58, 0.0  ;;  %v1704_v36 = vmul.f32 0.2, %v1544_v58  ;;  %v9385_v26 = vld [vmem:[#allocation7 + $0x26c] ss:$16 sps:$4 sm:$0xff]  }
 0x23a   : > { %2955 = vmatpush1.bf16.msra.mxu1 %v9368_v56  ;;  %3294 = vmatpush1.bf16.msra.mxu0 %v9371_v40  ;;  %v1850_v57 = vpack.c.bf16 %v1785_v10, %v1780_v38  ;;  %v1779_v48 = vsel %vm1619_vm10, %v1539_v24, %v1699_v37  ;;  %v1555_v29 = vadd.f32 %v11181_v27, %v11113_v43  ;;  %vm1630_vm12 = vcmp.ge.f32.partialorder %v1550_v6, 0.0  ;;  %v9391_v3 = vld [vmem:[#allocation7 + $0x28c] ss:$16 sps:$4 sm:$0xff]   ;;  %v9386_v10 = vld [vmem:[#allocation7 + $0x280] ss:$16 sps:$4 sm:$0xff]  }
 0x23b   : > { %2956 = vmatprep.subr.bf16.mxu1 %v9376_v19  ;;  %3295 = vmatprep.subr.bf16.mxu0 %v9379_v34  ;;  %v1784_v11 = vsel %vm1624_vm11, %v1544_v58, %v1704_v36  ;;  %v1710_v51 = vmul.f32 0.2, %v1550_v6  ;;  %v1549_v49 = vadd.f32 %v11178_v60, %v11116_v55  ;;  %v1554_v1 = vadd.f32 %v11178_v60, %v11119_v14  ;;  %v9380_v55 = vld [vmem:[#allocation7 + $0x260] ss:$16 sps:$4 sm:$0xff]  }
 0x23c   : > { %v1849_v46 = vpack.c.bf16 %v1784_v11, %v1779_v48  ;;  %vm1635_vm13 = vcmp.ge.f32.partialorder %v1555_v29, 0.0  ;;  %v1715_v56 = vmul.f32 0.2, %v1555_v29  ;;  %v1560_v43 = vadd.f32 %v11181_v27, %v11122_v32  ;;  %v9388_v32 = vld [vmem:[#allocation7 + $0x284] ss:$16 sps:$4 sm:$0xff]  }
 0x23d   : > { %2882 = vmatmul.mubr.bf16.gmra.mrb[52].mxu1 %v1844_v9  ;;  %3221 = vmatmul.mubr.bf16.gmra.mrb[36].mxu0 %v1844_v9  ;;  %v1790_v52 = vsel %vm1630_vm12, %v1550_v6, %v1710_v51  ;;  %vm1629_vm14 = vcmp.ge.f32.partialorder %v1549_v49, 0.0  ;;  %vm1634_vm15 = vcmp.ge.f32.partialorder %v1554_v1, 0.0  ;;  %v1709_v24 = vmul.f32 0.2, %v1549_v49  ;;  %v9394_v48 = vld [vmem:[#allocation7 + $0x2a4] ss:$16 sps:$4 sm:$0xff]  }
 0x23e   : > { %2891 = vmatprep.mubr.bf16.mxu1 %v1850_v57  ;;  %2957 = vmatpush1.bf16.msra.mxu1 %v9374_v4  ;;  %v1795_v20 = vsel %vm1635_vm13, %v1555_v29, %v1715_v56  ;;  %v1714_v40 = vmul.f32 0.2, %v1554_v1  ;;  %v1565_v14 = vadd.f32 %v11181_v27, %v11125_v8  ;;  %vm1640_vm0 = vcmp.ge.f32.partialorder %v1560_v43, 0.0 }
 0x23f   : > { %3230 = vmatprep.mubr.bf16.mxu0 %v1850_v57  ;;  %3296 = vmatpush1.bf16.msra.mxu0 %v9377_v41  ;;  %v1855_v19 = vpack.c.bf16 %v1795_v20, %v1790_v52  ;;  %v1789_v16 = vsel %vm1629_vm14, %v1549_v49, %v1709_v24  ;;  %v1720_v34 = vmul.f32 0.2, %v1560_v43  ;;  %v1559_v0 = vadd.f32 %v11178_v60, %v11128_v23  ;;  %v9389_v57 = vld [vmem:[#allocation7 + $0x288] ss:$16 sps:$4 sm:$0xff]  }
 0x240   : > { %2958 = vmatprep.subr.bf16.mxu1 %v9382_v12  ;;  %3297 = vmatprep.subr.bf16.mxu0 %v9385_v26  ;;  %v1794_v58 = vsel %vm1634_vm15, %v1554_v1, %v1714_v40  ;;  %vm1645_vm1 = vcmp.ge.f32.partialorder %v1565_v14, 0.0  ;;  %v1725_v9 = vmul.f32 0.2, %v1565_v14  ;;  %v1564_v8 = vadd.f32 %v11178_v60, %v11131_v54  ;;  %v9397_v12 = vld [vmem:[#allocation7 + $0x2ac] ss:$16 sps:$4 sm:$0xff]  }
 0x241   : > { %v11245_v37 = vpack.c.bf16 %v1794_v58, %v1789_v16  ;;  %v1800_v6 = vsel %vm1640_vm0, %v1560_v43, %v1720_v34  ;;  %vm1639_vm2 = vcmp.ge.f32.partialorder %v1559_v0, 0.0  ;;  %v1719_v38 = vmul.f32 0.2, %v1559_v0  ;;  %v9398_v16 = vld [vmem:[#allocation7 + $0x2c0] ss:$16 sps:$4 sm:$0xff]  }
 0x242   : > { %2959 = vmatpush1.bf16.msra.mxu1 %v9380_v55  ;;  %v1805_v36 = vsel %vm1645_vm1, %v1565_v14, %v1725_v9  ;;  %vm1644_vm3 = vcmp.ge.f32.partialorder %v1564_v8, 0.0  ;;  %v1724_v23 = vmul.f32 0.2, %v1564_v8  ;;  %v1570_v4 = vadd.f32 %v11181_v27, %v11134_v5  ;;  %v9392_v5 = vld [vmem:[#allocation7 + $0x2a0] ss:$16 sps:$4 sm:$0xff]  }
 0x243   : > { %3298 = vmatpush1.bf16.msra.mxu0 %v9383_v31  ;;  %2960 = vmatprep.subr.bf16.mxu1 %v9388_v32  ;;  %v11250_v29 = vpack.c.bf16 %v1805_v36, %v1800_v6  ;;  %v1799_v54 = vsel %vm1639_vm2, %v1559_v0, %v1719_v38  ;;  %v1575_v41 = vadd.f32 %v11181_v27, %v11137_v45  ;;  %v9395_v45 = vld [vmem:[#allocation7 + $0x2a8] ss:$16 sps:$4 sm:$0xff]   ;;  %v9406_v9 = vld [vmem:[#allocation7 + $0x2e4] ss:$16 sps:$4 sm:$0xff]   ;;  %v9409_v38 = vld [vmem:[#allocation7 + $0x2ec] ss:$16 sps:$4 sm:$0xff]  }
 0x244   : > { %3299 = vmatprep.subr.bf16.mxu0 %v9391_v3  ;;  %v1804_v11 = vsel %vm1644_vm3, %v1564_v8, %v1724_v23  ;;  %vm1650_vm4 = vcmp.ge.f32.partialorder %v1570_v4, 0.0  ;;  %v1730_v51 = vmul.f32 0.2, %v1570_v4  ;;  %v1569_v49 = vadd.f32 %v11178_v60, %v11140_v17  ;;  %v9400_v17 = vld [vmem:[#allocation7 + $0x2c4] ss:$16 sps:$4 sm:$0xff]  }
 0x245   : > { %2892 = vmatmul.mubr.bf16.gmra.mrb[56].mxu1 %v1849_v46  ;;  %3231 = vmatmul.mubr.bf16.gmra.mrb[40].mxu0 %v1849_v46  ;;  %v11256_v1 = vpack.c.bf16 %v1804_v11, %v1799_v54  ;;  %vm1655_vm5 = vcmp.ge.f32.partialorder %v1575_v41, 0.0  ;;  %v1735_v26 = vmul.f32 0.2, %v1575_v41  ;;  %v1574_v56 = vadd.f32 %v11178_v60, %v11143_v22  ;;  %v9403_v22 = vld [vmem:[#allocation7 + $0x2cc] ss:$16 sps:$4 sm:$0xff]  }
 0x246   : > { %2901 = vmatprep.mubr.bf16.mxu1 %v1855_v19  ;;  %2961 = vmatpush1.bf16.msra.mxu1 %v9386_v10  ;;  %v1810_v43 = vsel %vm1650_vm4, %v1570_v4, %v1730_v51  ;;  %vm1649_vm6 = vcmp.ge.f32.partialorder %v1569_v49, 0.0  ;;  %v1729_v52 = vmul.f32 0.2, %v1569_v49  ;;  %v1580_v24 = vadd.f32 %v11181_v27, %v11146_v30  ;;  %v9401_v34 = vld [vmem:[#allocation7 + $0x2c8] ss:$16 sps:$4 sm:$0xff]  }
 0x247   : > { %3240 = vmatprep.mubr.bf16.mxu0 %v1855_v19  ;;  %3300 = vmatpush1.bf16.msra.mxu0 %v9389_v57  ;;  %v1815_v46 = vsel %vm1655_vm5, %v1575_v41, %v1735_v26  ;;  %vm1654_vm7 = vcmp.ge.f32.partialorder %v1574_v56, 0.0  ;;  %v1734_v55 = vmul.f32 0.2, %v1574_v56  ;;  %v1585_v20 = vadd.f32 %v11181_v27, %v11149_v18  ;;  %v9404_v4 = vld [vmem:[#allocation7 + $0x2e0] ss:$16 sps:$4 sm:$0xff]  }
 0x248   : > { %2962 = vmatprep.subr.bf16.mxu1 %v9394_v48  ;;  %3301 = vmatprep.subr.bf16.mxu0 %v9397_v12  ;;  %v11264_v40 = vpack.c.bf16 %v1815_v46, %v1810_v43  ;;  %v1809_v14 = vsel %vm1649_vm6, %v1569_v49, %v1729_v52  ;;  %vm1660_vm8 = vcmp.ge.f32.partialorder %v1580_v24, 0.0  ;;  %v1740_v31 = vmul.f32 0.2, %v1580_v24  ;;  %v9407_v48 = vld [vmem:[#allocation7 + $0x2e8] ss:$16 sps:$4 sm:$0xff]  }
 0x249   : > { %v1814_v32 = vsel %vm1654_vm7, %v1574_v56, %v1734_v55  ;;  %vm1665_vm9 = vcmp.ge.f32.partialorder %v1585_v20, 0.0  ;;  %v1745_v30 = vmul.f32 0.2, %v1585_v20  ;;  %v1579_v19 = vadd.f32 %v11178_v60, %v11152_v47  ;;  %v9415_v11 = vld [vmem:[#allocation7 + $0x30c] ss:$16 sps:$4 sm:$0xff]  }
 0x24a   : > { %2963 = vmatpush1.bf16.msra.mxu1 %v9392_v5  ;;  %v11268_v0 = vpack.c.bf16 %v1814_v32, %v1809_v14  ;;  %v1820_v18 = vsel %vm1660_vm8, %v1580_v24, %v1740_v31  ;;  %v1584_v3 = vadd.f32 %v11178_v60, %v11155_v15  ;;  %v1590_v58 = vadd.f32 %v11181_v27, %v11158_v28  ;;  %v9410_v5 = vld [vmem:[#allocation7 + $0x300] ss:$16 sps:$4 sm:$0xff]   ;;  %v9413_v26 = vld [vmem:[#allocation7 + $0x308] ss:$16 sps:$4 sm:$0xff]  }
 0x24b   : > { %3302 = vmatpush1.bf16.msra.mxu0 %v9395_v45  ;;  %2964 = vmatprep.subr.bf16.mxu1 %v9400_v17  ;;  %v1825_v8 = vsel %vm1665_vm9, %v1585_v20, %v1745_v30  ;;  %vm1659_vm10 = vcmp.ge.f32.partialorder %v1579_v19, 0.0  ;;  %v1739_v6 = vmul.f32 0.2, %v1579_v19  ;;  %v1595_v47 = vadd.f32 %v11181_v27, %v11165_v25  ;;  %v14282_v43 = vld [vmem:[#allocation33_spill] sm:$0xff]  ;;  %v9416_v14 = vld [vmem:[#allocation7 + $0x320] ss:$16 sps:$4 sm:$0xff]  }
 0x24c   : > { %3303 = vmatprep.subr.bf16.mxu0 %v9403_v22  ;;  %v11276_v10 = vpack.c.bf16 %v1825_v8, %v1820_v18  ;;  %vm1664_vm11 = vcmp.ge.f32.partialorder %v1584_v3, 0.0  ;;  %v1744_v36 = vmul.f32 0.2, %v1584_v3  ;;  %vm1670_vm12 = vcmp.ge.f32.partialorder %v1590_v58, 0.0  ;;  %v9421_v17 = vld [vmem:[#allocation7 + $0x32c] ss:$16 sps:$4 sm:$0xff]  }
 0x24d   : > { %2902 = vmatmul.mubr.bf16.gmra.mrb[60].mxu1 %v11245_v37  ;;  %3241 = vmatmul.mubr.bf16.gmra.mrb[44].mxu0 %v11245_v37  ;;  %v1819_v15 = vsel %vm1659_vm10, %v1579_v19, %v1739_v6  ;;  %vm1675_vm13 = vcmp.ge.f32.partialorder %v1595_v47, 0.0  ;;  %v1750_v28 = vmul.f32 0.2, %v1590_v58  ;;  %v1755_v23 = vmul.f32 0.2, %v1595_v47  ;;  %v14283_v30 = vld [vmem:[#allocation28_spill] sm:$0xff] }
 0x24e   : > { %2911 = vmatprep.mubr.bf16.mxu1 %v11250_v29  ;;  %2965 = vmatpush1.bf16.msra.mxu1 %v9398_v16  ;;  %v1824_v25 = vsel %vm1664_vm11, %v1584_v3, %v1744_v36  ;;  %v1589_v27 = vadd.f32 %v11178_v60, %v11168_v39  ;;  %v1594_v57 = vadd.f32 %v11178_v60, %v11171_v35  ;;  %v9412_v37 = vld [vmem:[#allocation7 + $0x304] ss:$16 sps:$4 sm:$0xff]  }
 0x24f   : > { %3250 = vmatprep.mubr.bf16.mxu0 %v11250_v29  ;;  %3304 = vmatpush1.bf16.msra.mxu0 %v9401_v34  ;;  %v11286_v54 = vpack.c.bf16 %v1824_v25, %v1819_v15  ;;  %v1830_v41 = vsel %vm1670_vm12, %v1590_v58, %v1750_v28  ;;  %v1835_v12 = vsel %vm1675_vm13, %v1595_v47, %v1755_v23  ;;  %v9424_v16 = vld [vmem:[#allocation7 + $0x344] ss:$16 sps:$4 sm:$0xff]   ;;  %v9427_v58 = vld [vmem:[#allocation7 + $0x34c] ss:$16 sps:$4 sm:$0xff]  }
 0x250   : > { %2966 = vmatprep.subr.bf16.mxu1 %v9406_v9  ;;  %3305 = vmatprep.subr.bf16.mxu0 %v9409_v38  ;;  %v11289_v51 = vpack.c.bf16 %v1835_v12, %v1830_v41  ;;  %vm1669_vm14 = vcmp.ge.f32.partialorder %v1589_v27, 0.0  ;;  %vm1674_vm15 = vcmp.ge.f32.partialorder %v1594_v57, 0.0  ;;  %v1749_v39 = vmul.f32 0.2, %v1589_v27  ;;  %v14284_v47 = vld [vmem:[#allocation32_spill] sm:$0xff]  ;;  %v14285_v36 = vld [vmem:[#allocation38_spill] sm:$0xff] }
 0x251   : > { %v1754_v49 = vmul.f32 0.2, %v1594_v57  ;;  %v1522_v35 = vadd.f32 %v11187_v61, %v11175_v33  ;;  %v1527_v60 = vadd.f32 %v11187_v61, %v11191_v44  ;;  %v1521_v29 = vadd.f32 %v11184_v62, %v11195_v7  ;;  %v9418_v33 = vld [vmem:[#allocation7 + $0x324] ss:$16 sps:$4 sm:$0xff]   ;;  %v14286_v28 = vld [vmem:[#allocation41_spill] sm:$0xff] }
 0x252   : > { %2967 = vmatpush1.bf16.msra.mxu1 %v9404_v4  ;;  %v1829_v56 = vsel %vm1669_vm14, %v1589_v27, %v1749_v39  ;;  %v1526_v45 = vadd.f32 %v11184_v62, %v11199_v42  ;;  %v1410_v52 = vmul.f32 %v11070_v63, %v14282_v43  ;;  %v1532_v24 = vadd.f32 %v11187_v61, %v11203_v21  ;;  %v14287_v4 = vld [vmem:[#allocation36_spill] sm:$0xff] }
 0x253   : > { %3306 = vmatpush1.bf16.msra.mxu0 %v9407_v48  ;;  %2968 = vmatprep.subr.bf16.mxu1 %v9412_v37  ;;  %v1834_v44 = vsel %vm1674_vm15, %v1594_v57, %v1754_v49  ;;  %vm1602_vm0 = vcmp.ge.f32.partialorder %v1522_v35, 0.0  ;;  %vm1607_vm1 = vcmp.ge.f32.partialorder %v1527_v60, 0.0  ;;  %v1682_v7 = vmul.f32 0.2, %v1522_v35  ;;  %v9422_v27 = vld [vmem:[#allocation7 + $0x340] ss:$16 sps:$4 sm:$0xff]  }
 0x254   : > { %3307 = vmatprep.subr.bf16.mxu0 %v9415_v11  ;;  %v11304_v46 = vpack.c.bf16 %v1834_v44, %v1829_v56  ;;  %v1687_v55 = vmul.f32 0.2, %v1527_v60  ;;  %vm1601_vm2 = vcmp.ge.f32.partialorder %v1521_v29, 0.0  ;;  %vm1606_vm3 = vcmp.ge.f32.partialorder %v1526_v45, 0.0  ;;  %v9425_v57 = vld [vmem:[#allocation7 + $0x348] ss:$16 sps:$4 sm:$0xff]  }
 0x255   : > { %2912 = vmatmul.mubr.bf16.gmra.mrb[64].mxu1 %v11256_v1  ;;  %3251 = vmatmul.mubr.bf16.gmra.mrb[48].mxu0 %v11256_v1  ;;  %v1762_v42 = vsel %vm1602_vm0, %v1522_v35, %v1682_v7  ;;  %v1681_v21 = vmul.f32 0.2, %v1521_v29  ;;  %v1686_v20 = vmul.f32 0.2, %v1526_v45  ;;  %v1537_v22 = vadd.f32 %v11187_v61, %v1410_v52  ;;  %v9419_v1 = vld [vmem:[#allocation7 + $0x328] ss:$16 sps:$4 sm:$0xff]  }
 0x256   : > { %2921 = vmatprep.mubr.bf16.mxu1 %v11264_v40  ;;  %2969 = vmatpush1.bf16.msra.mxu1 %v9410_v5  ;;  %v1767_v31 = vsel %vm1607_vm1, %v1527_v60, %v1687_v55  ;;  %vm1612_vm4 = vcmp.ge.f32.partialorder %v1532_v24, 0.0  ;;  %v1692_v32 = vmul.f32 0.2, %v1532_v24  ;;  %v1404_v19 = vmul.f32 %v11075_v13, %v14283_v30  ;;  %v14288_v41 = vld [vmem:[#allocation40_spill] sm:$0xff]  ;;  %v14289_v11 = vld [vmem:[#allocation46_spill] sm:$0xff] }
 0x257   : > { %3260 = vmatprep.mubr.bf16.mxu0 %v11264_v40  ;;  %3308 = vmatpush1.bf16.msra.mxu0 %v9413_v26  ;;  %v11314_v34 = vpack.c.bf16 %v1767_v31, %v1762_v42  ;;  %v1761_v18 = vsel %vm1601_vm2, %v1521_v29, %v1681_v21  ;;  %v1766_v3 = vsel %vm1606_vm3, %v1526_v45, %v1686_v20  ;;  %vm1617_vm5 = vcmp.ge.f32.partialorder %v1537_v22, 0.0  ;;  %v9430_v49 = vld [vmem:[#allocation7 + $0x364] ss:$16 sps:$4 sm:$0xff]   ;;  %v9433_v5 = vld [vmem:[#allocation7 + $0x36c] ss:$16 sps:$4 sm:$0xff]  }
 0x258   : > { %2970 = vmatprep.subr.bf16.mxu1 %v9418_v33  ;;  %3309 = vmatprep.subr.bf16.mxu0 %v9421_v17  ;;  %v11318_v9 = vpack.c.bf16 %v1766_v3, %v1761_v18  ;;  %v1697_v8 = vmul.f32 0.2, %v1537_v22  ;;  %v1772_v6 = vsel %vm1612_vm4, %v1532_v24, %v1692_v32  ;;  %v1409_v40 = vmul.f32 %v11075_v13, %v14284_v47  ;;  %v9428_v43 = vld [vmem:[#allocation7 + $0x360] ss:$16 sps:$4 sm:$0xff]   ;;  %v9431_v44 = vld [vmem:[#allocation7 + $0x368] ss:$16 sps:$4 sm:$0xff]  }
 0x259   : > { %v1531_v38 = vadd.f32 %v11184_v62, %v1404_v19  ;;  %v1415_v15 = vmul.f32 %v11070_v63, %v14285_v36  ;;  %v1420_v23 = vmul.f32 %v11070_v63, %v14286_v28  ;;  %v1414_v25 = vmul.f32 %v11075_v13, %v14287_v4  ;;  %v9436_v55 = vld [vmem:[#allocation7 + $0x384] ss:$16 sps:$4 sm:$0xff]   ;;  %v9439_v20 = vld [vmem:[#allocation7 + $0x38c] ss:$16 sps:$4 sm:$0xff]   ;;  %v9434_v3 = vld [vmem:[#allocation7 + $0x380] ss:$16 sps:$4 sm:$0xff]  }
 0x25a   : > { %2971 = vmatpush1.bf16.msra.mxu1 %v9416_v14  ;;  %v1777_v48 = vsel %vm1617_vm5, %v1537_v22, %v1697_v8  ;;  %v1536_v37 = vadd.f32 %v11184_v62, %v1409_v40  ;;  %v1419_v12 = vmul.f32 %v11075_v13, %v14288_v41  ;;  %v1425_v39 = vmul.f32 %v11070_v63, %v14289_v11  ;;  %v14290_v19 = vld [vmem:[#allocation44_spill] sm:$0xff]  ;;  %v14292_v4 = vld [vmem:[#allocation53_spill] sm:$0xff]  ;;  %v14293_v41 = vld [vmem:[#allocation55_spill] sm:$0xff] }
 0x25b   : > { %3310 = vmatpush1.bf16.msra.mxu0 %v9419_v1  ;;  %2972 = vmatprep.subr.bf16.mxu1 %v9424_v16  ;;  %v11335_v35 = vpack.c.bf16 %v1777_v48, %v1772_v6  ;;  %vm1611_vm6 = vcmp.ge.f32.partialorder %v1531_v38, 0.0  ;;  %v1691_v60 = vmul.f32 0.2, %v1531_v38  ;;  %v1542_v29 = vadd.f32 %v11187_v61, %v1415_v15  ;;  %v14291_v16 = vld [vmem:[#allocation48_spill] sm:$0xff]  ;;  %v9445_v15 = vld [vmem:[#allocation7 + $0x3ac] ss:$16 sps:$4 sm:$0xff]  }
 0x25c   : > { %3311 = vmatprep.subr.bf16.mxu0 %v9427_v58  ;;  %vm1616_vm7 = vcmp.ge.f32.partialorder %v1536_v37, 0.0  ;;  %v1696_v26 = vmul.f32 0.2, %v1536_v37  ;;  %v1547_v56 = vadd.f32 %v11187_v61, %v1420_v23  ;;  %v1541_v45 = vadd.f32 %v11184_v62, %v1414_v25  ;;  %v9442_v47 = vld [vmem:[#allocation7 + $0x3a4] ss:$16 sps:$4 sm:$0xff]  }
 0x25d   : > { %2922 = vmatmul.mubr.bf16.gmra.mrb[68].mxu1 %v11268_v0  ;;  %3261 = vmatmul.mubr.bf16.gmra.mrb[52].mxu0 %v11268_v0  ;;  %v1771_v52 = vsel %vm1611_vm6, %v1531_v38, %v1691_v60  ;;  %vm1622_vm8 = vcmp.ge.f32.partialorder %v1542_v29, 0.0  ;;  %v1702_v24 = vmul.f32 0.2, %v1542_v29  ;;  %v1546_v33 = vadd.f32 %v11184_v62, %v1419_v12  ;;  %v9440_v48 = vld [vmem:[#allocation7 + $0x3a0] ss:$16 sps:$4 sm:$0xff]  }
 0x25e   : > { %2931 = vmatprep.mubr.bf16.mxu1 %v11276_v10  ;;  %2973 = vmatpush1.bf16.msra.mxu1 %v9422_v27  ;;  %v1776_v7 = vsel %vm1616_vm7, %v1536_v37, %v1696_v26  ;;  %vm1627_vm9 = vcmp.ge.f32.partialorder %v1547_v56, 0.0  ;;  %v1707_v17 = vmul.f32 0.2, %v1547_v56  ;;  %vm1621_vm10 = vcmp.ge.f32.partialorder %v1541_v45, 0.0 }
 0x25f   : > { %3270 = vmatprep.mubr.bf16.mxu0 %v11276_v10  ;;  %3312 = vmatpush1.bf16.msra.mxu0 %v9425_v57  ;;  %v11345_v42 = vpack.c.bf16 %v1776_v7, %v1771_v52  ;;  %v1782_v0 = vsel %vm1622_vm8, %v1542_v29, %v1702_v24  ;;  %vm1626_vm11 = vcmp.ge.f32.partialorder %v1546_v33, 0.0  ;;  %v1701_v21 = vmul.f32 0.2, %v1541_v45  ;;  %v14297_v7 = vld [vmem:[#allocation59_spill] sm:$0xff] }
 0x260   : > { %2974 = vmatprep.subr.bf16.mxu1 %v9430_v49  ;;  %3313 = vmatprep.subr.bf16.mxu0 %v9433_v5  ;;  %v1787_v22 = vsel %vm1627_vm9, %v1547_v56, %v1707_v17  ;;  %v1706_v14 = vmul.f32 0.2, %v1546_v33  ;;  %v1430_v31 = vmul.f32 %v11070_v63, %v10892_v53  ;;  %v1552_v32 = vadd.f32 %v11187_v61, %v1425_v39  ;;  %v9437_v53 = vld [vmem:[#allocation7 + $0x388] ss:$16 sps:$4 sm:$0xff]   ;;  %v9448_v49 = vld [vmem:[#allocation7 + $0x3c4] ss:$16 sps:$4 sm:$0xff]  }
 0x261   : > { %v11350_v30 = vpack.c.bf16 %v1787_v22, %v1782_v0  ;;  %v1781_v10 = vsel %vm1621_vm10, %v1541_v45, %v1701_v21  ;;  %v1424_v1 = vmul.f32 %v11075_v13, %v14290_v19  ;;  %v1429_v18 = vmul.f32 %v11075_v13, %v14291_v16  ;;  %v9443_v39 = vld [vmem:[#allocation7 + $0x3a8] ss:$16 sps:$4 sm:$0xff]   ;;  %v9451_v5 = vld [vmem:[#allocation7 + $0x3cc] ss:$16 sps:$4 sm:$0xff]   ;;  %v9454_v16 = vld [vmem:[#allocation7 + $0x3e4] ss:$16 sps:$4 sm:$0xff]  }
 0x262   : > { %2975 = vmatpush1.bf16.msra.mxu1 %v9428_v43  ;;  %v1786_v58 = vsel %vm1626_vm11, %v1546_v33, %v1706_v14  ;;  %v1557_v8 = vadd.f32 %v11187_v61, %v1430_v31  ;;  %vm1632_vm12 = vcmp.ge.f32.partialorder %v1552_v32, 0.0  ;;  %v1712_v6 = vmul.f32 0.2, %v1552_v32  ;;  %v14294_v43 = vld [vmem:[#allocation51_spill] sm:$0xff]  ;;  %v14296_v33 = vld [vmem:[#allocation57_spill] sm:$0xff] }
 0x263   : > { %3314 = vmatpush1.bf16.msra.mxu0 %v9431_v44  ;;  %2976 = vmatprep.subr.bf16.mxu1 %v9436_v55  ;;  %v11358_v40 = vpack.c.bf16 %v1786_v58, %v1781_v10  ;;  %v1551_v38 = vadd.f32 %v11184_v62, %v1424_v1  ;;  %v1556_v36 = vadd.f32 %v11184_v62, %v1429_v18  ;;  %v9446_v55 = vld [vmem:[#allocation7 + $0x3c0] ss:$16 sps:$4 sm:$0xff]   ;;  %vm1677_vm2 = vcmp.ge.f32.partialorder %v11206_v2, 0.0  ;;  %v9449_v14 = vld [vmem:[#allocation7 + $0x3c8] ss:$16 sps:$4 sm:$0xff]  }
 0x264   : > { %3315 = vmatprep.subr.bf16.mxu0 %v9439_v20  ;;  %vm1637_vm13 = vcmp.ge.f32.partialorder %v1557_v8, 0.0  ;;  %v1717_v28 = vmul.f32 0.2, %v1557_v8  ;;  %v1792_v23 = vsel %vm1632_vm12, %v1552_v32, %v1712_v6  ;;  %v1435_v25 = vmul.f32 %v11070_v63, %v14292_v4  ;;  %v14298_v20 = vld [vmem:[#allocation56_spill] sm:$0xff]  ;;  %v9457_v18 = vld [vmem:[#allocation7 + $0x3ec] ss:$16 sps:$4 sm:$0xff]  }
 0x265   : > { %2932 = vmatmul.mubr.bf16.gmra.mrb[72].mxu1 %v11286_v54  ;;  %3271 = vmatmul.mubr.bf16.gmra.mrb[56].mxu0 %v11286_v54  ;;  %vm1631_vm14 = vcmp.ge.f32.partialorder %v1551_v38, 0.0  ;;  %vm1636_vm15 = vcmp.ge.f32.partialorder %v1556_v36, 0.0  ;;  %v1711_v27 = vmul.f32 0.2, %v1551_v38  ;;  %v1716_v57 = vmul.f32 0.2, %v1556_v36 }
 0x266   : > { %2941 = vmatprep.mubr.bf16.mxu1 %v11289_v51  ;;  %2977 = vmatpush1.bf16.msra.mxu1 %v9434_v3  ;;  %v1797_v37 = vsel %vm1637_vm13, %v1557_v8, %v1717_v28  ;;  %v1440_v12 = vmul.f32 %v11070_v63, %v14293_v41  ;;  %v1562_v11 = vadd.f32 %v11187_v61, %v1435_v25  ;;  %v11391_v19 = vmul.f32 0.2, %v11206_v2  ;;  %v9452_v1 = vld [vmem:[#allocation7 + $0x3e0] ss:$16 sps:$4 sm:$0xff]   ;;  %v14300_v41 = vld [vmem:[#allocation61_spill] sm:$0xff] }
 0x267   : > { %3280 = vmatprep.mubr.bf16.mxu0 %v11289_v51  ;;  %3316 = vmatpush1.bf16.msra.mxu0 %v9437_v53  ;;  %v11371_v54 = vpack.c.bf16 %v1797_v37, %v1792_v23  ;;  %v1791_v60 = vsel %vm1631_vm14, %v1551_v38, %v1711_v27  ;;  %v1796_v29 = vsel %vm1636_vm15, %v1556_v36, %v1716_v57  ;;  %v14295_v51 = vld [vmem:[#allocation54_spill] sm:$0xff]  ;;  %v9463_v27 = vld [vmem:[#allocation7 + $0x40c] ss:$16 sps:$4 sm:$0xff]  }
 0x268   : > { %2978 = vmatprep.subr.bf16.mxu1 %v9442_v47  ;;  %3317 = vmatprep.subr.bf16.mxu0 %v9445_v15  ;;  %v11373_v26 = vpack.c.bf16 %v1796_v29, %v1791_v60  ;;  %v1567_v56 = vadd.f32 %v11187_v61, %v1440_v12  ;;  %vm1642_vm0 = vcmp.ge.f32.partialorder %v1562_v11, 0.0  ;;  %v1722_v45 = vmul.f32 0.2, %v1562_v11  ;;  %v14299_v8 = vld [vmem:[#allocation58_spill] sm:$0xff]  ;;  %v9455_v47 = vld [vmem:[#allocation7 + $0x3e8] ss:$16 sps:$4 sm:$0xff]  }
 0x269   : > { %v1434_v52 = vmul.f32 %v11075_v13, %v14294_v43  ;;  %v1439_v24 = vmul.f32 %v11075_v13, %v14295_v51  ;;  %v1445_v44 = vmul.f32 %v11070_v63, %v14296_v33  ;;  %v1450_v17 = vmul.f32 %v11070_v63, %v14297_v7  ;;  %v9460_v23 = vld [vmem:[#allocation7 + $0x404] ss:$16 sps:$4 sm:$0xff]   ;;  %v14301_v29 = vld [vmem:[#allocation63_spill] sm:$0xff] }
 0x26a   : > { %2979 = vmatpush1.bf16.msra.mxu1 %v9440_v48  ;;  %vm1647_vm1 = vcmp.ge.f32.partialorder %v1567_v56, 0.0  ;;  %v1727_v0 = vmul.f32 0.2, %v1567_v56  ;;  %v1802_v21 = vsel %vm1642_vm0, %v1562_v11, %v1722_v45  ;;  %v1444_v22 = vmul.f32 %v11075_v13, %v14298_v20  ;;  %v9458_v45 = vld [vmem:[#allocation7 + $0x400] ss:$16 sps:$4 sm:$0xff]  }
 0x26b   : > { %3318 = vmatpush1.bf16.msra.mxu0 %v9443_v39  ;;  %2980 = vmatprep.subr.bf16.mxu1 %v9448_v49  ;;  %v1561_v31 = vadd.f32 %v11184_v62, %v1434_v52  ;;  %v1566_v32 = vadd.f32 %v11184_v62, %v1439_v24  ;;  %v1572_v10 = vadd.f32 %v11187_v61, %v1445_v44  ;;  %v9461_v43 = vld [vmem:[#allocation7 + $0x408] ss:$16 sps:$4 sm:$0xff]   ;;  %v14302_v51 = vld [vmem:[#allocation60_spill] sm:$0xff]  ;;  %v14303_v33 = vld [vmem:[#allocation62_spill] sm:$0xff] }
 0x26c   : > { %3319 = vmatprep.subr.bf16.mxu0 %v9451_v5  ;;  %v1807_v3 = vsel %vm1647_vm1, %v1567_v56, %v1727_v0  ;;  %v1577_v58 = vadd.f32 %v11187_v61, %v1450_v17  ;;  %v1449_v6 = vmul.f32 %v11075_v13, %v14299_v8  ;;  %v1571_v53 = vadd.f32 %v11184_v62, %v1444_v22  ;;  %v9466_v7 = vld [vmem:[#allocation7 + $0x424] ss:$16 sps:$4 sm:$0xff]  }
 0x26d   : > { %2942 = vmatmul.mubr.bf16.gmra.mrb[76].mxu1 %v11304_v46  ;;  %3281 = vmatmul.mubr.bf16.gmra.mrb[60].mxu0 %v11304_v46  ;;  %v11400_v38 = vpack.c.bf16 %v1807_v3, %v1802_v21  ;;  %vm1641_vm3 = vcmp.ge.f32.partialorder %v1561_v31, 0.0  ;;  %vm1646_vm4 = vcmp.ge.f32.partialorder %v1566_v32, 0.0  ;;  %v1721_v36 = vmul.f32 0.2, %v1561_v31  ;;  %v9469_v21 = vld [vmem:[#allocation7 + $0x42c] ss:$16 sps:$4 sm:$0xff]  }
 0x26e   : > { %2981 = vmatpush1.bf16.msra.mxu1 %v9446_v55  ;;  %2984 = vmatprep.mubr.bf16.mxu1 %v11314_v34  ;;  %v1726_v15 = vmul.f32 0.2, %v1566_v32  ;;  %vm1652_vm5 = vcmp.ge.f32.partialorder %v1572_v10, 0.0  ;;  %vm1657_vm6 = vcmp.ge.f32.partialorder %v1577_v58, 0.0  ;;  %v1732_v28 = vmul.f32 0.2, %v1572_v10 }
 0x26f   : > { %3320 = vmatpush1.bf16.msra.mxu0 %v9449_v14  ;;  %3323 = vmatprep.mubr.bf16.mxu0 %v11314_v34  ;;  %v1801_v4 = vsel %vm1641_vm3, %v1561_v31, %v1721_v36  ;;  %v1737_v25 = vmul.f32 0.2, %v1577_v58  ;;  %v1576_v46 = vadd.f32 %v11184_v62, %v1449_v6  ;;  %vm1651_vm7 = vcmp.ge.f32.partialorder %v1571_v53, 0.0  ;;  %v14304_v14 = vld [vmem:[#allocation65_spill] sm:$0xff]  ;;  %v14306_v6 = vld [vmem:[#allocation66_spill] sm:$0xff] }
 0x270   : > { %2982 = vmatprep.subr.bf16.mxu1 %v9454_v16  ;;  %3321 = vmatprep.subr.bf16.mxu0 %v9457_v18  ;;  %v1806_v57 = vsel %vm1646_vm4, %v1566_v32, %v1726_v15  ;;  %v1812_v48 = vsel %vm1652_vm5, %v1572_v10, %v1732_v28  ;;  %v1731_v37 = vmul.f32 0.2, %v1571_v53  ;;  %v1455_v12 = vmul.f32 %v11070_v63, %v14300_v41  ;;  %v9464_v10 = vld [vmem:[#allocation7 + $0x420] ss:$16 sps:$4 sm:$0xff]   ;;  %v9478_v41 = vld [vmem:[#allocation7 + $0x464] ss:$16 sps:$4 sm:$0xff]  }
 0x271   : > { %v11408_v11 = vpack.c.bf16 %v1806_v57, %v1801_v4  ;;  %v1817_v34 = vsel %vm1657_vm6, %v1577_v58, %v1737_v25  ;;  %vm1656_vm8 = vcmp.ge.f32.partialorder %v1576_v46, 0.0  ;;  %v1736_v39 = vmul.f32 0.2, %v1576_v46  ;;  %v14305_v18 = vld [vmem:[#allocation64_spill] sm:$0xff] }
 0x272   : > { %2983 = vmatpush1.bf16.msra.mxu1 %v9452_v1  ;;  %v11411_v49 = vpack.c.bf16 %v1817_v34, %v1812_v48  ;;  %v1811_v60 = vsel %vm1651_vm7, %v1571_v53, %v1731_v37  ;;  %v1460_v5 = vmul.f32 %v11070_v63, %v14301_v29  ;;  %v1582_v56 = vadd.f32 %v11187_v61, %v1455_v12  ;;  %v14308_v48 = vld [vmem:[#allocation31_spill] sm:$0xff] }
 0x273   : > { %3322 = vmatpush1.bf16.msra.mxu0 %v9455_v47  ;;  %3065 = vmatprep.subr.bf16.mxu1 %v9460_v23  ;;  %v1816_v52 = vsel %vm1656_vm8, %v1576_v46, %v1736_v39  ;;  %v1454_v24 = vmul.f32 %v11075_v13, %v14302_v51  ;;  %v1459_v44 = vmul.f32 %v11075_v13, %v14303_v33  ;;  %v9475_v47 = vld [vmem:[#allocation7 + $0x44c] ss:$16 sps:$4 sm:$0xff]   ;;  %v9470_v23 = vld [vmem:[#allocation7 + $0x440] ss:$16 sps:$4 sm:$0xff]   ;;  %v9479_v33 = vld [vmem:[#allocation7 + $0x468] ss:$16 sps:$4 sm:$0xff]  }
 0x274   : > { %3404 = vmatprep.subr.bf16.mxu0 %v9463_v27  ;;  %v11420_v17 = vpack.c.bf16 %v1816_v52, %v1811_v60  ;;  %v1587_v55 = vadd.f32 %v11187_v61, %v1460_v5  ;;  %vm1662_vm9 = vcmp.ge.f32.partialorder %v1582_v56, 0.0  ;;  %v1742_v0 = vmul.f32 0.2, %v1582_v56  ;;  %v14309_v39 = vld [vmem:[#allocation26_spill] sm:$0xff]  ;;  %v14310_v51 = vld [vmem:[#allocation29_spill] sm:$0xff] }
 0x275   : > { %2985 = vmatmul.mubr.bf16.vlgmr.msra.gmra.mrb[48].mxu1 %v11318_v9  ;;  %v1581_v20 = vadd.f32 %v11184_v62, %v1454_v24  ;;  %v1586_v22 = vadd.f32 %v11184_v62, %v1459_v44  ;;  %v1465_v31 = vmul.f32 %v11070_v63, %v14304_v14  ;;  %v1837_v32 = vsel %vm1677_vm2, %v11206_v2, %v11391_v19  ;;  %v9467_v2 = vld [vmem:[#allocation7 + $0x428] ss:$16 sps:$4 sm:$0xff]  }
 0x276   : > { %3324 = vmatmul.mubr.bf16.vlgmr.msra.gmra.mrb[32].mxu0 %v11318_v9  ;;  %2994 = vmatprep.mubr.bf16.mxu1 %v11335_v35  ;;  %vm1667_vm10 = vcmp.ge.f32.partialorder %v1587_v55, 0.0  ;;  %v1747_v1 = vmul.f32 0.2, %v1587_v55  ;;  %v1822_v16 = vsel %vm1662_vm9, %v1582_v56, %v1742_v0  ;;  %v1464_v3 = vmul.f32 %v11075_v13, %v14305_v18  ;;  %v9472_v9 = vld [vmem:[#allocation7 + $0x444] ss:$16 sps:$4 sm:$0xff]  }
 0x277   : > { %3066 = vmatpush1.bf16.msra.mxu1 %v9458_v45  ;;  %3333 = vmatprep.mubr.bf16.mxu0 %v11335_v35  ;;  %vm1661_vm11 = vcmp.ge.f32.partialorder %v1581_v20, 0.0  ;;  %vm1666_vm12 = vcmp.ge.f32.partialorder %v1586_v22, 0.0  ;;  %v1741_v63 = vmul.f32 0.2, %v1581_v20  ;;  %v1746_v58 = vmul.f32 0.2, %v1586_v22 }
 0x278   : > { %3405 = vmatpush1.bf16.msra.mxu0 %v9461_v43  ;;  %3067 = vmatprep.subr.bf16.mxu1 %v9466_v7  ;;  %v1827_v19 = vsel %vm1667_vm10, %v1587_v55, %v1747_v1  ;;  %v1592_v8 = vadd.f32 %v11187_v61, %v1465_v31  ;;  %v1469_v53 = vmul.f32 %v11075_v13, %v14306_v6  ;;  %v9473_v61 = vld [vmem:[#allocation7 + $0x448] ss:$16 sps:$4 sm:$0xff]   ;;  %v9476_v45 = vld [vmem:[#allocation7 + $0x460] ss:$16 sps:$4 sm:$0xff]  }
 0x279   : > { %3406 = vmatprep.subr.bf16.mxu0 %v9469_v21  ;;  %v11440_v36 = vpack.c.bf16 %v1827_v19, %v1822_v16  ;;  %v1821_v15 = vsel %vm1661_vm11, %v1581_v20, %v1741_v63  ;;  %v1826_v35 = vsel %vm1666_vm12, %v1586_v22, %v1746_v58  ;;  %v1591_v28 = vadd.f32 %v11184_v62, %v1464_v3  ;;  %v14307_v13 = vld [vmem:[#allocation27_spill] sm:$0xff]  ;;  %v14313_v3 = vld [vmem:[#allocation76_spill] sm:$0xff] }
 0x27a   : > { %v11443_v4 = vpack.c.bf16 %v1826_v35, %v1821_v15  ;;  %vm1672_vm13 = vcmp.ge.f32.partialorder %v1592_v8, 0.0  ;;  %v1752_v25 = vmul.f32 0.2, %v1592_v8  ;;  %v1596_v46 = vadd.f32 %v11184_v62, %v1469_v53  ;;  %v9481_v62 = vld [vmem:[#allocation7 + $0x46c] ss:$16 sps:$4 sm:$0xff]  }
 0x27b   : > { %3068 = vmatpush1.bf16.msra.mxu1 %v9464_v10  ;;  %vm1671_vm14 = vcmp.ge.f32.partialorder %v1591_v28, 0.0  ;;  %v1751_v27 = vmul.f32 0.2, %v1591_v28  ;;  %v1396_v57 = vmul.f32 %v11038_v50, %v14307_v13  ;;  %v1401_v37 = vmul.f32 %v11038_v50, %v14308_v48  ;;  %v14311_v20 = vld [vmem:[#allocation35_spill] sm:$0xff]  ;;  %v9482_v63 = vld [vmem:[#allocation7 + $0x480] ss:$16 sps:$4 sm:$0xff]  }
 0x27c   : > { %3407 = vmatpush1.bf16.msra.mxu0 %v9467_v2  ;;  %3069 = vmatprep.subr.bf16.mxu1 %v9472_v9  ;;  %v1832_v12 = vsel %vm1672_vm13, %v1592_v8, %v1752_v25  ;;  %vm1676_vm15 = vcmp.ge.f32.partialorder %v1596_v46, 0.0  ;;  %v1756_v34 = vmul.f32 0.2, %v1596_v46  ;;  %v1406_v60 = vmul.f32 %v14309_v39, %v11038_v50  ;;  %v9485_v58 = vld [vmem:[#allocation7 + $0x488] ss:$16 sps:$4 sm:$0xff]   ;;  %v14314_v8 = vld [vmem:[#allocation34_spill] sm:$0xff] }
 0x27d   : > { %2995 = vmatmul.mubr.bf16.gmra.mrb[52].mxu1 %v11345_v42  ;;  %3408 = vmatprep.subr.bf16.mxu0 %v9475_v47  ;;  %v11453_v29 = vpack.c.bf16 %v1837_v32, %v1832_v12  ;;  %v1831_v5 = vsel %vm1671_vm14, %v1591_v28, %v1751_v27  ;;  %v1523_v56 = vadd.f32 %v11078_v59, %v1396_v57  ;;  %v14312_v32 = vld [vmem:[#allocation39_spill] sm:$0xff]  ;;  %vm1668_vm4 = vcmp.ge.f32.partialorder %v14313_v3, 0.0  ;;  %v9490_v53 = vld [vmem:[#allocation7 + $0x4a4] ss:$16 sps:$4 sm:$0xff]   ;;  %v14315_v35 = vld [vmem:[#allocation37_spill] sm:$0xff] }
 0x27e   : > { %3334 = vmatmul.mubr.bf16.gmra.mrb[36].mxu0 %v11345_v42  ;;  %3004 = vmatprep.mubr.bf16.mxu1 %v11350_v30  ;;  %v1836_v43 = vsel %vm1676_vm15, %v1596_v46, %v1756_v34  ;;  %v1528_v52 = vadd.f32 %v11078_v59, %v1401_v37  ;;  %v1411_v24 = vmul.f32 %v14310_v51, %v11038_v50  ;;  %v9484_v42 = vld [vmem:[#allocation7 + $0x484] ss:$16 sps:$4 sm:$0xff]   ;;  %v9488_v27 = vld [vmem:[#allocation7 + $0x4a0] ss:$16 sps:$4 sm:$0xff]   ;;  %v14316_v48 = vld [vmem:[#allocation43_spill] sm:$0xff] }
 0x27f   : > { %3343 = vmatprep.mubr.bf16.mxu0 %v11350_v30  ;;  %3070 = vmatpush1.bf16.msra.mxu1 %v9470_v23  ;;  %v11462_v44 = vpack.c.bf16 %v1836_v43, %v1831_v5  ;;  %vm1603_vm0 = vcmp.ge.f32.partialorder %v1523_v56, 0.0  ;;  %v1683_v7 = vmul.f32 0.2, %v1523_v56  ;;  %v1533_v55 = vadd.f32 %v11078_v59, %v1406_v60  ;;  %v9487_v30 = vld [vmem:[#allocation7 + $0x48c] ss:$16 sps:$4 sm:$0xff]   ;;  %v14318_v51 = vld [vmem:[#allocation42_spill] sm:$0xff] }
 0x280   : > { %3409 = vmatpush1.bf16.msra.mxu0 %v9473_v61  ;;  %3071 = vmatprep.subr.bf16.mxu1 %v9478_v41  ;;  %vm1608_vm1 = vcmp.ge.f32.partialorder %v1528_v52, 0.0  ;;  %v1688_v0 = vmul.f32 0.2, %v1528_v52  ;;  %v1538_v21 = vadd.f32 %v11078_v59, %v1411_v24  ;;  %v1416_v22 = vmul.f32 %v11038_v50, %v14311_v20  ;;  %v9493_v23 = vld [vmem:[#allocation7 + $0x4ac] ss:$16 sps:$4 sm:$0xff]  }
 0x281   : > { %3410 = vmatprep.subr.bf16.mxu0 %v9481_v62  ;;  %v1763_v14 = vsel %vm1603_vm0, %v1523_v56, %v1683_v7  ;;  %vm1613_vm2 = vcmp.ge.f32.partialorder %v1533_v55, 0.0  ;;  %v1693_v31 = vmul.f32 0.2, %v1533_v55  ;;  %v1421_v10 = vmul.f32 %v11038_v50, %v14312_v32  ;;  %v9491_v12 = vld [vmem:[#allocation7 + $0x4a8] ss:$16 sps:$4 sm:$0xff]  }
 0x282   : > { %v1768_v1 = vsel %vm1608_vm1, %v1528_v52, %v1688_v0  ;;  %vm1618_vm3 = vcmp.ge.f32.partialorder %v1538_v21, 0.0  ;;  %v1698_v16 = vmul.f32 0.2, %v1538_v21  ;;  %v1543_v18 = vadd.f32 %v11078_v59, %v1416_v22  ;;  %v14317_v60 = vld [vmem:[#allocation47_spill] sm:$0xff]  ;;  %v9496_v62 = vld [vmem:[#allocation7 + $0x4c4] ss:$16 sps:$4 sm:$0xff]  }
 0x283   : > { %3072 = vmatpush1.bf16.msra.mxu1 %v9476_v45  ;;  %v11472_v2 = vpack.c.bf16 %v1768_v1, %v1763_v14  ;;  %v1773_v9 = vsel %vm1613_vm2, %v1533_v55, %v1693_v31  ;;  %v1548_v19 = vadd.f32 %v11078_v59, %v1421_v10  ;;  %v1426_v6 = vmul.f32 %v14314_v8, %v11038_v50  ;;  %v9499_v43 = vld [vmem:[#allocation7 + $0x4cc] ss:$16 sps:$4 sm:$0xff]   ;;  %v14320_v0 = vld [vmem:[#allocation50_spill] sm:$0xff]  ;;  %v9497_v31 = vld [vmem:[#allocation7 + $0x4c8] ss:$16 sps:$4 sm:$0xff]  }
 0x284   : > { %3411 = vmatpush1.bf16.msra.mxu0 %v9479_v33  ;;  %3073 = vmatprep.subr.bf16.mxu1 %v9484_v42  ;;  %v1778_v47 = vsel %vm1618_vm3, %v1538_v21, %v1698_v16  ;;  %vm1623_vm5 = vcmp.ge.f32.partialorder %v1543_v18, 0.0  ;;  %v1703_v15 = vmul.f32 0.2, %v1543_v18  ;;  %v1431_v28 = vmul.f32 %v14315_v35, %v11038_v50  ;;  %v14319_v33 = vld [vmem:[#allocation45_spill] sm:$0xff]  ;;  %v9494_v20 = vld [vmem:[#allocation7 + $0x4c0] ss:$16 sps:$4 sm:$0xff]  }
 0x285   : > { %3005 = vmatmul.mubr.bf16.gmra.mrb[56].mxu1 %v11358_v40  ;;  %3412 = vmatprep.subr.bf16.mxu0 %v9487_v30  ;;  %v11480_v25 = vpack.c.bf16 %v1778_v47, %v1773_v9  ;;  %vm1628_vm6 = vcmp.ge.f32.partialorder %v1548_v19, 0.0  ;;  %v1708_v46 = vmul.f32 0.2, %v1548_v19  ;;  %v1553_v61 = vadd.f32 %v11078_v59, %v1426_v6  ;;  %v9502_v32 = vld [vmem:[#allocation7 + $0x4e4] ss:$16 sps:$4 sm:$0xff]  }
 0x286   : > { %3344 = vmatmul.mubr.bf16.gmra.mrb[40].mxu0 %v11358_v40  ;;  %3014 = vmatprep.mubr.bf16.mxu1 %v11371_v54  ;;  %v1783_v13 = vsel %vm1623_vm5, %v1543_v18, %v1703_v15  ;;  %v1558_v57 = vadd.f32 %v11078_v59, %v1431_v28  ;;  %v1436_v37 = vmul.f32 %v11038_v50, %v14316_v48  ;;  %v1748_v41 = vmul.f32 0.2, %v14313_v3  ;;  %v9505_v18 = vld [vmem:[#allocation7 + $0x4ec] ss:$16 sps:$4 sm:$0xff]   ;;  %v9500_v6 = vld [vmem:[#allocation7 + $0x4e0] ss:$16 sps:$4 sm:$0xff]  }
 0x287   : > { %3353 = vmatprep.mubr.bf16.mxu0 %v11371_v54  ;;  %3074 = vmatpush1.bf16.msra.mxu1 %v9482_v63  ;;  %v1788_v34 = vsel %vm1628_vm6, %v1548_v19, %v1708_v46  ;;  %vm1633_vm7 = vcmp.ge.f32.partialorder %v1553_v61, 0.0  ;;  %v1713_v39 = vmul.f32 0.2, %v1553_v61  ;;  %v1441_v40 = vmul.f32 %v11038_v50, %v14317_v60  ;;  %v14321_v15 = vld [vmem:[#allocation49_spill] sm:$0xff]  ;;  %v14322_v28 = vld [vmem:[#allocation52_spill] sm:$0xff] }
 0x288   : > { %3413 = vmatpush1.bf16.msra.mxu0 %v9485_v58  ;;  %3075 = vmatprep.subr.bf16.mxu1 %v9490_v53  ;;  %v11492_v5 = vpack.c.bf16 %v1788_v34, %v1783_v13  ;;  %vm1638_vm8 = vcmp.ge.f32.partialorder %v1558_v57, 0.0  ;;  %v1718_v56 = vmul.f32 0.2, %v1558_v57  ;;  %v1563_v45 = vadd.f32 %v11078_v59, %v1436_v37 }
 0x289   : > { %3414 = vmatprep.subr.bf16.mxu0 %v9493_v23  ;;  %v1793_v54 = vsel %vm1633_vm7, %v1553_v61, %v1713_v39  ;;  %v1568_v52 = vadd.f32 %v11078_v59, %v1441_v40  ;;  %v1446_v24 = vmul.f32 %v14318_v51, %v11038_v50  ;;  %v1451_v7 = vmul.f32 %v14319_v33, %v11038_v50  ;;  %v9515_v40 = vld [vmem:[#allocation8 + $0x40] ss:$28 sps:$4 sm:$0xff]  }
 0x28a   : > { %v1798_v55 = vsel %vm1638_vm8, %v1558_v57, %v1718_v56  ;;  %vm1643_vm9 = vcmp.ge.f32.partialorder %v1563_v45, 0.0  ;;  %v1723_v42 = vmul.f32 0.2, %v1563_v45  ;;  %v1456_v21 = vmul.f32 %v11038_v50, %v14320_v0  ;;  %v9523_v51 = vld [vmem:[#allocation8 + $0x7c] ss:$28 sps:$4 sm:$0xff]  }
 0x28b   : > { %3076 = vmatpush1.bf16.msra.mxu1 %v9488_v27  ;;  %v11502_v22 = vpack.c.bf16 %v1798_v55, %v1793_v54  ;;  %vm1648_vm10 = vcmp.ge.f32.partialorder %v1568_v52, 0.0  ;;  %v1728_v30 = vmul.f32 0.2, %v1568_v52  ;;  %v1573_v14 = vadd.f32 %v11078_v59, %v1446_v24 }
 0x28c   : > { %3415 = vmatpush1.bf16.msra.mxu0 %v9491_v12  ;;  %3077 = vmatprep.subr.bf16.mxu1 %v9496_v62  ;;  %v1803_v10 = vsel %vm1643_vm9, %v1563_v45, %v1723_v42  ;;  %v1578_v1 = vadd.f32 %v11078_v59, %v1451_v7  ;;  %v1583_v16 = vadd.f32 %v11078_v59, %v1456_v21  ;;  %v9512_v12 = vld [vmem:[#allocation8 + $0x38] ss:$28 sps:$4 sm:$0xff]   ;;  %vm3781_vm0 = vcmask 1045504  }
 0x28d   : > { %3015 = vmatmul.mubr.bf16.gmra.mrb[60].mxu1 %v11373_v26  ;;  %3416 = vmatprep.subr.bf16.mxu0 %v9499_v43  ;;  %v1808_v63 = vsel %vm1648_vm10, %v1568_v52, %v1728_v30  ;;  %vm1653_vm11 = vcmp.ge.f32.partialorder %v1573_v14, 0.0  ;;  %v1733_v58 = vmul.f32 0.2, %v1573_v14  ;;  %v1828_v9 = vsel %vm1668_vm4, %v14313_v3, %v1748_v41  ;;  %v9520_v62 = vld [vmem:[#allocation8 + $0x74] ss:$28 sps:$4 sm:$0xff]  }
 0x28e   : > { %3354 = vmatmul.mubr.bf16.gmra.mrb[44].mxu0 %v11373_v26  ;;  %3024 = vmatprep.mubr.bf16.mxu1 %v11400_v38  ;;  %v1863_v19 = vpack.c.bf16 %v1808_v63, %v1803_v10  ;;  %vm1658_vm12 = vcmp.ge.f32.partialorder %v1578_v1, 0.0  ;;  %v1738_v8 = vmul.f32 0.2, %v1578_v1  ;;  %vm1663_vm13 = vcmp.ge.f32.partialorder %v1583_v16, 0.0  ;;  %v9503_v26 = vld [vmem:[#allocation7 + $0x4e8] ss:$16 sps:$4 sm:$0xff]  }
 0x28f   : > { %3363 = vmatprep.mubr.bf16.mxu0 %v11400_v38  ;;  %3078 = vmatpush1.bf16.msra.mxu1 %v9494_v20  ;;  %v1813_v53 = vsel %vm1653_vm11, %v1573_v14, %v1733_v58  ;;  %v1743_v47 = vmul.f32 0.2, %v1583_v16  ;;  %v1466_v35 = vmul.f32 %v14321_v15, %v11038_v50  ;;  %v1471_v3 = vmul.f32 %v14322_v28, %v11038_v50  ;;  %v9518_v30 = vld [vmem:[#allocation8 + $0x70] ss:$28 sps:$4 sm:$0xff]  }
 0x290   : > { %3417 = vmatpush1.bf16.msra.mxu0 %v9497_v31  ;;  %3079 = vmatprep.subr.bf16.mxu1 %v9502_v32  ;;  %v1818_v23 = vsel %vm1658_vm12, %v1578_v1, %v1738_v8  ;;  %v9521_v32 = vld [vmem:[#allocation8 + $0x78] ss:$28 sps:$4 sm:$0xff]   ;;  %v9526_v1 = vld [vmem:[#allocation8 + $0xac] ss:$28 sps:$4 sm:$0xff]  }
 0x291   : > { %3418 = vmatprep.subr.bf16.mxu0 %v9505_v18  ;;  %v1868_v46 = vpack.c.bf16 %v1818_v23, %v1813_v53  ;;  %v1823_v61 = vsel %vm1663_vm13, %v1583_v16, %v1743_v47  ;;  %v1593_v27 = vadd.f32 %v11078_v59, %v1466_v35  ;;  %v1598_v38 = vadd.f32 %v11078_v59, %v1471_v3  ;;  %v9529_v18 = vld [vmem:[#allocation8 + $0xb4] ss:$28 sps:$4 sm:$0xff]   ;;  %v9524_v8 = vld [vmem:[#allocation8 + $0xa8] ss:$28 sps:$4 sm:$0xff]  }
 0x292   : > { %v1873_v13 = vpack.c.bf16 %v1828_v9, %v1823_v61  ;;  %v14323_v59 = vmov 0   ;;  %v9527_v3 = vld [vmem:[#allocation8 + $0xb0] ss:$28 sps:$4 sm:$0xff]  }
 0x293   : > { %3080 = vmatpush1.bf16.msra.mxu1 %v9500_v6  ;;  %vm1673_vm14 = vcmp.ge.f32.partialorder %v1593_v27, 0.0  ;;  %vm1678_vm15 = vcmp.ge.f32.partialorder %v1598_v38, 0.0  ;;  %v1753_v57 = vmul.f32 0.2, %v1593_v27  ;;  %v1758_v48 = vmul.f32 0.2, %v1598_v38 }
 0x294   : > { %3419 = vmatpush1.bf16.msra.mxu0 %v9503_v26  ;;  %v9532_v26 = vld [vmem:[#allocation8 + $0xe4] ss:$28 sps:$4 sm:$0xff]  }
 0x295   : > { %3025 = vmatmul.mubr.bf16.gmra.mrb[64].mxu1 %v11408_v11  ;;  %v1833_v50 = vsel %vm1673_vm14, %v1593_v27, %v1753_v57  ;;  %v1838_v37 = vsel %vm1678_vm15, %v1598_v38, %v1758_v48  ;;  %v9535_v57 = vld [vmem:[#allocation8 + $0xec] ss:$28 sps:$4 sm:$0xff]  }
 0x296   : > { %3364 = vmatmul.mubr.bf16.gmra.mrb[48].mxu0 %v11408_v11  ;;  %3034 = vmatprep.mubr.bf16.mxu1 %v11411_v49  ;;  %v1878_v41 = vpack.c.bf16 %v1838_v37, %v1833_v50  ;;  %v9506_v11 = vld [vmem:[#allocation8] ss:$28 sps:$4 sm:$0xff]  }
 0x297   : > { %3373 = vmatprep.mubr.bf16.mxu0 %v11411_v49  ;;  %v9508_v49 = vld [vmem:[#allocation8 + $0x4] ss:$28 sps:$4 sm:$0xff]  }
 0x298   : > { %5669 = vmatprep.subr.bf16.mxu1 %v9508_v49 }
 0x29d   : > { %3035 = vmatmul.mubr.bf16.gmra.mrb[68].mxu1 %v11420_v17 }
 0x29e   : > { %3374 = vmatmul.mubr.bf16.gmra.mrb[52].mxu0 %v11420_v17  ;;  %3044 = vmatprep.mubr.bf16.mxu1 %v11440_v36  ;;  %v9509_v17 = vld [vmem:[#allocation8 + $0x8] ss:$28 sps:$4 sm:$0xff]  }
 0x29f   : > { %3383 = vmatprep.mubr.bf16.mxu0 %v11440_v36  ;;  %v9511_v36 = vld [vmem:[#allocation8 + $0xc] ss:$28 sps:$4 sm:$0xff]  }
 0x2a0   : > { %5895 = vmatprep.subr.bf16.mxu0 %v9511_v36 }
 0x2a5   : > { %3045 = vmatmul.mubr.bf16.gmra.mrb[72].mxu1 %v11443_v4 }
 0x2a6   : > { %3384 = vmatmul.mubr.bf16.gmra.mrb[56].mxu0 %v11443_v4  ;;  %3054 = vmatprep.mubr.bf16.mxu1 %v11453_v29  ;;  %v9514_v4 = vld [vmem:[#allocation8 + $0x3c] ss:$28 sps:$4 sm:$0xff]  }
 0x2a7   : > { %3393 = vmatprep.mubr.bf16.mxu0 %v11453_v29 }
 0x2ad   : > { %3055 = vmatmul.mubr.bf16.gmra.mrb[76].mxu1 %v11462_v44 }
 0x2ae   : > { %3394 = vmatmul.mubr.bf16.gmra.mrb[60].mxu0 %v11462_v44  ;;  %3097 = vmatprep.mubr.bf16.mxu1 %v14323_v59  ;;  %v9517_v44 = vld [vmem:[#allocation8 + $0x44] ss:$28 sps:$4 sm:$0xff]  }
 0x2af   : > { %3436 = vmatprep.mubr.bf16.mxu0 %v14323_v59 }
 0x2b5   : > { %3098 = vmatmul.mubr.bf16.vlgmr.msra.gmra.mrb[48].mxu1 %v11472_v2 }
 0x2b6   : > { %3437 = vmatmul.mubr.bf16.vlgmr.msra.gmra.mrb[32].mxu0 %v11472_v2  ;;  %3107 = vmatprep.mubr.bf16.mxu1 %v14323_v59 }
 0x2b7   : > { %3446 = vmatprep.mubr.bf16.mxu0 %v14323_v59  ;;  %5670 = vmatpush1.bf16.msra.mxu1 %v9506_v11 }
 0x2b8   : > { %5896 = vmatpush1.bf16.msra.mxu0 %v9509_v17  ;;  %5671 = vmatprep.subr.bf16.mxu1 %v9514_v4  ;;  %v9530_v4 = vld [vmem:[#allocation8 + $0xe0] ss:$28 sps:$4 sm:$0xff]  }
 0x2b9   : > { %5897 = vmatprep.subr.bf16.mxu0 %v9517_v44 }
 0x2bb   : > { %5672 = vmatpush1.bf16.msra.mxu1 %v9512_v12 }
 0x2bc   : > { %5898 = vmatpush1.bf16.msra.mxu0 %v9515_v40  ;;  %5673 = vmatprep.subr.bf16.mxu1 %v9520_v62  ;;  %v9533_v40 = vld [vmem:[#allocation8 + $0xe8] ss:$28 sps:$4 sm:$0xff]  }
 0x2bd   : > { %3108 = vmatmul.mubr.bf16.gmra.mrb[52].mxu1 %v11480_v25  ;;  %5899 = vmatprep.subr.bf16.mxu0 %v9523_v51  ;;  %v9541_v51 = vld [vmem:[#allocation8 + $0x124] ss:$28 sps:$4 sm:$0xff]  }
 0x2be   : > { %3447 = vmatmul.mubr.bf16.gmra.mrb[36].mxu0 %v11480_v25  ;;  %3117 = vmatprep.mubr.bf16.mxu1 %v14323_v59 }
 0x2bf   : > { %3456 = vmatprep.mubr.bf16.mxu0 %v14323_v59  ;;  %5674 = vmatpush1.bf16.msra.mxu1 %v9518_v30 }
 0x2c0   : > { %5900 = vmatpush1.bf16.msra.mxu0 %v9521_v32  ;;  %5675 = vmatprep.subr.bf16.mxu1 %v9526_v1  ;;  %v9539_v32 = vld [vmem:[#allocation8 + $0x120] ss:$28 sps:$4 sm:$0xff]  }
 0x2c1   : > { %5901 = vmatprep.subr.bf16.mxu0 %v9529_v18 }
 0x2c3   : > { %5676 = vmatpush1.bf16.msra.mxu1 %v9524_v8 }
 0x2c4   : > { %5902 = vmatpush1.bf16.msra.mxu0 %v9527_v3  ;;  %5677 = vmatprep.subr.bf16.mxu1 %v9532_v26 }
 0x2c5   : > { %3118 = vmatmul.mubr.bf16.gmra.mrb[56].mxu1 %v11492_v5  ;;  %5903 = vmatprep.subr.bf16.mxu0 %v9535_v57 }
 0x2c6   : > { %3457 = vmatmul.mubr.bf16.gmra.mrb[40].mxu0 %v11492_v5  ;;  %3127 = vmatprep.mubr.bf16.mxu1 %v14323_v59 }
 0x2c7   : > { %3466 = vmatprep.mubr.bf16.mxu0 %v14323_v59  ;;  %5678 = vmatpush1.bf16.msra.mxu1 %v9530_v4 }
 0x2c8   : > { %5904 = vmatpush1.bf16.msra.mxu0 %v9533_v40 }
 0x2c9   : > { %5905 = vmatprep.subr.bf16.mxu0 %v9541_v51 }
 0x2cc   : > { %5906 = vmatpush1.bf16.msra.mxu0 %v9539_v32 }
 0x2cd   : > { %3128 = vmatmul.mubr.bf16.gmra.mrb[60].mxu1 %v11502_v22 }
 0x2ce   : > { %3467 = vmatmul.mubr.bf16.gmra.mrb[44].mxu0 %v11502_v22  ;;  %3137 = vmatprep.mubr.bf16.mxu1 %v14323_v59 }
 0x2cf   : > { %3476 = vmatprep.mubr.bf16.mxu0 %v14323_v59 }
 0x2d5   : > { %3138 = vmatmul.mubr.bf16.gmra.mrb[64].mxu1 %v1863_v19 }
 0x2d6   : > { %3477 = vmatmul.mubr.bf16.gmra.mrb[48].mxu0 %v1863_v19  ;;  %3147 = vmatprep.mubr.bf16.mxu1 %v14323_v59 }
 0x2d7   : > { %3486 = vmatprep.mubr.bf16.mxu0 %v14323_v59 }
 0x2dd   : > { %3148 = vmatmul.mubr.bf16.gmra.mrb[68].mxu1 %v1868_v46 }
 0x2de   : > { %3487 = vmatmul.mubr.bf16.gmra.mrb[52].mxu0 %v1868_v46  ;;  %3157 = vmatprep.mubr.bf16.mxu1 %v14323_v59 }
 0x2df   : > { %3496 = vmatprep.mubr.bf16.mxu0 %v14323_v59 }
 0x2e5   : > { %3158 = vmatmul.mubr.bf16.gmra.mrb[72].mxu1 %v1873_v13 }
 0x2e6   : > { %3497 = vmatmul.mubr.bf16.gmra.mrb[56].mxu0 %v1873_v13  ;;  %3167 = vmatprep.mubr.bf16.mxu1 %v14323_v59 }
 0x2e7   : > { %3506 = vmatprep.mubr.bf16.mxu0 %v14323_v59 }
 0x2ed   : > { %3168 = vmatmul.mubr.bf16.gmra.mrb[76].mxu1 %v1878_v41 }
 0x2ee   : > { %3507 = vmatmul.mubr.bf16.gmra.mrb[60].mxu0 %v1878_v41 }
 0x388   : > { %v11558_v29 = vpop.f32.mrb[48].mxu1 }
 0x389   : > { %v11560_v2 = vpop.f32.mrb[32].mxu0  ;;  %v11562_v25 = vpop.f32.mrb[49].mxu1  ;;  %v3605_v34 = vmul.f32 %v11558_v29, %v11558_v29 }
 0x38a   : > { %14324 = vst [vmem:[#allocation16_spill] sm:$0xff] %v11560_v2  ;;  %v11566_v39 = vpop.f32.mrb[33].mxu0  ;;  %v11568_v60 = vpop.f32.mrb[50].mxu1  ;;  %v3607_v5 = vmul.f32 %v11560_v2, %v11560_v2  ;;  %v3606_v56 = vmul.f32 %v11562_v25, %v11562_v25 }
 0x38b   : > { %14325 = vst [vmem:[#allocation17_spill] sm:$0xff] %v11566_v39  ;;  %v3517_v45 = vadd.f32 %v11568_v60, %v11558_v29  ;;  %v3609_v43 = vmul.f32 %v11568_v60, %v11568_v60  ;;  %v11578_v54 = vpop.f32.mrb[34].mxu0  ;;  %v11580_v52 = vpop.f32.mrb[51].mxu1  ;;  %v3608_v0 = vmul.f32 %v11566_v39, %v11566_v39 }
 0x38c   : > { %14326 = vst [vmem:[#allocation19_spill] sm:$0xff] %v11578_v54  ;;  %v3559_v24 = vadd.f32 %v11578_v54, %v11560_v2  ;;  %v3611_v33 = vmul.f32 %v11578_v54, %v11578_v54  ;;  %v3538_v7 = vadd.f32 %v11580_v52, %v11562_v25  ;;  %v3610_v55 = vmul.f32 %v11580_v52, %v11580_v52  ;;  %v11590_v42 = vpop.f32.mrb[35].mxu0 }
 0x38d   : > { %14327 = vst [vmem:[#allocation21_spill] sm:$0xff] %v11590_v42  ;;  %v3669_v21 = vadd.f32 %v3609_v43, %v3605_v34  ;;  %v3580_v20 = vadd.f32 %v11590_v42, %v11566_v39  ;;  %v3612_v22 = vmul.f32 %v11590_v42, %v11590_v42 }
 0x38e   : > { %v3711_v14 = vadd.f32 %v3611_v33, %v3607_v5  ;;  %v3690_v31 = vadd.f32 %v3610_v55, %v3606_v56  ;;  %v9538_v56 = vld [vmem:[#allocation8 + $0x11c] ss:$28 sps:$4 sm:$0xff]  }
 0x38f   : > { %v3732_v10 = vadd.f32 %v3612_v22, %v3608_v0  ;;  %v9536_v0 = vld [vmem:[#allocation8 + $0x118] ss:$28 sps:$4 sm:$0xff]   ;;  %5679 = vmatprep.subr.bf16.mxu1 %v9538_v56  ;;  %v9548_v56 = vld [vmem:[#allocation8 + $0x188] ss:$28 sps:$4 sm:$0xff]  }
 0x390   : > { %v11598_v16 = vpop.f32.mrb[52].mxu1  ;;  %5680 = vmatpush1.bf16.msra.mxu1 %v9536_v0 }
 0x391   : > { %v3518_v63 = vadd.f32 %v3517_v45, %v11598_v16  ;;  %v3613_v58 = vmul.f32 %v11598_v16, %v11598_v16  ;;  %v11603_v9 = vpop.f32.mrb[36].mxu0  ;;  %v11605_v19 = vpop.f32.mrb[53].mxu1 }
 0x392   : > { %14328 = vst [vmem:[#allocation18_spill] sm:$0xff] %v11603_v9  ;;  %v3560_v6 = vadd.f32 %v3559_v24, %v11603_v9  ;;  %v3615_v53 = vmul.f32 %v11603_v9, %v11603_v9  ;;  %v3539_v47 = vadd.f32 %v3538_v7, %v11605_v19  ;;  %v3614_v15 = vmul.f32 %v11605_v19, %v11605_v19  ;;  %v11613_v35 = vpop.f32.mrb[37].mxu0  ;;  %v11615_v28 = vpop.f32.mrb[54].mxu1 }
 0x393   : > { %14329 = vst [vmem:[#allocation20_spill] sm:$0xff] %v11613_v35  ;;  %v3670_v23 = vadd.f32 %v3669_v21, %v3613_v58  ;;  %v3581_v46 = vadd.f32 %v3580_v20, %v11613_v35  ;;  %v3616_v61 = vmul.f32 %v11613_v35, %v11613_v35  ;;  %v3519_v27 = vadd.f32 %v3518_v63, %v11615_v28  ;;  %v11621_v38 = vpop.f32.mrb[38].mxu0  ;;  %v11623_v13 = vpop.f32.mrb[55].mxu1 }
 0x394   : > { %14330 = vst [vmem:[#allocation23_spill] sm:$0xff] %v11621_v38  ;;  %v3712_v48 = vadd.f32 %v3711_v14, %v3615_v53  ;;  %v3691_v50 = vadd.f32 %v3690_v31, %v3614_v15  ;;  %v3617_v37 = vmul.f32 %v11615_v28, %v11615_v28  ;;  %v3561_v41 = vadd.f32 %v3560_v6, %v11621_v38  ;;  %v11628_v59 = vpop.f32.mrb[39].mxu0  ;;  %v9547_v53 = vld [vmem:[#allocation8 + $0x15c] ss:$28 sps:$4 sm:$0xff]  }
 0x395   : > { %14331 = vst [vmem:[#allocation25_spill] sm:$0xff] %v11628_v59  ;;  %v3733_v11 = vadd.f32 %v3732_v10, %v3616_v61  ;;  %v3619_v49 = vmul.f32 %v11621_v38, %v11621_v38  ;;  %v3540_v17 = vadd.f32 %v3539_v47, %v11623_v13  ;;  %v3618_v36 = vmul.f32 %v11623_v13, %v11623_v13  ;;  %v9544_v10 = vld [vmem:[#allocation8 + $0x154] ss:$28 sps:$4 sm:$0xff]  }
 0x396   : > { %v3671_v44 = vadd.f32 %v3670_v23, %v3617_v37  ;;  %v3582_v12 = vadd.f32 %v3581_v46, %v11628_v59  ;;  %v3620_v34 = vmul.f32 %v11628_v59, %v11628_v59  ;;  %5681 = vmatprep.subr.bf16.mxu1 %v9544_v10  ;;  %5907 = vmatprep.subr.bf16.mxu0 %v9547_v53 }
 0x397   : > { %v3713_v62 = vadd.f32 %v3712_v48, %v3619_v49  ;;  %v3692_v5 = vadd.f32 %v3691_v50, %v3618_v36  ;;  %v9542_v48 = vld [vmem:[#allocation8 + $0x150] ss:$28 sps:$4 sm:$0xff]  }
 0x398   : > { %v3734_v45 = vadd.f32 %v3733_v11, %v3620_v34  ;;  %v11638_v43 = vpop.f32.mrb[56].mxu1  ;;  %v9545_v11 = vld [vmem:[#allocation8 + $0x158] ss:$28 sps:$4 sm:$0xff]   ;;  %v9550_v36 = vld [vmem:[#allocation8 + $0x18c] ss:$28 sps:$4 sm:$0xff]   ;;  %5682 = vmatpush1.bf16.msra.mxu1 %v9542_v48 }
 0x399   : > { %v3520_v24 = vadd.f32 %v3519_v27, %v11638_v43  ;;  %v3621_v33 = vmul.f32 %v11638_v43, %v11638_v43  ;;  %v11643_v7 = vpop.f32.mrb[40].mxu0  ;;  %v11645_v55 = vpop.f32.mrb[57].mxu1  ;;  %5908 = vmatpush1.bf16.msra.mxu0 %v9545_v11  ;;  %5683 = vmatprep.subr.bf16.mxu1 %v9550_v36  ;;  %v9554_v48 = vld [vmem:[#allocation8 + $0x1c0] ss:$28 sps:$4 sm:$0xff]   ;;  %v9557_v11 = vld [vmem:[#allocation8 + $0x1c8] ss:$28 sps:$4 sm:$0xff]  }
 0x39a   : > { %14332 = vst [vmem:[#allocation22_spill] sm:$0xff] %v11643_v7  ;;  %v3562_v21 = vadd.f32 %v3561_v41, %v11643_v7  ;;  %v3623_v20 = vmul.f32 %v11643_v7, %v11643_v7  ;;  %v3541_v22 = vadd.f32 %v3540_v17, %v11645_v55  ;;  %v3622_v30 = vmul.f32 %v11645_v55, %v11645_v55  ;;  %v11653_v14 = vpop.f32.mrb[41].mxu0  ;;  %v11655_v31 = vpop.f32.mrb[58].mxu1  ;;  %v9562_v36 = vld [vmem:[#allocation8 + $0x1fc] ss:$28 sps:$4 sm:$0xff]  }
 0x39b   : > { %14333 = vst [vmem:[#allocation24_spill] sm:$0xff] %v11653_v14  ;;  %v3672_v1 = vadd.f32 %v3671_v44, %v3621_v33  ;;  %v3583_v18 = vadd.f32 %v3582_v12, %v11653_v14  ;;  %v3624_v63 = vmul.f32 %v11653_v14, %v11653_v14  ;;  %v3521_v58 = vadd.f32 %v3520_v24, %v11655_v31  ;;  %v11661_v8 = vpop.f32.mrb[42].mxu0  ;;  %v11663_v6 = vpop.f32.mrb[59].mxu1  ;;  %v9553_v12 = vld [vmem:[#allocation8 + $0x194] ss:$28 sps:$4 sm:$0xff]  }
 0x39c   : > { %14334 = vst [vmem:[#allocation30_spill] sm:$0xff] %v11661_v8  ;;  %v3714_v47 = vadd.f32 %v3713_v62, %v3623_v20  ;;  %v3693_v15 = vadd.f32 %v3692_v5, %v3622_v30  ;;  %v3625_v3 = vmul.f32 %v11655_v31, %v11655_v31  ;;  %v3563_v26 = vadd.f32 %v3562_v21, %v11661_v8  ;;  %v11668_v23 = vpop.f32.mrb[43].mxu0  ;;  %v9551_v20 = vld [vmem:[#allocation8 + $0x190] ss:$28 sps:$4 sm:$0xff]  }
 0x39d   : > { %14335 = vst [vmem:[#allocation33_spill] sm:$0xff] %v11668_v23  ;;  %v3735_v46 = vadd.f32 %v3734_v45, %v3624_v63  ;;  %v3627_v61 = vmul.f32 %v11661_v8, %v11661_v8  ;;  %v3542_v27 = vadd.f32 %v3541_v22, %v11663_v6  ;;  %v3626_v57 = vmul.f32 %v11663_v6, %v11663_v6  ;;  %v9556_v22 = vld [vmem:[#allocation8 + $0x1c4] ss:$28 sps:$4 sm:$0xff]   ;;  %v9607_v14 = vld [vmem:[#allocation8 + $0x38c] ss:$28 sps:$4 sm:$0xff]  }
 0x39e   : > { %v3673_v50 = vadd.f32 %v3672_v1, %v3625_v3  ;;  %v3584_v37 = vadd.f32 %v3583_v18, %v11668_v23  ;;  %v3628_v41 = vmul.f32 %v11668_v23, %v11668_v23  ;;  %5909 = vmatprep.subr.bf16.mxu0 %v9553_v12  ;;  %5684 = vmatpush1.bf16.msra.mxu1 %v9548_v56  ;;  %v9601_v23 = vld [vmem:[#allocation8 + $0x354] ss:$28 sps:$4 sm:$0xff]  }
 0x39f   : > { %v3715_v49 = vadd.f32 %v3714_v47, %v3627_v61  ;;  %v3694_v17 = vadd.f32 %v3693_v15, %v3626_v57  ;;  %5910 = vmatpush1.bf16.msra.mxu0 %v9551_v20  ;;  %5685 = vmatprep.subr.bf16.mxu1 %v9556_v22 }
 0x3a0   : > { %v3736_v4 = vadd.f32 %v3735_v46, %v3628_v41  ;;  %v11678_v44 = vpop.f32.mrb[60].mxu1 }
 0x3a1   : > { %v3522_v34 = vadd.f32 %v3521_v58, %v11678_v44  ;;  %v3629_v40 = vmul.f32 %v11678_v44, %v11678_v44  ;;  %v11683_v62 = vpop.f32.mrb[44].mxu0  ;;  %v11685_v5 = vpop.f32.mrb[61].mxu1  ;;  %v9559_v58 = vld [vmem:[#allocation8 + $0x1cc] ss:$28 sps:$4 sm:$0xff]  }
 0x3a2   : > { %14336 = vst [vmem:[#allocation28_spill] sm:$0xff] %v11683_v62  ;;  %v3564_v45 = vadd.f32 %v3563_v26, %v11683_v62  ;;  %v3631_v51 = vmul.f32 %v11683_v62, %v11683_v62  ;;  %v3543_v24 = vadd.f32 %v3542_v27, %v11685_v5  ;;  %v3630_v33 = vmul.f32 %v11685_v5, %v11685_v5  ;;  %v11693_v0 = vpop.f32.mrb[45].mxu0  ;;  %v11695_v21 = vpop.f32.mrb[62].mxu1 }
 0x3a3   : > { %14337 = vst [vmem:[#allocation32_spill] sm:$0xff] %v11693_v0  ;;  %v3674_v30 = vadd.f32 %v3673_v50, %v3629_v40  ;;  %v3585_v32 = vadd.f32 %v3584_v37, %v11693_v0  ;;  %v3632_v10 = vmul.f32 %v11693_v0, %v11693_v0  ;;  %v3523_v1 = vadd.f32 %v3522_v34, %v11695_v21  ;;  %v11701_v18 = vpop.f32.mrb[46].mxu0  ;;  %v11703_v63 = vpop.f32.mrb[63].mxu1  ;;  %v9565_v34 = vld [vmem:[#allocation8 + $0x204] ss:$28 sps:$4 sm:$0xff]  }
 0x3a4   : > { %14338 = vst [vmem:[#allocation38_spill] sm:$0xff] %v11701_v18  ;;  %v3716_v53 = vadd.f32 %v3715_v49, %v3631_v51  ;;  %v3695_v47 = vadd.f32 %v3694_v17, %v3630_v33  ;;  %v3633_v15 = vmul.f32 %v11695_v21, %v11695_v21  ;;  %v3565_v3 = vadd.f32 %v3564_v45, %v11701_v18  ;;  %v11708_v26 = vpop.f32.mrb[47].mxu0  ;;  %v9595_v0 = vld [vmem:[#allocation8 + $0x31c] ss:$28 sps:$4 sm:$0xff]  }
 0x3a5   : > { %14339 = vst [vmem:[#allocation41_spill] sm:$0xff] %v11708_v26  ;;  %v3737_v46 = vadd.f32 %v3736_v4, %v3632_v10  ;;  %v3635_v61 = vmul.f32 %v11701_v18, %v11701_v18  ;;  %v3544_v27 = vadd.f32 %v3543_v24, %v11703_v63  ;;  %v3634_v57 = vmul.f32 %v11703_v63, %v11703_v63  ;;  %v9560_v24 = vld [vmem:[#allocation8 + $0x1f8] ss:$28 sps:$4 sm:$0xff]  }
 0x3a6   : > { %v3675_v50 = vadd.f32 %v3674_v30, %v3633_v15  ;;  %v3586_v37 = vadd.f32 %v3585_v32, %v11708_v26  ;;  %v3636_v41 = vmul.f32 %v11708_v26, %v11708_v26  ;;  %5911 = vmatprep.subr.bf16.mxu0 %v9559_v58  ;;  %5686 = vmatpush1.bf16.msra.mxu1 %v9554_v48  ;;  %v9568_v58 = vld [vmem:[#allocation8 + $0x234] ss:$28 sps:$4 sm:$0xff]   ;;  %v9589_v26 = vld [vmem:[#allocation8 + $0x2e4] ss:$28 sps:$4 sm:$0xff]  }
 0x3a7   : > { %v3717_v49 = vadd.f32 %v3716_v53, %v3635_v61  ;;  %v3696_v17 = vadd.f32 %v3695_v47, %v3634_v57  ;;  %5912 = vmatpush1.bf16.msra.mxu0 %v9557_v11  ;;  %5687 = vmatprep.subr.bf16.mxu1 %v9562_v36 }
 0x3a8   : > { %v3738_v4 = vadd.f32 %v3737_v46, %v3636_v41  ;;  %v11718_v12 = vpop.f32.mrb[64].mxu1  ;;  %5913 = vmatprep.subr.bf16.mxu0 %v9565_v34  ;;  %v9569_v34 = vld [vmem:[#allocation8 + $0x238] ss:$28 sps:$4 sm:$0xff]  }
 0x3a9   : > { %v3524_v40 = vadd.f32 %v3523_v1, %v11718_v12  ;;  %v3637_v56 = vmul.f32 %v11718_v12, %v11718_v12  ;;  %v11723_v45 = vpop.f32.mrb[48].mxu0  ;;  %v11725_v51 = vpop.f32.mrb[65].mxu1  ;;  %v9563_v1 = vld [vmem:[#allocation8 + $0x200] ss:$28 sps:$4 sm:$0xff]  }
 0x3aa   : > { %14340 = vst [vmem:[#allocation36_spill] sm:$0xff] %v11723_v45  ;;  %v3566_v33 = vadd.f32 %v3565_v3, %v11723_v45  ;;  %v3639_v20 = vmul.f32 %v11723_v45, %v11723_v45  ;;  %v3545_v22 = vadd.f32 %v3544_v27, %v11725_v51  ;;  %v3638_v30 = vmul.f32 %v11725_v51, %v11725_v51  ;;  %v11733_v32 = vpop.f32.mrb[49].mxu0  ;;  %v11735_v10 = vpop.f32.mrb[66].mxu1  ;;  %v9571_v27 = vld [vmem:[#allocation8 + $0x23c] ss:$28 sps:$4 sm:$0xff]  }
 0x3ab   : > { %14341 = vst [vmem:[#allocation40_spill] sm:$0xff] %v11733_v32  ;;  %v3676_v53 = vadd.f32 %v3675_v50, %v3637_v56  ;;  %v3587_v47 = vadd.f32 %v3586_v37, %v11733_v32  ;;  %v3640_v15 = vmul.f32 %v11733_v32, %v11733_v32  ;;  %v3525_v3 = vadd.f32 %v3524_v40, %v11735_v10  ;;  %v11741_v46 = vpop.f32.mrb[50].mxu0  ;;  %v11743_v61 = vpop.f32.mrb[67].mxu1  ;;  %v9577_v45 = vld [vmem:[#allocation8 + $0x274] ss:$28 sps:$4 sm:$0xff]  }
 0x3ac   : > { %14342 = vst [vmem:[#allocation46_spill] sm:$0xff] %v11741_v46  ;;  %v3718_v57 = vadd.f32 %v3717_v49, %v3639_v20  ;;  %v3697_v48 = vadd.f32 %v3696_v17, %v3638_v30  ;;  %v3641_v41 = vmul.f32 %v11735_v10, %v11735_v10  ;;  %v3567_v50 = vadd.f32 %v3566_v33, %v11741_v46  ;;  %v11748_v11 = vpop.f32.mrb[51].mxu0  ;;  %v9566_v49 = vld [vmem:[#allocation8 + $0x230] ss:$28 sps:$4 sm:$0xff]  }
 0x3ad   : > { %14343 = vst [vmem:[#allocation44_spill] sm:$0xff] %v11748_v11  ;;  %v3739_v37 = vadd.f32 %v3738_v4, %v3640_v15  ;;  %v3643_v40 = vmul.f32 %v11741_v46, %v11741_v46  ;;  %v3546_v56 = vadd.f32 %v3545_v22, %v11743_v61  ;;  %v3642_v36 = vmul.f32 %v11743_v61, %v11743_v61  ;;  %v9574_v15 = vld [vmem:[#allocation8 + $0x26c] ss:$28 sps:$4 sm:$0xff]  }
 0x3ae   : > { %5688 = vmatpush1.bf16.msra.mxu1 %v9560_v24  ;;  %v3677_v17 = vadd.f32 %v3676_v53, %v3641_v41  ;;  %v3588_v20 = vadd.f32 %v3587_v47, %v11748_v11  ;;  %v3644_v33 = vmul.f32 %v11748_v11, %v11748_v11  ;;  %5914 = vmatpush1.bf16.msra.mxu0 %v9563_v1  ;;  %v9572_v1 = vld [vmem:[#allocation8 + $0x268] ss:$28 sps:$4 sm:$0xff]  }
 0x3af   : > { %5689 = vmatprep.subr.bf16.mxu1 %v9568_v58  ;;  %v3719_v4 = vadd.f32 %v3718_v57, %v3643_v40  ;;  %v3698_v30 = vadd.f32 %v3697_v48, %v3642_v36  ;;  %5915 = vmatprep.subr.bf16.mxu0 %v9571_v27  ;;  %v9575_v40 = vld [vmem:[#allocation8 + $0x270] ss:$28 sps:$4 sm:$0xff]   ;;  %v9580_v36 = vld [vmem:[#allocation8 + $0x2a4] ss:$28 sps:$4 sm:$0xff]  }
 0x3b0   : > { %v3740_v46 = vadd.f32 %v3739_v37, %v3644_v33  ;;  %v11758_v22 = vpop.f32.mrb[68].mxu1  ;;  %v9583_v32 = vld [vmem:[#allocation8 + $0x2ac] ss:$28 sps:$4 sm:$0xff]  }
 0x3b1   : > { %v3526_v24 = vadd.f32 %v3525_v3, %v11758_v22  ;;  %v3645_v53 = vmul.f32 %v11758_v22, %v11758_v22  ;;  %v11763_v47 = vpop.f32.mrb[52].mxu0  ;;  %v11765_v41 = vpop.f32.mrb[69].mxu1 }
 0x3b2   : > { %14344 = vst [vmem:[#allocation48_spill] sm:$0xff] %v11763_v47  ;;  %5690 = vmatpush1.bf16.msra.mxu1 %v9566_v49  ;;  %v3568_v58 = vadd.f32 %v3567_v50, %v11763_v47  ;;  %v3647_v27 = vmul.f32 %v11763_v47, %v11763_v47  ;;  %v3547_v57 = vadd.f32 %v3546_v56, %v11765_v41  ;;  %v11773_v3 = vpop.f32.mrb[53].mxu0  ;;  %v11775_v37 = vpop.f32.mrb[70].mxu1 }
 0x3b3   : > { %v3646_v48 = vmul.f32 %v11765_v41, %v11765_v41  ;;  %14345 = vst [vmem:[#allocation53_spill] sm:$0xff] %v11773_v3  ;;  %5916 = vmatpush1.bf16.msra.mxu0 %v9569_v34  ;;  %v3678_v33 = vadd.f32 %v3677_v17, %v3645_v53  ;;  %v3589_v49 = vadd.f32 %v3588_v20, %v11773_v3  ;;  %v11781_v11 = vpop.f32.mrb[54].mxu0  ;;  %v11783_v56 = vpop.f32.mrb[71].mxu1 }
 0x3b4   : > { %v3648_v50 = vmul.f32 %v11773_v3, %v11773_v3  ;;  %v3527_v47 = vadd.f32 %v3526_v24, %v11775_v37  ;;  %14346 = vst [vmem:[#allocation55_spill] sm:$0xff] %v11781_v11  ;;  %5691 = vmatprep.subr.bf16.mxu1 %v9574_v15  ;;  %v3720_v18 = vadd.f32 %v3719_v4, %v3647_v27  ;;  %v11788_v53 = vpop.f32.mrb[55].mxu0  ;;  %v9578_v4 = vld [vmem:[#allocation8 + $0x2a0] ss:$28 sps:$4 sm:$0xff]  }
 0x3b5   : > { %v3699_v62 = vadd.f32 %v3698_v30, %v3646_v48  ;;  %v3649_v34 = vmul.f32 %v11775_v37, %v11775_v37  ;;  %v3569_v17 = vadd.f32 %v3568_v58, %v11781_v11  ;;  %14347 = vst [vmem:[#allocation51_spill] sm:$0xff] %v11788_v53  ;;  %5917 = vmatprep.subr.bf16.mxu0 %v9577_v45  ;;  %v9581_v45 = vld [vmem:[#allocation8 + $0x2a8] ss:$28 sps:$4 sm:$0xff]  }
 0x3b6   : > { %v3741_v20 = vadd.f32 %v3740_v46, %v3648_v50  ;;  %v3651_v24 = vmul.f32 %v11781_v11, %v11781_v11  ;;  %v3548_v3 = vadd.f32 %v3547_v57, %v11783_v56  ;;  %v3650_v15 = vmul.f32 %v11783_v56, %v11783_v56  ;;  %5692 = vmatpush1.bf16.msra.mxu1 %v9572_v1  ;;  %v9586_v50 = vld [vmem:[#allocation8 + $0x2dc] ss:$28 sps:$4 sm:$0xff]  }
 0x3b7   : > { %v3679_v30 = vadd.f32 %v3678_v33, %v3649_v34  ;;  %v3590_v27 = vadd.f32 %v3589_v49, %v11788_v53  ;;  %v3652_v58 = vmul.f32 %v11788_v53, %v11788_v53  ;;  %5918 = vmatpush1.bf16.msra.mxu0 %v9575_v40  ;;  %5693 = vmatprep.subr.bf16.mxu1 %v9580_v36  ;;  %v9584_v40 = vld [vmem:[#allocation8 + $0x2d8] ss:$28 sps:$4 sm:$0xff]  }
 0x3b8   : > { %v3721_v46 = vadd.f32 %v3720_v18, %v3651_v24  ;;  %v3700_v48 = vadd.f32 %v3699_v62, %v3650_v15  ;;  %5919 = vmatprep.subr.bf16.mxu0 %v9583_v32  ;;  %v11798_v57 = vpop.f32.mrb[72].mxu1  ;;  %v9587_v24 = vld [vmem:[#allocation8 + $0x2e0] ss:$28 sps:$4 sm:$0xff]   ;;  %v9592_v15 = vld [vmem:[#allocation8 + $0x314] ss:$28 sps:$4 sm:$0xff]  }
 0x3b9   : > { %v3742_v11 = vadd.f32 %v3741_v20, %v3652_v58  ;;  %v3528_v1 = vadd.f32 %v3527_v47, %v11798_v57  ;;  %v3653_v33 = vmul.f32 %v11798_v57, %v11798_v57  ;;  %v11803_v49 = vpop.f32.mrb[56].mxu0  ;;  %v11805_v34 = vpop.f32.mrb[73].mxu1 }
 0x3ba   : > { %14348 = vst [vmem:[#allocation54_spill] sm:$0xff] %v11803_v49  ;;  %5694 = vmatpush1.bf16.msra.mxu1 %v9578_v4  ;;  %v3570_v18 = vadd.f32 %v3569_v17, %v11803_v49  ;;  %v3655_v62 = vmul.f32 %v11803_v49, %v11803_v49  ;;  %v3549_v32 = vadd.f32 %v3548_v3, %v11805_v34  ;;  %v11813_v47 = vpop.f32.mrb[57].mxu0  ;;  %v11815_v20 = vpop.f32.mrb[74].mxu1 }
 0x3bb   : > { %v3654_v36 = vmul.f32 %v11805_v34, %v11805_v34  ;;  %14349 = vst [vmem:[#allocation57_spill] sm:$0xff] %v11813_v47  ;;  %5920 = vmatpush1.bf16.msra.mxu0 %v9581_v45  ;;  %v3680_v58 = vadd.f32 %v3679_v30, %v3653_v33  ;;  %v3591_v4 = vadd.f32 %v3590_v27, %v11813_v47  ;;  %v11821_v53 = vpop.f32.mrb[58].mxu0  ;;  %v11823_v3 = vpop.f32.mrb[75].mxu1 }
 0x3bc   : > { %v3656_v17 = vmul.f32 %v11813_v47, %v11813_v47  ;;  %v3529_v49 = vadd.f32 %v3528_v1, %v11815_v20  ;;  %14350 = vst [vmem:[#allocation59_spill] sm:$0xff] %v11821_v53  ;;  %5695 = vmatprep.subr.bf16.mxu1 %v9586_v50  ;;  %v3722_v8 = vadd.f32 %v3721_v46, %v3655_v62  ;;  %v11828_v33 = vpop.f32.mrb[59].mxu0  ;;  %v9590_v46 = vld [vmem:[#allocation8 + $0x310] ss:$28 sps:$4 sm:$0xff]  }
 0x3bd   : > { %v3701_v7 = vadd.f32 %v3700_v48, %v3654_v36  ;;  %v3657_v45 = vmul.f32 %v11815_v20, %v11815_v20  ;;  %v3571_v30 = vadd.f32 %v3570_v18, %v11821_v53  ;;  %14351 = vst [vmem:[#allocation56_spill] sm:$0xff] %v11828_v33  ;;  %5921 = vmatprep.subr.bf16.mxu0 %v9589_v26  ;;  %v9593_v26 = vld [vmem:[#allocation8 + $0x318] ss:$28 sps:$4 sm:$0xff]  }
 0x3be   : > { %v3743_v27 = vadd.f32 %v3742_v11, %v3656_v17  ;;  %v3659_v1 = vmul.f32 %v11821_v53, %v11821_v53  ;;  %v3550_v47 = vadd.f32 %v3549_v32, %v11823_v3  ;;  %v3658_v50 = vmul.f32 %v11823_v3, %v11823_v3  ;;  %5696 = vmatpush1.bf16.msra.mxu1 %v9584_v40  ;;  %v9598_v17 = vld [vmem:[#allocation8 + $0x34c] ss:$28 sps:$4 sm:$0xff]  }
 0x3bf   : > { %v3681_v48 = vadd.f32 %v3680_v58, %v3657_v45  ;;  %v3592_v62 = vadd.f32 %v3591_v4, %v11828_v33  ;;  %v3660_v18 = vmul.f32 %v11828_v33, %v11828_v33  ;;  %5922 = vmatpush1.bf16.msra.mxu0 %v9587_v24  ;;  %5697 = vmatprep.subr.bf16.mxu1 %v9592_v15  ;;  %v9596_v24 = vld [vmem:[#allocation8 + $0x348] ss:$28 sps:$4 sm:$0xff]  }
 0x3c0   : > { %v3723_v11 = vadd.f32 %v3722_v8, %v3659_v1  ;;  %v3702_v36 = vadd.f32 %v3701_v7, %v3658_v50  ;;  %5923 = vmatprep.subr.bf16.mxu0 %v9595_v0  ;;  %v11838_v32 = vpop.f32.mrb[76].mxu1  ;;  %v9599_v1 = vld [vmem:[#allocation8 + $0x350] ss:$28 sps:$4 sm:$0xff]   ;;  %v9604_v50 = vld [vmem:[#allocation8 + $0x384] ss:$28 sps:$4 sm:$0xff]  }
 0x3c1   : > { %v3744_v53 = vadd.f32 %v3743_v27, %v3660_v18  ;;  %14352 = vst [vmem:[#allocation58_spill] sm:$0xff] %v11838_v32  ;;  %v3530_v40 = vadd.f32 %v3529_v49, %v11838_v32  ;;  %v3661_v58 = vmul.f32 %v11838_v32, %v11838_v32  ;;  %v11843_v4 = vpop.f32.mrb[60].mxu0  ;;  %v11845_v45 = vpop.f32.mrb[77].mxu1 }
 0x3c2   : > { %14353 = vst [vmem:[#allocation61_spill] sm:$0xff] %v11843_v4  ;;  %5698 = vmatpush1.bf16.msra.mxu1 %v9590_v46  ;;  %v3572_v8 = vadd.f32 %v3571_v30, %v11843_v4  ;;  %v3663_v7 = vmul.f32 %v11843_v4, %v11843_v4  ;;  %v3551_v0 = vadd.f32 %v3550_v47, %v11845_v45  ;;  %v11853_v49 = vpop.f32.mrb[61].mxu0  ;;  %v11855_v27 = vpop.f32.mrb[78].mxu1 }
 0x3c3   : > { %v3662_v15 = vmul.f32 %v11845_v45, %v11845_v45  ;;  %14354 = vst [vmem:[#allocation63_spill] sm:$0xff] %v11853_v49  ;;  %14355 = vst [vmem:[#allocation60_spill] sm:$0xff] %v11855_v27  ;;  %5924 = vmatpush1.bf16.msra.mxu0 %v9593_v26  ;;  %v3682_v18 = vadd.f32 %v3681_v48, %v3661_v58  ;;  %v3593_v46 = vadd.f32 %v3592_v62, %v11853_v49  ;;  %v11861_v33 = vpop.f32.mrb[62].mxu0  ;;  %v11863_v47 = vpop.f32.mrb[79].mxu1 }
 0x3c4   : > { %v3664_v30 = vmul.f32 %v11853_v49, %v11853_v49  ;;  %v3531_v4 = vadd.f32 %v3530_v40, %v11855_v27  ;;  %14356 = vst [vmem:[#allocation62_spill] sm:$0xff] %v11861_v33  ;;  %14357 = vst [vmem:[#allocation65_spill] sm:$0xff] %v11863_v47  ;;  %5699 = vmatprep.subr.bf16.mxu1 %v9598_v17  ;;  %v3724_v38 = vadd.f32 %v3723_v11, %v3663_v7  ;;  %v11868_v58 = vpop.f32.mrb[63].mxu0 }
 0x3c5   : > { %v3703_v9 = vadd.f32 %v3702_v36, %v3662_v15  ;;  %v3665_v26 = vmul.f32 %v11855_v27, %v11855_v27  ;;  %v3573_v48 = vadd.f32 %v3572_v8, %v11861_v33  ;;  %5925 = vmatprep.subr.bf16.mxu0 %v9601_v23  ;;  %v3667_v40 = vmul.f32 %v11861_v33, %v11861_v33 }
 0x3c6   : > { %v3745_v62 = vadd.f32 %v3744_v53, %v3664_v30  ;;  %v3532_v49 = vrot.slane %v3531_v4, 4  ;;  %v3552_v59 = vadd.f32 %v3551_v0, %v11863_v47  ;;  %5700 = vmatpush1.bf16.msra.mxu1 %v9596_v24  ;;  %v3666_v11 = vmul.f32 %v11863_v47, %v11863_v47 }
 0x3c7   : > { %v3683_v17 = vadd.f32 %v3682_v18, %v3665_v26  ;;  %v3574_v35 = vrot.slane %v3573_v48, 4  ;;  %v3594_v36 = vadd.f32 %v3593_v46, %v11868_v58  ;;  %5926 = vmatpush1.bf16.msra.mxu0 %v9599_v1  ;;  %5782 = vmatprep.subr.bf16.mxu1 %v9604_v50  ;;  %v3725_v7 = vadd.f32 %v3724_v38, %v3667_v40 }
 0x3c8   : > { %v3533_v8 = vadd.f32 %v3532_v49, %v3531_v4  ;;  %v3553_v23 = vrot.slane %v3552_v59, 4  ;;  %v3668_v53 = vmul.f32 %v11868_v58, %v11868_v58  ;;  %6008 = vmatprep.subr.bf16.mxu0 %v9607_v14  ;;  %v3704_v0 = vadd.f32 %v3703_v9, %v3666_v11 }
 0x3c9   : > { %v3684_v15 = vrot.slane %v3683_v17, 4  ;;  %v3575_v30 = vadd.f32 %v3574_v35, %v3573_v48  ;;  %v3595_v24 = vrot.slane %v3594_v36, 4  ;;  %v3726_v26 = vrot.slane %v3725_v7, 4 }
 0x3ca   : > { %v3534_v18 = vrot.slane %v3533_v8, 2  ;;  %v3554_v33 = vadd.f32 %v3553_v23, %v3552_v59  ;;  %v3746_v54 = vadd.f32 %v3745_v62, %v3668_v53  ;;  %v3705_v46 = vrot.slane %v3704_v0, 4 }
 0x3cb   : > { %v3685_v2 = vadd.f32 %v3684_v15, %v3683_v17  ;;  %v3576_v42 = vrot.slane %v3575_v30, 2  ;;  %v3596_v1 = vadd.f32 %v3595_v24, %v3594_v36  ;;  %v3727_v4 = vadd.f32 %v3726_v26, %v3725_v7 }
 0x3cc   : > { %v3535_v50 = vadd.f32 %v3534_v18, %v3533_v8  ;;  %v3555_v38 = vrot.slane %v3554_v33, 2  ;;  %v3747_v49 = vrot.slane %v3746_v54, 4  ;;  %v3706_v27 = vadd.f32 %v3705_v46, %v3704_v0 }
 0x3cd   : > { %v3686_v40 = vrot.slane %v3685_v2, 2  ;;  %v3577_v39 = vadd.f32 %v3576_v42, %v3575_v30  ;;  %v3597_v14 = vrot.slane %v3596_v1, 2  ;;  %v3728_v35 = vrot.slane %v3727_v4, 2 }
 0x3ce   : > { %v3536_v32 = vrot.slane %v3535_v50, 1  ;;  %v3556_v9 = vadd.f32 %v3555_v38, %v3554_v33  ;;  %v3748_v48 = vadd.f32 %v3747_v49, %v3746_v54  ;;  %v3707_v59 = vrot.slane %v3706_v27, 2 }
 0x3cf   : > { %v3687_v11 = vadd.f32 %v3686_v40, %v3685_v2  ;;  %v3578_v47 = vrot.slane %v3577_v39, 1  ;;  %v3598_v62 = vadd.f32 %v3597_v14, %v3596_v1  ;;  %v3729_v23 = vadd.f32 %v3728_v35, %v3727_v4 }
 0x3d0   : > { %v3537_v17 = vadd.f32 %v3536_v32, %v3535_v50  ;;  %v3557_v53 = vrot.slane %v3556_v9, 1  ;;  %v3749_v36 = vrot.slane %v3748_v48, 2  ;;  %v3708_v15 = vadd.f32 %v3707_v59, %v3706_v27 }
 0x3d1   : > { %v3688_v8 = vrot.slane %v3687_v11, 1  ;;  %v3579_v7 = vadd.f32 %v3578_v47, %v3577_v39  ;;  %v3599_v24 = vrot.slane %v3598_v62, 1  ;;  %v3730_v42 = vrot.slane %v3729_v23, 1 }
 0x3d2   : > { %v3601_v18 = vmul.f32 0.0078125, %v3537_v17  ;;  %v3558_v30 = vadd.f32 %v3557_v53, %v3556_v9  ;;  %v3750_v0 = vadd.f32 %v3749_v36, %v3748_v48  ;;  %v3709_v33 = vrot.slane %v3708_v15, 1 }
 0x3d3   : > { %v3689_v26 = vadd.f32 %v3688_v8, %v3687_v11  ;;  %v3603_v46 = vmul.f32 0.0078125, %v3579_v7  ;;  %v3600_v54 = vadd.f32 %v3599_v24, %v3598_v62  ;;  %v3731_v38 = vadd.f32 %v3730_v42, %v3729_v23 }
 0x3d4   : > { %v3757_v2 = vmul.f32 %v3601_v18, %v3601_v18  ;;  %v3602_v49 = vmul.f32 0.0078125, %v3558_v30  ;;  %v3751_v1 = vrot.slane %v3750_v0, 1  ;;  %v3710_v4 = vadd.f32 %v3709_v33, %v3708_v15  ;;  %v11878_v30 = vld [vmem:[#allocation10 + $0x10] sm:$0xff] }
 0x3d5   : > { %v3753_v32 = vmul.f32 0.0078125, %v3689_v26  ;;  %v3759_v50 = vmul.f32 %v3603_v46, %v3603_v46  ;;  %v3604_v40 = vmul.f32 0.0078125, %v3600_v54  ;;  %v3755_v14 = vmul.f32 0.0078125, %v3731_v38  ;;  %14358 = vst [vmem:[#allocation64_spill] sm:$0xff] %v11878_v30  ;;  %v10082_v54 = vld [vmem:[#allocation10 + $0x8] sm:$0xff] }
 0x3d6   : > { %v3758_v39 = vmul.f32 %v3602_v49, %v3602_v49  ;;  %v3752_v27 = vadd.f32 %v3751_v1, %v3750_v0  ;;  %v3754_v35 = vmul.f32 0.0078125, %v3710_v4  ;;  %v14129_v1 = vrot.slane %v11878_v30, 2  ;;  %v9610_v30 = vld [vmem:[#allocation8 + $0x3bc] ss:$28 sps:$4 sm:$0xff]  }
 0x3d7   : > { %v3761_v47 = vsub.f32 %v3753_v32, %v3757_v2  ;;  %v3760_v59 = vmul.f32 %v3604_v40, %v3604_v40  ;;  %v3763_v9 = vsub.f32 %v3755_v14, %v3759_v50  ;;  %v3779_v2 = vrot.slane %v10082_v54, 2  ;;  %v14359_v50 = vld [vmem:[#allocation67_spill] sm:$0xff] }
 0x3d8   : > { %v3756_v48 = vmul.f32 0.0078125, %v3752_v27  ;;  %v3762_v17 = vsub.f32 %v3754_v35, %v3758_v39  ;;  %v14360_v35 = vld [vmem:[#allocation68_spill] sm:$0xff] }
 0x3d9   : > { %v3765_v11 = vmax.f32 %v3761_v47, 0.0  ;;  %v3767_v53 = vmax.f32 %v3763_v9, 0.0  ;;  %v3782_v39 = vsel %vm3781_vm0, %v3779_v2, %v14129_v1  ;;  %v14361_v9 = vld [vmem:[#allocation69_spill] sm:$0xff] }
 0x3da   : > { %v3764_v62 = vsub.f32 %v3756_v48, %v3760_v59  ;;  %v3766_v23 = vmax.f32 %v3762_v17, 0.0 }
 0x3db   : > { %v3769_v36 = vadd.f32 1e-05, %v3765_v11  ;;  %v3771_v8 = vadd.f32 1e-05, %v3767_v53  ;;  %v14362_v11 = vld [vmem:[#allocation70_spill] sm:$0xff]  ;;  %v14363_v53 = vld [vmem:[#allocation71_spill] sm:$0xff] }
 0x3dc   : > { %v3768_v7 = vmax.f32 %v3764_v62, 0.0  ;;  %v3770_v24 = vadd.f32 1e-05, %v3766_v23 }
 0x3dd   : > { %9836 = vrsqrt.f32 %v3769_v36 }
 0x3de   : > { %9838 = vrsqrt.f32 %v3771_v8  ;;  %v3772_v15 = vadd.f32 1e-05, %v3768_v7 }
 0x3df   : > { %9840 = vrsqrt.f32 %v3770_v24 }
 0x3e0   : > { %9842 = vrsqrt.f32 %v3772_v15 }
 0x3e7   : > { %v9837_v42 = vpop.eup %9836 }
 0x3e8   : > { %v9839_v0 = vpop.eup %9838 }
 0x3e9   : > { %v9841_v26 = vpop.eup %9840 }
 0x3ea   : > { %v9843_v33 = vpop.eup %9842  ;;  %v3788_v38 = vcombine.low %v9837_v42, %v9841_v26 }
 0x3eb   : > { %v3789_v32 = vcombine.low %v9839_v0, %v9843_v33 }
 0x3ec   : > { %v3796_v4 = vrot.slane %v3788_v38, %v14359_v50 }
 0x3ed   : > { %v3803_v14 = vrot.slane %v3789_v32, %v14359_v50 }
 0x3ef   : > { %v3804_v27 = vcombine.low %v3796_v4, %v3803_v14 }
 0x3f1   : > { %v3806_v47 = vmul.f32 %v3804_v27, %v3782_v39 }
 0x3f3   : > { %v3811_v59 = vrot.slane %v3806_v47, %v14360_v35  ;;  %v3815_v48 = vrot.slane %v3806_v47, %v14361_v9  ;;  %v3819_v17 = vrot.slane %v3806_v47, %v14362_v11  ;;  %v3823_v62 = vrot.slane %v3806_v47, %v14363_v53 }
 0x3f5   : > { %v3828_v36 = vmul.f32 %v3811_v59, %v3601_v18  ;;  %v3829_v23 = vmul.f32 %v3815_v48, %v3602_v49  ;;  %v3830_v8 = vmul.f32 %v3819_v17, %v3603_v46  ;;  %v3831_v7 = vmul.f32 %v3823_v62, %v3604_v40 }
 0x3f6   : > { %v3859_v24 = vrot.slane %v3811_v59, %v14360_v35  ;;  %v3863_v15 = vrot.slane %v3815_v48, %v14360_v35  ;;  %v11893_v42 = vrot.slane %v3823_v62, %v14360_v35  ;;  %v11896_v33 = vrot.slane %v3819_v17, %v14360_v35  ;;  %v14366_v48 = vld [vmem:[#allocation73_spill] sm:$0xff]  ;;  %v14367_v17 = vld [vmem:[#allocation75_spill] sm:$0xff] }
 0x3f7   : > { %v3836_v0 = vcombine.low %v3828_v36, %v3829_v23  ;;  %v3837_v26 = vcombine.low %v3830_v8, %v3831_v7 }
 0x3f8   : > { %v3935_v54 = vmul.f32 %v11893_v42, %v11868_v58  ;;  %v3873_v18 = vmul.f32 %v3863_v15, %v11562_v25  ;;  %v3877_v46 = vmul.f32 %v3863_v15, %v11580_v52  ;;  %v3872_v49 = vmul.f32 %v3859_v24, %v11558_v29 }
 0x3f9   : > { %v3844_v40 = vrot.slane %v3836_v0, %v14359_v50  ;;  %v3851_v2 = vrot.slane %v3837_v26, %v14359_v50  ;;  %v3876_v38 = vmul.f32 %v3859_v24, %v11568_v60  ;;  %v3881_v32 = vmul.f32 %v3863_v15, %v11605_v19  ;;  %v9613_v50 = vld [vmem:[#allocation8 + $0x3c4] ss:$28 sps:$4 sm:$0xff]  }
 0x3fa   : > { %v3885_v4 = vmul.f32 %v3863_v15, %v11623_v13  ;;  %v3880_v14 = vmul.f32 %v3859_v24, %v11598_v16  ;;  %v11910_v58 = vmul.f32 %v3859_v24, %v11615_v28  ;;  %v11913_v25 = vmul.f32 %v3863_v15, %v11645_v55 }
 0x3fb   : > { %v3852_v52 = vcombine.low %v3844_v40, %v3851_v2  ;;  %v11916_v29 = vmul.f32 %v3863_v15, %v11663_v6  ;;  %v11919_v27 = vmul.f32 %v3859_v24, %v11638_v43  ;;  %v11922_v60 = vmul.f32 %v3859_v24, %v11655_v31 }
 0x3fc   : > { %v11925_v19 = vmul.f32 %v3863_v15, %v11685_v5  ;;  %v11928_v16 = vmul.f32 %v3863_v15, %v11703_v63  ;;  %v11931_v28 = vmul.f32 %v3859_v24, %v11678_v44  ;;  %v11934_v13 = vmul.f32 %v3859_v24, %v11695_v21 }
 0x3fd   : > { %v3853_v55 = vrot.slane %v3852_v52, 7  ;;  %v11937_v6 = vmul.f32 %v3863_v15, %v11725_v51  ;;  %v11940_v43 = vmul.f32 %v3863_v15, %v11743_v61  ;;  %v11943_v31 = vmul.f32 %v3859_v24, %v11718_v12 }
 0x3fe   : > { %v11946_v5 = vmul.f32 %v3859_v24, %v11735_v10  ;;  %v11949_v63 = vmul.f32 %v3863_v15, %v11765_v41  ;;  %v11952_v44 = vmul.f32 %v3863_v15, %v11783_v56  ;;  %v11955_v21 = vmul.f32 %v3859_v24, %v11758_v22  ;;  %v14364_v22 = vld [vmem:[#allocation65_spill] sm:$0xff] }
 0x3ff   : > { %v3855_v51 = vsub.f32 %v3782_v39, %v3853_v55  ;;  %v11958_v47 = vmul.f32 %v3859_v24, %v11775_v37  ;;  %v11961_v61 = vmul.f32 %v3863_v15, %v11805_v34  ;;  %v11964_v12 = vmul.f32 %v3863_v15, %v11823_v3  ;;  %v14365_v37 = vld [vmem:[#allocation72_spill] sm:$0xff]  ;;  %v14368_v3 = vld [vmem:[#allocation58_spill] sm:$0xff]  ;;  %v14374_v55 = vld [vmem:[#allocation19_spill] sm:$0xff] }
 0x400   : > { %v11967_v10 = vmul.f32 %v3859_v24, %v11798_v57  ;;  %v11970_v41 = vmul.f32 %v3859_v24, %v11815_v20  ;;  %v11973_v56 = vmul.f32 %v3863_v15, %v11845_v45  ;;  %v11976_v39 = vmul.f32 %v3863_v15, %v14364_v22  ;;  %v14369_v57 = vld [vmem:[#allocation60_spill] sm:$0xff]  ;;  %v14370_v20 = vld [vmem:[#allocation17_spill] sm:$0xff]  ;;  %v14372_v15 = vld [vmem:[#allocation74_spill] sm:$0xff] }
 0x401   : > { %v3940_v59 = vrot.slane %v3855_v51, %v14365_v37  ;;  %v3944_v34 = vrot.slane %v3855_v51, %v14366_v48  ;;  %v3952_v62 = vrot.slane %v3855_v51, %v14367_v17  ;;  %v11982_v36 = vmul.f32 %v3859_v24, %v14368_v3  ;;  %v14371_v45 = vld [vmem:[#allocation21_spill] sm:$0xff]  ;;  %v14375_v3 = vld [vmem:[#allocation20_spill] sm:$0xff] }
 0x402   : > { %v11985_v23 = vmul.f32 %v3859_v24, %v14369_v57  ;;  %v11989_v8 = vmul.f32 %v11893_v42, %v14370_v20  ;;  %v11993_v7 = vmul.f32 %v11893_v42, %v14371_v45  ;;  %v3948_v0 = vrot.slane %v3855_v51, %v14372_v15  ;;  %v14373_v24 = vld [vmem:[#allocation16_spill] sm:$0xff] }
 0x403   : > { %v11997_v26 = vrot.slane %v3940_v59, %v14365_v37  ;;  %v12000_v40 = vrot.slane %v3944_v34, %v14365_v37  ;;  %v12003_v2 = vrot.slane %v3952_v62, %v14365_v37  ;;  %v12007_v52 = vmul.f32 %v11896_v33, %v14373_v24  ;;  %v14376_v59 = vld [vmem:[#allocation25_spill] sm:$0xff] }
 0x404   : > { %v12011_v22 = vmul.f32 %v11896_v33, %v14374_v55  ;;  %v12015_v51 = vmul.f32 %v11893_v42, %v14375_v3  ;;  %v12019_v57 = vmul.f32 %v11893_v42, %v14376_v59  ;;  %v12032_v59 = vrot.slane %v3948_v0, %v14365_v37  ;;  %v9602_v0 = vld [vmem:[#allocation8 + $0x380] ss:$28 sps:$4 sm:$0xff]   ;;  %v9605_v37 = vld [vmem:[#allocation8 + $0x388] ss:$28 sps:$4 sm:$0xff]  }
 0x405   : > { %v12022_v34 = vadd.f32 %v12003_v2, %v3935_v54  ;;  %v3974_v62 = vadd.f32 %v12000_v40, %v3873_v18  ;;  %v3978_v20 = vadd.f32 %v12000_v40, %v3877_v46  ;;  %v3973_v45 = vadd.f32 %v11997_v26, %v3872_v49 }
 0x406   : > { %v3977_v24 = vadd.f32 %v11997_v26, %v3876_v38  ;;  %v3982_v55 = vadd.f32 %v12000_v40, %v3881_v32  ;;  %v3986_v3 = vadd.f32 %v12000_v40, %v3885_v4  ;;  %v3981_v1 = vadd.f32 %v11997_v26, %v3880_v14 }
 0x407   : > { %vm4038_vm1 = vcmp.ge.f32.partialorder %v3974_v62, 0.0  ;;  %vm4042_vm2 = vcmp.ge.f32.partialorder %v3978_v20, 0.0  ;;  %v4102_v54 = vmul.f32 0.2, %v3974_v62  ;;  %v4106_v17 = vmul.f32 0.2, %v3978_v20 }
 0x408   : > { %vm4037_vm3 = vcmp.ge.f32.partialorder %v3973_v45, 0.0  ;;  %vm4041_vm4 = vcmp.ge.f32.partialorder %v3977_v24, 0.0  ;;  %v4101_v18 = vmul.f32 0.2, %v3973_v45  ;;  %v4105_v46 = vmul.f32 0.2, %v3977_v24 }
 0x409   : > { %vm4046_vm5 = vcmp.ge.f32.partialorder %v3982_v55, 0.0  ;;  %vm4050_vm6 = vcmp.ge.f32.partialorder %v3986_v3, 0.0  ;;  %v4166_v49 = vsel %vm4038_vm1, %v3974_v62, %v4102_v54  ;;  %v4170_v38 = vsel %vm4042_vm2, %v3978_v20, %v4106_v17 }
 0x40a   : > { %v4110_v32 = vmul.f32 0.2, %v3982_v55  ;;  %v4114_v15 = vmul.f32 0.2, %v3986_v3  ;;  %v12034_v4 = vpack.c.bf16 %v4170_v38, %v4166_v49  ;;  %v4165_v14 = vsel %vm4037_vm3, %v3973_v45, %v4101_v18  ;;  %v9617_v49 = vld [vmem:[#allocation8 + $0x3f8] ss:$28 sps:$4 sm:$0xff]  }
 0x40b   : > { %v4169_v48 = vsel %vm4041_vm4, %v3977_v24, %v4105_v46  ;;  %v3985_v53 = vadd.f32 %v11997_v26, %v11910_v58  ;;  %vm4045_vm7 = vcmp.ge.f32.partialorder %v3981_v1, 0.0  ;;  %v4109_v62 = vmul.f32 0.2, %v3981_v1  ;;  %v9614_v46 = vld [vmem:[#allocation8 + $0x3f0] ss:$28 sps:$4 sm:$0xff]  }
 0x40c   : > { %v12038_v11 = vpack.c.bf16 %v4169_v48, %v4165_v14  ;;  %v4174_v9 = vsel %vm4046_vm5, %v3982_v55, %v4110_v32  ;;  %v4178_v35 = vsel %vm4050_vm6, %v3986_v3, %v4114_v15  ;;  %5701 = vmatprep.mubr.bf16.mxu1 %v12034_v4  ;;  %5927 = vmatprep.mubr.bf16.mxu0 %v12034_v4  ;;  %v9616_v55 = vld [vmem:[#allocation8 + $0x3f4] ss:$28 sps:$4 sm:$0xff]  }
 0x40d   : > { %v12042_v17 = vpack.c.bf16 %v4178_v35, %v4174_v9  ;;  %vm4049_vm8 = vcmp.ge.f32.partialorder %v3985_v53, 0.0  ;;  %v4113_v20 = vmul.f32 0.2, %v3985_v53  ;;  %v3990_v58 = vadd.f32 %v12000_v40, %v11913_v25  ;;  %v9608_v35 = vld [vmem:[#allocation8 + $0x3b8] ss:$28 sps:$4 sm:$0xff]  }
 0x40e   : > { %5702 = vmatmul.mubr.bf16.vlgmr.msra.gmra.mrb[80].mxu1 %v12038_v11  ;;  %5928 = vmatmul.mubr.bf16.vlgmr.msra.gmra.mrb[64].mxu0 %v12038_v11  ;;  %v3994_v48 = vadd.f32 %v12000_v40, %v11916_v29  ;;  %v3989_v15 = vadd.f32 %v11997_v26, %v11919_v27  ;;  %v9611_v9 = vld [vmem:[#allocation8 + $0x3c0] ss:$28 sps:$4 sm:$0xff]   ;;  %v4173_v45 = vsel %vm4045_vm7, %v3981_v1, %v4109_v62 }
 0x40f   : > { %5711 = vmatprep.mubr.bf16.mxu1 %v12042_v17  ;;  %5783 = vmatpush1.bf16.msra.mxu1 %v9602_v0  ;;  %v4177_v24 = vsel %vm4049_vm8, %v3985_v53, %v4113_v20  ;;  %v3993_v3 = vadd.f32 %v11997_v26, %v11922_v60  ;;  %v9619_v29 = vld [vmem:[#allocation8 + $0x3fc] ss:$28 sps:$4 sm:$0xff]   ;;  %vm4054_vm9 = vcmp.ge.f32.partialorder %v3990_v58, 0.0  ;;  %v4118_v27 = vmul.f32 0.2, %v3990_v58 }
 0x410   : > { %5937 = vmatprep.mubr.bf16.mxu0 %v12042_v17  ;;  %6009 = vmatpush1.bf16.msra.mxu0 %v9605_v37  ;;  %v12057_v25 = vpack.c.bf16 %v4177_v24, %v4173_v45  ;;  %vm4058_vm10 = vcmp.ge.f32.partialorder %v3994_v48, 0.0  ;;  %v4122_v54 = vmul.f32 0.2, %v3994_v48  ;;  %vm4053_vm11 = vcmp.ge.f32.partialorder %v3989_v15, 0.0  ;;  %v9622_v0 = vld [vmem:[#allocation8 + $0x42c] ss:$28 sps:$4 sm:$0xff]  }
 0x411   : > { %5784 = vmatprep.subr.bf16.mxu1 %v9610_v30  ;;  %6010 = vmatprep.subr.bf16.mxu0 %v9613_v50  ;;  %vm4057_vm12 = vcmp.ge.f32.partialorder %v3993_v3, 0.0  ;;  %v4117_v1 = vmul.f32 0.2, %v3989_v15  ;;  %v4182_v53 = vsel %vm4054_vm9, %v3990_v58, %v4118_v27  ;;  %v4121_v18 = vmul.f32 0.2, %v3993_v3 }
 0x412   : > { %v3998_v60 = vadd.f32 %v12000_v40, %v11925_v19  ;;  %v4002_v37 = vadd.f32 %v12000_v40, %v11928_v16  ;;  %v4186_v38 = vsel %vm4058_vm10, %v3994_v48, %v4122_v54  ;;  %v3997_v30 = vadd.f32 %v11997_v26, %v11931_v28  ;;  %v9625_v19 = vld [vmem:[#allocation8 + $0x434] ss:$28 sps:$4 sm:$0xff]  }
 0x413   : > { %5785 = vmatpush1.bf16.msra.mxu1 %v9608_v35  ;;  %v4181_v32 = vsel %vm4053_vm11, %v3989_v15, %v4117_v1  ;;  %v4001_v50 = vadd.f32 %v11997_v26, %v11934_v13  ;;  %v12067_v14 = vpack.c.bf16 %v4186_v38, %v4182_v53  ;;  %v4185_v62 = vsel %vm4057_vm12, %v3993_v3, %v4121_v18  ;;  %v9620_v15 = vld [vmem:[#allocation8 + $0x428] ss:$28 sps:$4 sm:$0xff]   ;;  %v9623_v35 = vld [vmem:[#allocation8 + $0x430] ss:$28 sps:$4 sm:$0xff]   ;;  %v9634_v38 = vld [vmem:[#allocation8 + $0x49c] ss:$28 sps:$4 sm:$0xff]  }
 0x414   : > { %6011 = vmatpush1.bf16.msra.mxu0 %v9611_v9  ;;  %5786 = vmatprep.subr.bf16.mxu1 %v9616_v55  ;;  %vm4062_vm13 = vcmp.ge.f32.partialorder %v3998_v60, 0.0  ;;  %vm4066_vm14 = vcmp.ge.f32.partialorder %v4002_v37, 0.0  ;;  %v12070_v16 = vpack.c.bf16 %v4185_v62, %v4181_v32  ;;  %v4126_v20 = vmul.f32 0.2, %v3998_v60  ;;  %v9628_v55 = vld [vmem:[#allocation8 + $0x464] ss:$28 sps:$4 sm:$0xff]  }
 0x415   : > { %6012 = vmatprep.subr.bf16.mxu0 %v9619_v29  ;;  %v4130_v58 = vmul.f32 0.2, %v4002_v37  ;;  %vm4061_vm15 = vcmp.ge.f32.partialorder %v3997_v30, 0.0  ;;  %vm4065_vm1 = vcmp.ge.f32.partialorder %v4001_v50, 0.0  ;;  %v4125_v28 = vmul.f32 0.2, %v3997_v30 }
 0x416   : > { %5712 = vmatmul.mubr.bf16.gmra.mrb[84].mxu1 %v12057_v25  ;;  %5938 = vmatmul.mubr.bf16.gmra.mrb[68].mxu0 %v12057_v25  ;;  %v4129_v13 = vmul.f32 0.2, %v4001_v50  ;;  %v4006_v48 = vadd.f32 %v12000_v40, %v11937_v6  ;;  %v4190_v9 = vsel %vm4062_vm13, %v3998_v60, %v4126_v20  ;;  %v4010_v24 = vadd.f32 %v12000_v40, %v11940_v43  ;;  %v9631_v3 = vld [vmem:[#allocation8 + $0x46c] ss:$28 sps:$4 sm:$0xff]  }
 0x417   : > { %5721 = vmatprep.mubr.bf16.mxu1 %v12067_v14  ;;  %5787 = vmatpush1.bf16.msra.mxu1 %v9614_v46  ;;  %v4194_v45 = vsel %vm4066_vm14, %v4002_v37, %v4130_v58  ;;  %v4189_v6 = vsel %vm4061_vm15, %v3997_v30, %v4125_v28  ;;  %v4005_v43 = vadd.f32 %v11997_v26, %v11943_v31  ;;  %v9626_v46 = vld [vmem:[#allocation8 + $0x460] ss:$28 sps:$4 sm:$0xff]  }
 0x418   : > { %5947 = vmatprep.mubr.bf16.mxu0 %v12067_v14  ;;  %6013 = vmatpush1.bf16.msra.mxu0 %v9617_v49  ;;  %v12082_v29 = vpack.c.bf16 %v4194_v45, %v4190_v9  ;;  %v4193_v27 = vsel %vm4065_vm1, %v4001_v50, %v4129_v13  ;;  %vm4070_vm2 = vcmp.ge.f32.partialorder %v4006_v48, 0.0  ;;  %vm4074_vm3 = vcmp.ge.f32.partialorder %v4010_v24, 0.0  ;;  %v9629_v49 = vld [vmem:[#allocation8 + $0x468] ss:$28 sps:$4 sm:$0xff]  }
 0x419   : > { %5788 = vmatprep.subr.bf16.mxu1 %v9622_v0  ;;  %6014 = vmatprep.subr.bf16.mxu0 %v9625_v19  ;;  %v12086_v54 = vpack.c.bf16 %v4193_v27, %v4189_v6  ;;  %v4134_v1 = vmul.f32 0.2, %v4006_v48  ;;  %v4138_v53 = vmul.f32 0.2, %v4010_v24  ;;  %v4009_v18 = vadd.f32 %v11997_v26, %v11946_v5  ;;  %v9637_v5 = vld [vmem:[#allocation8 + $0x4a4] ss:$28 sps:$4 sm:$0xff]  }
 0x41a   : > { %v4014_v60 = vadd.f32 %v12000_v40, %v11949_v63  ;;  %v4018_v37 = vadd.f32 %v12000_v40, %v11952_v44  ;;  %v4013_v50 = vadd.f32 %v11997_v26, %v11955_v21  ;;  %v4017_v31 = vadd.f32 %v11997_v26, %v11958_v47  ;;  %v9632_v47 = vld [vmem:[#allocation8 + $0x498] ss:$28 sps:$4 sm:$0xff]  }
 0x41b   : > { %5789 = vmatpush1.bf16.msra.mxu1 %v9620_v15  ;;  %v4198_v32 = vsel %vm4070_vm2, %v4006_v48, %v4134_v1  ;;  %v4202_v30 = vsel %vm4074_vm3, %v4010_v24, %v4138_v53  ;;  %vm4069_vm4 = vcmp.ge.f32.partialorder %v4005_v43, 0.0  ;;  %vm4073_vm5 = vcmp.ge.f32.partialorder %v4009_v18, 0.0  ;;  %v9635_v48 = vld [vmem:[#allocation8 + $0x4a0] ss:$28 sps:$4 sm:$0xff]   ;;  %v9640_v15 = vld [vmem:[#allocation8 + $0x4d4] ss:$28 sps:$4 sm:$0xff]  }
 0x41c   : > { %6015 = vmatpush1.bf16.msra.mxu0 %v9623_v35  ;;  %5790 = vmatprep.subr.bf16.mxu1 %v9628_v55  ;;  %v12100_v0 = vpack.c.bf16 %v4202_v30, %v4198_v32  ;;  %v4133_v63 = vmul.f32 0.2, %v4005_v43  ;;  %v4137_v44 = vmul.f32 0.2, %v4009_v18  ;;  %vm4078_vm6 = vcmp.ge.f32.partialorder %v4014_v60, 0.0 }
 0x41d   : > { %6016 = vmatprep.subr.bf16.mxu0 %v9631_v3  ;;  %vm4082_vm7 = vcmp.ge.f32.partialorder %v4018_v37, 0.0  ;;  %v4142_v19 = vmul.f32 0.2, %v4014_v60  ;;  %v4146_v62 = vmul.f32 0.2, %v4018_v37  ;;  %vm4077_vm8 = vcmp.ge.f32.partialorder %v4013_v50, 0.0 }
 0x41e   : > { %5722 = vmatmul.mubr.bf16.gmra.mrb[88].mxu1 %v12070_v16  ;;  %5948 = vmatmul.mubr.bf16.gmra.mrb[72].mxu0 %v12070_v16  ;;  %v4197_v21 = vsel %vm4069_vm4, %v4005_v43, %v4133_v63  ;;  %vm4081_vm9 = vcmp.ge.f32.partialorder %v4017_v31, 0.0  ;;  %v4201_v20 = vsel %vm4073_vm5, %v4009_v18, %v4137_v44  ;;  %v4141_v28 = vmul.f32 0.2, %v4013_v50  ;;  %v9643_v24 = vld [vmem:[#allocation8 + $0x4dc] ss:$28 sps:$4 sm:$0xff]  }
 0x41f   : > { %5731 = vmatprep.mubr.bf16.mxu1 %v12082_v29  ;;  %5791 = vmatpush1.bf16.msra.mxu1 %v9626_v46  ;;  %v4206_v58 = vsel %vm4078_vm6, %v4014_v60, %v4142_v19  ;;  %v4145_v13 = vmul.f32 0.2, %v4017_v31  ;;  %v12107_v35 = vpack.c.bf16 %v4201_v20, %v4197_v21  ;;  %v4210_v9 = vsel %vm4082_vm7, %v4018_v37, %v4146_v62  ;;  %v9638_v43 = vld [vmem:[#allocation8 + $0x4d0] ss:$28 sps:$4 sm:$0xff]   ;;  %v9641_v18 = vld [vmem:[#allocation8 + $0x4d8] ss:$28 sps:$4 sm:$0xff]  }
 0x420   : > { %5957 = vmatprep.mubr.bf16.mxu0 %v12082_v29  ;;  %6017 = vmatpush1.bf16.msra.mxu0 %v9629_v49  ;;  %v4022_v45 = vadd.f32 %v12000_v40, %v11961_v61  ;;  %v12112_v55 = vpack.c.bf16 %v4210_v9, %v4206_v58  ;;  %v4205_v3 = vsel %vm4077_vm8, %v4013_v50, %v4141_v28  ;;  %v9646_v61 = vld [vmem:[#allocation8 + $0x50c] ss:$28 sps:$4 sm:$0xff]   ;;  %v9652_v44 = vld [vmem:[#allocation8 + $0x544] ss:$28 sps:$4 sm:$0xff]  }
 0x421   : > { %5792 = vmatprep.subr.bf16.mxu1 %v9634_v38  ;;  %6018 = vmatprep.subr.bf16.mxu0 %v9637_v5  ;;  %v4209_v6 = vsel %vm4081_vm9, %v4017_v31, %v4145_v13  ;;  %v4026_v1 = vadd.f32 %v12000_v40, %v11964_v12  ;;  %v4021_v60 = vadd.f32 %v11997_v26, %v11967_v10  ;;  %v9649_v12 = vld [vmem:[#allocation8 + $0x514] ss:$28 sps:$4 sm:$0xff]  }
 0x422   : > { %v12116_v27 = vpack.c.bf16 %v4209_v6, %v4205_v3  ;;  %vm4086_vm10 = vcmp.ge.f32.partialorder %v4022_v45, 0.0  ;;  %v4150_v53 = vmul.f32 0.2, %v4022_v45  ;;  %v4025_v37 = vadd.f32 %v11997_v26, %v11970_v41  ;;  %v9647_v63 = vld [vmem:[#allocation8 + $0x510] ss:$28 sps:$4 sm:$0xff]  }
 0x423   : > { %5793 = vmatpush1.bf16.msra.mxu1 %v9632_v47  ;;  %v4030_v46 = vadd.f32 %v12000_v40, %v11973_v56  ;;  %v4034_v49 = vadd.f32 %v12000_v40, %v11976_v39  ;;  %vm4090_vm11 = vcmp.ge.f32.partialorder %v4026_v1, 0.0  ;;  %v4154_v38 = vmul.f32 0.2, %v4026_v1  ;;  %v9644_v40 = vld [vmem:[#allocation8 + $0x508] ss:$28 sps:$4 sm:$0xff]  }
 0x424   : > { %6019 = vmatpush1.bf16.msra.mxu0 %v9635_v48  ;;  %5794 = vmatprep.subr.bf16.mxu1 %v9640_v15  ;;  %v4214_v32 = vsel %vm4086_vm10, %v4022_v45, %v4150_v53  ;;  %v4029_v30 = vadd.f32 %v11997_v26, %v11982_v36  ;;  %vm4085_vm12 = vcmp.ge.f32.partialorder %v4021_v60, 0.0  ;;  %vm4089_vm13 = vcmp.ge.f32.partialorder %v4025_v37, 0.0  ;;  %v9655_v47 = vld [vmem:[#allocation8 + $0x54c] ss:$28 sps:$4 sm:$0xff]   ;;  %v9658_v6 = vld [vmem:[#allocation8 + $0x57c] ss:$28 sps:$4 sm:$0xff]  }
 0x425   : > { %6020 = vmatprep.subr.bf16.mxu0 %v9643_v24  ;;  %v4149_v10 = vmul.f32 0.2, %v4021_v60  ;;  %v4153_v41 = vmul.f32 0.2, %v4025_v37  ;;  %v4218_v56 = vsel %vm4090_vm11, %v4026_v1, %v4154_v38  ;;  %vm4094_vm14 = vcmp.ge.f32.partialorder %v4030_v46, 0.0 }
 0x426   : > { %5732 = vmatmul.mubr.bf16.gmra.mrb[92].mxu1 %v12086_v54  ;;  %5958 = vmatmul.mubr.bf16.gmra.mrb[76].mxu0 %v12086_v54  ;;  %vm4098_vm15 = vcmp.ge.f32.partialorder %v4034_v49, 0.0  ;;  %v4158_v39 = vmul.f32 0.2, %v4030_v46  ;;  %v12133_v50 = vpack.c.bf16 %v4218_v56, %v4214_v32  ;;  %v4162_v5 = vmul.f32 0.2, %v4034_v49 }
 0x427   : > { %5741 = vmatprep.mubr.bf16.mxu1 %v12100_v0  ;;  %5795 = vmatpush1.bf16.msra.mxu1 %v9638_v43  ;;  %v4213_v36 = vsel %vm4085_vm12, %v4021_v60, %v4149_v10  ;;  %v4217_v31 = vsel %vm4089_vm13, %v4025_v37, %v4153_v41  ;;  %v4033_v62 = vadd.f32 %v11997_v26, %v11985_v23  ;;  %vm4093_vm1 = vcmp.ge.f32.partialorder %v4029_v30, 0.0  ;;  %v9650_v26 = vld [vmem:[#allocation8 + $0x540] ss:$28 sps:$4 sm:$0xff]   ;;  %v9653_v24 = vld [vmem:[#allocation8 + $0x548] ss:$28 sps:$4 sm:$0xff]   ;;  %v14377_v10 = vld [vmem:[#allocation18_spill] sm:$0xff] }
 0x428   : > { %5967 = vmatprep.mubr.bf16.mxu0 %v12100_v0  ;;  %6021 = vmatpush1.bf16.msra.mxu0 %v9641_v18  ;;  %v12136_v19 = vpack.c.bf16 %v4217_v31, %v4213_v36  ;;  %v4222_v21 = vsel %vm4094_vm14, %v4030_v46, %v4158_v39  ;;  %v4226_v20 = vsel %vm4098_vm15, %v4034_v49, %v4162_v5  ;;  %v4157_v58 = vmul.f32 0.2, %v4029_v30  ;;  %v9661_v1 = vld [vmem:[#allocation8 + $0x584] ss:$28 sps:$4 sm:$0xff]   ;;  %v9664_v38 = vld [vmem:[#allocation8 + $0x5b4] ss:$28 sps:$4 sm:$0xff]  }
 0x429   : > { %5796 = vmatprep.subr.bf16.mxu1 %v9646_v61  ;;  %6022 = vmatprep.subr.bf16.mxu0 %v9649_v12  ;;  %v3976_v28 = vadd.f32 %v12003_v2, %v11989_v8  ;;  %v3980_v13 = vadd.f32 %v12003_v2, %v11993_v7  ;;  %v12145_v48 = vpack.c.bf16 %v4226_v20, %v4222_v21  ;;  %vm4097_vm2 = vcmp.ge.f32.partialorder %v4033_v62, 0.0  ;;  %v9656_v61 = vld [vmem:[#allocation8 + $0x578] ss:$28 sps:$4 sm:$0xff]   ;;  %v9659_v46 = vld [vmem:[#allocation8 + $0x580] ss:$28 sps:$4 sm:$0xff]   ;;  %v14380_v21 = vld [vmem:[#allocation33_spill] sm:$0xff] }
 0x42a   : > { %v4161_v15 = vmul.f32 0.2, %v4033_v62  ;;  %v3975_v23 = vadd.f32 %v12032_v59, %v12007_v52  ;;  %v4221_v9 = vsel %vm4093_vm1, %v4029_v30, %v4157_v58  ;;  %v3979_v7 = vadd.f32 %v12032_v59, %v12011_v22  ;;  %v9667_v41 = vld [vmem:[#allocation8 + $0x5bc] ss:$28 sps:$4 sm:$0xff]  }
 0x42b   : > { %5797 = vmatpush1.bf16.msra.mxu1 %v9644_v40  ;;  %vm4040_vm3 = vcmp.ge.f32.partialorder %v3976_v28, 0.0  ;;  %vm4044_vm4 = vcmp.ge.f32.partialorder %v3980_v13, 0.0  ;;  %v4104_v45 = vmul.f32 0.2, %v3976_v28  ;;  %v4108_v3 = vmul.f32 0.2, %v3980_v13 }
 0x42c   : > { %6023 = vmatpush1.bf16.msra.mxu0 %v9647_v63  ;;  %5798 = vmatprep.subr.bf16.mxu1 %v9652_v44  ;;  %v4225_v8 = vsel %vm4097_vm2, %v4033_v62, %v4161_v15  ;;  %vm4039_vm5 = vcmp.ge.f32.partialorder %v3975_v23, 0.0  ;;  %v4103_v43 = vmul.f32 0.2, %v3975_v23  ;;  %v3984_v18 = vadd.f32 %v12003_v2, %v12015_v51  ;;  %v14378_v40 = vld [vmem:[#allocation23_spill] sm:$0xff]  ;;  %v14379_v63 = vld [vmem:[#allocation24_spill] sm:$0xff] }
 0x42d   : > { %6024 = vmatprep.subr.bf16.mxu0 %v9655_v47  ;;  %v12151_v53 = vpack.c.bf16 %v4225_v8, %v4221_v9  ;;  %v4168_v52 = vsel %vm4040_vm3, %v3976_v28, %v4104_v45  ;;  %v4172_v60 = vsel %vm4044_vm4, %v3980_v13, %v4108_v3  ;;  %vm4043_vm6 = vcmp.ge.f32.partialorder %v3979_v7, 0.0  ;;  %v9662_v47 = vld [vmem:[#allocation8 + $0x5b0] ss:$28 sps:$4 sm:$0xff]   ;;  %v9665_v20 = vld [vmem:[#allocation8 + $0x5b8] ss:$28 sps:$4 sm:$0xff]  }
 0x42e   : > { %5742 = vmatmul.mubr.bf16.gmra.mrb[96].mxu1 %v12107_v35  ;;  %5968 = vmatmul.mubr.bf16.gmra.mrb[80].mxu0 %v12107_v35  ;;  %v4107_v22 = vmul.f32 0.2, %v3979_v7  ;;  %v3988_v37 = vadd.f32 %v12003_v2, %v12019_v57  ;;  %v12161_v49 = vpack.c.bf16 %v4172_v60, %v4168_v52  ;;  %v4167_v51 = vsel %vm4039_vm5, %v3975_v23, %v4103_v43  ;;  %v14381_v13 = vld [vmem:[#allocation22_spill] sm:$0xff]  ;;  %v9670_v9 = vld [vmem:[#allocation8 + $0x5ec] ss:$28 sps:$4 sm:$0xff]  }
 0x42f   : > { %5751 = vmatprep.mubr.bf16.mxu1 %v12112_v55  ;;  %5799 = vmatpush1.bf16.msra.mxu1 %v9650_v26  ;;  %vm4048_vm7 = vcmp.ge.f32.partialorder %v3984_v18, 0.0  ;;  %v4112_v12 = vmul.f32 0.2, %v3984_v18  ;;  %v3882_v57 = vmul.f32 %v11896_v33, %v14377_v10  ;;  %v3886_v36 = vmul.f32 %v11896_v33, %v14378_v40  ;;  %v14382_v23 = vld [vmem:[#allocation30_spill] sm:$0xff]  ;;  %v9668_v52 = vld [vmem:[#allocation8 + $0x5e8] ss:$28 sps:$4 sm:$0xff]  }
 0x430   : > { %5977 = vmatprep.mubr.bf16.mxu0 %v12112_v55  ;;  %6025 = vmatpush1.bf16.msra.mxu0 %v9653_v24  ;;  %v4171_v32 = vsel %vm4043_vm6, %v3979_v7, %v4107_v22  ;;  %vm4052_vm8 = vcmp.ge.f32.partialorder %v3988_v37, 0.0  ;;  %v4116_v30 = vmul.f32 0.2, %v3988_v37  ;;  %v3891_v44 = vmul.f32 %v11893_v42, %v14379_v63  ;;  %v9673_v3 = vld [vmem:[#allocation8 + $0x5f4] ss:$28 sps:$4 sm:$0xff]   ;;  %v14383_v10 = vld [vmem:[#allocation32_spill] sm:$0xff] }
 0x431   : > { %5800 = vmatprep.subr.bf16.mxu1 %v9658_v6  ;;  %6026 = vmatprep.subr.bf16.mxu0 %v9661_v1  ;;  %v12167_v56 = vpack.c.bf16 %v4171_v32, %v4167_v51  ;;  %v4176_v39 = vsel %vm4048_vm7, %v3984_v18, %v4112_v12  ;;  %v3983_v5 = vadd.f32 %v12032_v59, %v3882_v57  ;;  %v9679_v32 = vld [vmem:[#allocation8 + $0x62c] ss:$28 sps:$4 sm:$0xff]  }
 0x432   : > { %v4180_v31 = vsel %vm4052_vm8, %v3988_v37, %v4116_v30  ;;  %v3895_v62 = vmul.f32 %v11893_v42, %v14380_v21  ;;  %v3987_v28 = vadd.f32 %v12032_v59, %v3886_v36  ;;  %v3890_v15 = vmul.f32 %v11896_v33, %v14381_v13  ;;  %v9676_v37 = vld [vmem:[#allocation8 + $0x624] ss:$28 sps:$4 sm:$0xff]  }
 0x433   : > { %5801 = vmatpush1.bf16.msra.mxu1 %v9656_v61  ;;  %v12176_v58 = vpack.c.bf16 %v4180_v31, %v4176_v39  ;;  %v3894_v26 = vmul.f32 %v11896_v33, %v14382_v23  ;;  %vm4047_vm9 = vcmp.ge.f32.partialorder %v3983_v5, 0.0  ;;  %v4111_v45 = vmul.f32 0.2, %v3983_v5  ;;  %v9671_v61 = vld [vmem:[#allocation8 + $0x5f0] ss:$28 sps:$4 sm:$0xff]  }
 0x434   : > { %6027 = vmatpush1.bf16.msra.mxu0 %v9659_v46  ;;  %5802 = vmatprep.subr.bf16.mxu1 %v9664_v38  ;;  %v3992_v24 = vadd.f32 %v12003_v2, %v3891_v44  ;;  %v3996_v8 = vadd.f32 %v12003_v2, %v3895_v62  ;;  %vm4051_vm10 = vcmp.ge.f32.partialorder %v3987_v28, 0.0  ;;  %v4115_v7 = vmul.f32 0.2, %v3987_v28  ;;  %v9674_v44 = vld [vmem:[#allocation8 + $0x620] ss:$28 sps:$4 sm:$0xff]  }
 0x435   : > { %6028 = vmatprep.subr.bf16.mxu0 %v9667_v41  ;;  %v3991_v6 = vadd.f32 %v12032_v59, %v3890_v15  ;;  %v3995_v1 = vadd.f32 %v12032_v59, %v3894_v26  ;;  %v4175_v43 = vsel %vm4047_vm9, %v3983_v5, %v4111_v45  ;;  %v3899_v57 = vmul.f32 %v11893_v42, %v14383_v10  ;;  %v14384_v41 = vld [vmem:[#allocation41_spill] sm:$0xff]  ;;  %v14385_v5 = vld [vmem:[#allocation28_spill] sm:$0xff]  ;;  %v9682_v15 = vld [vmem:[#allocation8 + $0x65c] ss:$28 sps:$4 sm:$0xff]  }
 0x436   : > { %5752 = vmatmul.mubr.bf16.gmra.mrb[100].mxu1 %v12116_v27  ;;  %5978 = vmatmul.mubr.bf16.gmra.mrb[84].mxu0 %v12116_v27  ;;  %vm4056_vm11 = vcmp.ge.f32.partialorder %v3992_v24, 0.0  ;;  %vm4060_vm12 = vcmp.ge.f32.partialorder %v3996_v8, 0.0  ;;  %v4120_v18 = vmul.f32 0.2, %v3992_v24  ;;  %v4179_v60 = vsel %vm4051_vm10, %v3987_v28, %v4115_v7  ;;  %v9677_v13 = vld [vmem:[#allocation8 + $0x628] ss:$28 sps:$4 sm:$0xff]  }
 0x437   : > { %5761 = vmatprep.mubr.bf16.mxu1 %v12133_v50  ;;  %5803 = vmatpush1.bf16.msra.mxu1 %v9662_v47  ;;  %v4124_v22 = vmul.f32 0.2, %v3996_v8  ;;  %vm4055_vm13 = vcmp.ge.f32.partialorder %v3991_v6, 0.0  ;;  %vm4059_vm14 = vcmp.ge.f32.partialorder %v3995_v1, 0.0  ;;  %v12191_v46 = vpack.c.bf16 %v4179_v60, %v4175_v43  ;;  %v9685_v23 = vld [vmem:[#allocation8 + $0x664] ss:$28 sps:$4 sm:$0xff]  }
 0x438   : > { %5987 = vmatprep.mubr.bf16.mxu0 %v12133_v50  ;;  %6029 = vmatpush1.bf16.msra.mxu0 %v9665_v20  ;;  %v4184_v51 = vsel %vm4056_vm11, %v3992_v24, %v4120_v18  ;;  %v4119_v12 = vmul.f32 0.2, %v3991_v6  ;;  %v4123_v38 = vmul.f32 0.2, %v3995_v1  ;;  %v3903_v39 = vmul.f32 %v11893_v42, %v14384_v41  ;;  %v14386_v20 = vld [vmem:[#allocation38_spill] sm:$0xff]  ;;  %v14388_v24 = vld [vmem:[#allocation44_spill] sm:$0xff] }
 0x439   : > { %5804 = vmatprep.subr.bf16.mxu1 %v9670_v9  ;;  %6030 = vmatprep.subr.bf16.mxu0 %v9673_v3  ;;  %v4188_v30 = vsel %vm4060_vm12, %v3996_v8, %v4124_v22  ;;  %v3898_v63 = vmul.f32 %v11896_v33, %v14385_v5  ;;  %v4000_v62 = vadd.f32 %v12003_v2, %v3899_v57  ;;  %v14387_v9 = vld [vmem:[#allocation40_spill] sm:$0xff]  ;;  %v9680_v43 = vld [vmem:[#allocation8 + $0x658] ss:$28 sps:$4 sm:$0xff]   ;;  %v14391_v5 = vld [vmem:[#allocation53_spill] sm:$0xff]  ;;  %vm4100_vm10 = vcmp.ge.f32.partialorder %v12022_v34, 0.0 }
 0x43a   : > { %v12198_v40 = vpack.c.bf16 %v4188_v30, %v4184_v51  ;;  %v4183_v36 = vsel %vm4055_vm13, %v3991_v6, %v4119_v12  ;;  %v4187_v31 = vsel %vm4059_vm14, %v3995_v1, %v4123_v38  ;;  %v4004_v47 = vadd.f32 %v12003_v2, %v3903_v39  ;;  %v9683_v18 = vld [vmem:[#allocation8 + $0x660] ss:$28 sps:$4 sm:$0xff]  }
 0x43b   : > { %5805 = vmatpush1.bf16.msra.mxu1 %v9668_v52  ;;  %v12204_v21 = vpack.c.bf16 %v4187_v31, %v4183_v36  ;;  %v3902_v28 = vmul.f32 %v11896_v33, %v14386_v20  ;;  %v3999_v26 = vadd.f32 %v12032_v59, %v3898_v63  ;;  %v3907_v45 = vmul.f32 %v11893_v42, %v14387_v9  ;;  %v9691_v51 = vld [vmem:[#allocation8 + $0x69c] ss:$28 sps:$4 sm:$0xff]   ;;  %v14389_v41 = vld [vmem:[#allocation36_spill] sm:$0xff]  ;;  %v14390_v36 = vld [vmem:[#allocation46_spill] sm:$0xff] }
 0x43c   : > { %6031 = vmatpush1.bf16.msra.mxu0 %v9671_v61  ;;  %5806 = vmatprep.subr.bf16.mxu1 %v9676_v37  ;;  %v3911_v8 = vmul.f32 %v11893_v42, %v14388_v24  ;;  %vm4064_vm15 = vcmp.ge.f32.partialorder %v4000_v62, 0.0  ;;  %vm4068_vm1 = vcmp.ge.f32.partialorder %v4004_v47, 0.0  ;;  %v4128_v3 = vmul.f32 0.2, %v4000_v62  ;;  %v9688_v61 = vld [vmem:[#allocation8 + $0x694] ss:$28 sps:$4 sm:$0xff]  }
 0x43d   : > { %6032 = vmatprep.subr.bf16.mxu0 %v9679_v32  ;;  %v4132_v7 = vmul.f32 0.2, %v4004_v47  ;;  %v4003_v6 = vadd.f32 %v12032_v59, %v3902_v28  ;;  %vm4063_vm2 = vcmp.ge.f32.partialorder %v3999_v26, 0.0  ;;  %v4127_v1 = vmul.f32 0.2, %v3999_v26  ;;  %v14392_v28 = vld [vmem:[#allocation51_spill] sm:$0xff] }
 0x43e   : > { %5762 = vmatmul.mubr.bf16.gmra.mrb[104].mxu1 %v12136_v19  ;;  %5988 = vmatmul.mubr.bf16.gmra.mrb[88].mxu0 %v12136_v19  ;;  %v4008_v52 = vadd.f32 %v12003_v2, %v3907_v45  ;;  %v4192_v60 = vsel %vm4064_vm15, %v4000_v62, %v4128_v3  ;;  %v4012_v37 = vadd.f32 %v12003_v2, %v3911_v8  ;;  %v9692_v45 = vld [vmem:[#allocation8 + $0x6c8] ss:$28 sps:$4 sm:$0xff]   ;;  %v9697_v8 = vld [vmem:[#allocation8 + $0x6d4] ss:$28 sps:$4 sm:$0xff]  }
 0x43f   : > { %5771 = vmatprep.mubr.bf16.mxu1 %v12145_v48  ;;  %5807 = vmatpush1.bf16.msra.mxu1 %v9674_v44  ;;  %v4196_v22 = vsel %vm4068_vm1, %v4004_v47, %v4132_v7  ;;  %vm4067_vm3 = vcmp.ge.f32.partialorder %v4003_v6, 0.0  ;;  %v4131_v38 = vmul.f32 0.2, %v4003_v6  ;;  %v4191_v32 = vsel %vm4063_vm2, %v3999_v26, %v4127_v1  ;;  %v9686_v44 = vld [vmem:[#allocation8 + $0x690] ss:$28 sps:$4 sm:$0xff]  }
 0x440   : > { %5997 = vmatprep.mubr.bf16.mxu0 %v12145_v48  ;;  %6033 = vmatpush1.bf16.msra.mxu0 %v9677_v13  ;;  %v12222_v12 = vpack.c.bf16 %v4196_v22, %v4192_v60  ;;  %vm4072_vm4 = vcmp.ge.f32.partialorder %v4008_v52, 0.0  ;;  %vm4076_vm5 = vcmp.ge.f32.partialorder %v4012_v37, 0.0  ;;  %v4136_v30 = vmul.f32 0.2, %v4008_v52  ;;  %v9694_v24 = vld [vmem:[#allocation8 + $0x6cc] ss:$28 sps:$4 sm:$0xff]  }
 0x441   : > { %5808 = vmatprep.subr.bf16.mxu1 %v9682_v15  ;;  %6034 = vmatprep.subr.bf16.mxu0 %v9685_v23  ;;  %v4140_v10 = vmul.f32 0.2, %v4012_v37  ;;  %v4195_v57 = vsel %vm4067_vm3, %v4003_v6, %v4131_v38  ;;  %v3906_v39 = vmul.f32 %v11896_v33, %v14389_v41  ;;  %v3910_v31 = vmul.f32 %v11896_v33, %v14390_v36  ;;  %v9689_v15 = vld [vmem:[#allocation8 + $0x698] ss:$28 sps:$4 sm:$0xff]   ;;  %v14393_v6 = vld [vmem:[#allocation48_spill] sm:$0xff] }
 0x442   : > { %v3915_v63 = vmul.f32 %v11893_v42, %v14391_v5  ;;  %v12231_v62 = vpack.c.bf16 %v4195_v57, %v4191_v32  ;;  %v4200_v47 = vsel %vm4072_vm4, %v4008_v52, %v4136_v30  ;;  %v3919_v13 = vmul.f32 %v11893_v42, %v14392_v28  ;;  %v14394_v52 = vld [vmem:[#allocation55_spill] sm:$0xff] }
 0x443   : > { %5809 = vmatpush1.bf16.msra.mxu1 %v9680_v43  ;;  %v4204_v20 = vsel %vm4076_vm5, %v4012_v37, %v4140_v10  ;;  %v4007_v26 = vadd.f32 %v12032_v59, %v3906_v39  ;;  %v4011_v9 = vadd.f32 %v12032_v59, %v3910_v31  ;;  %v3914_v1 = vmul.f32 %v11896_v33, %v14393_v6  ;;  %v9695_v37 = vld [vmem:[#allocation8 + $0x6d0] ss:$28 sps:$4 sm:$0xff]   ;;  %v9701_v57 = vld [vmem:[#allocation8 + $0x1d8] ss:$28 sps:$4 sm:$0xff]  }
 0x444   : > { %6035 = vmatpush1.bf16.msra.mxu0 %v9683_v18  ;;  %5810 = vmatprep.subr.bf16.mxu1 %v9688_v61  ;;  %v12235_v23 = vpack.c.bf16 %v4204_v20, %v4200_v47  ;;  %v4016_v3 = vadd.f32 %v12003_v2, %v3915_v63  ;;  %v4020_v7 = vadd.f32 %v12003_v2, %v3919_v13  ;;  %v4164_v10 = vmul.f32 0.2, %v12022_v34  ;;  %v14396_v20 = vld [vmem:[#allocation56_spill] sm:$0xff]  ;;  %v14397_v13 = vld [vmem:[#allocation54_spill] sm:$0xff] }
 0x445   : > { %6036 = vmatprep.subr.bf16.mxu0 %v9691_v51  ;;  %v3918_v43 = vmul.f32 %v11896_v33, %v14394_v52  ;;  %vm4071_vm6 = vcmp.ge.f32.partialorder %v4007_v26, 0.0  ;;  %vm4075_vm7 = vcmp.ge.f32.partialorder %v4011_v9, 0.0  ;;  %v4135_v18 = vmul.f32 0.2, %v4007_v26  ;;  %v9700_v51 = vld [vmem:[#allocation8 + $0x14] ss:$28 sps:$4 sm:$0xff]  }
 0x446   : > { %5772 = vmatmul.mubr.bf16.gmra.mrb[108].mxu1 %v12151_v53  ;;  %5998 = vmatmul.mubr.bf16.gmra.mrb[92].mxu0 %v12151_v53  ;;  %v4139_v61 = vmul.f32 0.2, %v4011_v9  ;;  %vm4080_vm8 = vcmp.ge.f32.partialorder %v4016_v3, 0.0  ;;  %vm4084_vm9 = vcmp.ge.f32.partialorder %v4020_v7, 0.0  ;;  %v4144_v60 = vmul.f32 0.2, %v4016_v3 }
 0x447   : > { %5811 = vmatpush1.bf16.msra.mxu1 %v9686_v44  ;;  %5814 = vmatprep.mubr.bf16.mxu1 %v12161_v49  ;;  %v4148_v22 = vmul.f32 0.2, %v4020_v7  ;;  %v4199_v38 = vsel %vm4071_vm6, %v4007_v26, %v4135_v18  ;;  %v4015_v30 = vadd.f32 %v12032_v59, %v3914_v1  ;;  %v4019_v5 = vadd.f32 %v12032_v59, %v3918_v43  ;;  %v14395_v44 = vld [vmem:[#allocation57_spill] sm:$0xff]  ;;  %v14398_v26 = vld [vmem:[#allocation59_spill] sm:$0xff] }
 0x448   : > { %6037 = vmatpush1.bf16.msra.mxu0 %v9689_v15  ;;  %6040 = vmatprep.mubr.bf16.mxu0 %v12161_v49  ;;  %v4203_v32 = vsel %vm4075_vm7, %v4011_v9, %v4139_v61  ;;  %v4208_v39 = vsel %vm4080_vm8, %v4016_v3, %v4144_v60  ;;  %v3923_v47 = vmul.f32 %v11893_v42, %v14395_v44  ;;  %v9702_v6 = vld [vmem:[#allocation8 + $0x18] ss:$28 sps:$4 sm:$0xff]   ;;  %v9705_v1 = vld [vmem:[#allocation8 + $0x4c] ss:$28 sps:$4 sm:$0xff]  }
 0x449   : > { %5812 = vmatprep.subr.bf16.mxu1 %v9694_v24  ;;  %6038 = vmatprep.subr.bf16.mxu0 %v9697_v8  ;;  %v12252_v41 = vpack.c.bf16 %v4203_v32, %v4199_v38  ;;  %v4212_v36 = vsel %vm4084_vm9, %v4020_v7, %v4148_v22  ;;  %vm4079_vm11 = vcmp.ge.f32.partialorder %v4015_v30, 0.0  ;;  %v4143_v63 = vmul.f32 0.2, %v4015_v30  ;;  %v9698_v24 = vld [vmem:[#allocation8 + $0x10] ss:$28 sps:$4 sm:$0xff]   ;;  %v14399_v7 = vld [vmem:[#allocation63_spill] sm:$0xff] }
 0x44a   : > { %v12256_v31 = vpack.c.bf16 %v4212_v36, %v4208_v39  ;;  %v3927_v28 = vmul.f32 %v11893_v42, %v14396_v20  ;;  %v3922_v15 = vmul.f32 %v11896_v33, %v14397_v13  ;;  %v3926_v9 = vmul.f32 %v11896_v33, %v14398_v26  ;;  %v9703_v60 = vld [vmem:[#allocation8 + $0x48] ss:$28 sps:$4 sm:$0xff]   ;;  %v9709_v22 = vld [vmem:[#allocation8 + $0x210] ss:$28 sps:$4 sm:$0xff]  }
 0x44b   : > { %5813 = vmatpush1.bf16.msra.mxu1 %v9692_v45  ;;  %vm4083_vm12 = vcmp.ge.f32.partialorder %v4019_v5, 0.0  ;;  %v4147_v8 = vmul.f32 0.2, %v4019_v5  ;;  %v4207_v3 = vsel %vm4079_vm11, %v4015_v30, %v4143_v63  ;;  %v3931_v45 = vmul.f32 %v11893_v42, %v14399_v7  ;;  %v14400_v38 = vld [vmem:[#allocation61_spill] sm:$0xff]  ;;  %v9708_v30 = vld [vmem:[#allocation8 + $0x84] ss:$28 sps:$4 sm:$0xff]  }
 0x44c   : > { %6039 = vmatpush1.bf16.msra.mxu0 %v9695_v37  ;;  %6121 = vmatprep.subr.bf16.mxu1 %v9700_v51  ;;  %v4024_v52 = vadd.f32 %v12003_v2, %v3923_v47  ;;  %v4028_v43 = vadd.f32 %v12003_v2, %v3927_v28  ;;  %v4023_v18 = vadd.f32 %v12032_v59, %v3922_v15  ;;  %v9717_v44 = vld [vmem:[#allocation8 + $0x248] ss:$28 sps:$4 sm:$0xff]   ;;  %v14401_v28 = vld [vmem:[#allocation62_spill] sm:$0xff] }
 0x44d   : > { %8701 = vmatprep.subr.bf16.mxu0 %v9701_v57  ;;  %v4027_v61 = vadd.f32 %v12032_v59, %v3926_v9  ;;  %v4211_v37 = vsel %vm4083_vm12, %v4019_v5, %v4147_v8  ;;  %v4032_v51 = vadd.f32 %v12003_v2, %v3931_v45  ;;  %v4228_v42 = vsel %vm4100_vm10, %v12022_v34, %v4164_v10  ;;  %v9710_v57 = vld [vmem:[#allocation8 + $0x50] ss:$28 sps:$4 sm:$0xff]   ;;  %v9706_v8 = vld [vmem:[#allocation8 + $0x80] ss:$28 sps:$4 sm:$0xff]  }
 0x44e   : > { %5815 = vmatmul.mubr.bf16.vlgmr.msra.gmra.mrb[80].mxu1 %v12167_v56  ;;  %v3930_v32 = vmul.f32 %v11896_v33, %v14400_v38  ;;  %v12282_v39 = vpack.c.bf16 %v4211_v37, %v4207_v3  ;;  %vm4088_vm13 = vcmp.ge.f32.partialorder %v4024_v52, 0.0  ;;  %vm4092_vm14 = vcmp.ge.f32.partialorder %v4028_v43, 0.0  ;;  %v9721_v38 = vld [vmem:[#allocation8 + $0x12c] ss:$28 sps:$4 sm:$0xff]  }
 0x44f   : > { %6041 = vmatmul.mubr.bf16.vlgmr.msra.gmra.mrb[64].mxu0 %v12167_v56  ;;  %5824 = vmatprep.mubr.bf16.mxu1 %v12176_v58  ;;  %v4152_v36 = vmul.f32 0.2, %v4024_v52  ;;  %v4156_v2 = vmul.f32 0.2, %v4028_v43  ;;  %vm4087_vm15 = vcmp.ge.f32.partialorder %v4023_v18, 0.0  ;;  %vm4091_vm1 = vcmp.ge.f32.partialorder %v4027_v61, 0.0 }
 0x450   : > { %6050 = vmatprep.mubr.bf16.mxu0 %v12176_v58  ;;  %6122 = vmatpush1.bf16.msra.mxu1 %v9698_v24  ;;  %v4151_v34 = vmul.f32 0.2, %v4023_v18  ;;  %v4155_v5 = vmul.f32 0.2, %v4027_v61  ;;  %vm4096_vm2 = vcmp.ge.f32.partialorder %v4032_v51, 0.0  ;;  %v3934_v13 = vmul.f32 %v11896_v33, %v14401_v28 }
 0x451   : > { %8702 = vmatpush3.bf16.msra.mxu0 %v9702_v6  ;;  %6123 = vmatprep.subr.bf16.mxu1 %v9705_v1  ;;  %v4216_v10 = vsel %vm4088_vm13, %v4024_v52, %v4152_v36  ;;  %v4160_v63 = vmul.f32 0.2, %v4032_v51  ;;  %v4220_v47 = vsel %vm4092_vm14, %v4028_v43, %v4156_v2  ;;  %v4031_v15 = vadd.f32 %v12032_v59, %v3930_v32  ;;  %v9713_v6 = vld [vmem:[#allocation8 + $0xbc] ss:$28 sps:$4 sm:$0xff]   ;;  %v9718_v1 = vld [vmem:[#allocation8 + $0x88] ss:$28 sps:$4 sm:$0xff]  }
 0x452   : > { %8703 = vmatprep.subr.bf16.mxu0 %v9709_v22  ;;  %v4215_v20 = vsel %vm4087_vm15, %v4023_v18, %v4151_v34  ;;  %v12289_v26 = vpack.c.bf16 %v4220_v47, %v4216_v10  ;;  %v4219_v9 = vsel %vm4091_vm1, %v4027_v61, %v4155_v5  ;;  %v4035_v45 = vadd.f32 %v12032_v59, %v3934_v13  ;;  %v9725_v52 = vld [vmem:[#allocation8 + $0x280] ss:$28 sps:$4 sm:$0xff]   ;;  %v9711_v59 = vld [vmem:[#allocation8 + $0xb8] ss:$28 sps:$4 sm:$0xff]   ;;  %v9742_v2 = vld [vmem:[#allocation8 + $0x130] ss:$28 sps:$4 sm:$0xff]  }
 0x453   : > { %v4224_v24 = vsel %vm4096_vm2, %v4032_v51, %v4160_v63  ;;  %v12291_v3 = vpack.c.bf16 %v4219_v9, %v4215_v20  ;;  %vm4095_vm3 = vcmp.ge.f32.partialorder %v4031_v15, 0.0  ;;  %v4159_v33 = vmul.f32 0.2, %v4031_v15  ;;  %v9726_v22 = vld [vmem:[#allocation8 + $0xc0] ss:$28 sps:$4 sm:$0xff]  }
 0x454   : > { %6124 = vmatpush1.bf16.msra.mxu1 %v9703_v60  ;;  %v12293_v7 = vpack.c.bf16 %v4228_v42, %v4224_v24  ;;  %vm4099_vm4 = vcmp.ge.f32.partialorder %v4035_v45, 0.0  ;;  %v4163_v43 = vmul.f32 0.2, %v4035_v45  ;;  %v9716_v60 = vld [vmem:[#allocation8 + $0xf4] ss:$28 sps:$4 sm:$0xff]  }
 0x455   : > { %6125 = vmatprep.subr.bf16.mxu1 %v9708_v30  ;;  %8704 = vmatpush3.bf16.msra.mxu0 %v9710_v57  ;;  %v4223_v18 = vsel %vm4095_vm3, %v4031_v15, %v4159_v33  ;;  %v9733_v51 = vld [vmem:[#allocation8 + $0x2b8] ss:$28 sps:$4 sm:$0xff]   ;;  %v9714_v42 = vld [vmem:[#allocation8 + $0xf0] ss:$28 sps:$4 sm:$0xff]   ;;  %v9719_v57 = vld [vmem:[#allocation8 + $0x128] ss:$28 sps:$4 sm:$0xff]  }
 0x456   : > { %5825 = vmatmul.mubr.bf16.gmra.mrb[84].mxu1 %v12191_v46  ;;  %8705 = vmatprep.subr.bf16.mxu0 %v9717_v44  ;;  %v4227_v61 = vsel %vm4099_vm4, %v4035_v45, %v4163_v43  ;;  %v9734_v32 = vld [vmem:[#allocation8 + $0xf8] ss:$28 sps:$4 sm:$0xff]   ;;  %v9741_v30 = vld [vmem:[#allocation8 + $0x2f0] ss:$28 sps:$4 sm:$0xff]   ;;  %v9724_v36 = vld [vmem:[#allocation8 + $0x164] ss:$28 sps:$4 sm:$0xff]  }
 0x457   : > { %6051 = vmatmul.mubr.bf16.gmra.mrb[68].mxu0 %v12191_v46  ;;  %5834 = vmatprep.mubr.bf16.mxu1 %v12198_v40  ;;  %v12300_v37 = vpack.c.bf16 %v4227_v61, %v4223_v18  ;;  %v9749_v34 = vld [vmem:[#allocation8 + $0x328] ss:$28 sps:$4 sm:$0xff]   ;;  %v9722_v10 = vld [vmem:[#allocation8 + $0x160] ss:$28 sps:$4 sm:$0xff]   ;;  %v9727_v47 = vld [vmem:[#allocation8 + $0x198] ss:$28 sps:$4 sm:$0xff]  }
 0x458   : > { %6060 = vmatprep.mubr.bf16.mxu0 %v12198_v40  ;;  %6126 = vmatpush1.bf16.msra.mxu1 %v9706_v8  ;;  %v9729_v5 = vld [vmem:[#allocation8 + $0x19c] ss:$28 sps:$4 sm:$0xff]   ;;  %v9750_v63 = vld [vmem:[#allocation8 + $0x168] ss:$28 sps:$4 sm:$0xff]   ;;  %v9732_v20 = vld [vmem:[#allocation8 + $0x1d4] ss:$28 sps:$4 sm:$0xff]  }
 0x459   : > { %6127 = vmatprep.subr.bf16.mxu1 %v9713_v6  ;;  %8706 = vmatpush3.bf16.msra.mxu0 %v9718_v1  ;;  %v9757_v44 = vld [vmem:[#allocation8 + $0x360] ss:$28 sps:$4 sm:$0xff]   ;;  %v9765_v13 = vld [vmem:[#allocation8 + $0x558] ss:$28 sps:$4 sm:$0xff]   ;;  %v9730_v15 = vld [vmem:[#allocation8 + $0x1d0] ss:$28 sps:$4 sm:$0xff]  }
 0x45a   : > { %8707 = vmatprep.subr.bf16.mxu0 %v9725_v52  ;;  %v9758_v28 = vld [vmem:[#allocation8 + $0x1a0] ss:$28 sps:$4 sm:$0xff]   ;;  %v9737_v9 = vld [vmem:[#allocation8 + $0x20c] ss:$28 sps:$4 sm:$0xff]   ;;  %v9743_v1 = vld [vmem:[#allocation8 + $0x278] ss:$28 sps:$4 sm:$0xff]  }
 0x45b   : > { %v9735_v24 = vld [vmem:[#allocation8 + $0x208] ss:$28 sps:$4 sm:$0xff]   ;;  %v9738_v45 = vld [vmem:[#allocation8 + $0x240] ss:$28 sps:$4 sm:$0xff]   ;;  %v9748_v33 = vld [vmem:[#allocation8 + $0x2b4] ss:$28 sps:$4 sm:$0xff]  }
 0x45c   : > { %6128 = vmatpush1.bf16.msra.mxu1 %v9711_v59  ;;  %v9740_v8 = vld [vmem:[#allocation8 + $0x244] ss:$28 sps:$4 sm:$0xff]   ;;  %v9745_v6 = vld [vmem:[#allocation8 + $0x27c] ss:$28 sps:$4 sm:$0xff]   ;;  %v9746_v52 = vld [vmem:[#allocation8 + $0x2b0] ss:$28 sps:$4 sm:$0xff]  }
 0x45d   : > { %6129 = vmatprep.subr.bf16.mxu1 %v9716_v60  ;;  %8708 = vmatpush3.bf16.msra.mxu0 %v9726_v22  ;;  %v9753_v43 = vld [vmem:[#allocation8 + $0x2ec] ss:$28 sps:$4 sm:$0xff]   ;;  %v9756_v59 = vld [vmem:[#allocation8 + $0x324] ss:$28 sps:$4 sm:$0xff]   ;;  %v9761_v60 = vld [vmem:[#allocation8 + $0x35c] ss:$28 sps:$4 sm:$0xff]  }
 0x45e   : > { %5835 = vmatmul.mubr.bf16.gmra.mrb[88].mxu1 %v12204_v21  ;;  %8709 = vmatprep.subr.bf16.mxu0 %v9733_v51  ;;  %v9751_v18 = vld [vmem:[#allocation8 + $0x2e8] ss:$28 sps:$4 sm:$0xff]   ;;  %v9754_v61 = vld [vmem:[#allocation8 + $0x320] ss:$28 sps:$4 sm:$0xff]   ;;  %v9759_v22 = vld [vmem:[#allocation8 + $0x358] ss:$28 sps:$4 sm:$0xff]  }
 0x45f   : > { %6061 = vmatmul.mubr.bf16.gmra.mrb[72].mxu0 %v12204_v21  ;;  %5844 = vmatprep.mubr.bf16.mxu1 %v12222_v12  ;;  %v9764_v51 = vld [vmem:[#allocation8 + $0x394] ss:$28 sps:$4 sm:$0xff]  }
 0x460   : > { %6070 = vmatprep.mubr.bf16.mxu0 %v12222_v12  ;;  %6130 = vmatpush1.bf16.msra.mxu1 %v9714_v42  ;;  %v9762_v42 = vld [vmem:[#allocation8 + $0x390] ss:$28 sps:$4 sm:$0xff]  }
 0x461   : > { %6131 = vmatprep.subr.bf16.mxu1 %v9721_v38  ;;  %8710 = vmatpush3.bf16.msra.mxu0 %v9734_v32  ;;  %v9766_v38 = vld [vmem:[#allocation8 + $0x398] ss:$28 sps:$4 sm:$0xff]   ;;  %v9769_v32 = vld [vmem:[#allocation8 + $0x3cc] ss:$28 sps:$4 sm:$0xff]  }
 0x462   : > { %8711 = vmatprep.subr.bf16.mxu0 %v9741_v30  ;;  %v9773_v30 = vld [vmem:[#allocation8 + $0x590] ss:$28 sps:$4 sm:$0xff]  }
 0x464   : > { %6132 = vmatpush1.bf16.msra.mxu1 %v9719_v57  ;;  %v9767_v57 = vld [vmem:[#allocation8 + $0x3c8] ss:$28 sps:$4 sm:$0xff]  }
 0x465   : > { %6133 = vmatprep.subr.bf16.mxu1 %v9724_v36  ;;  %8712 = vmatpush3.bf16.msra.mxu0 %v9742_v2  ;;  %v9774_v36 = vld [vmem:[#allocation8 + $0x3d0] ss:$28 sps:$4 sm:$0xff]   ;;  %v9781_v2 = vld [vmem:[#allocation8 + $0x5c8] ss:$28 sps:$4 sm:$0xff]  }
 0x466   : > { %5845 = vmatmul.mubr.bf16.gmra.mrb[92].mxu1 %v12231_v62  ;;  %8713 = vmatprep.subr.bf16.mxu0 %v9749_v34  ;;  %v9770_v34 = vld [vmem:[#allocation8 + $0x400] ss:$28 sps:$4 sm:$0xff]  }
 0x467   : > { %6071 = vmatmul.mubr.bf16.gmra.mrb[76].mxu0 %v12231_v62  ;;  %5854 = vmatprep.mubr.bf16.mxu1 %v12235_v23 }
 0x468   : > { %6080 = vmatprep.mubr.bf16.mxu0 %v12235_v23  ;;  %6134 = vmatpush1.bf16.msra.mxu1 %v9722_v10  ;;  %v9777_v10 = vld [vmem:[#allocation8 + $0x43c] ss:$28 sps:$4 sm:$0xff]  }
 0x469   : > { %6135 = vmatprep.subr.bf16.mxu1 %v9729_v5  ;;  %8714 = vmatpush3.bf16.msra.mxu0 %v9750_v63  ;;  %v9782_v5 = vld [vmem:[#allocation8 + $0x408] ss:$28 sps:$4 sm:$0xff]   ;;  %v9780_v63 = vld [vmem:[#allocation8 + $0x474] ss:$28 sps:$4 sm:$0xff]  }
 0x46a   : > { %8715 = vmatprep.subr.bf16.mxu0 %v9757_v44  ;;  %v9790_v44 = vld [vmem:[#allocation8 + $0x440] ss:$28 sps:$4 sm:$0xff]  }
 0x46c   : > { %6136 = vmatpush1.bf16.msra.mxu1 %v9727_v47  ;;  %v9778_v47 = vld [vmem:[#allocation8 + $0x470] ss:$28 sps:$4 sm:$0xff]  }
 0x46d   : > { %6137 = vmatprep.subr.bf16.mxu1 %v9732_v20  ;;  %8716 = vmatpush3.bf16.msra.mxu0 %v9758_v28  ;;  %v9785_v20 = vld [vmem:[#allocation8 + $0x4ac] ss:$28 sps:$4 sm:$0xff]   ;;  %v9797_v28 = vld [vmem:[#allocation8 + $0x638] ss:$28 sps:$4 sm:$0xff]  }
 0x46e   : > { %5855 = vmatmul.mubr.bf16.gmra.mrb[96].mxu1 %v12252_v41  ;;  %8765 = vmatprep.subr.bf16.mxu0 %v9765_v13  ;;  %v9805_v13 = vld [vmem:[#allocation8 + $0x670] ss:$28 sps:$4 sm:$0xff]  }
 0x46f   : > { %6081 = vmatmul.mubr.bf16.gmra.mrb[80].mxu0 %v12252_v41  ;;  %5864 = vmatprep.mubr.bf16.mxu1 %v12256_v31 }
 0x470   : > { %6090 = vmatprep.mubr.bf16.mxu0 %v12256_v31  ;;  %6138 = vmatpush1.bf16.msra.mxu1 %v9730_v15  ;;  %v9788_v15 = vld [vmem:[#allocation8 + $0x4e4] ss:$28 sps:$4 sm:$0xff]  }
 0x471   : > { %6139 = vmatprep.subr.bf16.mxu1 %v9737_v9  ;;  %v9786_v9 = vld [vmem:[#allocation8 + $0x4e0] ss:$28 sps:$4 sm:$0xff]  }
 0x474   : > { %6140 = vmatpush1.bf16.msra.mxu1 %v9735_v24  ;;  %v9793_v24 = vld [vmem:[#allocation8 + $0x51c] ss:$28 sps:$4 sm:$0xff]  }
 0x475   : > { %6141 = vmatprep.subr.bf16.mxu1 %v9740_v8  ;;  %v9806_v8 = vld [vmem:[#allocation8 + $0x4b0] ss:$28 sps:$4 sm:$0xff]  }
 0x476   : > { %5865 = vmatmul.mubr.bf16.gmra.mrb[100].mxu1 %v12282_v39 }
 0x477   : > { %6091 = vmatmul.mubr.bf16.gmra.mrb[84].mxu0 %v12282_v39  ;;  %5874 = vmatprep.mubr.bf16.mxu1 %v12289_v26 }
 0x478   : > { %6100 = vmatprep.mubr.bf16.mxu0 %v12289_v26  ;;  %6142 = vmatpush1.bf16.msra.mxu1 %v9738_v45  ;;  %v9791_v45 = vld [vmem:[#allocation8 + $0x518] ss:$28 sps:$4 sm:$0xff]  }
 0x479   : > { %6143 = vmatprep.subr.bf16.mxu1 %v9745_v6  ;;  %v9814_v6 = vld [vmem:[#allocation8 + $0x4e8] ss:$28 sps:$4 sm:$0xff]  }
 0x47c   : > { %6144 = vmatpush1.bf16.msra.mxu1 %v9743_v1  ;;  %v9794_v1 = vld [vmem:[#allocation8 + $0x550] ss:$28 sps:$4 sm:$0xff]  }
 0x47d   : > { %6145 = vmatprep.subr.bf16.mxu1 %v9748_v33  ;;  %v9801_v33 = vld [vmem:[#allocation8 + $0x58c] ss:$28 sps:$4 sm:$0xff]  }
 0x47e   : > { %5875 = vmatmul.mubr.bf16.gmra.mrb[104].mxu1 %v12291_v3 }
 0x47f   : > { %6101 = vmatmul.mubr.bf16.gmra.mrb[88].mxu0 %v12291_v3  ;;  %5884 = vmatprep.mubr.bf16.mxu1 %v12293_v7 }
 0x480   : > { %6110 = vmatprep.mubr.bf16.mxu0 %v12293_v7  ;;  %6146 = vmatpush1.bf16.msra.mxu1 %v9746_v52  ;;  %v9821_v52 = vld [vmem:[#allocation8 + $0x6e0] ss:$28 sps:$4 sm:$0xff]  }
 0x481   : > { %6147 = vmatprep.subr.bf16.mxu1 %v9753_v43  ;;  %v9804_v43 = vld [vmem:[#allocation8 + $0x5c4] ss:$28 sps:$4 sm:$0xff]  }
 0x484   : > { %6148 = vmatpush1.bf16.msra.mxu1 %v9751_v18  ;;  %v9802_v18 = vld [vmem:[#allocation8 + $0x5c0] ss:$28 sps:$4 sm:$0xff]  }
 0x485   : > { %6149 = vmatprep.subr.bf16.mxu1 %v9756_v59  ;;  %v9809_v59 = vld [vmem:[#allocation8 + $0x5fc] ss:$28 sps:$4 sm:$0xff]  }
 0x486   : > { %5885 = vmatmul.mubr.bf16.gmra.mrb[108].mxu1 %v12300_v37 }
 0x487   : > { %6111 = vmatmul.mubr.bf16.gmra.mrb[92].mxu0 %v12300_v37  ;;  %6153 = vmatprep.mubr.bf16.mxu1 %v12034_v4 }
 0x488   : > { %6150 = vmatpush1.bf16.msra.mxu1 %v9754_v61  ;;  %6379 = vmatprep.mubr.bf16.mxu0 %v12034_v4  ;;  %v9772_v4 = vld [vmem:[#allocation8 + $0x404] ss:$28 sps:$4 sm:$0xff]   ;;  %v9810_v61 = vld [vmem:[#allocation8 + $0x630] ss:$28 sps:$4 sm:$0xff]  }
 0x489   : > { %6151 = vmatprep.subr.bf16.mxu1 %v9761_v60  ;;  %v9817_v60 = vld [vmem:[#allocation8 + $0x66c] ss:$28 sps:$4 sm:$0xff]  }
 0x48c   : > { %6152 = vmatpush1.bf16.msra.mxu1 %v9759_v22  ;;  %v9820_v22 = vld [vmem:[#allocation8 + $0x6a4] ss:$28 sps:$4 sm:$0xff]  }
 0x48d   : > { %6234 = vmatprep.subr.bf16.mxu1 %v9764_v51  ;;  %v9825_v51 = vld [vmem:[#allocation8 + $0x6dc] ss:$28 sps:$4 sm:$0xff]  }
 0x48f   : > { %6154 = vmatmul.mubr.bf16.vlgmr.msra.gmra.mrb[112].mxu1 %v12038_v11  ;;  %6380 = vmatmul.mubr.bf16.vlgmr.msra.gmra.mrb[96].mxu0 %v12038_v11  ;;  %v9789_v11 = vld [vmem:[#allocation8 + $0x600] ss:$28 sps:$4 sm:$0xff]  }
 0x490   : > { %6163 = vmatprep.mubr.bf16.mxu1 %v12042_v17  ;;  %6235 = vmatpush1.bf16.msra.mxu1 %v9762_v42 }
 0x491   : > { %6387 = vmatprep.mubr.bf16.mxu0 %v12042_v17  ;;  %8766 = vmatpush3.bf16.msra.mxu0 %v9766_v38  ;;  %v9775_v17 = vld [vmem:[#allocation8 + $0x438] ss:$28 sps:$4 sm:$0xff]  }
 0x492   : > { %6236 = vmatprep.subr.bf16.mxu1 %v9769_v32  ;;  %8767 = vmatprep.subr.bf16.mxu0 %v9773_v30 }
 0x494   : > { %6237 = vmatpush1.bf16.msra.mxu1 %v9767_v57 }
 0x495   : > { %6238 = vmatprep.subr.bf16.mxu1 %v9772_v4  ;;  %8768 = vmatpush3.bf16.msra.mxu0 %v9774_v36 }
 0x496   : > { %8769 = vmatprep.subr.bf16.mxu0 %v9781_v2 }
 0x497   : > { %6164 = vmatmul.mubr.bf16.gmra.mrb[116].mxu1 %v12057_v25  ;;  %6388 = vmatmul.mubr.bf16.gmra.mrb[100].mxu0 %v12057_v25  ;;  %v9798_v25 = vld [vmem:[#allocation8 + $0x478] ss:$28 sps:$4 sm:$0xff]  }
 0x498   : > { %6173 = vmatprep.mubr.bf16.mxu1 %v12067_v14  ;;  %6239 = vmatpush1.bf16.msra.mxu1 %v9770_v34 }
 0x499   : > { %6395 = vmatprep.mubr.bf16.mxu0 %v12067_v14  ;;  %6240 = vmatprep.subr.bf16.mxu1 %v9777_v10  ;;  %v9783_v14 = vld [vmem:[#allocation8 + $0x4a8] ss:$28 sps:$4 sm:$0xff]  }
 0x49a   : > { %8770 = vmatpush3.bf16.msra.mxu0 %v9782_v5 }
 0x49b   : > { %8771 = vmatprep.subr.bf16.mxu0 %v9789_v11 }
 0x49c   : > { %6241 = vmatpush1.bf16.msra.mxu1 %v9775_v17 }
 0x49d   : > { %6242 = vmatprep.subr.bf16.mxu1 %v9780_v63 }
 0x49e   : > { %8772 = vmatpush3.bf16.msra.mxu0 %v9790_v44 }
 0x49f   : > { %6174 = vmatmul.mubr.bf16.gmra.mrb[120].mxu1 %v12070_v16  ;;  %6396 = vmatmul.mubr.bf16.gmra.mrb[104].mxu0 %v12070_v16  ;;  %v9813_v16 = vld [vmem:[#allocation8 + $0x6a8] ss:$28 sps:$4 sm:$0xff]  }
 0x4a0   : > { %6183 = vmatprep.mubr.bf16.mxu1 %v12082_v29  ;;  %6243 = vmatpush1.bf16.msra.mxu1 %v9778_v47 }
 0x4a1   : > { %6403 = vmatprep.mubr.bf16.mxu0 %v12082_v29  ;;  %6244 = vmatprep.subr.bf16.mxu1 %v9785_v20  ;;  %v9796_v29 = vld [vmem:[#allocation8 + $0x554] ss:$28 sps:$4 sm:$0xff]  }
 0x4a2   : > { %8773 = vmatprep.subr.bf16.mxu0 %v9797_v28 }
 0x4a3   : > { %8774 = vmatpush3.bf16.msra.mxu0 %v9798_v25 }
 0x4a4   : > { %6245 = vmatpush1.bf16.msra.mxu1 %v9783_v14  ;;  %8775 = vmatprep.subr.bf16.mxu0 %v9805_v13 }
 0x4a5   : > { %6246 = vmatprep.subr.bf16.mxu1 %v9788_v15 }
 0x4a7   : > { %6184 = vmatmul.mubr.bf16.gmra.mrb[124].mxu1 %v12086_v54  ;;  %6404 = vmatmul.mubr.bf16.gmra.mrb[108].mxu0 %v12086_v54  ;;  %v9822_v54 = vld [vmem:[#allocation8 + $0x520] ss:$28 sps:$4 sm:$0xff]  }
 0x4a8   : > { %6193 = vmatprep.mubr.bf16.mxu1 %v12100_v0  ;;  %6247 = vmatpush1.bf16.msra.mxu1 %v9786_v9 }
 0x4a9   : > { %6411 = vmatprep.mubr.bf16.mxu0 %v12100_v0  ;;  %6248 = vmatprep.subr.bf16.mxu1 %v9793_v24  ;;  %v9799_v0 = vld [vmem:[#allocation8 + $0x588] ss:$28 sps:$4 sm:$0xff]  }
 0x4aa   : > { %8776 = vmatpush3.bf16.msra.mxu0 %v9806_v8 }
 0x4ab   : > { %8777 = vmatprep.subr.bf16.mxu0 %v9813_v16 }
 0x4ac   : > { %6249 = vmatpush1.bf16.msra.mxu1 %v9791_v45 }
 0x4ad   : > { %6250 = vmatprep.subr.bf16.mxu1 %v9796_v29 }
 0x4ae   : > { %8778 = vmatpush3.bf16.msra.mxu0 %v9814_v6 }
 0x4af   : > { %6194 = vmatmul.mubr.bf16.gmra.mrb[128].mxu1 %v12107_v35  ;;  %6412 = vmatmul.mubr.bf16.gmra.mrb[112].mxu0 %v12107_v35  ;;  %v9807_v35 = vld [vmem:[#allocation8 + $0x5f8] ss:$28 sps:$4 sm:$0xff]  }
 0x4b0   : > { %6203 = vmatprep.mubr.bf16.mxu1 %v12112_v55  ;;  %6251 = vmatpush1.bf16.msra.mxu1 %v9794_v1 }
 0x4b1   : > { %6419 = vmatprep.mubr.bf16.mxu0 %v12112_v55  ;;  %6252 = vmatprep.subr.bf16.mxu1 %v9801_v33  ;;  %v9812_v55 = vld [vmem:[#allocation8 + $0x634] ss:$28 sps:$4 sm:$0xff]  }
 0x4b2   : > { %8779 = vmatprep.subr.bf16.mxu0 %v9821_v52 }
 0x4b3   : > { %8780 = vmatpush3.bf16.msra.mxu0 %v9822_v54 }
 0x4b4   : > { %6253 = vmatpush1.bf16.msra.mxu1 %v9799_v0 }
 0x4b5   : > { %6254 = vmatprep.subr.bf16.mxu1 %v9804_v43 }
 0x4b7   : > { %6204 = vmatmul.mubr.bf16.gmra.mrb[132].mxu1 %v12116_v27  ;;  %6420 = vmatmul.mubr.bf16.gmra.mrb[116].mxu0 %v12116_v27  ;;  %v9815_v27 = vld [vmem:[#allocation8 + $0x668] ss:$28 sps:$4 sm:$0xff]  }
 0x4b8   : > { %6213 = vmatprep.mubr.bf16.mxu1 %v12133_v50  ;;  %6255 = vmatpush1.bf16.msra.mxu1 %v9802_v18 }
 0x4b9   : > { %6427 = vmatprep.mubr.bf16.mxu0 %v12133_v50  ;;  %6256 = vmatprep.subr.bf16.mxu1 %v9809_v59  ;;  %v9818_v50 = vld [vmem:[#allocation8 + $0x6a0] ss:$28 sps:$4 sm:$0xff]  }
 0x4bc   : > { %6257 = vmatpush1.bf16.msra.mxu1 %v9807_v35 }
 0x4bd   : > { %6258 = vmatprep.subr.bf16.mxu1 %v9812_v55 }
 0x4bf   : > { %6214 = vmatmul.mubr.bf16.gmra.mrb[136].mxu1 %v12136_v19  ;;  %6428 = vmatmul.mubr.bf16.gmra.mrb[120].mxu0 %v12136_v19  ;;  %v9823_v19 = vld [vmem:[#allocation8 + $0x6d8] ss:$28 sps:$4 sm:$0xff]  }
 0x4c0   : > { %6223 = vmatprep.mubr.bf16.mxu1 %v12145_v48  ;;  %6259 = vmatpush1.bf16.msra.mxu1 %v9810_v61 }
 0x4c1   : > { %6435 = vmatprep.mubr.bf16.mxu0 %v12145_v48  ;;  %6260 = vmatprep.subr.bf16.mxu1 %v9817_v60 }
 0x4c4   : > { %6261 = vmatpush1.bf16.msra.mxu1 %v9815_v27 }
 0x4c5   : > { %6262 = vmatprep.subr.bf16.mxu1 %v9820_v22 }
 0x4c7   : > { %6224 = vmatmul.mubr.bf16.gmra.mrb[140].mxu1 %v12151_v53  ;;  %6436 = vmatmul.mubr.bf16.gmra.mrb[124].mxu0 %v12151_v53 }
 0x4c8   : > { %6263 = vmatpush1.bf16.msra.mxu1 %v9818_v50  ;;  %6266 = vmatprep.mubr.bf16.mxu1 %v12161_v49 }
 0x4c9   : > { %6476 = vmatprep.mubr.bf16.mxu0 %v12161_v49  ;;  %6264 = vmatprep.subr.bf16.mxu1 %v9825_v51 }
 0x4cc   : > { %6265 = vmatpush1.bf16.msra.mxu1 %v9823_v19 }
 0x4cf   : > { %6267 = vmatmul.mubr.bf16.vlgmr.msra.gmra.mrb[112].mxu1 %v12167_v56  ;;  %6477 = vmatmul.mubr.bf16.vlgmr.msra.gmra.mrb[128].mxu0 %v12167_v56 }
 0x4d0   : > { %6276 = vmatprep.mubr.bf16.mxu1 %v12176_v58  ;;  %6484 = vmatprep.mubr.bf16.mxu0 %v12176_v58 }
 0x4d7   : > { %6277 = vmatmul.mubr.bf16.gmra.mrb[116].mxu1 %v12191_v46  ;;  %6485 = vmatmul.mubr.bf16.gmra.mrb[132].mxu0 %v12191_v46 }
 0x4d8   : > { %6286 = vmatprep.mubr.bf16.mxu1 %v12198_v40  ;;  %6492 = vmatprep.mubr.bf16.mxu0 %v12198_v40 }
 0x4df   : > { %6287 = vmatmul.mubr.bf16.gmra.mrb[120].mxu1 %v12204_v21  ;;  %6493 = vmatmul.mubr.bf16.gmra.mrb[136].mxu0 %v12204_v21 }
 0x4e0   : > { %6296 = vmatprep.mubr.bf16.mxu1 %v12222_v12  ;;  %6500 = vmatprep.mubr.bf16.mxu0 %v12222_v12 }
 0x4e7   : > { %6297 = vmatmul.mubr.bf16.gmra.mrb[124].mxu1 %v12231_v62  ;;  %6501 = vmatmul.mubr.bf16.gmra.mrb[140].mxu0 %v12231_v62 }
 0x4e8   : > { %6306 = vmatprep.mubr.bf16.mxu1 %v12235_v23  ;;  %6508 = vmatprep.mubr.bf16.mxu0 %v12235_v23 }
 0x4ef   : > { %6307 = vmatmul.mubr.bf16.gmra.mrb[128].mxu1 %v12252_v41  ;;  %6509 = vmatmul.mubr.bf16.gmra.mrb[144].mxu0 %v12252_v41 }
 0x4f0   : > { %6316 = vmatprep.mubr.bf16.mxu1 %v12256_v31  ;;  %6516 = vmatprep.mubr.bf16.mxu0 %v12256_v31 }
 0x4f7   : > { %6317 = vmatmul.mubr.bf16.gmra.mrb[132].mxu1 %v12282_v39  ;;  %6517 = vmatmul.mubr.bf16.gmra.mrb[148].mxu0 %v12282_v39 }
 0x4f8   : > { %6326 = vmatprep.mubr.bf16.mxu1 %v12289_v26  ;;  %6524 = vmatprep.mubr.bf16.mxu0 %v12289_v26 }
 0x4ff   : > { %6327 = vmatmul.mubr.bf16.gmra.mrb[136].mxu1 %v12291_v3  ;;  %6525 = vmatmul.mubr.bf16.gmra.mrb[152].mxu0 %v12291_v3 }
 0x500   : > { %6336 = vmatprep.mubr.bf16.mxu1 %v12293_v7  ;;  %6532 = vmatprep.mubr.bf16.mxu0 %v12293_v7 }
 0x507   : > { %6337 = vmatmul.mubr.bf16.gmra.mrb[140].mxu1 %v12300_v37  ;;  %6533 = vmatmul.mubr.bf16.gmra.mrb[156].mxu0 %v12300_v37 }
 0x521   : > { %v12388_v48 = vpop.f32.mrb[80].mxu1 }
 0x522   : > { %v12390_v53 = vpop.f32.mrb[64].mxu0  ;;  %v12392_v49 = vpop.f32.mrb[81].mxu1  ;;  %v6695_v56 = vmul.f32 %v12388_v48, %v12388_v48 }
 0x523   : > { %v12396_v58 = vpop.f32.mrb[65].mxu0  ;;  %v12398_v46 = vpop.f32.mrb[82].mxu1  ;;  %v6697_v40 = vmul.f32 %v12390_v53, %v12390_v53  ;;  %v6696_v21 = vmul.f32 %v12392_v49, %v12392_v49 }
 0x524   : > { %v6541_v12 = vadd.f32 %v12398_v46, %v12388_v48  ;;  %v6702_v62 = vmul.f32 %v12398_v46, %v12398_v46  ;;  %v12408_v23 = vpop.f32.mrb[66].mxu0  ;;  %v12410_v41 = vpop.f32.mrb[83].mxu1  ;;  %v6698_v37 = vmul.f32 %v12396_v58, %v12396_v58 }
 0x525   : > { %v6583_v31 = vadd.f32 %v12408_v23, %v12390_v53  ;;  %v6704_v39 = vmul.f32 %v12408_v23, %v12408_v23  ;;  %v6562_v26 = vadd.f32 %v12410_v41, %v12392_v49  ;;  %v6703_v3 = vmul.f32 %v12410_v41, %v12410_v41  ;;  %v12420_v7 = vpop.f32.mrb[67].mxu0 }
 0x526   : > { %v6807_v42 = vadd.f32 %v6702_v62, %v6695_v56  ;;  %v6604_v38 = vadd.f32 %v12420_v7, %v12396_v58  ;;  %v6705_v32 = vmul.f32 %v12420_v7, %v12420_v7 }
 0x527   : > { %v6849_v30 = vadd.f32 %v6704_v39, %v6697_v40  ;;  %v6828_v57 = vadd.f32 %v6703_v3, %v6696_v21 }
 0x528   : > { %v6870_v4 = vadd.f32 %v6705_v32, %v6698_v37 }
 0x529   : > { %v12428_v36 = vpop.f32.mrb[84].mxu1 }
 0x52a   : > { %v6542_v2 = vadd.f32 %v6541_v12, %v12428_v36  ;;  %v6709_v34 = vmul.f32 %v12428_v36, %v12428_v36  ;;  %v12433_v10 = vpop.f32.mrb[68].mxu0  ;;  %v12435_v5 = vpop.f32.mrb[85].mxu1 }
 0x52b   : > { %v6584_v11 = vadd.f32 %v6583_v31, %v12433_v10  ;;  %v6711_v17 = vmul.f32 %v12433_v10, %v12433_v10  ;;  %v6563_v63 = vadd.f32 %v6562_v26, %v12435_v5  ;;  %v6710_v44 = vmul.f32 %v12435_v5, %v12435_v5  ;;  %v12443_v47 = vpop.f32.mrb[69].mxu0  ;;  %v12445_v20 = vpop.f32.mrb[86].mxu1 }
 0x52c   : > { %v6808_v28 = vadd.f32 %v6807_v42, %v6709_v34  ;;  %v6605_v25 = vadd.f32 %v6604_v38, %v12443_v47  ;;  %v6712_v14 = vmul.f32 %v12443_v47, %v12443_v47  ;;  %v6543_v13 = vadd.f32 %v6542_v2, %v12445_v20  ;;  %v12451_v15 = vpop.f32.mrb[70].mxu0  ;;  %v12453_v9 = vpop.f32.mrb[87].mxu1 }
 0x52d   : > { %v6850_v24 = vadd.f32 %v6849_v30, %v6711_v17  ;;  %v6829_v8 = vadd.f32 %v6828_v57, %v6710_v44  ;;  %v6716_v16 = vmul.f32 %v12445_v20, %v12445_v20  ;;  %v6585_v45 = vadd.f32 %v6584_v11, %v12451_v15  ;;  %v12458_v29 = vpop.f32.mrb[71].mxu0 }
 0x52e   : > { %v6871_v6 = vadd.f32 %v6870_v4, %v6712_v14  ;;  %v6718_v1 = vmul.f32 %v12451_v15, %v12451_v15  ;;  %v6564_v33 = vadd.f32 %v6563_v63, %v12453_v9  ;;  %v6717_v52 = vmul.f32 %v12453_v9, %v12453_v9 }
 0x52f   : > { %v6809_v54 = vadd.f32 %v6808_v28, %v6716_v16  ;;  %v6606_v0 = vadd.f32 %v6605_v25, %v12458_v29  ;;  %v6719_v43 = vmul.f32 %v12458_v29, %v12458_v29 }
 0x530   : > { %v6851_v18 = vadd.f32 %v6850_v24, %v6718_v1  ;;  %v6830_v59 = vadd.f32 %v6829_v8, %v6717_v52 }
 0x531   : > { %v6872_v35 = vadd.f32 %v6871_v6, %v6719_v43  ;;  %v12468_v55 = vpop.f32.mrb[88].mxu1 }
 0x532   : > { %v6544_v61 = vadd.f32 %v6543_v13, %v12468_v55  ;;  %v6723_v60 = vmul.f32 %v12468_v55, %v12468_v55  ;;  %v12473_v27 = vpop.f32.mrb[72].mxu0  ;;  %v12475_v22 = vpop.f32.mrb[89].mxu1 }
 0x533   : > { %v6586_v50 = vadd.f32 %v6585_v45, %v12473_v27  ;;  %v6725_v51 = vmul.f32 %v12473_v27, %v12473_v27  ;;  %v6565_v19 = vadd.f32 %v6564_v33, %v12475_v22  ;;  %v6724_v56 = vmul.f32 %v12475_v22, %v12475_v22  ;;  %v12483_v40 = vpop.f32.mrb[73].mxu0  ;;  %v12485_v21 = vpop.f32.mrb[90].mxu1 }
 0x534   : > { %v6810_v12 = vadd.f32 %v6809_v54, %v6723_v60  ;;  %v6607_v62 = vadd.f32 %v6606_v0, %v12483_v40  ;;  %v6726_v31 = vmul.f32 %v12483_v40, %v12483_v40  ;;  %v6545_v39 = vadd.f32 %v6544_v61, %v12485_v21  ;;  %v12491_v26 = vpop.f32.mrb[74].mxu0  ;;  %v12493_v3 = vpop.f32.mrb[91].mxu1 }
 0x535   : > { %v6852_v37 = vadd.f32 %v6851_v18, %v6725_v51  ;;  %v6831_v42 = vadd.f32 %v6830_v59, %v6724_v56  ;;  %v6730_v38 = vmul.f32 %v12485_v21, %v12485_v21  ;;  %v6587_v32 = vadd.f32 %v6586_v50, %v12491_v26  ;;  %v12498_v30 = vpop.f32.mrb[75].mxu0 }
 0x536   : > { %v6873_v57 = vadd.f32 %v6872_v35, %v6726_v31  ;;  %v6732_v4 = vmul.f32 %v12491_v26, %v12491_v26  ;;  %v6566_v2 = vadd.f32 %v6565_v19, %v12493_v3  ;;  %v6731_v34 = vmul.f32 %v12493_v3, %v12493_v3 }
 0x537   : > { %v6811_v11 = vadd.f32 %v6810_v12, %v6730_v38  ;;  %v6608_v17 = vadd.f32 %v6607_v62, %v12498_v30  ;;  %v6733_v63 = vmul.f32 %v12498_v30, %v12498_v30 }
 0x538   : > { %v6853_v44 = vadd.f32 %v6852_v37, %v6732_v4  ;;  %v6832_v28 = vadd.f32 %v6831_v42, %v6731_v34 }
 0x539   : > { %v6874_v25 = vadd.f32 %v6873_v57, %v6733_v63  ;;  %v12508_v14 = vpop.f32.mrb[92].mxu1 }
 0x53a   : > { %v6546_v13 = vadd.f32 %v6545_v39, %v12508_v14  ;;  %v6737_v24 = vmul.f32 %v12508_v14, %v12508_v14  ;;  %v12513_v8 = vpop.f32.mrb[76].mxu0  ;;  %v12515_v16 = vpop.f32.mrb[93].mxu1 }
 0x53b   : > { %v6588_v45 = vadd.f32 %v6587_v32, %v12513_v8  ;;  %v6739_v6 = vmul.f32 %v12513_v8, %v12513_v8  ;;  %v6567_v1 = vadd.f32 %v6566_v2, %v12515_v16  ;;  %v6738_v33 = vmul.f32 %v12515_v16, %v12515_v16  ;;  %v12523_v52 = vpop.f32.mrb[77].mxu0  ;;  %v12525_v54 = vpop.f32.mrb[94].mxu1 }
 0x53c   : > { %14402 = vst [vmem:[#allocation66_spill] sm:$0xff] %v12523_v52  ;;  %14403 = vst [vmem:[#allocation27_spill] sm:$0xff] %v12525_v54  ;;  %v6812_v0 = vadd.f32 %v6811_v11, %v6737_v24  ;;  %v6609_v43 = vadd.f32 %v6608_v17, %v12523_v52  ;;  %v6740_v18 = vmul.f32 %v12523_v52, %v12523_v52  ;;  %v12531_v35 = vpop.f32.mrb[78].mxu0  ;;  %v12533_v61 = vpop.f32.mrb[95].mxu1 }
 0x53d   : > { %v6547_v59 = vadd.f32 %v6546_v13, %v12525_v54  ;;  %14404 = vst [vmem:[#allocation31_spill] sm:$0xff] %v12531_v35  ;;  %14405 = vst [vmem:[#allocation26_spill] sm:$0xff] %v12533_v61  ;;  %v6854_v60 = vadd.f32 %v6853_v44, %v6739_v6  ;;  %v6833_v50 = vadd.f32 %v6832_v28, %v6738_v33  ;;  %v12538_v56 = vpop.f32.mrb[79].mxu0 }
 0x53e   : > { %v6744_v51 = vmul.f32 %v12525_v54, %v12525_v54  ;;  %v6589_v19 = vadd.f32 %v6588_v45, %v12531_v35  ;;  %14406 = vst [vmem:[#allocation29_spill] sm:$0xff] %v12538_v56  ;;  %v6875_v12 = vadd.f32 %v6874_v25, %v6740_v18  ;;  %v6746_v62 = vmul.f32 %v12531_v35, %v12531_v35 }
 0x53f   : > { %v6568_v31 = vadd.f32 %v6567_v1, %v12533_v61  ;;  %v6745_v39 = vmul.f32 %v12533_v61, %v12533_v61  ;;  %v6610_v42 = vadd.f32 %v6609_v43, %v12538_v56  ;;  %v6747_v38 = vmul.f32 %v12538_v56, %v12538_v56 }
 0x540   : > { %v6813_v37 = vadd.f32 %v6812_v0, %v6744_v51  ;;  %v6855_v32 = vadd.f32 %v6854_v60, %v6746_v62 }
 0x541   : > { %v6834_v57 = vadd.f32 %v6833_v50, %v6745_v39  ;;  %v6876_v4 = vadd.f32 %v6875_v12, %v6747_v38  ;;  %v12548_v2 = vpop.f32.mrb[96].mxu1 }
 0x542   : > { %14407 = vst [vmem:[#allocation35_spill] sm:$0xff] %v12548_v2  ;;  %v6548_v34 = vadd.f32 %v6547_v59, %v12548_v2  ;;  %v6751_v11 = vmul.f32 %v12548_v2, %v12548_v2  ;;  %v12553_v17 = vpop.f32.mrb[80].mxu0  ;;  %v12555_v63 = vpop.f32.mrb[97].mxu1 }
 0x543   : > { %14408 = vst [vmem:[#allocation39_spill] sm:$0xff] %v12553_v17  ;;  %14409 = vst [vmem:[#allocation76_spill] sm:$0xff] %v12555_v63  ;;  %v6590_v44 = vadd.f32 %v6589_v19, %v12553_v17  ;;  %v6753_v28 = vmul.f32 %v12553_v17, %v12553_v17  ;;  %v6569_v25 = vadd.f32 %v6568_v31, %v12555_v63  ;;  %v12563_v24 = vpop.f32.mrb[81].mxu0  ;;  %v12565_v45 = vpop.f32.mrb[98].mxu1 }
 0x544   : > { %v6752_v13 = vmul.f32 %v12555_v63, %v12555_v63  ;;  %14410 = vst [vmem:[#allocation34_spill] sm:$0xff] %v12563_v24  ;;  %14411 = vst [vmem:[#allocation37_spill] sm:$0xff] %v12565_v45  ;;  %v6814_v6 = vadd.f32 %v6813_v37, %v6751_v11  ;;  %v6611_v1 = vadd.f32 %v6610_v42, %v12563_v24  ;;  %v12571_v43 = vpop.f32.mrb[82].mxu0  ;;  %v12573_v18 = vpop.f32.mrb[99].mxu1 }
 0x545   : > { %v6754_v33 = vmul.f32 %v12563_v24, %v12563_v24  ;;  %v6549_v0 = vadd.f32 %v6548_v34, %v12565_v45  ;;  %14412 = vst [vmem:[#allocation43_spill] sm:$0xff] %v12571_v43  ;;  %14413 = vst [vmem:[#allocation47_spill] sm:$0xff] %v12573_v18  ;;  %v6856_v59 = vadd.f32 %v6855_v32, %v6753_v28  ;;  %v12578_v19 = vpop.f32.mrb[83].mxu0 }
 0x546   : > { %v6835_v60 = vadd.f32 %v6834_v57, %v6752_v13  ;;  %v6758_v50 = vmul.f32 %v12565_v45, %v12565_v45  ;;  %v6591_v51 = vadd.f32 %v6590_v44, %v12571_v43  ;;  %14414 = vst [vmem:[#allocation42_spill] sm:$0xff] %v12578_v19  ;;  %v6760_v62 = vmul.f32 %v12571_v43, %v12571_v43 }
 0x547   : > { %v6877_v12 = vadd.f32 %v6876_v4, %v6754_v33  ;;  %v6570_v31 = vadd.f32 %v6569_v25, %v12573_v18  ;;  %v6759_v39 = vmul.f32 %v12573_v18, %v12573_v18  ;;  %v6612_v42 = vadd.f32 %v6611_v1, %v12578_v19 }
 0x548   : > { %v6815_v37 = vadd.f32 %v6814_v6, %v6758_v50  ;;  %v6761_v38 = vmul.f32 %v12578_v19, %v12578_v19  ;;  %v6857_v32 = vadd.f32 %v6856_v59, %v6760_v62 }
 0x549   : > { %v6836_v57 = vadd.f32 %v6835_v60, %v6759_v39  ;;  %v12588_v11 = vpop.f32.mrb[100].mxu1 }
 0x54a   : > { %v6878_v34 = vadd.f32 %v6877_v12, %v6761_v38  ;;  %14415 = vst [vmem:[#allocation45_spill] sm:$0xff] %v12588_v11  ;;  %v6550_v4 = vadd.f32 %v6549_v0, %v12588_v11  ;;  %v6765_v44 = vmul.f32 %v12588_v11, %v12588_v11  ;;  %v12593_v28 = vpop.f32.mrb[84].mxu0  ;;  %v12595_v25 = vpop.f32.mrb[101].mxu1 }
 0x54b   : > { %14416 = vst [vmem:[#allocation50_spill] sm:$0xff] %v12593_v28  ;;  %14417 = vst [vmem:[#allocation49_spill] sm:$0xff] %v12595_v25  ;;  %v6592_v13 = vadd.f32 %v6591_v51, %v12593_v28  ;;  %v6767_v6 = vmul.f32 %v12593_v28, %v12593_v28  ;;  %v6571_v1 = vadd.f32 %v6570_v31, %v12595_v25  ;;  %v12603_v59 = vpop.f32.mrb[85].mxu0  ;;  %v12605_v0 = vpop.f32.mrb[102].mxu1 }
 0x54c   : > { %v6766_v33 = vmul.f32 %v12595_v25, %v12595_v25  ;;  %14418 = vst [vmem:[#allocation52_spill] sm:$0xff] %v12603_v59  ;;  %14419 = vst [vmem:[#allocation65_spill] sm:$0xff] %v12605_v0  ;;  %v6816_v60 = vadd.f32 %v6815_v37, %v6765_v44  ;;  %v6613_v50 = vadd.f32 %v6612_v42, %v12603_v59  ;;  %v12611_v62 = vpop.f32.mrb[86].mxu0  ;;  %v12613_v39 = vpop.f32.mrb[103].mxu1 }
 0x54d   : > { %v6768_v12 = vmul.f32 %v12603_v59, %v12603_v59  ;;  %v6551_v51 = vadd.f32 %v6550_v4, %v12605_v0  ;;  %14420 = vst [vmem:[#allocation58_spill] sm:$0xff] %v12611_v62  ;;  %14421 = vst [vmem:[#allocation60_spill] sm:$0xff] %v12613_v39  ;;  %v6858_v31 = vadd.f32 %v6857_v32, %v6767_v6  ;;  %v12618_v11 = vpop.f32.mrb[87].mxu0 }
 0x54e   : > { %v6837_v38 = vadd.f32 %v6836_v57, %v6766_v33  ;;  %v6772_v28 = vmul.f32 %v12605_v0, %v12605_v0  ;;  %v6593_v25 = vadd.f32 %v6592_v13, %v12611_v62  ;;  %14422 = vst [vmem:[#allocation17_spill] sm:$0xff] %v12618_v11  ;;  %v6774_v42 = vmul.f32 %v12611_v62, %v12611_v62 }
 0x54f   : > { %v6879_v37 = vadd.f32 %v6878_v34, %v6768_v12  ;;  %v6572_v44 = vadd.f32 %v6571_v1, %v12613_v39  ;;  %v6773_v4 = vmul.f32 %v12613_v39, %v12613_v39  ;;  %v6614_v32 = vadd.f32 %v6613_v50, %v12618_v11 }
 0x550   : > { %v6817_v59 = vadd.f32 %v6816_v60, %v6772_v28  ;;  %v6775_v57 = vmul.f32 %v12618_v11, %v12618_v11  ;;  %v6859_v6 = vadd.f32 %v6858_v31, %v6774_v42 }
 0x551   : > { %v6838_v33 = vadd.f32 %v6837_v38, %v6773_v4  ;;  %v12628_v0 = vpop.f32.mrb[104].mxu1 }
 0x552   : > { %v6880_v13 = vadd.f32 %v6879_v37, %v6775_v57  ;;  %14423 = vst [vmem:[#allocation21_spill] sm:$0xff] %v12628_v0  ;;  %v6552_v34 = vadd.f32 %v6551_v51, %v12628_v0  ;;  %v6779_v12 = vmul.f32 %v12628_v0, %v12628_v0  ;;  %v12633_v1 = vpop.f32.mrb[88].mxu0  ;;  %v12635_v62 = vpop.f32.mrb[105].mxu1 }
 0x553   : > { %14424 = vst [vmem:[#allocation16_spill] sm:$0xff] %v12633_v1  ;;  %14425 = vst [vmem:[#allocation19_spill] sm:$0xff] %v12635_v62  ;;  %v6594_v28 = vadd.f32 %v6593_v25, %v12633_v1  ;;  %v6781_v60 = vmul.f32 %v12633_v1, %v12633_v1  ;;  %v6573_v50 = vadd.f32 %v6572_v44, %v12635_v62  ;;  %v12643_v38 = vpop.f32.mrb[89].mxu0  ;;  %v12645_v51 = vpop.f32.mrb[106].mxu1 }
 0x554   : > { %v6780_v31 = vmul.f32 %v12635_v62, %v12635_v62  ;;  %14426 = vst [vmem:[#allocation20_spill] sm:$0xff] %v12643_v38  ;;  %14427 = vst [vmem:[#allocation25_spill] sm:$0xff] %v12645_v51  ;;  %v6818_v37 = vadd.f32 %v6817_v59, %v6779_v12  ;;  %v6615_v42 = vadd.f32 %v6614_v32, %v12643_v38  ;;  %v12651_v57 = vpop.f32.mrb[90].mxu0  ;;  %v12653_v1 = vpop.f32.mrb[107].mxu1 }
 0x555   : > { %v6782_v4 = vmul.f32 %v12643_v38, %v12643_v38  ;;  %v6553_v25 = vadd.f32 %v6552_v34, %v12645_v51  ;;  %14428 = vst [vmem:[#allocation18_spill] sm:$0xff] %v12651_v57  ;;  %14429 = vst [vmem:[#allocation23_spill] sm:$0xff] %v12653_v1  ;;  %v6860_v44 = vadd.f32 %v6859_v6, %v6781_v60  ;;  %v12658_v39 = vpop.f32.mrb[91].mxu0 }
 0x556   : > { %v6839_v0 = vadd.f32 %v6838_v33, %v6780_v31  ;;  %v6786_v62 = vmul.f32 %v12645_v51, %v12645_v51  ;;  %v6595_v11 = vadd.f32 %v6594_v28, %v12651_v57  ;;  %14430 = vst [vmem:[#allocation24_spill] sm:$0xff] %v12658_v39  ;;  %v6788_v32 = vmul.f32 %v12651_v57, %v12651_v57 }
 0x557   : > { %v6881_v59 = vadd.f32 %v6880_v13, %v6782_v4  ;;  %v6574_v12 = vadd.f32 %v6573_v50, %v12653_v1  ;;  %v6787_v34 = vmul.f32 %v12653_v1, %v12653_v1  ;;  %v6616_v6 = vadd.f32 %v6615_v42, %v12658_v39 }
 0x558   : > { %v6819_v38 = vadd.f32 %v6818_v37, %v6786_v62  ;;  %v6789_v33 = vmul.f32 %v12658_v39, %v12658_v39  ;;  %v6861_v60 = vadd.f32 %v6860_v44, %v6788_v32 }
 0x559   : > { %v6840_v31 = vadd.f32 %v6839_v0, %v6787_v34  ;;  %v12668_v51 = vpop.f32.mrb[108].mxu1 }
 0x55a   : > { %v6882_v28 = vadd.f32 %v6881_v59, %v6789_v33  ;;  %14431 = vst [vmem:[#allocation33_spill] sm:$0xff] %v12668_v51  ;;  %v6554_v13 = vadd.f32 %v6553_v25, %v12668_v51  ;;  %v6793_v4 = vmul.f32 %v12668_v51, %v12668_v51  ;;  %v12673_v50 = vpop.f32.mrb[92].mxu0  ;;  %v12675_v57 = vpop.f32.mrb[109].mxu1 }
 0x55b   : > { %14432 = vst [vmem:[#allocation22_spill] sm:$0xff] %v12673_v50  ;;  %14433 = vst [vmem:[#allocation30_spill] sm:$0xff] %v12675_v57  ;;  %v6596_v62 = vadd.f32 %v6595_v11, %v12673_v50  ;;  %v6795_v37 = vmul.f32 %v12673_v50, %v12673_v50  ;;  %v6575_v42 = vadd.f32 %v6574_v12, %v12675_v57  ;;  %v12683_v44 = vpop.f32.mrb[93].mxu0  ;;  %v12685_v25 = vpop.f32.mrb[110].mxu1 }
 0x55c   : > { %v6794_v0 = vmul.f32 %v12675_v57, %v12675_v57  ;;  %14434 = vst [vmem:[#allocation32_spill] sm:$0xff] %v12683_v44  ;;  %14435 = vst [vmem:[#allocation41_spill] sm:$0xff] %v12685_v25  ;;  %v6820_v59 = vadd.f32 %v6819_v38, %v6793_v4  ;;  %v6617_v32 = vadd.f32 %v6616_v6, %v12683_v44  ;;  %v12691_v33 = vpop.f32.mrb[94].mxu0  ;;  %v12693_v50 = vpop.f32.mrb[111].mxu1 }
 0x55d   : > { %v6796_v34 = vmul.f32 %v12683_v44, %v12683_v44  ;;  %v6555_v11 = vadd.f32 %v6554_v13, %v12685_v25  ;;  %14436 = vst [vmem:[#allocation28_spill] sm:$0xff] %v12691_v33  ;;  %14437 = vst [vmem:[#allocation38_spill] sm:$0xff] %v12693_v50  ;;  %v6862_v12 = vadd.f32 %v6861_v60, %v6795_v37  ;;  %v12698_v1 = vpop.f32.mrb[95].mxu0 }
 0x55e   : > { %v6841_v51 = vadd.f32 %v6840_v31, %v6794_v0  ;;  %v6800_v57 = vmul.f32 %v12685_v25, %v12685_v25  ;;  %v6597_v39 = vadd.f32 %v6596_v62, %v12691_v33  ;;  %14438 = vst [vmem:[#allocation40_spill] sm:$0xff] %v12698_v1  ;;  %v6802_v4 = vmul.f32 %v12691_v33, %v12691_v33 }
 0x55f   : > { %v6883_v38 = vadd.f32 %v6882_v28, %v6796_v34  ;;  %v6556_v6 = vrot.slane %v6555_v11, 4  ;;  %v6576_v13 = vadd.f32 %v6575_v42, %v12693_v50  ;;  %v6801_v60 = vmul.f32 %v12693_v50, %v12693_v50 }
 0x560   : > { %v6821_v44 = vadd.f32 %v6820_v59, %v6800_v57  ;;  %v6598_v19 = vrot.slane %v6597_v39, 4  ;;  %v6618_v31 = vadd.f32 %v6617_v32, %v12698_v1  ;;  %v6863_v0 = vadd.f32 %v6862_v12, %v6802_v4 }
 0x561   : > { %v6557_v37 = vadd.f32 %v6556_v6, %v6555_v11  ;;  %v6577_v25 = vrot.slane %v6576_v13, 4  ;;  %v6803_v62 = vmul.f32 %v12698_v1, %v12698_v1  ;;  %v6842_v43 = vadd.f32 %v6841_v51, %v6801_v60 }
 0x562   : > { %v6822_v28 = vrot.slane %v6821_v44, 4  ;;  %v6599_v34 = vadd.f32 %v6598_v19, %v6597_v39  ;;  %v6619_v18 = vrot.slane %v6618_v31, 4  ;;  %v6864_v45 = vrot.slane %v6863_v0, 4  ;;  %v8717_v59 = vpop.f32.mrb[96].mxu0 }
 0x563   : > { %v6558_v33 = vrot.slane %v6557_v37, 2  ;;  %v6578_v42 = vadd.f32 %v6577_v25, %v6576_v13  ;;  %v6884_v57 = vadd.f32 %v6883_v38, %v6803_v62  ;;  %v6843_v50 = vrot.slane %v6842_v43, 4  ;;  %v8718_v32 = vpop.f32.mrb[97].mxu0 }
 0x564   : > { %v6823_v24 = vadd.f32 %v6822_v28, %v6821_v44  ;;  %v6600_v17 = vrot.slane %v6599_v34, 2  ;;  %v6620_v63 = vadd.f32 %v6619_v18, %v6618_v31  ;;  %v6865_v12 = vadd.f32 %v6864_v45, %v6863_v0  ;;  %v8720_v2 = vpop.f32.mrb[98].mxu0 }
 0x565   : > { %v6559_v11 = vadd.f32 %v6558_v33, %v6557_v37  ;;  %v6579_v6 = vrot.slane %v6578_v42, 2  ;;  %v6885_v4 = vrot.slane %v6884_v57, 4  ;;  %v6844_v19 = vadd.f32 %v6843_v50, %v6842_v43  ;;  %v8721_v51 = vpop.f32.mrb[99].mxu0 }
 0x566   : > { %v6824_v1 = vrot.slane %v6823_v24, 2  ;;  %v6601_v56 = vadd.f32 %v6600_v17, %v6599_v34  ;;  %v6621_v39 = vrot.slane %v6620_v63, 2  ;;  %v6866_v35 = vrot.slane %v6865_v12, 2 }
 0x567   : > { %v6560_v60 = vrot.slane %v6559_v11, 1  ;;  %v6580_v25 = vadd.f32 %v6579_v6, %v6578_v42  ;;  %v6886_v38 = vadd.f32 %v6885_v4, %v6884_v57  ;;  %v6845_v62 = vrot.slane %v6844_v19, 2 }
 0x568   : > { %v6825_v13 = vadd.f32 %v6824_v1, %v6823_v24  ;;  %v6602_v44 = vrot.slane %v6601_v56, 1  ;;  %v6622_v28 = vadd.f32 %v6621_v39, %v6620_v63  ;;  %v6867_v31 = vadd.f32 %v6866_v35, %v6865_v12 }
 0x569   : > { %v6561_v18 = vadd.f32 %v6560_v60, %v6559_v11  ;;  %v6581_v33 = vrot.slane %v6580_v25, 1  ;;  %v6887_v45 = vrot.slane %v6886_v38, 2  ;;  %v6846_v61 = vadd.f32 %v6845_v62, %v6844_v19 }
 0x56a   : > { %v6826_v37 = vrot.slane %v6825_v13, 1  ;;  %v6603_v0 = vadd.f32 %v6602_v44, %v6601_v56  ;;  %v6623_v54 = vrot.slane %v6622_v28, 1  ;;  %v6868_v43 = vrot.slane %v6867_v31, 1  ;;  %v8723_v52 = vpop.f32.mrb[100].mxu0 }
 0x56b   : > { %v12708_v17 = vmul.f32 0.0078125, %v6561_v18  ;;  %v6582_v50 = vadd.f32 %v6581_v33, %v6580_v25  ;;  %v6888_v34 = vadd.f32 %v6887_v45, %v6886_v38  ;;  %v6847_v24 = vrot.slane %v6846_v61, 1  ;;  %v8724_v63 = vpop.f32.mrb[101].mxu0 }
 0x56c   : > { %v6827_v42 = vadd.f32 %v6826_v37, %v6825_v13  ;;  %v12710_v57 = vmul.f32 0.0078125, %v6603_v0  ;;  %v6624_v1 = vadd.f32 %v6623_v54, %v6622_v28  ;;  %v6869_v11 = vadd.f32 %v6868_v43, %v6867_v31  ;;  %v8726_v6 = vpop.f32.mrb[102].mxu0 }
 0x56d   : > { %v6961_v35 = vmul.f32 %v12708_v17, %v12708_v17  ;;  %v12714_v12 = vmul.f32 0.0078125, %v6582_v50  ;;  %v6889_v56 = vrot.slane %v6888_v34, 1  ;;  %v6848_v39 = vadd.f32 %v6847_v24, %v6846_v61  ;;  %v8727_v25 = vpop.f32.mrb[103].mxu0 }
 0x56e   : > { %v6954_v4 = vmul.f32 0.0078125, %v6827_v42  ;;  %v6963_v19 = vmul.f32 %v12710_v57, %v12710_v57  ;;  %v12718_v60 = vmul.f32 0.0078125, %v6624_v1  ;;  %v6956_v38 = vmul.f32 0.0078125, %v6869_v11 }
 0x56f   : > { %v6962_v54 = vmul.f32 %v12714_v12, %v12714_v12  ;;  %v6890_v13 = vadd.f32 %v6889_v56, %v6888_v34  ;;  %v12722_v44 = vadd.f32 %v8718_v32, %v8717_v59  ;;  %v6955_v28 = vmul.f32 0.0078125, %v6848_v39 }
 0x570   : > { %v6968_v62 = vsub.f32 %v6954_v4, %v6961_v35  ;;  %v6964_v18 = vmul.f32 %v12718_v60, %v12718_v60  ;;  %v12726_v31 = vadd.f32 %v8721_v51, %v8720_v2  ;;  %v6970_v33 = vsub.f32 %v6956_v38, %v6963_v19 }
 0x571   : > { %14439 = vst [vmem:[#allocation44_spill] sm:$0xff] %v12722_v44  ;;  %v6957_v45 = vmul.f32 0.0078125, %v6890_v13  ;;  %v12728_v61 = vadd.f32 %v8724_v63, %v8723_v52  ;;  %v12730_v37 = vadd.f32 %v8727_v25, %v8726_v6  ;;  %v6969_v43 = vsub.f32 %v6955_v28, %v6962_v54  ;;  %v303_v13 = vld [vmem:[#allocation10 + $0x18] sm:$0xff] }
 0x572   : > { %14440 = vst [vmem:[#allocation36_spill] sm:$0xff] %v12726_v31  ;;  %v6975_v0 = vmax.f32 %v6968_v62, 0.0  ;;  %v6977_v50 = vmax.f32 %v6970_v33, 0.0  ;;  %v8729_v34 = vpop.f32.mrb[104].mxu0  ;;  %v14487_v31 = vld [vmem:[#allocation58_spill] sm:$0xff] }
 0x573   : > { %14441 = vst [vmem:[#allocation46_spill] sm:$0xff] %v12728_v61  ;;  %14442 = vst [vmem:[#allocation53_spill] sm:$0xff] %v12730_v37  ;;  %v6971_v42 = vsub.f32 %v6957_v45, %v6964_v18  ;;  %v6976_v32 = vmax.f32 %v6969_v43, 0.0  ;;  %v8730_v24 = vpop.f32.mrb[105].mxu0  ;;  %v12740_v45 = vrot.slane %v303_v13, 2  ;;  %v14483_v37 = vld [vmem:[#allocation65_spill] sm:$0xff] }
 0x574   : > { %v6982_v59 = vadd.f32 1e-05, %v6975_v0  ;;  %v6984_v1 = vadd.f32 1e-05, %v6977_v50  ;;  %v12732_v11 = vadd.f32 %v8730_v24, %v8729_v34  ;;  %v8732_v2 = vpop.f32.mrb[106].mxu0  ;;  %v14485_v61 = vld [vmem:[#allocation60_spill] sm:$0xff] }
 0x575   : > { %v6978_v35 = vmax.f32 %v6971_v42, 0.0  ;;  %v6983_v51 = vadd.f32 1e-05, %v6976_v32  ;;  %v8733_v56 = vpop.f32.mrb[107].mxu0  ;;  %14447 = vst [vmem:[#allocation56_spill] sm:$0xff] %v12740_v45  ;;  %v14448_v42 = vld [vmem:[#allocation67_spill] sm:$0xff] }
 0x576   : > { %14443 = vst [vmem:[#allocation51_spill] sm:$0xff] %v12732_v11  ;;  %9844 = vrsqrt.f32 %v6982_v59  ;;  %v12734_v63 = vadd.f32 %v8733_v56, %v8732_v2 }
 0x577   : > { %9846 = vrsqrt.f32 %v6984_v1  ;;  %v6985_v52 = vadd.f32 1e-05, %v6978_v35  ;;  %v14450_v35 = vld [vmem:[#allocation64_spill] sm:$0xff] }
 0x578   : > { %14444 = vst [vmem:[#allocation48_spill] sm:$0xff] %v12734_v63  ;;  %9848 = vrsqrt.f32 %v6983_v51  ;;  %v14451_v2 = vrot.slane %v14450_v35, 2 }
 0x579   : > { %9850 = vrsqrt.f32 %v6985_v52 }
 0x57a   : > { %v8735_v6 = vpop.f32.mrb[108].mxu0  ;;  %v6998_v51 = vsel %vm3781_vm0, %v14451_v2, %v12740_v45  ;;  %v14468_v45 = vld [vmem:[#allocation37_spill] sm:$0xff] }
 0x57b   : > { %v8736_v4 = vpop.f32.mrb[109].mxu0 }
 0x57c   : > { %v12736_v19 = vadd.f32 %v8736_v4, %v8735_v6  ;;  %v8738_v39 = vpop.f32.mrb[110].mxu0 }
 0x57d   : > { %v8739_v25 = vpop.f32.mrb[111].mxu0 }
 0x57e   : > { %14445 = vst [vmem:[#allocation55_spill] sm:$0xff] %v12736_v19  ;;  %v12738_v38 = vadd.f32 %v8739_v25, %v8738_v39  ;;  %v14453_v39 = vld [vmem:[#allocation68_spill] sm:$0xff]  ;;  %v14479_v19 = vld [vmem:[#allocation50_spill] sm:$0xff] }
 0x580   : > { %14446 = vst [vmem:[#allocation57_spill] sm:$0xff] %v12738_v38  ;;  %v9845_v54 = vpop.eup %9844  ;;  %v14477_v38 = vld [vmem:[#allocation49_spill] sm:$0xff] }
 0x581   : > { %v9847_v62 = vpop.eup %9846 }
 0x582   : > { %v9849_v28 = vpop.eup %9848  ;;  %v8741_v0 = vpop.f32.mrb[112].mxu0 }
 0x583   : > { %v9851_v18 = vpop.eup %9850  ;;  %v7008_v33 = vcombine.low %v9845_v54, %v9849_v28  ;;  %v8742_v50 = vpop.f32.mrb[113].mxu0  ;;  %v14454_v54 = vld [vmem:[#allocation69_spill] sm:$0xff] }
 0x584   : > { %v7009_v43 = vcombine.low %v9847_v62, %v9851_v18  ;;  %v12743_v59 = vadd.f32 %v8742_v50, %v8741_v0  ;;  %v8744_v32 = vpop.f32.mrb[114].mxu0  ;;  %v14455_v62 = vld [vmem:[#allocation70_spill] sm:$0xff]  ;;  %v14456_v18 = vld [vmem:[#allocation71_spill] sm:$0xff] }
 0x585   : > { %v7016_v34 = vrot.slane %v7008_v33, %v14448_v42  ;;  %v8745_v1 = vpop.f32.mrb[115].mxu0 }
 0x586   : > { %14449 = vst [vmem:[#allocation54_spill] sm:$0xff] %v12743_v59  ;;  %v7023_v24 = vrot.slane %v7009_v43, %v14448_v42  ;;  %v12750_v56 = vadd.f32 %v8745_v1, %v8744_v32  ;;  %v14475_v59 = vld [vmem:[#allocation45_spill] sm:$0xff] }
 0x588   : > { %14452 = vst [vmem:[#allocation59_spill] sm:$0xff] %v12750_v56  ;;  %v7024_v52 = vcombine.low %v7016_v34, %v7023_v24  ;;  %v14473_v56 = vld [vmem:[#allocation42_spill] sm:$0xff] }
 0x58a   : > { %v7043_v6 = vmul.f32 %v7024_v52, %v6998_v51  ;;  %v8747_v4 = vpop.f32.mrb[116].mxu0 }
 0x58b   : > { %v8748_v0 = vpop.f32.mrb[117].mxu0 }
 0x58c   : > { %v7050_v25 = vrot.slane %v7043_v6, %v14453_v39  ;;  %v7054_v13 = vrot.slane %v7043_v6, %v14454_v54  ;;  %v7058_v28 = vrot.slane %v7043_v6, %v14455_v62  ;;  %v7062_v33 = vrot.slane %v7043_v6, %v14456_v18  ;;  %v8750_v50 = vpop.f32.mrb[118].mxu0  ;;  %v14465_v62 = vld [vmem:[#allocation76_spill] sm:$0xff]  ;;  %v14466_v54 = vld [vmem:[#allocation39_spill] sm:$0xff] }
 0x58d   : > { %v12756_v43 = vadd.f32 %v8748_v0, %v8747_v4  ;;  %v8751_v1 = vpop.f32.mrb[119].mxu0 }
 0x58e   : > { %v7082_v35 = vmul.f32 %v7050_v25, %v12708_v17  ;;  %v7083_v32 = vmul.f32 %v7054_v13, %v12714_v12  ;;  %v7084_v34 = vmul.f32 %v7058_v28, %v12710_v57  ;;  %v7085_v24 = vmul.f32 %v7062_v33, %v12718_v60 }
 0x58f   : > { %14457 = vst [vmem:[#allocation63_spill] sm:$0xff] %v12756_v43  ;;  %v12763_v2 = vrot.slane %v7050_v25, %v14453_v39  ;;  %v12766_v52 = vrot.slane %v7054_v13, %v14453_v39  ;;  %v12769_v6 = vrot.slane %v7058_v28, %v14453_v39  ;;  %v12772_v4 = vrot.slane %v7062_v33, %v14453_v39  ;;  %v14467_v39 = vld [vmem:[#allocation34_spill] sm:$0xff] }
 0x590   : > { %v7096_v17 = vcombine.low %v7082_v35, %v7083_v32  ;;  %v7097_v18 = vcombine.low %v7084_v34, %v7085_v24  ;;  %v12774_v12 = vadd.f32 %v8751_v1, %v8750_v50 }
 0x591   : > { %v12778_v57 = vmul.f32 %v12763_v2, %v12388_v48  ;;  %v12782_v60 = vmul.f32 %v12766_v52, %v12392_v49  ;;  %v12786_v25 = vmul.f32 %v12769_v6, %v12390_v53  ;;  %v12790_v13 = vmul.f32 %v12772_v4, %v12396_v58 }
 0x592   : > { %14458 = vst [vmem:[#allocation61_spill] sm:$0xff] %v12774_v12  ;;  %v7104_v28 = vrot.slane %v7096_v17, %v14448_v42  ;;  %v7111_v33 = vrot.slane %v7097_v18, %v14448_v42  ;;  %v12796_v48 = vmul.f32 %v12763_v2, %v12398_v46  ;;  %v12800_v49 = vmul.f32 %v12766_v52, %v12410_v41  ;;  %v12818_v50 = vpop.f32.mrb[120].mxu0  ;;  %v14459_v18 = vld [vmem:[#allocation66_spill] sm:$0xff]  ;;  %v14469_v42 = vld [vmem:[#allocation47_spill] sm:$0xff] }
 0x593   : > { %v12804_v53 = vmul.f32 %v12769_v6, %v12408_v23  ;;  %v12808_v58 = vmul.f32 %v12772_v4, %v12420_v7  ;;  %v12812_v0 = vmul.f32 %v12763_v2, %v12428_v36  ;;  %v12816_v46 = vmul.f32 %v12766_v52, %v12435_v5  ;;  %v12832_v36 = vpop.f32.mrb[121].mxu0  ;;  %v14471_v12 = vld [vmem:[#allocation43_spill] sm:$0xff] }
 0x594   : > { %v7112_v41 = vcombine.low %v7104_v28, %v7111_v33  ;;  %v12822_v35 = vmul.f32 %v12769_v6, %v12433_v10  ;;  %v12826_v23 = vmul.f32 %v12772_v4, %v12443_v47  ;;  %v12830_v7 = vmul.f32 %v12763_v2, %v12445_v20  ;;  %v8756_v20 = vpop.f32.mrb[122].mxu0  ;;  %v14460_v28 = vld [vmem:[#allocation27_spill] sm:$0xff] }
 0x595   : > { %v12836_v5 = vmul.f32 %v12766_v52, %v12453_v9  ;;  %v12840_v32 = vmul.f32 %v12769_v6, %v12451_v15  ;;  %v12844_v10 = vmul.f32 %v12772_v4, %v12458_v29  ;;  %v12848_v47 = vmul.f32 %v12763_v2, %v12468_v55  ;;  %v8757_v29 = vpop.f32.mrb[123].mxu0  ;;  %v14462_v33 = vld [vmem:[#allocation31_spill] sm:$0xff] }
 0x596   : > { %v7129_v34 = vrot.slane %v7112_v41, 7  ;;  %v12852_v24 = vmul.f32 %v12766_v52, %v12475_v22  ;;  %v12856_v9 = vmul.f32 %v12769_v6, %v12473_v27  ;;  %v12860_v15 = vmul.f32 %v12772_v4, %v12483_v40  ;;  %v14463_v41 = vld [vmem:[#allocation29_spill] sm:$0xff] }
 0x597   : > { %v12864_v1 = vmul.f32 %v12763_v2, %v12485_v21  ;;  %v12868_v55 = vmul.f32 %v12766_v52, %v12493_v3  ;;  %v12872_v22 = vmul.f32 %v12769_v6, %v12491_v26  ;;  %v12876_v27 = vmul.f32 %v12772_v4, %v12498_v30 }
 0x598   : > { %v7133_v17 = vsub.f32 %v6998_v51, %v7129_v34  ;;  %v12880_v40 = vmul.f32 %v12763_v2, %v12508_v14  ;;  %v12884_v21 = vmul.f32 %v12766_v52, %v12515_v16  ;;  %v12888_v3 = vmul.f32 %v12769_v6, %v12513_v8  ;;  %v14461_v51 = vld [vmem:[#allocation26_spill] sm:$0xff]  ;;  %v14464_v34 = vld [vmem:[#allocation35_spill] sm:$0xff] }
 0x599   : > { %v12892_v26 = vmul.f32 %v12772_v4, %v14459_v18  ;;  %v12896_v30 = vmul.f32 %v12763_v2, %v14460_v28  ;;  %v12900_v14 = vmul.f32 %v12766_v52, %v14461_v51  ;;  %v12904_v16 = vmul.f32 %v12769_v6, %v14462_v33 }
 0x59a   : > { %v12908_v8 = vmul.f32 %v12772_v4, %v14463_v41  ;;  %v12912_v18 = vmul.f32 %v12763_v2, %v14464_v34  ;;  %v12916_v28 = vmul.f32 %v12766_v52, %v14465_v62  ;;  %v12920_v51 = vmul.f32 %v12769_v6, %v14466_v54  ;;  %v8759_v43 = vpop.f32.mrb[124].mxu0 }
 0x59b   : > { %v12924_v33 = vmul.f32 %v12772_v4, %v14467_v39  ;;  %v12928_v41 = vmul.f32 %v12763_v2, %v14468_v45  ;;  %v12932_v34 = vmul.f32 %v12766_v52, %v14469_v42  ;;  %v12936_v62 = vmul.f32 %v12769_v6, %v14471_v12  ;;  %v8760_v63 = vpop.f32.mrb[125].mxu0  ;;  %v14481_v12 = vld [vmem:[#allocation52_spill] sm:$0xff] }
 0x59c   : > { %v12940_v54 = vmul.f32 %v12772_v4, %v14473_v56  ;;  %v12944_v39 = vmul.f32 %v12763_v2, %v14475_v59  ;;  %v12948_v45 = vmul.f32 %v12766_v52, %v14477_v38  ;;  %v12952_v42 = vmul.f32 %v12769_v6, %v14479_v19  ;;  %v8762_v44 = vpop.f32.mrb[126].mxu0  ;;  %v14489_v19 = vld [vmem:[#allocation17_spill] sm:$0xff] }
 0x59d   : > { %14470 = vst [vmem:[#allocation62_spill] sm:$0xff] %v12932_v34  ;;  %14472 = vst [vmem:[#allocation64_spill] sm:$0xff] %v12936_v62  ;;  %v12956_v11 = vmul.f32 %v12772_v4, %v14481_v12  ;;  %v12960_v56 = vmul.f32 %v12763_v2, %v14483_v37  ;;  %v12964_v59 = vmul.f32 %v12766_v52, %v14485_v61  ;;  %v14521_v62 = vld [vmem:[#allocation74_spill] sm:$0xff] }
 0x59e   : > { %14474 = vst [vmem:[#allocation71_spill] sm:$0xff] %v12940_v54  ;;  %14476 = vst [vmem:[#allocation66_spill] sm:$0xff] %v12944_v39  ;;  %v12968_v38 = vmul.f32 %v12769_v6, %v14487_v31  ;;  %v14497_v31 = vld [vmem:[#allocation20_spill] sm:$0xff]  ;;  %v14499_v39 = vld [vmem:[#allocation25_spill] sm:$0xff]  ;;  %v7288_v34 = vrot.slane %v7133_v17, %v14521_v62 }
 0x59f   : > { %14478 = vst [vmem:[#allocation27_spill] sm:$0xff] %v12948_v45  ;;  %14480 = vst [vmem:[#allocation26_spill] sm:$0xff] %v12952_v42  ;;  %v12972_v42 = vmul.f32 %v12772_v4, %v14489_v19  ;;  %v14491_v45 = vld [vmem:[#allocation21_spill] sm:$0xff]  ;;  %v12992_v19 = vmul.f32 %v12763_v2, %v14499_v39 }
 0x5a0   : > { %14482 = vst [vmem:[#allocation31_spill] sm:$0xff] %v12956_v11  ;;  %14484 = vst [vmem:[#allocation29_spill] sm:$0xff] %v12960_v56  ;;  %v12976_v12 = vmul.f32 %v12763_v2, %v14491_v45  ;;  %v14493_v11 = vld [vmem:[#allocation19_spill] sm:$0xff]  ;;  %v14495_v56 = vld [vmem:[#allocation16_spill] sm:$0xff] }
 0x5a1   : > { %14486 = vst [vmem:[#allocation35_spill] sm:$0xff] %v12964_v59  ;;  %14488 = vst [vmem:[#allocation76_spill] sm:$0xff] %v12968_v38  ;;  %v12980_v37 = vmul.f32 %v12766_v52, %v14493_v11  ;;  %v12984_v61 = vmul.f32 %v12769_v6, %v14495_v56  ;;  %v8763_v59 = vpop.f32.mrb[127].mxu0  ;;  %v12988_v38 = vmul.f32 %v12772_v4, %v14497_v31 }
 0x5a2   : > { %14490 = vst [vmem:[#allocation39_spill] sm:$0xff] %v12972_v42  ;;  %14492 = vst [vmem:[#allocation34_spill] sm:$0xff] %v12976_v12  ;;  %v14501_v42 = vld [vmem:[#allocation23_spill] sm:$0xff]  ;;  %v14503_v12 = vld [vmem:[#allocation18_spill] sm:$0xff] }
 0x5a3   : > { %14494 = vst [vmem:[#allocation37_spill] sm:$0xff] %v12980_v37  ;;  %14496 = vst [vmem:[#allocation47_spill] sm:$0xff] %v12984_v61  ;;  %v12996_v45 = vmul.f32 %v12766_v52, %v14501_v42  ;;  %v13000_v11 = vmul.f32 %v12769_v6, %v14503_v12  ;;  %v14505_v37 = vld [vmem:[#allocation24_spill] sm:$0xff]  ;;  %v14507_v61 = vld [vmem:[#allocation33_spill] sm:$0xff] }
 0x5a4   : > { %14498 = vst [vmem:[#allocation43_spill] sm:$0xff] %v12988_v38  ;;  %14500 = vst [vmem:[#allocation42_spill] sm:$0xff] %v12992_v19  ;;  %v13004_v56 = vmul.f32 %v12772_v4, %v14505_v37  ;;  %v13008_v31 = vmul.f32 %v12763_v2, %v14507_v61  ;;  %v14509_v38 = vld [vmem:[#allocation30_spill] sm:$0xff] }
 0x5a5   : > { %14502 = vst [vmem:[#allocation45_spill] sm:$0xff] %v12996_v45  ;;  %14504 = vst [vmem:[#allocation49_spill] sm:$0xff] %v13000_v11  ;;  %v13012_v39 = vmul.f32 %v12766_v52, %v14509_v38  ;;  %v14511_v19 = vld [vmem:[#allocation22_spill] sm:$0xff]  ;;  %v14513_v45 = vld [vmem:[#allocation32_spill] sm:$0xff] }
 0x5a6   : > { %14506 = vst [vmem:[#allocation50_spill] sm:$0xff] %v13004_v56  ;;  %14508 = vst [vmem:[#allocation52_spill] sm:$0xff] %v13008_v31  ;;  %v13016_v42 = vmul.f32 %v12769_v6, %v14511_v19  ;;  %v13020_v12 = vmul.f32 %v12772_v4, %v14513_v45  ;;  %v14515_v11 = vld [vmem:[#allocation41_spill] sm:$0xff]  ;;  %v14516_v56 = vld [vmem:[#allocation38_spill] sm:$0xff] }
 0x5a7   : > { %14510 = vst [vmem:[#allocation65_spill] sm:$0xff] %v13012_v39  ;;  %v13024_v37 = vmul.f32 %v12763_v2, %v14515_v11  ;;  %v13028_v61 = vmul.f32 %v12766_v52, %v14516_v56  ;;  %v14517_v31 = vld [vmem:[#allocation28_spill] sm:$0xff]  ;;  %v14520_v45 = vld [vmem:[#allocation73_spill] sm:$0xff]  ;;  %v14522_v2 = vld [vmem:[#allocation75_spill] sm:$0xff]  ;;  %v13044_v52 = vadd.f32 %v12832_v36, %v12818_v50  ;;  %v13046_v56 = vadd.f32 %v8757_v29, %v8756_v20 }
 0x5a8   : > { %14512 = vst [vmem:[#allocation60_spill] sm:$0xff] %v13016_v42  ;;  %14514 = vst [vmem:[#allocation58_spill] sm:$0xff] %v13020_v12  ;;  %v13032_v38 = vmul.f32 %v12769_v6, %v14517_v31  ;;  %v14518_v39 = vld [vmem:[#allocation40_spill] sm:$0xff]  ;;  %v7284_v12 = vrot.slane %v7133_v17, %v14520_v45  ;;  %v7292_v11 = vrot.slane %v7133_v17, %v14522_v2  ;;  %v13050_v31 = vpop.f32.mrb[112].mxu1 }
 0x5a9   : > { %v13036_v19 = vmul.f32 %v12772_v4, %v14518_v39  ;;  %v14519_v42 = vld [vmem:[#allocation72_spill] sm:$0xff]  ;;  %14523 = vst [vmem:[#allocation17_spill] sm:$0xff] %v13044_v52  ;;  %14524 = vst [vmem:[#allocation21_spill] sm:$0xff] %v13046_v56  ;;  %v13048_v6 = vadd.f32 %v8760_v63, %v8759_v43  ;;  %v8781_v4 = vpop.f32.mrb[128].mxu0  ;;  %v13063_v50 = vpop.f32.mrb[113].mxu1  ;;  %v13070_v43 = vmul.f32 %v13050_v31, %v13050_v31 }
 0x5aa   : > { %v7280_v54 = vrot.slane %v7133_v17, %v14519_v42  ;;  %14526 = vst [vmem:[#allocation16_spill] sm:$0xff] %v13050_v31  ;;  %v13056_v45 = vrot.slane %v7284_v12, %v14519_v42  ;;  %v13059_v62 = vrot.slane %v7288_v34, %v14519_v42  ;;  %v13061_v17 = vadd.f32 %v8763_v59, %v8762_v44  ;;  %v8782_v36 = vpop.f32.mrb[129].mxu0  ;;  %v13078_v34 = vpop.f32.mrb[114].mxu1 }
 0x5ab   : > { %14525 = vst [vmem:[#allocation19_spill] sm:$0xff] %v13048_v6  ;;  %14528 = vst [vmem:[#allocation25_spill] sm:$0xff] %v13063_v50  ;;  %v13066_v63 = vrot.slane %v7292_v11, %v14519_v42  ;;  %v13074_v20 = vmul.f32 %v13063_v50, %v13063_v50  ;;  %v13076_v29 = vadd.f32 %v8782_v36, %v8781_v4  ;;  %v13080_v44 = vpop.f32.mrb[130].mxu0  ;;  %v13098_v11 = vpop.f32.mrb[115].mxu1 }
 0x5ac   : > { %v13053_v39 = vrot.slane %v7280_v54, %v14519_v42  ;;  %14527 = vst [vmem:[#allocation20_spill] sm:$0xff] %v13061_v17  ;;  %14529 = vst [vmem:[#allocation23_spill] sm:$0xff] %v13078_v34  ;;  %v13088_v59 = vadd.f32 %v13056_v45, %v12782_v60  ;;  %v13092_v12 = vadd.f32 %v13059_v62, %v12786_v25  ;;  %v13100_v4 = vpop.f32.mrb[131].mxu0  ;;  %v13182_v42 = vpop.f32.mrb[116].mxu1 }
 0x5ad   : > { %14530 = vst [vmem:[#allocation18_spill] sm:$0xff] %v13098_v11  ;;  %v13108_v60 = vadd.f32 %v13056_v45, %v12800_v49  ;;  %v13112_v25 = vadd.f32 %v13059_v62, %v12804_v53  ;;  %v13128_v49 = vadd.f32 %v13059_v62, %v12822_v35  ;;  %v13132_v53 = vadd.f32 %v13066_v63, %v12826_v23  ;;  %v13202_v17 = vpop.f32.mrb[117].mxu1 }
 0x5ae   : > { %v13084_v54 = vadd.f32 %v13053_v39, %v12778_v57  ;;  %v13096_v2 = vadd.f32 %v13053_v39, %v12796_v48  ;;  %v13104_v57 = vadd.f32 %v13066_v63, %v12790_v13  ;;  %v13116_v48 = vadd.f32 %v13066_v63, %v12808_v58  ;;  %v13222_v56 = vpop.f32.mrb[118].mxu1 }
 0x5af   : > { %v13120_v36 = vadd.f32 %v13053_v39, %v12812_v0  ;;  %v13124_v13 = vadd.f32 %v13056_v45, %v12816_v46  ;;  %v13136_v58 = vadd.f32 %v13053_v39, %v12830_v7  ;;  %v13140_v0 = vadd.f32 %v13056_v45, %v12836_v5 }
 0x5b0   : > { %v13144_v46 = vadd.f32 %v13059_v62, %v12840_v32  ;;  %v13148_v35 = vadd.f32 %v13066_v63, %v12844_v10  ;;  %v13152_v23 = vadd.f32 %v13053_v39, %v12848_v47  ;;  %v13156_v7 = vadd.f32 %v13056_v45, %v12852_v24 }
 0x5b1   : > { %v13160_v5 = vadd.f32 %v13059_v62, %v12856_v9  ;;  %v13164_v32 = vadd.f32 %v13066_v63, %v12860_v15  ;;  %v13168_v10 = vadd.f32 %v13053_v39, %v12864_v1  ;;  %v13172_v47 = vadd.f32 %v13056_v45, %v12868_v55  ;;  %v13184_v15 = vpop.f32.mrb[132].mxu0 }
 0x5b2   : > { %v13176_v24 = vadd.f32 %v13059_v62, %v12872_v22  ;;  %v13180_v9 = vadd.f32 %v13066_v63, %v12876_v27  ;;  %v13188_v1 = vadd.f32 %v13053_v39, %v12880_v40  ;;  %v13192_v55 = vadd.f32 %v13056_v45, %v12884_v21  ;;  %v13204_v6 = vpop.f32.mrb[133].mxu0 }
 0x5b3   : > { %v13196_v22 = vadd.f32 %v13059_v62, %v12888_v3  ;;  %v13200_v27 = vadd.f32 %v13066_v63, %v12892_v26  ;;  %v13208_v40 = vadd.f32 %v13053_v39, %v12896_v30  ;;  %v13212_v21 = vadd.f32 %v13056_v45, %v12900_v14  ;;  %v13224_v52 = vpop.f32.mrb[134].mxu0 }
 0x5b4   : > { %v13216_v3 = vadd.f32 %v13059_v62, %v12904_v16  ;;  %v13220_v26 = vadd.f32 %v13066_v63, %v12908_v8  ;;  %v13228_v30 = vadd.f32 %v13053_v39, %v12912_v18  ;;  %v13232_v14 = vadd.f32 %v13056_v45, %v12916_v28 }
 0x5b5   : > { %14531 = vst [vmem:[#allocation24_spill] sm:$0xff] %v13200_v27  ;;  %14532 = vst [vmem:[#allocation33_spill] sm:$0xff] %v13208_v40  ;;  %v13236_v16 = vadd.f32 %v13059_v62, %v12920_v51  ;;  %v13240_v8 = vadd.f32 %v13066_v63, %v12924_v33  ;;  %v13248_v18 = vadd.f32 %v13053_v39, %v12928_v41  ;;  %v14550_v40 = vld [vmem:[#allocation27_spill] sm:$0xff]  ;;  %9852 = vtanh.f32 %v13084_v54 }
 0x5b6   : > { %14533 = vst [vmem:[#allocation30_spill] sm:$0xff] %v13212_v21  ;;  %14534 = vst [vmem:[#allocation22_spill] sm:$0xff] %v13216_v3  ;;  %v13244_v3 = vpop.f32.mrb[135].mxu0  ;;  %v13268_v41 = vadd.f32 %v13056_v45, %v14550_v40  ;;  %9854 = vtanh.f32 %v13088_v59 }
 0x5b7   : > { %14535 = vst [vmem:[#allocation32_spill] sm:$0xff] %v13220_v26  ;;  %14536 = vst [vmem:[#allocation41_spill] sm:$0xff] %v13228_v30  ;;  %v13242_v26 = vpop.f32.mrb[119].mxu1  ;;  %v14542_v30 = vld [vmem:[#allocation62_spill] sm:$0xff]  ;;  %9856 = vtanh.f32 %v13092_v12  ;;  %v8789_v12 = vadd.f32 %v13204_v6, %v13184_v15 }
 0x5b8   : > { %14537 = vst [vmem:[#allocation38_spill] sm:$0xff] %v13232_v14  ;;  %14538 = vst [vmem:[#allocation28_spill] sm:$0xff] %v13236_v16  ;;  %v13252_v28 = vadd.f32 %v13056_v45, %v14542_v30  ;;  %v14544_v14 = vld [vmem:[#allocation64_spill] sm:$0xff]  ;;  %v14546_v16 = vld [vmem:[#allocation71_spill] sm:$0xff]  ;;  %9858 = vtanh.f32 %v13104_v57 }
 0x5b9   : > { %14539 = vst [vmem:[#allocation40_spill] sm:$0xff] %v13240_v8  ;;  %14540 = vst [vmem:[#allocation75_spill] sm:$0xff] %v13242_v26  ;;  %v13256_v51 = vadd.f32 %v13059_v62, %v14544_v14  ;;  %v13260_v33 = vadd.f32 %v13066_v63, %v14546_v16  ;;  %v14548_v8 = vld [vmem:[#allocation66_spill] sm:$0xff]  ;;  %9860 = vtanh.f32 %v13096_v2 }
 0x5ba   : > { %14541 = vst [vmem:[#allocation77_spill] sm:$0xff] %v13248_v18  ;;  %14543 = vst [vmem:[#allocation62_spill] sm:$0xff] %v13252_v28  ;;  %v13264_v21 = vadd.f32 %v13053_v39, %v14548_v8  ;;  %v14552_v18 = vld [vmem:[#allocation26_spill] sm:$0xff]  ;;  %v14554_v28 = vld [vmem:[#allocation31_spill] sm:$0xff]  ;;  %9862 = vtanh.f32 %v13108_v60 }
 0x5bb   : > { %14545 = vst [vmem:[#allocation64_spill] sm:$0xff] %v13256_v51  ;;  %14547 = vst [vmem:[#allocation71_spill] sm:$0xff] %v13260_v33  ;;  %v13272_v30 = vadd.f32 %v13059_v62, %v14552_v18  ;;  %v13276_v14 = vadd.f32 %v13066_v63, %v14554_v28  ;;  %v14556_v51 = vld [vmem:[#allocation29_spill] sm:$0xff]  ;;  %v14558_v33 = vld [vmem:[#allocation35_spill] sm:$0xff]  ;;  %9864 = vtanh.f32 %v13112_v25 }
 0x5bc   : > { %14549 = vst [vmem:[#allocation66_spill] sm:$0xff] %v13264_v21  ;;  %14551 = vst [vmem:[#allocation27_spill] sm:$0xff] %v13268_v41  ;;  %v13280_v16 = vadd.f32 %v13053_v39, %v14556_v51  ;;  %v13284_v8 = vadd.f32 %v13056_v45, %v14558_v33  ;;  %v14560_v21 = vld [vmem:[#allocation76_spill] sm:$0xff]  ;;  %v14562_v41 = vld [vmem:[#allocation39_spill] sm:$0xff]  ;;  %9866 = vtanh.f32 %v13116_v48  ;;  %v6721_v48 = vmul.f32 %v13242_v26, %v13242_v26 }
 0x5bd   : > { %14553 = vst [vmem:[#allocation26_spill] sm:$0xff] %v13272_v30  ;;  %14555 = vst [vmem:[#allocation31_spill] sm:$0xff] %v13276_v14  ;;  %v13288_v40 = vadd.f32 %v13059_v62, %v14560_v21  ;;  %v13292_v18 = vadd.f32 %v13066_v63, %v14562_v41  ;;  %v14564_v30 = vld [vmem:[#allocation34_spill] sm:$0xff]  ;;  %v14566_v14 = vld [vmem:[#allocation37_spill] sm:$0xff]  ;;  %9868 = vtanh.f32 %v13120_v36 }
 0x5be   : > { %14557 = vst [vmem:[#allocation29_spill] sm:$0xff] %v13280_v16  ;;  %14559 = vst [vmem:[#allocation35_spill] sm:$0xff] %v13284_v8  ;;  %v13296_v28 = vadd.f32 %v13053_v39, %v14564_v30  ;;  %v13300_v51 = vadd.f32 %v13056_v45, %v14566_v14  ;;  %v14568_v16 = vld [vmem:[#allocation47_spill] sm:$0xff]  ;;  %9870 = vtanh.f32 %v13124_v13 }
 0x5bf   : > { %14561 = vst [vmem:[#allocation76_spill] sm:$0xff] %v13288_v40  ;;  %14563 = vst [vmem:[#allocation39_spill] sm:$0xff] %v13292_v18  ;;  %v13304_v33 = vadd.f32 %v13059_v62, %v14568_v16  ;;  %v14570_v8 = vld [vmem:[#allocation43_spill] sm:$0xff]  ;;  %v14572_v40 = vld [vmem:[#allocation42_spill] sm:$0xff]  ;;  %9872 = vtanh.f32 %v13128_v49 }
 0x5c0   : > { %14565 = vst [vmem:[#allocation34_spill] sm:$0xff] %v13296_v28  ;;  %14567 = vst [vmem:[#allocation37_spill] sm:$0xff] %v13300_v51  ;;  %v13308_v21 = vadd.f32 %v13066_v63, %v14570_v8  ;;  %v13312_v41 = vadd.f32 %v13053_v39, %v14572_v40  ;;  %v14574_v18 = vld [vmem:[#allocation45_spill] sm:$0xff]  ;;  %v14578_v51 = vld [vmem:[#allocation50_spill] sm:$0xff]  ;;  %v13328_v8 = vpop.f32.mrb[136].mxu0  ;;  %9874 = vtanh.f32 %v13132_v53 }
 0x5c1   : > { %14569 = vst [vmem:[#allocation47_spill] sm:$0xff] %v13304_v33  ;;  %v13316_v30 = vadd.f32 %v13056_v45, %v14574_v18  ;;  %v14576_v28 = vld [vmem:[#allocation49_spill] sm:$0xff]  ;;  %v13324_v16 = vadd.f32 %v13066_v63, %v14578_v51  ;;  %v13326_v33 = vpop.f32.mrb[120].mxu1  ;;  %v13348_v27 = vpop.f32.mrb[137].mxu0  ;;  %9876 = vtanh.f32 %v13136_v58  ;;  %v14594_v58 = vld [vmem:[#allocation51_spill] sm:$0xff] }
 0x5c2   : > { %14571 = vst [vmem:[#allocation43_spill] sm:$0xff] %v13308_v21  ;;  %14573 = vst [vmem:[#allocation42_spill] sm:$0xff] %v13312_v41  ;;  %v13320_v14 = vadd.f32 %v13059_v62, %v14576_v28  ;;  %v14580_v21 = vld [vmem:[#allocation52_spill] sm:$0xff]  ;;  %v14581_v41 = vld [vmem:[#allocation65_spill] sm:$0xff]  ;;  %9878 = vtanh.f32 %v13140_v0 }
 0x5c3   : > { %14575 = vst [vmem:[#allocation45_spill] sm:$0xff] %v13316_v30  ;;  %14579 = vst [vmem:[#allocation50_spill] sm:$0xff] %v13324_v16  ;;  %v13332_v40 = vadd.f32 %v13053_v39, %v14580_v21  ;;  %v13336_v18 = vadd.f32 %v13056_v45, %v14581_v41  ;;  %v14582_v30 = vld [vmem:[#allocation60_spill] sm:$0xff]  ;;  %v13346_v16 = vpop.f32.mrb[121].mxu1  ;;  %v13352_v21 = vadd.f32 %v13053_v39, %v13024_v37  ;;  %9880 = vtanh.f32 %v13144_v46 }
 0x5c4   : > { %14577 = vst [vmem:[#allocation49_spill] sm:$0xff] %v13320_v14  ;;  %v13340_v28 = vadd.f32 %v13059_v62, %v14582_v30  ;;  %v14584_v14 = vld [vmem:[#allocation58_spill] sm:$0xff]  ;;  %v13356_v41 = vadd.f32 %v13056_v45, %v13028_v61  ;;  %v13360_v30 = vadd.f32 %v13059_v62, %v13032_v38  ;;  %v14586_v37 = vld [vmem:[#allocation44_spill] sm:$0xff]  ;;  %v6625_v61 = vadd.f32 %v13078_v34, %v13050_v31 }
 0x5c5   : > { %v13344_v51 = vadd.f32 %v13066_v63, %v14584_v14  ;;  %v13364_v14 = vadd.f32 %v13066_v63, %v13036_v19  ;;  %v13373_v39 = vadd.f32 %v13076_v29, %v14586_v37  ;;  %v6706_v62 = vmul.f32 %v13078_v34, %v13078_v34 }
 0x5c6   : > { %14583 = vst [vmem:[#allocation52_spill] sm:$0xff] %v13340_v28  ;;  %v13368_v28 = vpop.f32.mrb[138].mxu0  ;;  %v6646_v45 = vadd.f32 %v13098_v11, %v13063_v50  ;;  %v6707_v63 = vmul.f32 %v13098_v11, %v13098_v11  ;;  %v8786_v29 = vadd.f32 %v13100_v4, %v13080_v44  ;;  %v6626_v34 = vadd.f32 %v6625_v61, %v13182_v42  ;;  %v14588_v50 = vld [vmem:[#allocation36_spill] sm:$0xff] }
 0x5c7   : > { %14585 = vst [vmem:[#allocation65_spill] sm:$0xff] %v13344_v51  ;;  %v13366_v51 = vpop.f32.mrb[122].mxu1  ;;  %14587 = vst [vmem:[#allocation60_spill] sm:$0xff] %v13373_v39  ;;  %v13381_v19 = vpop.f32.mrb[139].mxu0  ;;  %v6701_v54 = vmul.f32 %v13373_v39, %v13373_v39  ;;  %v6891_v37 = vadd.f32 %v6706_v62, %v13070_v43  ;;  %v6713_v11 = vmul.f32 %v13182_v42, %v13182_v42  ;;  %v14590_v62 = vld [vmem:[#allocation46_spill] sm:$0xff]  ;;  %9882 = vtanh.f32 %v13148_v35 }
 0x5c8   : > { %v13379_v38 = vpop.f32.mrb[123].mxu1  ;;  %v6912_v59 = vadd.f32 %v6707_v63, %v13074_v20  ;;  %v13398_v31 = vadd.f32 %v8786_v29, %v14588_v50  ;;  %v6647_v44 = vadd.f32 %v6646_v45, %v13202_v17  ;;  %v6714_v43 = vmul.f32 %v13202_v17, %v13202_v17  ;;  %v13415_v2 = vpop.f32.mrb[140].mxu0 }
 0x5c9   : > { %v6892_v4 = vadd.f32 %v6891_v37, %v6713_v11  ;;  %v13413_v57 = vpop.f32.mrb[124].mxu1  ;;  %v13419_v45 = vadd.f32 %v8789_v12, %v14590_v62  ;;  %v6627_v6 = vadd.f32 %v6626_v34, %v13222_v56  ;;  %v13424_v15 = vpop.f32.mrb[141].mxu0  ;;  %v6720_v63 = vmul.f32 %v13222_v56, %v13222_v56 }
 0x5ca   : > { %14589 = vst [vmem:[#allocation58_spill] sm:$0xff] %v13398_v31  ;;  %v6667_v50 = vadd.f32 %v13398_v31, %v13373_v39  ;;  %v6708_v20 = vmul.f32 %v13398_v31, %v13398_v31  ;;  %v6913_v61 = vadd.f32 %v6912_v59, %v6714_v43  ;;  %v13422_v60 = vpop.f32.mrb[125].mxu1  ;;  %v6648_v29 = vadd.f32 %v6647_v44, %v13242_v26  ;;  %v13433_v37 = vpop.f32.mrb[142].mxu0  ;;  %v14592_v39 = vld [vmem:[#allocation53_spill] sm:$0xff] }
 0x5cb   : > { %14591 = vst [vmem:[#allocation44_spill] sm:$0xff] %v13419_v45  ;;  %v13431_v25 = vpop.f32.mrb[126].mxu1  ;;  %v6715_v59 = vmul.f32 %v13419_v45, %v13419_v45  ;;  %v13443_v43 = vpop.f32.mrb[143].mxu0  ;;  %v6893_v44 = vadd.f32 %v6892_v4, %v6720_v63  ;;  %v8792_v12 = vadd.f32 %v13244_v3, %v13224_v52  ;;  %v6628_v36 = vadd.f32 %v6627_v6, %v13326_v33 }
 0x5cc   : > { %v6933_v11 = vadd.f32 %v6708_v20, %v6701_v54  ;;  %v6668_v34 = vadd.f32 %v6667_v50, %v13419_v45  ;;  %v13441_v54 = vpop.f32.mrb[127].mxu1  ;;  %v9853_v20 = vpop.eup %9852  ;;  %v6914_v62 = vadd.f32 %v6913_v61, %v6721_v48  ;;  %v6727_v45 = vmul.f32 %v13326_v33, %v13326_v33 }
 0x5cd   : > { %v9855_v31 = vpop.eup %9854  ;;  %v13454_v26 = vadd.f32 %v8792_v12, %v14592_v39  ;;  %v6649_v13 = vadd.f32 %v6648_v29, %v13346_v16  ;;  %v6728_v52 = vmul.f32 %v13346_v16, %v13346_v16  ;;  %v8795_v61 = vadd.f32 %v13348_v27, %v13328_v8  ;;  %v13466_v63 = vpop.f32.mrb[128].mxu1 }
 0x5ce   : > { %v6934_v50 = vadd.f32 %v6933_v11, %v6715_v59  ;;  %v9857_v3 = vpop.eup %9856  ;;  %v8621_v49 = vpack.c.bf16 %v9855_v31, %v9853_v20  ;;  %v6894_v4 = vadd.f32 %v6893_v44, %v6727_v45  ;;  %v13468_v29 = vpop.f32.mrb[144].mxu0  ;;  %v6629_v27 = vadd.f32 %v6628_v36, %v13366_v51 }
 0x5cf   : > { %14593 = vst [vmem:[#allocation36_spill] sm:$0xff] %v13454_v26  ;;  %v9859_v6 = vpop.eup %9858  ;;  %v6669_v53 = vadd.f32 %v6668_v34, %v13454_v26  ;;  %v6722_v39 = vmul.f32 %v13454_v26, %v13454_v26  ;;  %v6915_v11 = vadd.f32 %v6914_v62, %v6728_v52  ;;  %v13477_v0 = vadd.f32 %v8795_v61, %v14594_v58  ;;  %v13480_v8 = vpop.f32.mrb[129].mxu1  ;;  %v14622_v26 = vld [vmem:[#allocation27_spill] sm:$0xff] }
 0x5d0   : > { %v9861_v59 = vpop.eup %9860  ;;  %v8622_v31 = vpack.c.bf16 %v9859_v6, %v9857_v3  ;;  %7916 = vst [vmem:[%s13473_s26] sm:$0xff] %v8621_v49  ;;  %v13482_v45 = vpop.f32.mrb[145].mxu0  ;;  %v6734_v48 = vmul.f32 %v13366_v51, %v13366_v51  ;;  %v6650_v44 = vadd.f32 %v6649_v13, %v13379_v38  ;;  %9884 = vtanh.f32 %v13152_v23 }
 0x5d1   : > { %14595 = vst [vmem:[#allocation46_spill] sm:$0xff] %v13477_v0  ;;  %v9863_v34 = vpop.eup %9862  ;;  %v6935_v46 = vadd.f32 %v6934_v50, %v6722_v39  ;;  %v13488_v12 = vpop.f32.mrb[130].mxu1  ;;  %v6670_v52 = vadd.f32 %v6669_v53, %v13477_v0  ;;  %v6729_v35 = vmul.f32 %v13477_v0, %v13477_v0  ;;  %9886 = vtanh.f32 %v13156_v7  ;;  %v14615_v0 = vld [vmem:[#allocation77_spill] sm:$0xff] }
 0x5d2   : > { %v13490_v20 = vpop.f32.mrb[146].mxu0  ;;  %v9865_v62 = vpop.eup %9864  ;;  %v8625_v36 = vpack.c.bf16 %v9863_v34, %v9861_v59  ;;  %7917 = vst [vmem:[%s13473_s26 + $0x8] sm:$0xff] %v8622_v31  ;;  %v6895_v49 = vadd.f32 %v6894_v4, %v6734_v48  ;;  %v6735_v61 = vmul.f32 %v13379_v38, %v13379_v38  ;;  %v8798_v23 = vadd.f32 %v13381_v19, %v13368_v28  ;;  %v14596_v4 = vld [vmem:[#allocation48_spill] sm:$0xff] }
 0x5d3   : > { %v13497_v50 = vpop.f32.mrb[131].mxu1  ;;  %v13499_v3 = vpop.f32.mrb[147].mxu0  ;;  %9888 = vtanh.f32 %v13160_v5  ;;  %v6936_v39 = vadd.f32 %v6935_v46, %v6729_v35  ;;  %v6630_v59 = vadd.f32 %v6629_v27, %v13413_v57  ;;  %v6741_v34 = vmul.f32 %v13413_v57, %v13413_v57 }
 0x5d4   : > { %v9867_v13 = vpop.eup %9866  ;;  %7920 = vst [vmem:[%s13473_s26 + $0x1c] sm:$0xff] %v8625_v36  ;;  %9890 = vtanh.f32 %v13164_v32  ;;  %v6916_v7 = vadd.f32 %v6915_v11, %v6735_v61  ;;  %v13511_v58 = vadd.f32 %v8798_v23, %v14596_v4  ;;  %v6651_v28 = vadd.f32 %v6650_v44, %v13422_v60  ;;  %v13526_v36 = vpop.f32.mrb[148].mxu0 }
 0x5d5   : > { %v9869_v6 = vpop.eup %9868  ;;  %v8626_v53 = vpack.c.bf16 %v9867_v13, %v9865_v62  ;;  %9892 = vtanh.f32 %v13168_v10  ;;  %v6742_v19 = vmul.f32 %v13422_v60, %v13422_v60  ;;  %v6896_v46 = vadd.f32 %v6895_v49, %v6741_v34  ;;  %v13524_v62 = vpop.f32.mrb[132].mxu1 }
 0x5d6   : > { %v9871_v31 = vpop.eup %9870  ;;  %14597 = vst [vmem:[#allocation53_spill] sm:$0xff] %v13511_v58  ;;  %9894 = vtanh.f32 %v13172_v47  ;;  %v6671_v32 = vadd.f32 %v6670_v52, %v13511_v58  ;;  %v6736_v11 = vmul.f32 %v13511_v58, %v13511_v58  ;;  %v8801_v47 = vadd.f32 %v13424_v15, %v13415_v2  ;;  %v13532_v13 = vpop.f32.mrb[133].mxu1  ;;  %v14600_v15 = vld [vmem:[#allocation55_spill] sm:$0xff] }
 0x5d7   : > { %v9873_v48 = vpop.eup %9872  ;;  %v8629_v5 = vpack.c.bf16 %v9871_v31, %v9869_v6  ;;  %7921 = vst [vmem:[%s13473_s26 + $0x24] sm:$0xff] %v8626_v53  ;;  %9896 = vtanh.f32 %v13176_v24  ;;  %v6917_v35 = vadd.f32 %v6916_v7, %v6742_v19  ;;  %14598 = vst [vmem:[#allocation51_spill] sm:$0xff] %v13532_v13  ;;  %v13534_v52 = vpop.f32.mrb[149].mxu0  ;;  %v6631_v23 = vadd.f32 %v6630_v59, %v13431_v25 }
 0x5d8   : > { %v9875_v27 = vpop.eup %9874  ;;  %9898 = vtanh.f32 %v13180_v9  ;;  %v6937_v49 = vadd.f32 %v6936_v39, %v6736_v11  ;;  %v6748_v24 = vmul.f32 %v13431_v25, %v13431_v25  ;;  %v13540_v6 = vpop.f32.mrb[134].mxu1  ;;  %v13547_v7 = vadd.f32 %v8801_v47, %v14600_v15 }
 0x5d9   : > { %v9877_v10 = vpop.eup %9876  ;;  %v8630_v44 = vpack.c.bf16 %v9875_v27, %v9873_v48  ;;  %7924 = vst [vmem:[%s13473_s26 + $0x38] sm:$0xff] %v8629_v5  ;;  %14599 = vst [vmem:[#allocation48_spill] sm:$0xff] %v13540_v6  ;;  %v13542_v53 = vpop.f32.mrb[150].mxu0  ;;  %9900 = vtanh.f32 %v13188_v1  ;;  %v6652_v9 = vadd.f32 %v6651_v28, %v13441_v54  ;;  %v6749_v48 = vmul.f32 %v13441_v54, %v13441_v54 }
 0x5da   : > { %v9879_v61 = vpop.eup %9878  ;;  %14601 = vst [vmem:[#allocation55_spill] sm:$0xff] %v13547_v7  ;;  %v13550_v39 = vpop.f32.mrb[135].mxu1  ;;  %9902 = vtanh.f32 %v13192_v55  ;;  %v6897_v34 = vadd.f32 %v6896_v46, %v6748_v24  ;;  %v8804_v1 = vadd.f32 %v13443_v43, %v13433_v37  ;;  %v6672_v28 = vadd.f32 %v6671_v32, %v13547_v7  ;;  %v14602_v55 = vld [vmem:[#allocation24_spill] sm:$0xff]  ;;  %v14605_v43 = vld [vmem:[#allocation33_spill] sm:$0xff] }
 0x5db   : > { %v9881_v31 = vpop.eup %9880  ;;  %v8633_v2 = vpack.c.bf16 %v9879_v61, %v9877_v10  ;;  %7925 = vst [vmem:[%s13473_s26 + $0x40] sm:$0xff] %v8630_v44  ;;  %v13552_v59 = vpop.f32.mrb[151].mxu0  ;;  %9904 = vtanh.f32 %v13196_v22  ;;  %v6743_v27 = vmul.f32 %v13547_v7, %v13547_v7  ;;  %v6918_v46 = vadd.f32 %v6917_v35, %v6749_v48  ;;  %v14603_v10 = vld [vmem:[#allocation57_spill] sm:$0xff] }
 0x5dc   : > { %v9883_v4 = vpop.eup %9882  ;;  %9906 = vtanh.f32 %v14602_v55  ;;  %v13566_v44 = vadd.f32 %v8804_v1, %v14603_v10  ;;  %v6632_v47 = vadd.f32 %v6631_v23, %v13466_v63  ;;  %v6755_v32 = vmul.f32 %v13466_v63, %v13466_v63  ;;  %v13578_v15 = vpop.f32.mrb[136].mxu1  ;;  %v14607_v1 = vld [vmem:[#allocation22_spill] sm:$0xff] }
 0x5dd   : > { %v9885_v5 = vpop.eup %9884  ;;  %v8634_v19 = vpack.c.bf16 %v9883_v4, %v9881_v31  ;;  %7928 = vst [vmem:[%s13473_s26 + $0x54] sm:$0xff] %v8633_v2  ;;  %9908 = vtanh.f32 %v14605_v43  ;;  %v6938_v61 = vadd.f32 %v6937_v49, %v6743_v27  ;;  %v14606_v31 = vld [vmem:[#allocation30_spill] sm:$0xff]  ;;  %v6653_v23 = vadd.f32 %v6652_v9, %v13480_v8  ;;  %v13580_v4 = vpop.f32.mrb[152].mxu0  ;;  %v14608_v9 = vld [vmem:[#allocation32_spill] sm:$0xff] }
 0x5de   : > { %v9887_v11 = vpop.eup %9886  ;;  %14604 = vst [vmem:[#allocation24_spill] sm:$0xff] %v13566_v44  ;;  %9910 = vtanh.f32 %v14606_v31  ;;  %v6673_v35 = vadd.f32 %v6672_v28, %v13566_v44  ;;  %v6750_v2 = vmul.f32 %v13566_v44, %v13566_v44  ;;  %v13586_v28 = vpop.f32.mrb[137].mxu1  ;;  %v8807_v10 = vadd.f32 %v13482_v45, %v13468_v29  ;;  %v14610_v45 = vld [vmem:[#allocation38_spill] sm:$0xff] }
 0x5df   : > { %v9889_v37 = vpop.eup %9888  ;;  %v8637_v22 = vpack.c.bf16 %v9887_v11, %v9885_v5  ;;  %7929 = vst [vmem:[%s13473_s26 + $0x5c] sm:$0xff] %v8634_v19  ;;  %9912 = vtanh.f32 %v14607_v1  ;;  %v6898_v5 = vadd.f32 %v6897_v34, %v6755_v32  ;;  %v6756_v19 = vmul.f32 %v13480_v8, %v13480_v8  ;;  %v13588_v27 = vpop.f32.mrb[153].mxu0  ;;  %v14609_v32 = vld [vmem:[#allocation41_spill] sm:$0xff] }
 0x5e0   : > { %v9891_v24 = vpop.eup %9890  ;;  %9914 = vtanh.f32 %v14608_v9  ;;  %v6939_v55 = vadd.f32 %v6938_v61, %v6750_v2  ;;  %v6633_v43 = vadd.f32 %v6632_v47, %v13488_v12  ;;  %v6762_v1 = vmul.f32 %v13488_v12, %v13488_v12  ;;  %v14611_v47 = vld [vmem:[#allocation54_spill] sm:$0xff] }
 0x5e1   : > { %v9893_v48 = vpop.eup %9892  ;;  %v8638_v49 = vpack.c.bf16 %v9891_v24, %v9889_v37  ;;  %7932 = vst [vmem:[%s13473_s26 + $0x70] sm:$0xff] %v8637_v22  ;;  %v13594_v37 = vpop.f32.mrb[138].mxu1  ;;  %9916 = vtanh.f32 %v14609_v32  ;;  %v6919_v31 = vadd.f32 %v6918_v46, %v6756_v19  ;;  %v13608_v9 = vadd.f32 %v8807_v10, %v14611_v47 }
 0x5e2   : > { %v9895_v11 = vpop.eup %9894  ;;  %v13596_v22 = vpop.f32.mrb[154].mxu0  ;;  %9918 = vtanh.f32 %v14610_v45  ;;  %v6654_v44 = vadd.f32 %v6653_v23, %v13497_v50  ;;  %v8810_v32 = vadd.f32 %v13499_v3, %v13490_v20  ;;  %v14614_v45 = vld [vmem:[#allocation40_spill] sm:$0xff]  ;;  %v6634_v20 = vadd.f32 %v6633_v43, %v13524_v62 }
 0x5e3   : > { %v9897_v34 = vpop.eup %9896  ;;  %v8641_v24 = vpack.c.bf16 %v9895_v11, %v9893_v48  ;;  %7933 = vst [vmem:[%s13473_s26 + $0x78] sm:$0xff] %v8638_v49  ;;  %v13602_v61 = vpop.f32.mrb[139].mxu1  ;;  %14612 = vst [vmem:[#allocation57_spill] sm:$0xff] %v13608_v9  ;;  %v6763_v48 = vmul.f32 %v13497_v50, %v13497_v50  ;;  %v14613_v49 = vld [vmem:[#allocation28_spill] sm:$0xff]  ;;  %v6899_v11 = vadd.f32 %v6898_v5, %v6762_v1 }
 0x5e4   : > { %v13604_v2 = vpop.f32.mrb[155].mxu0  ;;  %v9899_v29 = vpop.eup %9898  ;;  %9920 = vtanh.f32 %v14613_v49  ;;  %v6674_v10 = vadd.f32 %v6673_v35, %v13608_v9  ;;  %v6757_v23 = vmul.f32 %v13608_v9, %v13608_v9  ;;  %v6769_v35 = vmul.f32 %v13524_v62, %v13524_v62 }
 0x5e5   : > { %v9901_v46 = vpop.eup %9900  ;;  %v8642_v19 = vpack.c.bf16 %v9899_v29, %v9897_v34  ;;  %7936 = vst [vmem:[%s13473_s26 + $0x8c] sm:$0xff] %v8641_v24  ;;  %9922 = vtanh.f32 %v14614_v45  ;;  %v6920_v47 = vadd.f32 %v6919_v31, %v6763_v48  ;;  %v14616_v34 = vld [vmem:[#allocation59_spill] sm:$0xff]  ;;  %v14618_v24 = vld [vmem:[#allocation62_spill] sm:$0xff]  ;;  %v6655_v31 = vadd.f32 %v6654_v44, %v13532_v13  ;;  %v13631_v29 = vpop.f32.mrb[140].mxu1 }
 0x5e6   : > { %v9903_v7 = vpop.eup %9902  ;;  %9924 = vtanh.f32 %v14615_v0  ;;  %v13624_v5 = vadd.f32 %v8810_v32, %v14616_v34  ;;  %v6940_v1 = vadd.f32 %v6939_v55, %v6757_v23  ;;  %v13633_v48 = vpop.f32.mrb[156].mxu0  ;;  %v14620_v45 = vld [vmem:[#allocation71_spill] sm:$0xff]  ;;  %v6900_v23 = vadd.f32 %v6899_v11, %v6769_v35 }
 0x5e7   : > { %v9905_v58 = vpop.eup %9904  ;;  %v8645_v49 = vpack.c.bf16 %v9903_v7, %v9901_v46  ;;  %7937 = vst [vmem:[%s13473_s26 + $0x94] sm:$0xff] %v8642_v19  ;;  %9926 = vtanh.f32 %v14618_v24  ;;  %v14619_v7 = vld [vmem:[#allocation64_spill] sm:$0xff]  ;;  %v13640_v19 = vpop.f32.mrb[141].mxu1  ;;  %v6770_v34 = vmul.f32 %v13532_v13, %v13532_v13  ;;  %v14621_v24 = vld [vmem:[#allocation66_spill] sm:$0xff] }
 0x5e8   : > { %14617 = vst [vmem:[#allocation33_spill] sm:$0xff] %v13624_v5  ;;  %v9907_v3 = vpop.eup %9906  ;;  %9928 = vtanh.f32 %v14619_v7  ;;  %v6675_v43 = vadd.f32 %v6674_v10, %v13624_v5  ;;  %v6764_v55 = vmul.f32 %v13624_v5, %v13624_v5  ;;  %v13642_v32 = vpop.f32.mrb[157].mxu0 }
 0x5e9   : > { %v9909_v0 = vpop.eup %9908  ;;  %v8646_v46 = vpack.c.bf16 %v9907_v3, %v9905_v58  ;;  %7940 = vst [vmem:[%s13473_s26 + $0xa8] sm:$0xff] %v8645_v49  ;;  %9930 = vtanh.f32 %v14620_v45  ;;  %v8813_v58 = vadd.f32 %v13534_v52, %v13526_v36  ;;  %v13649_v49 = vpop.f32.mrb[142].mxu1  ;;  %v6635_v45 = vadd.f32 %v6634_v20, %v13540_v6  ;;  %v14623_v52 = vld [vmem:[#allocation63_spill] sm:$0xff] }
 0x5ea   : > { %v9911_v44 = vpop.eup %9910  ;;  %v13651_v10 = vpop.f32.mrb[158].mxu0  ;;  %9932 = vtanh.f32 %v14621_v24  ;;  %v6941_v5 = vadd.f32 %v6940_v1, %v6764_v55  ;;  %v6921_v36 = vadd.f32 %v6920_v47, %v6770_v34  ;;  %v6776_v24 = vmul.f32 %v13540_v6, %v13540_v6  ;;  %v14627_v6 = vld [vmem:[#allocation29_spill] sm:$0xff] }
 0x5eb   : > { %v9913_v3 = vpop.eup %9912  ;;  %v8649_v7 = vpack.c.bf16 %v9911_v44, %v9909_v0  ;;  %7941 = vst [vmem:[%s13473_s26 + $0xb0] sm:$0xff] %v8646_v46  ;;  %v13656_v11 = vpop.f32.mrb[143].mxu1  ;;  %9934 = vtanh.f32 %v14622_v26  ;;  %v13662_v13 = vadd.f32 %v8813_v58, %v14623_v52  ;;  %v14625_v46 = vld [vmem:[#allocation26_spill] sm:$0xff]  ;;  %v6656_v20 = vadd.f32 %v6655_v31, %v13550_v39  ;;  %v14626_v26 = vld [vmem:[#allocation31_spill] sm:$0xff] }
 0x5ec   : > { %v13658_v35 = vpop.f32.mrb[159].mxu0  ;;  %v9915_v9 = vpop.eup %9914  ;;  %9936 = vtanh.f32 %v14625_v46  ;;  %v6777_v55 = vmul.f32 %v13550_v39, %v13550_v39  ;;  %v6901_v58 = vadd.f32 %v6900_v23, %v6776_v24  ;;  %v8816_v31 = vadd.f32 %v13552_v59, %v13542_v53  ;;  %v14628_v46 = vld [vmem:[#allocation35_spill] sm:$0xff]  ;;  %v14629_v24 = vld [vmem:[#allocation76_spill] sm:$0xff] }
 0x5ed   : > { %14624 = vst [vmem:[#allocation30_spill] sm:$0xff] %v13662_v13  ;;  %v9917_v0 = vpop.eup %9916  ;;  %v8650_v1 = vpack.c.bf16 %v9915_v9, %v9913_v3  ;;  %7944 = vst [vmem:[%s13473_s26 + $0xc4] sm:$0xff] %v8649_v7  ;;  %9938 = vtanh.f32 %v14626_v26  ;;  %v6676_v47 = vadd.f32 %v6675_v43, %v13662_v13  ;;  %v6771_v34 = vmul.f32 %v13662_v13, %v13662_v13 }
 0x5ee   : > { %v9919_v44 = vpop.eup %9918  ;;  %9940 = vtanh.f32 %v14627_v6  ;;  %v6922_v3 = vadd.f32 %v6921_v36, %v6777_v55  ;;  %v6636_v43 = vadd.f32 %v6635_v45, %v13578_v15  ;;  %v6783_v13 = vmul.f32 %v13578_v15, %v13578_v15 }
 0x5ef   : > { %v9921_v52 = vpop.eup %9920  ;;  %v8653_v9 = vpack.c.bf16 %v9919_v44, %v9917_v0  ;;  %7945 = vst [vmem:[%s13473_s26 + $0xcc] sm:$0xff] %v8650_v1  ;;  %9942 = vtanh.f32 %v14628_v46  ;;  %v6942_v26 = vadd.f32 %v6941_v5, %v6771_v34  ;;  %v14630_v0 = vld [vmem:[#allocation61_spill] sm:$0xff]  ;;  %v6657_v53 = vadd.f32 %v6656_v20, %v13586_v28  ;;  %v14631_v1 = vld [vmem:[#allocation39_spill] sm:$0xff]  ;;  %v14632_v34 = vld [vmem:[#allocation34_spill] sm:$0xff] }
 0x5f0   : > { %v9923_v7 = vpop.eup %9922  ;;  %9944 = vtanh.f32 %v14629_v24  ;;  %v13686_v36 = vadd.f32 %v8816_v31, %v14630_v0  ;;  %v6902_v5 = vadd.f32 %v6901_v58, %v6783_v13  ;;  %v6784_v45 = vmul.f32 %v13586_v28, %v13586_v28  ;;  %v14634_v58 = vld [vmem:[#allocation17_spill] sm:$0xff]  ;;  %v14635_v24 = vld [vmem:[#allocation47_spill] sm:$0xff] }
 0x5f1   : > { %v9925_v23 = vpop.eup %9924  ;;  %v8654_v6 = vpack.c.bf16 %v9923_v7, %v9921_v52  ;;  %7948 = vst [vmem:[%s13473_s26 + $0xe0] sm:$0xff] %v8653_v9  ;;  %9946 = vtanh.f32 %v14631_v1  ;;  %v8819_v55 = vadd.f32 %v13588_v27, %v13580_v4  ;;  %v14633_v7 = vld [vmem:[#allocation37_spill] sm:$0xff]  ;;  %v6637_v4 = vadd.f32 %v6636_v43, %v13594_v37 }
 0x5f2   : > { %v9927_v59 = vpop.eup %9926  ;;  %9948 = vtanh.f32 %v14632_v34  ;;  %v6677_v9 = vadd.f32 %v6676_v47, %v13686_v36  ;;  %v6778_v20 = vmul.f32 %v13686_v36, %v13686_v36  ;;  %v6923_v13 = vadd.f32 %v6922_v3, %v6784_v45 }
 0x5f3   : > { %v9929_v44 = vpop.eup %9928  ;;  %v8657_v52 = vpack.c.bf16 %v9927_v59, %v9925_v23  ;;  %7949 = vst [vmem:[%s13473_s26 + $0xe8] sm:$0xff] %v8654_v6  ;;  %9950 = vtanh.f32 %v14633_v7  ;;  %v13701_v46 = vadd.f32 %v8819_v55, %v14634_v58  ;;  %v6790_v47 = vmul.f32 %v13594_v37, %v13594_v37  ;;  %v14636_v59 = vld [vmem:[#allocation43_spill] sm:$0xff]  ;;  %v14637_v55 = vld [vmem:[#allocation42_spill] sm:$0xff]  ;;  %v14639_v58 = vld [vmem:[#allocation49_spill] sm:$0xff] }
 0x5f4   : > { %v9931_v31 = vpop.eup %9930  ;;  %9952 = vtanh.f32 %v14635_v24  ;;  %v6943_v6 = vadd.f32 %v6942_v26, %v6778_v20  ;;  %v6658_v43 = vadd.f32 %v6657_v53, %v13602_v61  ;;  %v6791_v34 = vmul.f32 %v13602_v61, %v13602_v61  ;;  %v14638_v20 = vld [vmem:[#allocation45_spill] sm:$0xff] }
 0x5f5   : > { %v9933_v27 = vpop.eup %9932  ;;  %v8658_v23 = vpack.c.bf16 %v9931_v31, %v9929_v44  ;;  %7952 = vst [vmem:[%s13473_s26 + $0xfc] sm:$0xff] %v8657_v52  ;;  %9954 = vtanh.f32 %v14636_v59  ;;  %v6678_v3 = vadd.f32 %v6677_v9, %v13701_v46  ;;  %v6785_v1 = vmul.f32 %v13701_v46, %v13701_v46 }
 0x5f6   : > { %v9935_v0 = vpop.eup %9934  ;;  %9956 = vtanh.f32 %v14637_v55  ;;  %v6903_v26 = vadd.f32 %v6902_v5, %v6790_v47  ;;  %v8822_v9 = vadd.f32 %v13604_v2, %v13596_v22  ;;  %v6638_v7 = vadd.f32 %v6637_v4, %v13631_v29  ;;  %v14640_v47 = vld [vmem:[#allocation50_spill] sm:$0xff] }
 0x5f7   : > { %v9937_v45 = vpop.eup %9936  ;;  %v8661_v44 = vpack.c.bf16 %v9935_v0, %v9933_v27  ;;  %7953 = vst [vmem:[%s13473_s26 + $0x104] sm:$0xff] %v8658_v23  ;;  %9958 = vtanh.f32 %v14638_v20  ;;  %v6944_v31 = vadd.f32 %v6943_v6, %v6785_v1  ;;  %v6924_v27 = vadd.f32 %v6923_v13, %v6791_v34  ;;  %v14641_v0 = vld [vmem:[#allocation21_spill] sm:$0xff]  ;;  %v14642_v34 = vld [vmem:[#allocation52_spill] sm:$0xff] }
 0x5f8   : > { %v9939_v52 = vpop.eup %9938  ;;  %9960 = vtanh.f32 %v14639_v58  ;;  %v6797_v5 = vmul.f32 %v13631_v29, %v13631_v29  ;;  %v13727_v6 = vadd.f32 %v8822_v9, %v14641_v0  ;;  %v6659_v22 = vadd.f32 %v6658_v43, %v13640_v19 }
 0x5f9   : > { %v9941_v53 = vpop.eup %9940  ;;  %v8662_v24 = vpack.c.bf16 %v9939_v52, %v9937_v45  ;;  %7956 = vst [vmem:[%s13473_s26 + $0x118] sm:$0xff] %v8661_v44  ;;  %9962 = vtanh.f32 %v14640_v47  ;;  %v6798_v2 = vmul.f32 %v13640_v19, %v13640_v19  ;;  %v8825_v1 = vadd.f32 %v13642_v32, %v13633_v48  ;;  %v14645_v48 = vld [vmem:[#allocation65_spill] sm:$0xff] }
 0x5fa   : > { %v9943_v23 = vpop.eup %9942  ;;  %9964 = vtanh.f32 %v13332_v40  ;;  %v6904_v13 = vadd.f32 %v6903_v26, %v6797_v5  ;;  %v6792_v55 = vmul.f32 %v13727_v6, %v13727_v6  ;;  %v14643_v40 = vld [vmem:[#allocation19_spill] sm:$0xff]  ;;  %v6639_v26 = vadd.f32 %v6638_v7, %v13649_v49 }
 0x5fb   : > { %v9945_v4 = vpop.eup %9944  ;;  %v8665_v59 = vpack.c.bf16 %v9943_v23, %v9941_v53  ;;  %7957 = vst [vmem:[%s13473_s26 + $0x120] sm:$0xff] %v8662_v24  ;;  %9966 = vtanh.f32 %v13336_v18  ;;  %v6925_v43 = vadd.f32 %v6924_v27, %v6798_v2  ;;  %v13742_v20 = vadd.f32 %v8825_v1, %v14643_v40 }
 0x5fc   : > { %v9947_v45 = vpop.eup %9946  ;;  %9968 = vtanh.f32 %v14642_v34  ;;  %v6804_v18 = vmul.f32 %v13649_v49, %v13649_v49  ;;  %v6660_v32 = vadd.f32 %v6659_v22, %v13656_v11  ;;  %v6679_v24 = vadd.f32 %v6678_v3, %v13727_v6 }
 0x5fd   : > { %v9949_v44 = vpop.eup %9948  ;;  %v8666_v52 = vpack.c.bf16 %v9947_v45, %v9945_v4  ;;  %7960 = vst [vmem:[%s13473_s26 + $0x134] sm:$0xff] %v8665_v59  ;;  %14644 = vst [vmem:[#allocation22_spill] sm:$0xff] %v13742_v20  ;;  %9970 = vtanh.f32 %v14645_v48  ;;  %v6945_v27 = vadd.f32 %v6944_v31, %v6792_v55  ;;  %v6640_v7 = vrot.slane %v6639_v26, 4  ;;  %v14646_v48 = vld [vmem:[#allocation20_spill] sm:$0xff] }
 0x5fe   : > { %v9951_v9 = vpop.eup %9950  ;;  %9972 = vtanh.f32 %v13352_v21  ;;  %v6905_v23 = vadd.f32 %v6904_v13, %v6804_v18  ;;  %v6661_v47 = vrot.slane %v6660_v32, 4  ;;  %v6799_v21 = vmul.f32 %v13742_v20, %v13742_v20 }
 0x5ff   : > { %v9953_v53 = vpop.eup %9952  ;;  %v8669_v58 = vpack.c.bf16 %v9951_v9, %v9949_v44  ;;  %7961 = vst [vmem:[%s13473_s26 + $0x13c] sm:$0xff] %v8666_v52  ;;  %9974 = vtanh.f32 %v13356_v41  ;;  %v6805_v22 = vmul.f32 %v13656_v11, %v13656_v11  ;;  %v6641_v41 = vadd.f32 %v6640_v7, %v6639_v26 }
 0x600   : > { %v9955_v5 = vpop.eup %9954  ;;  %9976 = vtanh.f32 %v13360_v30  ;;  %v6906_v31 = vrot.slane %v6905_v23, 4  ;;  %v6662_v4 = vadd.f32 %v6661_v47, %v6660_v32  ;;  %v6680_v30 = vadd.f32 %v6679_v24, %v13742_v20  ;;  %v14672_v20 = vld [vmem:[#allocation30_spill] sm:$0xff] }
 0x601   : > { %v9957_v0 = vpop.eup %9956  ;;  %v8670_v2 = vpack.c.bf16 %v9955_v5, %v9953_v53  ;;  %7964 = vst [vmem:[%s13473_s26 + $0x150] sm:$0xff] %v8669_v58  ;;  %9978 = vtanh.f32 %v13364_v14  ;;  %v6926_v1 = vadd.f32 %v6925_v43, %v6805_v22  ;;  %v8828_v45 = vadd.f32 %v13658_v35, %v13651_v10 }
 0x602   : > { %v9959_v3 = vpop.eup %9958  ;;  %v6642_v44 = vrot.slane %v6641_v41, 2  ;;  %v6907_v34 = vadd.f32 %v6906_v31, %v6905_v23  ;;  %v6663_v52 = vrot.slane %v6662_v4, 2  ;;  %v6946_v26 = vadd.f32 %v6945_v27, %v6799_v21 }
 0x603   : > { %v9961_v59 = vpop.eup %9960  ;;  %v8673_v13 = vpack.c.bf16 %v9959_v3, %v9957_v0  ;;  %7965 = vst [vmem:[%s13473_s26 + $0x158] sm:$0xff] %v8670_v2  ;;  %v6927_v9 = vrot.slane %v6926_v1, 4  ;;  %v13766_v18 = vadd.f32 %v8828_v45, %v14646_v48 }
 0x604   : > { %v9963_v55 = vpop.eup %9962  ;;  %v6643_v53 = vadd.f32 %v6642_v44, %v6641_v41  ;;  %v6908_v43 = vrot.slane %v6907_v34, 2  ;;  %v6664_v58 = vadd.f32 %v6663_v52, %v6662_v4 }
 0x605   : > { %v9965_v40 = vpop.eup %9964  ;;  %v8674_v14 = vpack.c.bf16 %v9963_v55, %v9961_v59  ;;  %7968 = vst [vmem:[%s13473_s26 + $0x16c] sm:$0xff] %v8673_v13  ;;  %v6928_v35 = vadd.f32 %v6927_v9, %v6926_v1  ;;  %v6681_v5 = vadd.f32 %v6680_v30, %v13766_v18  ;;  %v6806_v7 = vmul.f32 %v13766_v18, %v13766_v18 }
 0x606   : > { %v9967_v32 = vpop.eup %9966  ;;  %v6644_v27 = vrot.slane %v6643_v53, 1  ;;  %v6909_v47 = vadd.f32 %v6908_v43, %v6907_v34  ;;  %v6665_v0 = vrot.slane %v6664_v58, 1 }
 0x607   : > { %v9969_v24 = vpop.eup %9968  ;;  %v8677_v10 = vpack.c.bf16 %v9967_v32, %v9965_v40  ;;  %7969 = vst [vmem:[%s13473_s26 + $0x174] sm:$0xff] %v8674_v14  ;;  %v6929_v22 = vrot.slane %v6928_v35, 2  ;;  %v6682_v3 = vrot.slane %v6681_v5, 4  ;;  %v6947_v41 = vadd.f32 %v6946_v26, %v6806_v7 }
 0x608   : > { %v9971_v23 = vpop.eup %9970  ;;  %v6645_v4 = vadd.f32 %v6644_v27, %v6643_v53  ;;  %v6910_v59 = vrot.slane %v6909_v47, 1  ;;  %v6666_v13 = vadd.f32 %v6665_v0, %v6664_v58 }
 0x609   : > { %v9973_v2 = vpop.eup %9972  ;;  %v8678_v21 = vpack.c.bf16 %v9971_v23, %v9969_v24  ;;  %7972 = vst [vmem:[%s13473_s26 + $0x188] sm:$0xff] %v8677_v10  ;;  %v6930_v45 = vadd.f32 %v6929_v22, %v6928_v35  ;;  %v6683_v55 = vadd.f32 %v6682_v3, %v6681_v5  ;;  %v6948_v44 = vrot.slane %v6947_v41, 4 }
 0x60a   : > { %v9975_v31 = vpop.eup %9974  ;;  %v6692_v52 = vmul.f32 0.0078125, %v6645_v4  ;;  %v6911_v40 = vadd.f32 %v6910_v59, %v6909_v47  ;;  %v6693_v14 = vmul.f32 0.0078125, %v6666_v13 }
 0x60b   : > { %v9977_v30 = vpop.eup %9976  ;;  %v8681_v1 = vpack.c.bf16 %v9975_v31, %v9973_v2  ;;  %7973 = vst [vmem:[%s13473_s26 + $0x190] sm:$0xff] %v8678_v21  ;;  %v6931_v48 = vrot.slane %v6930_v45, 1  ;;  %v6684_v26 = vrot.slane %v6683_v55, 2  ;;  %v6949_v32 = vadd.f32 %v6948_v44, %v6947_v41 }
 0x60c   : > { %v9979_v34 = vpop.eup %9978  ;;  %v6958_v43 = vmul.f32 0.0078125, %v6911_v40  ;;  %v6965_v53 = vmul.f32 %v6692_v52, %v6692_v52  ;;  %v6966_v24 = vmul.f32 %v6693_v14, %v6693_v14 }
 0x60d   : > { %v8682_v9 = vpack.c.bf16 %v9979_v34, %v9977_v30  ;;  %7976 = vst [vmem:[%s13473_s26 + $0x1a4] sm:$0xff] %v8681_v1  ;;  %v6932_v58 = vadd.f32 %v6931_v48, %v6930_v45  ;;  %v6685_v10 = vadd.f32 %v6684_v26, %v6683_v55  ;;  %v6950_v7 = vrot.slane %v6949_v32, 2 }
 0x60e   : > { %v6972_v23 = vsub.f32 %v6958_v43, %v6965_v53  ;;  %v14648_v43 = vld [vmem:[#allocation56_spill] sm:$0xff] }
 0x60f   : > { %7977 = vst [vmem:[%s13473_s26 + $0x1ac] sm:$0xff] %v8682_v9  ;;  %v6959_v35 = vmul.f32 0.0078125, %v6932_v58  ;;  %v6686_v5 = vrot.slane %v6685_v10, 1  ;;  %v6951_v27 = vadd.f32 %v6950_v7, %v6949_v32  ;;  %v14647_v9 = vld [vmem:[#allocation67_spill] sm:$0xff]  ;;  %v14649_v58 = vld [vmem:[#allocation68_spill] sm:$0xff] }
 0x610   : > { %v6979_v0 = vmax.f32 %v6972_v23, 0.0  ;;  %v14651_v23 = vld [vmem:[#allocation70_spill] sm:$0xff] }
 0x611   : > { %v6973_v2 = vsub.f32 %v6959_v35, %v6966_v24  ;;  %v6687_v47 = vadd.f32 %v6686_v5, %v6685_v10  ;;  %v6952_v21 = vrot.slane %v6951_v27, 1  ;;  %v14650_v10 = vld [vmem:[#allocation69_spill] sm:$0xff] }
 0x612   : > { %v6986_v22 = vadd.f32 1e-05, %v6979_v0 }
 0x613   : > { %v6980_v3 = vmax.f32 %v6973_v2, 0.0  ;;  %v6694_v31 = vmul.f32 0.0078125, %v6687_v47  ;;  %v6953_v4 = vadd.f32 %v6952_v21, %v6951_v27 }
 0x614   : > { %9980 = vrsqrt.f32 %v6986_v22  ;;  %v14652_v22 = vld [vmem:[#allocation16_spill] sm:$0xff] }
 0x615   : > { %v6987_v41 = vadd.f32 1e-05, %v6980_v3  ;;  %v6960_v59 = vmul.f32 0.0078125, %v6953_v4  ;;  %v6967_v13 = vmul.f32 %v6694_v31, %v6694_v31  ;;  %v14653_v4 = vld [vmem:[#allocation23_spill] sm:$0xff] }
 0x617   : > { %9982 = vrsqrt.f32 %v6987_v41  ;;  %v6974_v30 = vsub.f32 %v6960_v59, %v6967_v13  ;;  %v14654_v59 = vld [vmem:[#allocation25_spill] sm:$0xff] }
 0x619   : > { %v6981_v1 = vmax.f32 %v6974_v30, 0.0  ;;  %v14655_v30 = vld [vmem:[#allocation18_spill] sm:$0xff] }
 0x61b   : > { %v6988_v45 = vadd.f32 1e-05, %v6981_v1 }
 0x61d   : > { %9984 = vrsqrt.f32 %v6988_v45 }
 0x61e   : > { %v9981_v55 = vpop.eup %9980 }
 0x621   : > { %v9983_v44 = vpop.eup %9982 }
 0x622   : > { %v7025_v34 = vcombine.low %v9981_v55, %v9983_v44 }
 0x624   : > { %v7032_v48 = vrot.slane %v7025_v34, %v14647_v9  ;;  %v14656_v34 = vld [vmem:[#allocation75_spill] sm:$0xff] }
 0x627   : > { %v9985_v40 = vpop.eup %9984 }
 0x628   : > { %v7039_v26 = vrot.slane %v9985_v40, %v14647_v9 }
 0x62a   : > { %v7040_v32 = vcombine.low %v7032_v48, %v7039_v26 }
 0x62c   : > { %v7044_v53 = vmul.f32 %v7040_v32, %v14648_v43 }
 0x62e   : > { %v7066_v24 = vrot.slane %v7044_v53, %v14649_v58  ;;  %v7070_v7 = vrot.slane %v7044_v53, %v14650_v10  ;;  %v7074_v35 = vrot.slane %v7044_v53, %v14651_v23  ;;  %v14657_v10 = vld [vmem:[#allocation60_spill] sm:$0xff] }
 0x630   : > { %v7086_v5 = vmul.f32 %v7066_v24, %v6692_v52  ;;  %v7087_v27 = vmul.f32 %v7070_v7, %v6693_v14  ;;  %v7088_v0 = vmul.f32 %v7074_v35, %v6694_v31  ;;  %v7154_v2 = vrot.slane %v7066_v24, %v14649_v58 }
 0x631   : > { %v7158_v47 = vrot.slane %v7070_v7, %v14649_v58  ;;  %v7162_v31 = vrot.slane %v7074_v35, %v14649_v58 }
 0x632   : > { %v7113_v21 = vcombine.low %v7086_v5, %v7087_v27  ;;  %v7167_v3 = vmul.f32 %v7154_v2, %v14652_v22  ;;  %v7174_v41 = vmul.f32 %v7154_v2, %v14653_v4  ;;  %v7127_v55 = vrot.slane %v7088_v0, %v14647_v9  ;;  %v14660_v27 = vld [vmem:[#allocation51_spill] sm:$0xff]  ;;  %v14661_v0 = vld [vmem:[#allocation48_spill] sm:$0xff] }
 0x633   : > { %v7168_v13 = vmul.f32 %v7158_v47, %v14654_v59  ;;  %v7175_v1 = vmul.f32 %v7158_v47, %v14655_v30  ;;  %v7181_v52 = vmul.f32 %v7154_v2, %v13182_v42  ;;  %v7182_v14 = vmul.f32 %v7158_v47, %v13202_v17  ;;  %v14662_v22 = vld [vmem:[#allocation36_spill] sm:$0xff]  ;;  %v14663_v30 = vld [vmem:[#allocation46_spill] sm:$0xff] }
 0x634   : > { %v7120_v45 = vrot.slane %v7113_v21, %v14647_v9  ;;  %v7188_v44 = vmul.f32 %v7154_v2, %v13222_v56  ;;  %v7189_v40 = vmul.f32 %v7158_v47, %v14656_v34  ;;  %v7195_v48 = vmul.f32 %v7154_v2, %v13326_v33 }
 0x635   : > { %v7196_v32 = vmul.f32 %v7158_v47, %v13346_v16  ;;  %v7202_v53 = vmul.f32 %v7154_v2, %v13366_v51  ;;  %v7203_v24 = vmul.f32 %v7158_v47, %v13379_v38  ;;  %v7209_v9 = vmul.f32 %v7154_v2, %v13413_v57  ;;  %v14658_v16 = vld [vmem:[#allocation58_spill] sm:$0xff]  ;;  %v14659_v51 = vld [vmem:[#allocation44_spill] sm:$0xff] }
 0x636   : > { %v7128_v26 = vcombine.low %v7120_v45, %v7127_v55  ;;  %v7210_v42 = vmul.f32 %v7158_v47, %v13422_v60  ;;  %v7216_v58 = vmul.f32 %v7154_v2, %v13431_v25  ;;  %v7217_v56 = vmul.f32 %v7158_v47, %v13441_v54  ;;  %v14664_v45 = vld [vmem:[#allocation53_spill] sm:$0xff]  ;;  %v14665_v55 = vld [vmem:[#allocation55_spill] sm:$0xff] }
 0x637   : > { %v7169_v7 = vmul.f32 %v7162_v31, %v14657_v10  ;;  %v7223_v33 = vmul.f32 %v7154_v2, %v13466_v63  ;;  %v7224_v23 = vmul.f32 %v7158_v47, %v13480_v8  ;;  %v7176_v35 = vmul.f32 %v7162_v31, %v14658_v16  ;;  %v14666_v10 = vld [vmem:[#allocation72_spill] sm:$0xff] }
 0x638   : > { %v7130_v17 = vrot.slane %v7128_v26, 7  ;;  %v7183_v5 = vmul.f32 %v7162_v31, %v14659_v51  ;;  %v7230_v38 = vmul.f32 %v7154_v2, %v13488_v12  ;;  %v7231_v57 = vmul.f32 %v7158_v47, %v13497_v50  ;;  %v14667_v51 = vld [vmem:[#allocation73_spill] sm:$0xff] }
 0x639   : > { %v7237_v25 = vmul.f32 %v7154_v2, %v13524_v62  ;;  %v7238_v54 = vmul.f32 %v7158_v47, %v14660_v27  ;;  %v7244_v21 = vmul.f32 %v7154_v2, %v14661_v0  ;;  %v7190_v63 = vmul.f32 %v7162_v31, %v14662_v22  ;;  %v14668_v0 = vld [vmem:[#allocation24_spill] sm:$0xff]  ;;  %v14669_v22 = vld [vmem:[#allocation57_spill] sm:$0xff] }
 0x63a   : > { %v7134_v60 = vsub.f32 %v14648_v43, %v7130_v17  ;;  %v7245_v8 = vmul.f32 %v7158_v47, %v13550_v39  ;;  %v7251_v4 = vmul.f32 %v7154_v2, %v13578_v15  ;;  %v7252_v59 = vmul.f32 %v7158_v47, %v13586_v28 }
 0x63b   : > { %v7197_v12 = vmul.f32 %v7162_v31, %v14663_v30  ;;  %v7204_v50 = vmul.f32 %v7162_v31, %v14664_v45  ;;  %v7258_v43 = vmul.f32 %v7154_v2, %v13594_v37  ;;  %v7259_v62 = vmul.f32 %v7158_v47, %v13602_v61  ;;  %v14670_v30 = vld [vmem:[#allocation33_spill] sm:$0xff] }
 0x63c   : > { %v7211_v34 = vmul.f32 %v7162_v31, %v14665_v55  ;;  %v7265_v26 = vmul.f32 %v7154_v2, %v13631_v29  ;;  %v7266_v17 = vmul.f32 %v7158_v47, %v13640_v19  ;;  %v7272_v39 = vmul.f32 %v7154_v2, %v13649_v49  ;;  %v14671_v55 = vld [vmem:[#allocation74_spill] sm:$0xff] }
 0x63d   : > { %v7273_v15 = vmul.f32 %v7158_v47, %v13656_v11  ;;  %v7274_v28 = vmul.f32 %v7162_v31, %v13766_v18  ;;  %v7296_v16 = vrot.slane %v7134_v60, %v14666_v10  ;;  %v7300_v27 = vrot.slane %v7134_v60, %v14667_v51  ;;  %v14673_v51 = vld [vmem:[#allocation22_spill] sm:$0xff] }
 0x63e   : > { %v7218_v37 = vmul.f32 %v7162_v31, %v14668_v0  ;;  %v7225_v61 = vmul.f32 %v7162_v31, %v14669_v22  ;;  %v7232_v45 = vmul.f32 %v7162_v31, %v14670_v30  ;;  %v7304_v29 = vrot.slane %v7134_v60, %v14671_v55 }
 0x63f   : > { %v7239_v19 = vmul.f32 %v7162_v31, %v14672_v20  ;;  %v7246_v49 = vmul.f32 %v7162_v31, %v13686_v36  ;;  %v7331_v11 = vrot.slane %v7296_v16, %v14666_v10  ;;  %v7335_v18 = vrot.slane %v7300_v27, %v14666_v10 }
 0x640   : > { %v7253_v2 = vmul.f32 %v7162_v31, %v13701_v46  ;;  %v7260_v47 = vmul.f32 %v7162_v31, %v13727_v6  ;;  %v7267_v0 = vmul.f32 %v7162_v31, %v14673_v51  ;;  %v7339_v22 = vrot.slane %v7304_v29, %v14666_v10 }
 0x641   : > { %v7344_v30 = vadd.f32 %v7331_v11, %v7167_v3  ;;  %v7345_v55 = vadd.f32 %v7335_v18, %v7168_v13  ;;  %v7351_v60 = vadd.f32 %v7331_v11, %v7174_v41  ;;  %v7352_v20 = vadd.f32 %v7335_v18, %v7175_v1 }
 0x642   : > { %v7346_v36 = vadd.f32 %v7339_v22, %v7169_v7  ;;  %v7353_v16 = vadd.f32 %v7339_v22, %v7176_v35  ;;  %v7358_v27 = vadd.f32 %v7331_v11, %v7181_v52  ;;  %v7359_v46 = vadd.f32 %v7335_v18, %v7182_v14 }
 0x643   : > { %v7360_v6 = vadd.f32 %v7339_v22, %v7183_v5  ;;  %v7365_v31 = vadd.f32 %v7331_v11, %v7188_v44  ;;  %v7366_v51 = vadd.f32 %v7335_v18, %v7189_v40  ;;  %v7367_v10 = vadd.f32 %v7339_v22, %v7190_v63 }
 0x644   : > { %v7372_v29 = vadd.f32 %v7331_v11, %v7195_v48  ;;  %v7373_v3 = vadd.f32 %v7335_v18, %v7196_v32  ;;  %v7374_v13 = vadd.f32 %v7339_v22, %v7197_v12  ;;  %v7379_v41 = vadd.f32 %v7331_v11, %v7202_v53 }
 0x645   : > { %v7380_v1 = vadd.f32 %v7335_v18, %v7203_v24  ;;  %v7381_v7 = vadd.f32 %v7339_v22, %v7204_v50  ;;  %v13842_v35 = vadd.f32 %v7331_v11, %v7209_v9  ;;  %v13844_v52 = vadd.f32 %v7335_v18, %v7210_v42 }
 0x646   : > { %v13846_v14 = vadd.f32 %v7339_v22, %v7211_v34  ;;  %v13848_v5 = vadd.f32 %v7331_v11, %v7216_v58  ;;  %v13850_v44 = vadd.f32 %v7335_v18, %v7217_v56  ;;  %v13852_v40 = vadd.f32 %v7339_v22, %v7218_v37 }
 0x647   : > { %v13854_v63 = vadd.f32 %v7331_v11, %v7223_v33  ;;  %v13856_v48 = vadd.f32 %v7335_v18, %v7224_v23  ;;  %v13858_v32 = vadd.f32 %v7339_v22, %v7225_v61  ;;  %v13860_v53 = vadd.f32 %v7331_v11, %v7230_v38 }
 0x648   : > { %v13862_v24 = vadd.f32 %v7335_v18, %v7231_v57  ;;  %v13864_v9 = vadd.f32 %v7339_v22, %v7232_v45  ;;  %v13866_v42 = vadd.f32 %v7331_v11, %v7237_v25  ;;  %v13868_v58 = vadd.f32 %v7335_v18, %v7238_v54 }
 0x649   : > { %v13870_v56 = vadd.f32 %v7339_v22, %v7239_v19  ;;  %v13872_v12 = vadd.f32 %v7331_v11, %v7244_v21  ;;  %v13874_v33 = vadd.f32 %v7335_v18, %v7245_v8  ;;  %v13876_v23 = vadd.f32 %v7339_v22, %v7246_v49 }
 0x64a   : > { %v13878_v50 = vadd.f32 %v7331_v11, %v7251_v4  ;;  %v13880_v38 = vadd.f32 %v7335_v18, %v7252_v59  ;;  %v13882_v57 = vadd.f32 %v7339_v22, %v7253_v2  ;;  %v13884_v34 = vadd.f32 %v7331_v11, %v7258_v43 }
 0x64b   : > { %v13886_v25 = vadd.f32 %v7335_v18, %v7259_v62  ;;  %v13888_v54 = vadd.f32 %v7339_v22, %v7260_v47  ;;  %v13890_v37 = vadd.f32 %v7331_v11, %v7265_v26  ;;  %v13892_v21 = vadd.f32 %v7335_v18, %v7266_v17 }
 0x64c   : > { %v13894_v8 = vadd.f32 %v7339_v22, %v7267_v0  ;;  %v13896_v61 = vadd.f32 %v7331_v11, %v7272_v39  ;;  %v13898_v4 = vadd.f32 %v7335_v18, %v7273_v15  ;;  %v13900_v59 = vadd.f32 %v7339_v22, %v7274_v28 }
 0x64d   : > { %9986 = vtanh.f32 %v7344_v30 }
 0x64e   : > { %9988 = vtanh.f32 %v7345_v55 }
 0x64f   : > { %9990 = vtanh.f32 %v7346_v36 }
 0x650   : > { %9992 = vtanh.f32 %v7351_v60 }
 0x651   : > { %9994 = vtanh.f32 %v7352_v20 }
 0x652   : > { %9996 = vtanh.f32 %v7353_v16 }
 0x653   : > { %9998 = vtanh.f32 %v7358_v27 }
 0x654   : > { %10000 = vtanh.f32 %v7359_v46 }
 0x655   : > { %10002 = vtanh.f32 %v7360_v6 }
 0x656   : > { %10004 = vtanh.f32 %v7365_v31 }
 0x657   : > { %v9987_v43 = vpop.eup %9986  ;;  %10006 = vtanh.f32 %v7366_v51 }
 0x658   : > { %v9989_v62 = vpop.eup %9988  ;;  %10008 = vtanh.f32 %v7367_v10 }
 0x659   : > { %v9991_v26 = vpop.eup %9990  ;;  %10010 = vtanh.f32 %v7372_v29  ;;  %v8623_v17 = vpack.c.bf16 %v9989_v62, %v9987_v43 }
 0x65a   : > { %v9993_v39 = vpop.eup %9992  ;;  %10012 = vtanh.f32 %v7373_v3  ;;  %v8624_v15 = vpack.c.bf16 %v9991_v26, %v9991_v26 }
 0x65b   : > { %v9995_v28 = vpop.eup %9994  ;;  %10014 = vtanh.f32 %v7374_v13  ;;  %7918 = vst [vmem:[%s13473_s26 + $0x10] sm:$0xff] %v8623_v17 }
 0x65c   : > { %v9997_v45 = vpop.eup %9996  ;;  %10016 = vtanh.f32 %v7379_v41  ;;  %v8627_v19 = vpack.c.bf16 %v9995_v28, %v9993_v39  ;;  %7919 = vst [vmem:[%s13473_s26 + $0x18] sm:$0xf] %v8624_v15 }
 0x65d   : > { %v9999_v49 = vpop.eup %9998  ;;  %10018 = vtanh.f32 %v7380_v1  ;;  %v8628_v11 = vpack.c.bf16 %v9997_v45, %v9997_v45 }
 0x65e   : > { %v10001_v18 = vpop.eup %10000  ;;  %10020 = vtanh.f32 %v7381_v7  ;;  %7922 = vst [vmem:[%s13473_s26 + $0x2c] sm:$0xff] %v8627_v19 }
 0x65f   : > { %v10003_v2 = vpop.eup %10002  ;;  %10022 = vtanh.f32 %v13842_v35  ;;  %v8631_v47 = vpack.c.bf16 %v10001_v18, %v9999_v49  ;;  %7923 = vst [vmem:[%s13473_s26 + $0x34] sm:$0xf] %v8628_v11 }
 0x660   : > { %v10005_v0 = vpop.eup %10004  ;;  %10024 = vtanh.f32 %v13844_v52  ;;  %v8632_v22 = vpack.c.bf16 %v10003_v2, %v10003_v2 }
 0x661   : > { %v10007_v30 = vpop.eup %10006  ;;  %10026 = vtanh.f32 %v13846_v14  ;;  %7926 = vst [vmem:[%s13473_s26 + $0x48] sm:$0xff] %v8631_v47 }
 0x662   : > { %v10009_v55 = vpop.eup %10008  ;;  %10028 = vtanh.f32 %v13848_v5  ;;  %v8635_v60 = vpack.c.bf16 %v10007_v30, %v10005_v0  ;;  %7927 = vst [vmem:[%s13473_s26 + $0x50] sm:$0xf] %v8632_v22 }
 0x663   : > { %v10011_v20 = vpop.eup %10010  ;;  %10030 = vtanh.f32 %v13850_v44  ;;  %v8636_v36 = vpack.c.bf16 %v10009_v55, %v10009_v55 }
 0x664   : > { %v10013_v16 = vpop.eup %10012  ;;  %10032 = vtanh.f32 %v13852_v40  ;;  %7930 = vst [vmem:[%s13473_s26 + $0x64] sm:$0xff] %v8635_v60 }
 0x665   : > { %v10015_v27 = vpop.eup %10014  ;;  %10034 = vtanh.f32 %v13854_v63  ;;  %v8639_v46 = vpack.c.bf16 %v10013_v16, %v10011_v20  ;;  %7931 = vst [vmem:[%s13473_s26 + $0x6c] sm:$0xf] %v8636_v36 }
 0x666   : > { %v10017_v6 = vpop.eup %10016  ;;  %10036 = vtanh.f32 %v13856_v48  ;;  %v8640_v31 = vpack.c.bf16 %v10015_v27, %v10015_v27 }
 0x667   : > { %v10019_v51 = vpop.eup %10018  ;;  %10038 = vtanh.f32 %v13858_v32  ;;  %7934 = vst [vmem:[%s13473_s26 + $0x80] sm:$0xff] %v8639_v46 }
 0x668   : > { %v10021_v10 = vpop.eup %10020  ;;  %10040 = vtanh.f32 %v13860_v53  ;;  %v8643_v29 = vpack.c.bf16 %v10019_v51, %v10017_v6  ;;  %7935 = vst [vmem:[%s13473_s26 + $0x88] sm:$0xf] %v8640_v31 }
 0x669   : > { %v10023_v3 = vpop.eup %10022  ;;  %10042 = vtanh.f32 %v13862_v24  ;;  %v8644_v13 = vpack.c.bf16 %v10021_v10, %v10021_v10 }
 0x66a   : > { %v10025_v41 = vpop.eup %10024  ;;  %10044 = vtanh.f32 %v13864_v9  ;;  %7938 = vst [vmem:[%s13473_s26 + $0x9c] sm:$0xff] %v8643_v29 }
 0x66b   : > { %v10027_v1 = vpop.eup %10026  ;;  %10046 = vtanh.f32 %v13866_v42  ;;  %v8647_v7 = vpack.c.bf16 %v10025_v41, %v10023_v3  ;;  %7939 = vst [vmem:[%s13473_s26 + $0xa4] sm:$0xf] %v8644_v13 }
 0x66c   : > { %v10029_v35 = vpop.eup %10028  ;;  %10048 = vtanh.f32 %v13868_v58  ;;  %v8648_v52 = vpack.c.bf16 %v10027_v1, %v10027_v1 }
 0x66d   : > { %v10031_v14 = vpop.eup %10030  ;;  %10050 = vtanh.f32 %v13870_v56  ;;  %7942 = vst [vmem:[%s13473_s26 + $0xb8] sm:$0xff] %v8647_v7 }
 0x66e   : > { %v10033_v5 = vpop.eup %10032  ;;  %10052 = vtanh.f32 %v13872_v12  ;;  %v8651_v44 = vpack.c.bf16 %v10031_v14, %v10029_v35  ;;  %7943 = vst [vmem:[%s13473_s26 + $0xc0] sm:$0xf] %v8648_v52 }
 0x66f   : > { %v10035_v40 = vpop.eup %10034  ;;  %10054 = vtanh.f32 %v13874_v33  ;;  %v8652_v63 = vpack.c.bf16 %v10033_v5, %v10033_v5 }
 0x670   : > { %v10037_v48 = vpop.eup %10036  ;;  %10056 = vtanh.f32 %v13876_v23  ;;  %7946 = vst [vmem:[%s13473_s26 + $0xd4] sm:$0xff] %v8651_v44 }
 0x671   : > { %v10039_v32 = vpop.eup %10038  ;;  %10058 = vtanh.f32 %v13878_v50  ;;  %v8655_v53 = vpack.c.bf16 %v10037_v48, %v10035_v40  ;;  %7947 = vst [vmem:[%s13473_s26 + $0xdc] sm:$0xf] %v8652_v63 }
 0x672   : > { %v10041_v24 = vpop.eup %10040  ;;  %10060 = vtanh.f32 %v13880_v38  ;;  %v8656_v9 = vpack.c.bf16 %v10039_v32, %v10039_v32 }
 0x673   : > { %v10043_v42 = vpop.eup %10042  ;;  %10062 = vtanh.f32 %v13882_v57  ;;  %7950 = vst [vmem:[%s13473_s26 + $0xf0] sm:$0xff] %v8655_v53 }
 0x674   : > { %v10045_v58 = vpop.eup %10044  ;;  %10064 = vtanh.f32 %v13884_v34  ;;  %v8659_v56 = vpack.c.bf16 %v10043_v42, %v10041_v24  ;;  %7951 = vst [vmem:[%s13473_s26 + $0xf8] sm:$0xf] %v8656_v9 }
 0x675   : > { %v10047_v12 = vpop.eup %10046  ;;  %10066 = vtanh.f32 %v13886_v25  ;;  %v8660_v33 = vpack.c.bf16 %v10045_v58, %v10045_v58 }
 0x676   : > { %v10049_v23 = vpop.eup %10048  ;;  %10068 = vtanh.f32 %v13888_v54  ;;  %7954 = vst [vmem:[%s13473_s26 + $0x10c] sm:$0xff] %v8659_v56 }
 0x677   : > { %v10051_v50 = vpop.eup %10050  ;;  %10070 = vtanh.f32 %v13890_v37  ;;  %v8663_v38 = vpack.c.bf16 %v10049_v23, %v10047_v12  ;;  %7955 = vst [vmem:[%s13473_s26 + $0x114] sm:$0xf] %v8660_v33 }
 0x678   : > { %v10053_v57 = vpop.eup %10052  ;;  %10072 = vtanh.f32 %v13892_v21  ;;  %v8664_v34 = vpack.c.bf16 %v10051_v50, %v10051_v50 }
 0x679   : > { %v10055_v43 = vpop.eup %10054  ;;  %10074 = vtanh.f32 %v13894_v8  ;;  %7958 = vst [vmem:[%s13473_s26 + $0x128] sm:$0xff] %v8663_v38 }
 0x67a   : > { %v10057_v25 = vpop.eup %10056  ;;  %10076 = vtanh.f32 %v13896_v61  ;;  %v8667_v54 = vpack.c.bf16 %v10055_v43, %v10053_v57  ;;  %7959 = vst [vmem:[%s13473_s26 + $0x130] sm:$0xf] %v8664_v34 }
 0x67b   : > { %v10059_v37 = vpop.eup %10058  ;;  %10078 = vtanh.f32 %v13898_v4  ;;  %v8668_v62 = vpack.c.bf16 %v10057_v25, %v10057_v25 }
 0x67c   : > { %v10061_v26 = vpop.eup %10060  ;;  %10080 = vtanh.f32 %v13900_v59  ;;  %7962 = vst [vmem:[%s13473_s26 + $0x144] sm:$0xff] %v8667_v54 }
 0x67d   : > { %v10063_v21 = vpop.eup %10062  ;;  %v8671_v8 = vpack.c.bf16 %v10061_v26, %v10059_v37  ;;  %7963 = vst [vmem:[%s13473_s26 + $0x14c] sm:$0xf] %v8668_v62 }
 0x67e   : > { %v10065_v17 = vpop.eup %10064  ;;  %v8672_v39 = vpack.c.bf16 %v10063_v21, %v10063_v21 }
 0x67f   : > { %v10067_v61 = vpop.eup %10066  ;;  %7966 = vst [vmem:[%s13473_s26 + $0x160] sm:$0xff] %v8671_v8 }
 0x680   : > { %v10069_v15 = vpop.eup %10068  ;;  %v8675_v28 = vpack.c.bf16 %v10067_v61, %v10065_v17  ;;  %7967 = vst [vmem:[%s13473_s26 + $0x168] sm:$0xf] %v8672_v39 }
 0x681   : > { %v10071_v4 = vpop.eup %10070  ;;  %v8676_v45 = vpack.c.bf16 %v10069_v15, %v10069_v15 }
 0x682   : > { %v10073_v19 = vpop.eup %10072  ;;  %7970 = vst [vmem:[%s13473_s26 + $0x17c] sm:$0xff] %v8675_v28 }
 0x683   : > { %v10075_v59 = vpop.eup %10074  ;;  %v8679_v49 = vpack.c.bf16 %v10073_v19, %v10071_v4  ;;  %7971 = vst [vmem:[%s13473_s26 + $0x184] sm:$0xf] %v8676_v45 }
 0x684   : > { %v10077_v11 = vpop.eup %10076  ;;  %v8680_v18 = vpack.c.bf16 %v10075_v59, %v10075_v59 }
 0x685   : > { %v10079_v2 = vpop.eup %10078  ;;  %7974 = vst [vmem:[%s13473_s26 + $0x198] sm:$0xff] %v8679_v49 }
 0x686   : > { %v10081_v47 = vpop.eup %10080  ;;  %v8683_v0 = vpack.c.bf16 %v10079_v2, %v10077_v11  ;;  %7975 = vst [vmem:[%s13473_s26 + $0x1a0] sm:$0xf] %v8680_v18 }
 0x687   : > { %v8684_v22 = vpack.c.bf16 %v10081_v47, %v10081_v47 }
 0x688   : > { %7978 = vst [vmem:[%s13473_s26 + $0x1b4] sm:$0xff] %v8683_v0 }
 0x689   : > { %7979 = vst [vmem:[%s13473_s26 + $0x1bc] sm:$0xf] %v8684_v22 }
 0x68a   : > { %10238 = shalt.err (!%p10235_p12)
}
 0x68b   : > { %s10239_s28 = scalar_lea.hbm %s13967_s17, 7168  ;;  %s10243_s23 = scalar_lea.hbm %s14019_s5, 28672 }
 0x68c   : > { %p10240_p0 = scmp.ne.s32.totalorder %s13967_s17, %s10239_s28  ;;  %p10244_p11 = scmp.lt.u32.totalorder %s13967_s17, %s14019_s5 }
 0x68d   : > { %p10245_p1 = scmp.lt.u32.totalorder %s10243_s23, %s10239_s28  ;;  %p10247_p6 = scmp.lt.u32.totalorder %s10239_s28, %s13967_s17 }
 0x68e   : > { %p10241_p5 = pnand %p10240_p0, %p10497_p4 }
 0x68f   : > { %p10246_p2 = por %p10245_p1, %p10244_p11 }
 0x690   : > { %p10242_p10 = pneg %p10241_p5 }
 0x691   : > { %p10248_p8 = por %p10247_p6, %p10246_p2 }
 0x693   : > { %p10249_p13 = pnand %p10248_p8, %p10242_p10 }
 0x695   : > { %10252 = shalt.err (!%p10249_p13)
}
 0x696   : > { %s10317_s9 = smov 448   ;;  %s10318_s13 = smov 28  }
 0x697   : > { %9121 = dma.vmem_to_hbm [thread:$0]  (%p10497_p4), %s13969_s11, 7168, %s13967_s17, %s7981_s22, %s10317_s9, %s10317_s9, %s10318_s13  }
 0x698 PF: > { %p9153_p3 = scmp.ge.s32.totalorder %s10299_s21, 2  ;;  %s8009_s27 = sand.u32 1, %s10287_s18  }
 0x699   : > { %p14674_p7 = scmp.ne.s32.totalorder %s14196_s25, 0  ;;  %s8010_s7 = scalar_lea.sflag [#allocation4], %s8009_s27 }
 0x69b   : > { %p9141_p9 = pnand %p9153_p3, %p14674_p7 }
 0x69d   : > { %10282 = dma.done.wait (!%p9141_p9), %s8010_s7, 7168  }
 0x69e   : > { %10284 = vsyncadd (!%p9141_p9), %s8010_s7, 4294960128  ;;  %p20_p12 = scmp.ge.s32.totalorder %s10487_s12, 6   ;;  %s14675_s18 = smov %s10291_s19 }
 0x69f   : > { %s14676_s19 = smov %s10295_s20  ;;  %s14677_s20 = smov %s10503_s16 }
 0x6a0   : > { %s14678_s21 = smov %s10487_s12  ;;  %22 = sbr.rel (!%p20_p12) target bundleno = 7 (0x7), region = 101 }
 0x6a7   :  { %8015 = vsyncpa [#allocation3], 1 }
 0x6a8   :  { %8017 = vsyncpa [#allocation3 + $0x1], 1 }
 0x6a9   :  { %8018 = vsyncpa [#allocation6], 1 }
 0x6aa   :  { %8019 = vsyncpa [#allocation9], 1 }
 0x6ab   :  { %8020 = vsyncpa [#allocation4], 1 }
 0x6ac   :  { %8022 = vsyncpa [#allocation4 + $0x1], 1 }

</bundles_post_ra>
